<compile_context>
chip_gen: v7x
topology: tpu7x:2x2x1
jax: 0.10.0
libtpu: 0.0.40
codegen_flags: <defaults>
</compile_context>

<pallas_src>
import jax
import jax.numpy as jnp
from jax.experimental import pallas as pl
from jax.experimental.pallas import tpu as pltpu

# ----------------------- hyper-params (mirror __init__) ---------------------
SAMPLE_RATE = 16000
N_FFT = 2048
HOP = 512
N_MELS = 40
N_FREQS = N_FFT // 2 + 1          # 1025 (onesided)
BN_EPS = 1e-5
CONV_CHANNELS = (16, 32, 64)

LANE = 128                        # lane-dense output padding (mel + conv channels)
NF_PAD = ((N_FREQS + LANE - 1) // LANE) * LANE   # 1152 zero-padded freq bins (exact)
PALLAS_CONV_MIN_ROWS = 64         # below this a pallas_call launch is pure overhead


def _round_up(x, m):
    return ((x + m - 1) // m) * m


def pick_rm(rows, sub=16, max_rm=256):
    """Row-block size: multiple of `sub`, <= max_rm, >= 2 grid steps when rows
    allow it (v7x has 2 TensorCores), and padding waste bounded (no ~2x junk)."""
    if rows <= sub:
        rm = sub
    else:
        nb = max(2, -(-rows // max_rm))
        rm = min(max_rm, _round_up(-(-rows // nb), sub))
    return rm, _round_up(rows, rm)


# ------------------------------ Pallas kernels ------------------------------
def melspec_kernel(frames_ref, cs_ref, mel_ref, out_ref):
    # frames: (RM, n_fft) bf16          -- one row block of STFT frames
    # cs:     (n_fft, 2*NF_PAD) bf16    -- Hann-windowed [all-cos | all-sin], resident
    # mel:    (NF_PAD, 128) bf16        -- mel filterbank, lane-padded 40 -> 128, resident
    # out:    (RM, 128) f32             -- lane-dense, written exactly once
    ri = jnp.dot(frames_ref[...], cs_ref[...], preferred_element_type=jnp.float32)
    re = ri[:, :NF_PAD]
    im = ri[:, NF_PAD:]
    power = (re * re + im * im).astype(jnp.bfloat16)   # |STFT|^2 (power=2.0), bf16 MXU path
    out_ref[...] = jnp.dot(power, mel_ref[...], preferred_element_type=jnp.float32)


def conv_bn_relu_kernel(p_ref, w_ref, scale_ref, shift_ref, out_ref):
    # p: (RM, 9*C_in) bf16; w: (9*C_in, 128) bf16; scale/shift: (1, 128) f32
    # out: (RM, 128) bf16 (lane-dense, unmasked stores)
    y = jnp.dot(p_ref[...], w_ref[...], preferred_element_type=jnp.float32)
    y = y * scale_ref[...] + shift_ref[...]            # conv bias + BatchNorm folded (f32)
    out_ref[...] = jnp.maximum(y, 0.0).astype(out_ref.dtype)   # ReLU (Dropout=id in eval)


# ------------------------------- kernel wrappers ----------------------------
def melspec_pallas(frames_bf16, cs_bf16, mel_fb_pad, rm):
    rows = frames_bf16.shape[0]                        # padded to a multiple of rm
    grid = (rows // rm,)
    flops = 2 * rows * N_FFT * 2 * NF_PAD + 2 * rows * NF_PAD * LANE
    bytes_accessed = (frames_bf16.size * 2 + cs_bf16.size * 2
                      + mel_fb_pad.size * 2 + rows * LANE * 4)
    return pl.pallas_call(
        melspec_kernel,
        out_shape=jax.ShapeDtypeStruct((rows, LANE), jnp.float32),
        grid=grid,
        in_specs=[
            pl.BlockSpec((rm, N_FFT), lambda i: (i, 0)),
            pl.BlockSpec((N_FFT, 2 * NF_PAD), lambda i: (0, 0)),   # VMEM-resident
            pl.BlockSpec((NF_PAD, LANE), lambda i: (0, 0)),        # VMEM-resident
        ],
        out_specs=pl.BlockSpec((rm, LANE), lambda i: (i, 0)),
        compiler_params=pltpu.CompilerParams(
            dimension_semantics=("parallel",),
            vmem_limit_bytes=32 * 1024 * 1024),        # raise v5e's 16 MiB default
        cost_estimate=pl.CostEstimate(
            flops=flops, transcendentals=0, bytes_accessed=bytes_accessed),
    )(frames_bf16, cs_bf16, mel_fb_pad)


def conv_bn_relu_pallas(patches, w_pad, scale_pad, shift_pad, rm):
    rows, kdim = patches.shape                         # rows padded to multiple of rm
    grid = (rows // rm,)
    flops = 2 * rows * kdim * LANE
    bytes_accessed = patches.size * 2 + w_pad.size * 2 + rows * LANE * 2
    return pl.pallas_call(
        conv_bn_relu_kernel,
        out_shape=jax.ShapeDtypeStruct((rows, LANE), jnp.bfloat16),
        grid=grid,
        in_specs=[
            pl.BlockSpec((rm, kdim), lambda i: (i, 0)),
            pl.BlockSpec((kdim, LANE), lambda i: (0, 0)),
            pl.BlockSpec((1, LANE), lambda i: (0, 0)),
            pl.BlockSpec((1, LANE), lambda i: (0, 0)),
        ],
        out_specs=pl.BlockSpec((rm, LANE), lambda i: (i, 0)),
        compiler_params=pltpu.CompilerParams(dimension_semantics=("parallel",)),
        cost_estimate=pl.CostEstimate(
            flops=flops, transcendentals=0, bytes_accessed=bytes_accessed),
    )(patches, w_pad, scale_pad, shift_pad)


# ------------------------------ constant builders ---------------------------
def build_dft_constants():
    """bf16 (n_fft, 2*NF_PAD) matrix: [win*cos(all bins) | win*sin(all bins)]."""
    n = jnp.arange(N_FFT, dtype=jnp.int32)
    k = jnp.arange(NF_PAD, dtype=jnp.int32)
    phase = jnp.mod(n[:, None] * k[None, :], N_FFT).astype(jnp.float32)
    phase = phase * (2.0 * jnp.pi / N_FFT)
    win = 0.5 - 0.5 * jnp.cos(
        2.0 * jnp.pi * jnp.arange(N_FFT, dtype=jnp.float32) / N_FFT)  # periodic Hann
    valid = (k < N_FREQS)[None, :]                     # zero padded freq columns -> exact
    cosw = jnp.where(valid, win[:, None] * jnp.cos(phase), 0.0)
    sinw = jnp.where(valid, win[:, None] * jnp.sin(phase), 0.0)
    # sign of sin vs torch.stft's exp(-i..) is irrelevant: only re^2+im^2 is used
    return jnp.concatenate([cosw, sinw], axis=1).astype(jnp.bfloat16)


def mel_filterbank(n_freqs, f_min, f_max, n_mels, sr):
    # torchaudio melscale_fbanks, mel_scale="htk", norm=None
    all_freqs = jnp.linspace(0.0, sr / 2.0, n_freqs)
    hz_to_mel = lambda f: 2595.0 * jnp.log10(1.0 + f / 700.0)
    mel_to_hz = lambda m: 700.0 * (jnp.power(10.0, m / 2595.0) - 1.0)
    m_pts = jnp.linspace(hz_to_mel(f_min), hz_to_mel(f_max), n_mels + 2)
    f_pts = mel_to_hz(m_pts)
    f_diff = f_pts[1:] - f_pts[:-1]
    slopes = f_pts[None, :] - all_freqs[:, None]
    down = -slopes[:, :-2] / f_diff[:-1]
    up = slopes[:, 2:] / f_diff[1:]
    fb = jnp.maximum(0.0, jnp.minimum(down, up))
    return fb.astype(jnp.float32)                      # (n_freqs, n_mels)


def build_mel_fb_padded():
    fb = mel_filterbank(N_FREQS, 0.0, SAMPLE_RATE / 2.0, N_MELS, SAMPLE_RATE)
    fb = jnp.pad(fb, ((0, NF_PAD - N_FREQS), (0, LANE - N_MELS)))  # lane-dense (1152, 128)
    return fb.astype(jnp.bfloat16)


# ------------------------------ JAX glue helpers ----------------------------
def frame_signal(wav, n_fft, hop):
    # wav: (B, T); center=True, reflect pad (torch.stft defaults)
    # TODO(synk): for long audio, build frames inside the kernel from the padded
    # waveform via hop-strided pl.ds reads to avoid the ~4x materialized overlap.
    pad = n_fft // 2
    xp = jnp.pad(wav, ((0, 0), (pad, pad)), mode="reflect")
    t_p = xp.shape[1]
    n_frames = 1 + (t_p - n_fft) // hop
    idx = hop * jnp.arange(n_frames)[:, None] + jnp.arange(n_fft)[None, :]
    return xp[:, idx]                                  # (B, F, n_fft)


def im2col_nhwc(x, k=3, stride=2, pad=1):
    # x: (B, H, W, C) -> patches (B*Ho*Wo, k*k*C) ordered (kh, kw, C)
    B, H, W, C = x.shape
    xp = jnp.pad(x, ((0, 0), (pad, pad), (pad, pad), (0, 0)))
    Ho = (H + 2 * pad - k) // stride + 1
    Wo = (W + 2 * pad - k) // stride + 1
    cols = []
    for di in range(k):
        for dj in range(k):
            cols.append(xp[:, di:di + stride * Ho:stride,
                           dj:dj + stride * Wo:stride, :])
    p = jnp.stack(cols, axis=3)                        # (B, Ho, Wo, k*k, C)
    return p.reshape(B * Ho * Wo, k * k * C), Ho, Wo


def _conv_out(d):
    return (d + 2 - 3) // 2 + 1


def compute_linear_in(features_in):
    # same computation the module does with torch.ones(1, 1, features_in)
    n_frames = 1 + features_in // HOP
    h, w = N_MELS, n_frames
    for _ in range(3):
        h, w = _conv_out(h), _conv_out(w)
    return CONV_CHANNELS[-1] * h * w


# ------------------------------ parameter init ------------------------------
def init_params(key, n_classes, linear_in):
    params = {}
    c_in = 1
    for li, c_out in enumerate(CONV_CHANNELS):
        key, kw, kb, kg, kbe, km, kv = jax.random.split(key, 7)
        params[f"conv{li}"] = dict(
            w=0.1 * jax.random.normal(kw, (c_out, c_in, 3, 3), jnp.float32),
            b=0.1 * jax.random.normal(kb, (c_out,), jnp.float32),
            gamma=1.0 + 0.05 * jax.random.normal(kg, (c_out,), jnp.float32),
            beta=0.05 * jax.random.normal(kbe, (c_out,), jnp.float32),
            mean=0.05 * jax.random.normal(km, (c_out,), jnp.float32),
            var=1.0 + 0.1 * jnp.abs(jax.random.normal(kv, (c_out,), jnp.float32)),
        )
        c_in = c_out
    key, kfw, kfb = jax.random.split(key, 3)
    params["fc_w"] = 0.05 * jax.random.normal(kfw, (linear_in, n_classes), jnp.float32)
    params["fc_b"] = 0.05 * jax.random.normal(kfb, (n_classes,), jnp.float32)
    return params


# --------------------------------- forward ----------------------------------
def forward(params, x, cs_bf16, mel_fb_pad):
    # x: (B, 1, T) waveform, matching the PyTorch module input
    B = x.shape[0]
    wav = x.reshape(B, -1).astype(jnp.float32)

    # --- feature_extractor: MelSpectrogram -----------------------------------
    frames = frame_signal(wav, N_FFT, HOP)             # (B, F, n_fft)
    F = frames.shape[1]
    rows = B * F
    rm, rows_pad = pick_rm(rows, sub=16, max_rm=128)   # >=2 grid steps when possible
    frames2d = frames.reshape(rows, N_FFT).astype(jnp.bfloat16)
    frames2d = jnp.pad(frames2d, ((0, rows_pad - rows), (0, 0)))
    mel = melspec_pallas(frames2d, cs_bf16, mel_fb_pad, rm)[:rows, :N_MELS]

    # NHWC conv input: (B, H=n_mels, W=time, C=1), bf16 activations
    h = mel.reshape(B, F, N_MELS).transpose(0, 2, 1)[..., None].astype(jnp.bfloat16)

    # --- conv stack: 3x (Conv2d s2 p1 + BN + ReLU [+ Dropout=id]), NHWC -------
    for li, c_out in enumerate(CONV_CHANNELS):
        p = params[f"conv{li}"]
        c_in = h.shape[-1]
        patches, Ho, Wo = im2col_nhwc(h)               # (B*Ho*Wo, 9*C_in), bf16
        prow = patches.shape[0]
        # weight rows ordered (kh, kw, c_in) to match im2col_nhwc column order
        w_mat = p["w"].transpose(2, 3, 1, 0).reshape(9 * c_in, c_out)
        scale = p["gamma"] / jnp.sqrt(p["var"] + BN_EPS)
        shift = p["beta"] + (p["b"] - p["mean"]) * scale
        if prow >= PALLAS_CONV_MIN_ROWS:
            rm_c, prow_pad = pick_rm(prow, sub=16, max_rm=256)
            patches_p = jnp.pad(patches, ((0, prow_pad - prow), (0, 0)))
            w_pad = jnp.pad(w_mat, ((0, 0), (0, LANE - c_out))).astype(jnp.bfloat16)
            scale_pad = jnp.pad(scale, (0, LANE - c_out))[None, :]
            shift_pad = jnp.pad(shift, (0, LANE - c_out))[None, :]
            out = conv_bn_relu_pallas(patches_p, w_pad, scale_pad, shift_pad,
                                      rm_c)[:prow, :c_out]
        else:
            # Tiny tail conv (< one MXU tile of rows): a pallas_call launch and
            # its HBM round-trip would dominate -> hand to XLA (per review).
            y = jnp.dot(patches.astype(jnp.float32), w_mat)
            y = y * scale[None, :] + shift[None, :]
            out = jnp.maximum(y, 0.0).astype(jnp.bfloat16)
        h = out.reshape(B, Ho, Wo, c_out)              # NHWC, bf16

    # --- Flatten: fold NCHW (C,H,W) ordering into fc_w row permutation --------
    Hf, Wf, Cf = h.shape[1], h.shape[2], h.shape[3]
    flat = h.reshape(B, Hf * Wf * Cf)                  # (H, W, C) ordering
    perm = (jnp.arange(Cf)[None, None, :] * (Hf * Wf)
            + jnp.arange(Hf)[:, None, None] * Wf
            + jnp.arange(Wf)[None, :, None]).reshape(-1)
    fc_w_hwc = params["fc_w"][perm]                    # exact nn.Flatten semantics

    # --- classifier: Dropout (identity at inference) + Linear -----------------
    # TODO(synk): training-mode Dropout RNG not implemented (inference semantics).
    # (B,320)@(320,10) is far below one MXU tile: leave to XLA, no Pallas launch.
    return flat.astype(jnp.float32) @ fc_w_hwc + params["fc_b"][None, :]


# ----------------------------------- main ------------------------------------
if __name__ == "__main__":
    key = jax.random.PRNGKey(0)
    k_x, k_p = jax.random.split(key)

    B, T = 2, 1600               # (B, 1, T) waveform -> 4 STFT frames -> flatten 320
    n_classes = 10
    features_in = 5              # as in the module's __init__
    linear_in = compute_linear_in(features_in)   # = 320

    x = jax.random.normal(k_x, (B, 1, T), dtype=jnp.float32)
    params = init_params(k_p, n_classes, linear_in)

    cs_bf16 = build_dft_constants()              # windowed [cos|sin] DFT matrix (bf16)
    mel_fb_pad = build_mel_fb_padded()           # (NF_PAD, 128) bf16, lane-dense

    fwd = jax.jit(forward)
    logits = jax.block_until_ready(fwd(params, x, cs_bf16, mel_fb_pad))

    assert logits.shape == (B, n_classes), logits.shape
    assert logits.dtype == jnp.float32
    print("KERNEL_OK")
</pallas_src>

<mosaic_0001>
module attributes {stable_mosaic.version = 11 : i64} {
  func.func @melspec_kernel(%arg0: i32, %arg1: memref<16x2048xbf16, #tpu.memory_space<vmem>>, %arg2: memref<2048x2304xbf16, #tpu.memory_space<vmem>>, %arg3: memref<1152x128xbf16, #tpu.memory_space<vmem>>, %arg4: memref<16x128xf32, #tpu.memory_space<vmem>>) attributes {dimension_semantics = [#tpu.dimension_semantics<parallel>], iteration_bounds = array<i64: 1>, scalar_prefetch = 0 : i64, scratch_operands = 0 : i64, tpu.core_type = #tpu.core_type<tc>, window_params = [{transform_indices = @transform_0, window_bounds = array<i64: 16, 2048>}, {pipeline_mode = #tpu.pipeline_mode<synchronous>, transform_indices = @transform_1, window_bounds = array<i64: 2048, 2304>}, {pipeline_mode = #tpu.pipeline_mode<synchronous>, transform_indices = @transform_2, window_bounds = array<i64: 1152, 128>}, {transform_indices = @transform_3, window_bounds = array<i64: 16, 128>}]} {
    %c0 = arith.constant 0 : index
    %c0_0 = arith.constant 0 : index
    %0 = vector.load %arg1[%c0, %c0_0] : memref<16x2048xbf16, #tpu.memory_space<vmem>>, vector<16x2048xbf16>
    %c0_1 = arith.constant 0 : index
    %c0_2 = arith.constant 0 : index
    %1 = vector.load %arg2[%c0_1, %c0_2] : memref<2048x2304xbf16, #tpu.memory_space<vmem>>, vector<2048x2304xbf16>
    %cst = arith.constant dense<0.000000e+00> : vector<16x2304xf32>
    %2 = tpu.matmul %0, %1, %cst {dimension_numbers = #tpu.dot_dimension_numbers<[1], [0], [0], [1], [0, 0, 1, 1], [], []>} : vector<16x2048xbf16>, vector<2048x2304xbf16>, vector<16x2304xf32> -> vector<16x2304xf32>
    %3 = vector.extract_strided_slice %2 {offsets = [0, 0], sizes = [16, 1152], strides = [1, 1]} : vector<16x2304xf32> to vector<16x1152xf32>
    %4 = vector.extract_strided_slice %2 {offsets = [0, 1152], sizes = [16, 1152], strides = [1, 1]} : vector<16x2304xf32> to vector<16x1152xf32>
    %5 = arith.mulf %3, %3 : vector<16x1152xf32>
    %6 = arith.mulf %4, %4 : vector<16x1152xf32>
    %7 = arith.addf %5, %6 : vector<16x1152xf32>
    %8 = arith.truncf %7 : vector<16x1152xf32> to vector<16x1152xbf16>
    %c0_3 = arith.constant 0 : index
    %c0_4 = arith.constant 0 : index
    %9 = vector.load %arg3[%c0_3, %c0_4] : memref<1152x128xbf16, #tpu.memory_space<vmem>>, vector<1152x128xbf16>
    %cst_5 = arith.constant dense<0.000000e+00> : vector<16x128xf32>
    %10 = tpu.matmul %8, %9, %cst_5 {dimension_numbers = #tpu.dot_dimension_numbers<[1], [0], [0], [1], [0, 0, 1, 1], [], []>} : vector<16x1152xbf16>, vector<1152x128xbf16>, vector<16x128xf32> -> vector<16x128xf32>
    %c0_6 = arith.constant 0 : index
    %c0_7 = arith.constant 0 : index
    %11 = vector.load %arg4[%c0_6, %c0_7] : memref<16x128xf32, #tpu.memory_space<vmem>>, vector<16x128xf32>
    tpu.vector_store %arg4[%c0_6, %c0_7], %10 {strides = array<i32>} : memref<16x128xf32, #tpu.memory_space<vmem>>, vector<16x128xf32>,
    return
  }
  func.func @transform_0(%arg0: i32) -> (i32, i32) {
    %c0_i32 = arith.constant 0 : i32
    %c0_i32_0 = arith.constant 0 : i32
    return %arg0, %c0_i32 : i32, i32
  }
  func.func @transform_1(%arg0: i32) -> (i32, i32) {
    %c0_i32 = arith.constant 0 : i32
    %c0_i32_0 = arith.constant 0 : i32
    %c0_i32_1 = arith.constant 0 : i32
    return %c0_i32, %c0_i32_0 : i32, i32
  }
  func.func @transform_2(%arg0: i32) -> (i32, i32) {
    %c0_i32 = arith.constant 0 : i32
    %c0_i32_0 = arith.constant 0 : i32
    %c0_i32_1 = arith.constant 0 : i32
    return %c0_i32, %c0_i32_0 : i32, i32
  }
  func.func @transform_3(%arg0: i32) -> (i32, i32) {
    %c0_i32 = arith.constant 0 : i32
    %c0_i32_0 = arith.constant 0 : i32
    return %arg0, %c0_i32 : i32, i32
  }
}

module attributes {stable_mosaic.version = 11 : i64} {
  func.func @conv_bn_relu_kernel(%arg0: i32, %arg1: memref<48x9xbf16, #tpu.memory_space<vmem>>, %arg2: memref<9x128xbf16, #tpu.memory_space<vmem>>, %arg3: memref<1x128xf32, #tpu.memory_space<vmem>>, %arg4: memref<1x128xf32, #tpu.memory_space<vmem>>, %arg5: memref<48x128xbf16, #tpu.memory_space<vmem>>) attributes {dimension_semantics = [#tpu.dimension_semantics<parallel>], iteration_bounds = array<i64: 2>, scalar_prefetch = 0 : i64, scratch_operands = 0 : i64, tpu.core_type = #tpu.core_type<tc>, window_params = [{transform_indices = @transform_0, window_bounds = array<i64: 48, 9>}, {pipeline_mode = #tpu.pipeline_mode<synchronous>, transform_indices = @transform_1, window_bounds = array<i64: 9, 128>}, {pipeline_mode = #tpu.pipeline_mode<synchronous>, transform_indices = @transform_2, window_bounds = array<i64: 1, 128>}, {pipeline_mode = #tpu.pipeline_mode<synchronous>, transform_indices = @transform_3, window_bounds = array<i64: 1, 128>}, {transform_indices = @transform_4, window_bounds = array<i64: 48, 128>}]} {
    %c0 = arith.constant 0 : index
    %c0_0 = arith.constant 0 : index
    %0 = vector.load %arg1[%c0, %c0_0] : memref<48x9xbf16, #tpu.memory_space<vmem>>, vector<48x9xbf16>
    %c0_1 = arith.constant 0 : index
    %c0_2 = arith.constant 0 : index
    %1 = vector.load %arg2[%c0_1, %c0_2] : memref<9x128xbf16, #tpu.memory_space<vmem>>, vector<9x128xbf16>
    %cst = arith.constant dense<0.000000e+00> : vector<48x128xf32>
    %2 = tpu.matmul %0, %1, %cst {dimension_numbers = #tpu.dot_dimension_numbers<[1], [0], [0], [1], [0, 0, 1, 1], [], []>} : vector<48x9xbf16>, vector<9x128xbf16>, vector<48x128xf32> -> vector<48x128xf32>
    %c0_3 = arith.constant 0 : index
    %c0_4 = arith.constant 0 : index
    %3 = vector.load %arg3[%c0_3, %c0_4] : memref<1x128xf32, #tpu.memory_space<vmem>>, vector<1x128xf32>
    %4 = vector.broadcast %3 : vector<1x128xf32> to vector<48x128xf32>
    %5 = arith.mulf %2, %4 : vector<48x128xf32>
    %c0_5 = arith.constant 0 : index
    %c0_6 = arith.constant 0 : index
    %6 = vector.load %arg4[%c0_5, %c0_6] : memref<1x128xf32, #tpu.memory_space<vmem>>, vector<1x128xf32>
    %7 = vector.broadcast %6 : vector<1x128xf32> to vector<48x128xf32>
    %8 = arith.addf %5, %7 : vector<48x128xf32>
    %cst_7 = arith.constant 0.000000e+00 : f32
    %9 = vector.broadcast %cst_7 : f32 to vector<48x128xf32>
    %10 = arith.maximumf %8, %9 : vector<48x128xf32>
    %11 = arith.truncf %10 : vector<48x128xf32> to vector<48x128xbf16>
    %c0_8 = arith.constant 0 : index
    %c0_9 = arith.constant 0 : index
    %12 = vector.load %arg5[%c0_8, %c0_9] : memref<48x128xbf16, #tpu.memory_space<vmem>>, vector<48x128xbf16>
    tpu.vector_store %arg5[%c0_8, %c0_9], %11 {strides = array<i32>} : memref<48x128xbf16, #tpu.memory_space<vmem>>, vector<48x128xbf16>,
    return
  }
  func.func @transform_0(%arg0: i32) -> (i32, i32) {
    %c0_i32 = arith.constant 0 : i32
    %c0_i32_0 = arith.constant 0 : i32
    return %arg0, %c0_i32 : i32, i32
  }
  func.func @transform_1(%arg0: i32) -> (i32, i32) {
    %c0_i32 = arith.constant 0 : i32
    %c0_i32_0 = arith.constant 0 : i32
    %c0_i32_1 = arith.constant 0 : i32
    return %c0_i32, %c0_i32_0 : i32, i32
  }
  func.func @transform_2(%arg0: i32) -> (i32, i32) {
    %c0_i32 = arith.constant 0 : i32
    %c0_i32_0 = arith.constant 0 : i32
    %c0_i32_1 = arith.constant 0 : i32
    return %c0_i32, %c0_i32_0 : i32, i32
  }
  func.func @transform_3(%arg0: i32) -> (i32, i32) {
    %c0_i32 = arith.constant 0 : i32
    %c0_i32_0 = arith.constant 0 : i32
    %c0_i32_1 = arith.constant 0 : i32
    return %c0_i32, %c0_i32_0 : i32, i32
  }
  func.func @transform_4(%arg0: i32) -> (i32, i32) {
    %c0_i32 = arith.constant 0 : i32
    %c0_i32_0 = arith.constant 0 : i32
    return %arg0, %c0_i32 : i32, i32
  }
}

</mosaic_0001>

<bundles_post_ra>
// kernel: forward.3
= control target key start
LH: loop header
LB: loop body
LE: loop exit
PB: predicated region body
PF: predicated region fallthrough
CT: control target
= control target key end

     0   :  { %s540_s15 = smov 0   ;;  %s576_s0 = inlined_call_operand.vmem [shape: bf16[96,9], index: 0, kind: input, shape index: {}]   ;;  %s577_s1 = inlined_call_operand.vmem [shape: bf16[9,128], index: 1, kind: input, shape index: {}]   ;;  %s578_s2 = inlined_call_operand.vmem [shape: f32[1,128], index: 2, kind: input, shape index: {}]   ;;  %s579_s3 = inlined_call_operand.vmem [shape: f32[1,128], index: 3, kind: input, shape index: {}]   ;;  %s580_s4 = inlined_call_operand.vmem [shape: bf16[96,128], index: 4, kind: output, shape index: {}]  }
   0x1 LB: > { %s422_s16 = sadd.s32 4294967295, %s510_s15   ;;  %p426_p0 = scmp.ge.s32.totalorder %s510_s15, 1  ;;  %s510_s15 = sphi %s540_s15, %s14_s15  }
   0x2   : > { %p163_p1 = scmp.lt.s32.totalorder %s510_s15, 3 }
   0x4   : > { %p164_p2 = pnand %p426_p0, %p163_p1 }
   0x5   : > { %vm240_vm0 = vcmask (!%p164_p2), 1043456   ;;  %v512_v0 = vmov (!%p164_p2), 0.0   ;;  %v500_v1 = vld [vmem:[%s577_s1] sm:$0x1f] (!%p164_p2)   ;;  %vm241_vm1 = vcmask (!%p164_p2), 1044480   ;;  %s189_s19 = smul.u32 (!%p164_p2), 6, %s422_s16 }
   0x6   : > { %167 = sbr.rel (%p164_p2) target bundleno = 248 (0xf8), region = 36  ;;  %487 = vmatprep.subr.bf16.mxu1 (!%p164_p2), %v512_v0  ;;  %473 = vmatprep.subr.bf16.mxu0 (!%p164_p2), %v512_v0  ;;  %v513_v2 = vmov (!%p164_p2), 65535   ;;  %vm514_vm2 = vmmov (!%p164_p2), 0   ;;  %vm230_vm3 = vcmask (!%p164_p2), 72704   ;;  %v436_v9 = vld [vmem:[%s578_s2] ss:$0 sm:$0xff] (!%p164_p2) }
   0x7   : > { %v242_v3 = vsel (!%p164_p2), %vm240_vm0, 4294967295, %v513_v2  ;;  %479 = vmatprep.mubr.msk.bf16.mxu1 (!%p164_p2), %vm514_vm2, %v512_v0  ;;  %475 = vmatprep.mubr.msk.bf16.mxu0 (!%p164_p2), %vm514_vm2, %v512_v0  ;;  %p190_p3 = scmp.lt.s32.totalorder (!%p164_p2), %s189_s19, 11  ;;  %v437_v11 = vld [vmem:[%s579_s3] ss:$0 sm:$0xff] (!%p164_p2) }
   0x8   : > { %v243_v4 = vsel (!%p164_p2), %vm241_vm1, %v242_v3, 0 }
   0x9   : > { %v245_v5 = vand.u32 (!%p164_p2), %v500_v1, %v243_v4 }
   0xb   : > { %488 = vmatpush3.bf16.msra.mxu1 (!%p164_p2), %v245_v5  ;;  %474 = vmatpush3.bf16.msra.mxu0 (!%p164_p2), %v245_v5 }
   0xd   : > { %s582_s19 = smov (!%p190_p3, %s189_s19), 11 }
   0xe   : > { %s427_s20 = sshll.u32 %s582_s19, 2 }
   0xf   : > { %s193_s23 = scalar_lea.vmem %s576_s0, %s427_s20  ;;  %s199_s30 = scalar_lea.vmem %s580_s4, %s427_s20 }
  0x10   : > { %v501_v6 = vld [vmem:[%s193_s23 + $0x8] sm:$0xff]   ;;  %v502_v7 = vld [vmem:[%s193_s23] sm:$0xff]   ;;  %v503_v8 = vld [vmem:[%s193_s23 + $0x10] sm:$0xff]  }
  0x11   : > { %480 = vmatmul.mubr.msk.bf16.vlgmr.msra.gmra.mrb[0].mxu1 %vm230_vm3, %v501_v6  ;;  %476 = vmatmul.mubr.msk.bf16.vlgmr.msra.gmra.mrb[0].mxu0 %vm230_vm3, %v502_v7 }
  0x12   : > { %483 = vmatprep.mubr.msk.bf16.mxu1 %vm514_vm2, %v512_v0 }
  0x19   : > { %484 = vmatmul.mubr.msk.bf16.gmra.mrb[4].mxu1 %vm230_vm3, %v503_v8 }
  0xe4   : > { %v289_v10 = vpop.f32.mrb[0].mxu1  ;;  %v281_v14 = vpop.f32.mrb[0].mxu0 }
  0xe5   : > { %v313_v12 = vmul.f32 %v436_v9, %v289_v10  ;;  %v481_v13 = vpop.f32.mrb[1].mxu1  ;;  %v311_v16 = vmul.f32 %v436_v9, %v281_v14  ;;  %v477_v17 = vpop.f32.mrb[1].mxu0 }
  0xe6   : > { %v292_v15 = vpop.f32.mrb[2].mxu1  ;;  %v284_v21 = vpop.f32.mrb[2].mxu0 }
  0xe7   : > { %v326_v18 = vadd.f32 %v437_v11, %v313_v12  ;;  %v314_v19 = vmul.f32 %v436_v9, %v292_v15  ;;  %v482_v20 = vpop.f32.mrb[3].mxu1  ;;  %v324_v22 = vadd.f32 %v437_v11, %v311_v16  ;;  %v312_v23 = vmul.f32 %v436_v9, %v284_v21  ;;  %v478_v24 = vpop.f32.mrb[3].mxu0 }
  0xe9   : > { %v327_v25 = vadd.f32 %v437_v11, %v314_v19  ;;  %v330_v26 = vmax.f32 %v324_v22, 0.0  ;;  %v325_v27 = vadd.f32 %v437_v11, %v312_v23  ;;  %v332_v28 = vmax.f32 %v326_v18, 0.0 }
  0xeb   : > { %v333_v29 = vmax.f32 %v327_v25, 0.0  ;;  %v331_v30 = vmax.f32 %v325_v27, 0.0 }
  0xec   : > { %v297_v31 = vpop.f32.mrb[4].mxu1 }
  0xed   : > { %v460_v32 = vpack.c.bf16 %v333_v29, %v332_v28  ;;  %v315_v33 = vmul.f32 %v436_v9, %v297_v31  ;;  %v485_v34 = vpop.f32.mrb[5].mxu1  ;;  %v455_v35 = vpack.c.bf16 %v331_v30, %v330_v26 }
  0xee   : > { %v300_v36 = vpop.f32.mrb[6].mxu1 }
  0xef   : > { %467 = vst [vmem:[%s199_s30 + $0x8] sm:$0xff] %v460_v32   ;;  %v328_v37 = vadd.f32 %v437_v11, %v315_v33  ;;  %v316_v38 = vmul.f32 %v436_v9, %v300_v36  ;;  %v486_v39 = vpop.f32.mrb[7].mxu1  ;;  %456 = vst [vmem:[%s199_s30] sm:$0xff] %v455_v35  }
  0xf1   : > { %v329_v40 = vadd.f32 %v437_v11, %v316_v38  ;;  %v334_v41 = vmax.f32 %v328_v37, 0.0 }
  0xf3   : > { %v335_v42 = vmax.f32 %v329_v40, 0.0 }
  0xf5   : > { %v465_v43 = vpack.c.bf16 %v335_v42, %v334_v41 }
  0xf7   : > { %468 = vst [vmem:[%s199_s30 + $0x10] sm:$0xff] %v465_v43  }
  0xf8 PF: > { %s14_s15 = sadd.s32 1, %s510_s15  }
  0xf9   : > { %p11_p4 = scmp.ge.s32.totalorder %s14_s15, 4  }
  0xfb   :  { %13 = sbr.rel (!%p11_p4) target bundleno = 1 (0x1), region = 66 }

// kernel: forward.2
= control target key start
LH: loop header
LB: loop body
LE: loop exit
PB: predicated region body
PF: predicated region fallthrough
CT: control target
= control target key end

     0   :  { %8 = vsyncpa [#allocation3], 0  ;;  %s24214_s12 = smov [#allocation2]   ;;  %s24883_s0 = inlined_call_operand.vmem [shape: bf16[16,2048], index: 0, kind: input, shape index: {}]   ;;  %s24884_s1 = inlined_call_operand.hbm [shape: bf16[2048,2304], index: 1, kind: input, shape index: {}]   ;;  %s24885_s2 = inlined_call_operand.vmem [shape: bf16[1152,128], index: 2, kind: input, shape index: {}]   ;;  %s24886_s3 = inlined_call_operand.vmem [shape: f32[16,128], index: 3, kind: output, shape index: {}]  }
   0x1   :  { %s16_s13 = sshll.u32 %s24214_s12, 4  ;;  %s24190_s16 = scalar_lea.hbm %s24884_s1, 294912  ;;  %s17_s13 = int_to_ptr.vmem [resolvable:$true] %s16_s13 }
   0x2   :  { %p24191_p0 = scmp.ne.s32.totalorder %s24884_s1, %s24190_s16  ;;  %p24194_p1 = scmp.lt.u32.totalorder %s24190_s16, %s24884_s1 }
   0x4   :  { %p24196_p2 = pnand %p24194_p1, %p24191_p0 }
   0x6   :  { %24199 = shalt.err (!%p24196_p2)
}
   0x7   :  { %s24200_s21 = scalar_lea.vmem %s17_s13, 294912  ;;  %p24205_p4 = scmp.lt.s32.totalorder %s17_s13, %s17_s13 }
   0x8   :  { %p24201_p3 = scmp.ne.s32.totalorder %s17_s13, %s24200_s21  ;;  %p24206_p5 = scmp.lt.s32.totalorder %s24200_s21, %s24200_s21 }
   0xa   :  { %p24207_p6 = por %p24206_p5, %p24205_p4 }
   0xc   :  { %p24208_p7 = pnand %p24207_p6, %p24201_p3 }
   0xe   :  { %24211 = shalt.err (!%p24208_p7)
}
   0xf   :  { %s24215_s22 = smov 1152   ;;  %s24216_s23 = smov 72  }
  0x10   :  { %22 = dma.hbm_to_vmem [thread:$0]  %s24884_s1, 294912, %s17_s13, [#allocation3], %s24215_s22, %s24215_s22, %s24216_s23  }
  0x11   :  { %24212 = dma.done.wait [#allocation3], 294912  }
  0x12   :  { %24213 = vsyncadd [#allocation3], 4294672384  ;;  %v20662_v0 = vld [vmem:[#allocation2 + $0x4] ss:$72 sps:$4 sm:$0xff]   ;;  %v20666_v2 = vld [vmem:[#allocation2] ss:$72 sps:$4 sm:$0xff]  }
  0x13   :  { %v20664_v1 = vld [vmem:[#allocation2 + $0x1b04] ss:$72 sps:$4 sm:$0xff]   ;;  %13949 = vmatprep.subr.bf16.mxu1 %v20662_v0  ;;  %v20667_v3 = vld [vmem:[#allocation2 + $0x1b00] ss:$72 sps:$4 sm:$0xff]   ;;  %v20668_v4 = vld [vmem:[#allocation2 + $0x94] ss:$72 sps:$4 sm:$0xff]  }
  0x14   :  { %14078 = vmatprep.subr.bf16.mxu0 %v20664_v1  ;;  %13950 = vmatpush1.bf16.msra.mxu1 %v20666_v2  ;;  %v20670_v5 = vld [vmem:[#allocation2 + $0x1b94] ss:$72 sps:$4 sm:$0xff]   ;;  %v20672_v6 = vld [vmem:[#allocation2 + $0x90] ss:$72 sps:$4 sm:$0xff]   ;;  %v20674_v8 = vld [vmem:[#allocation2 + $0x124] ss:$72 sps:$4 sm:$0xff]  }
  0x15   :  { %14079 = vmatpush1.bf16.msra.mxu0 %v20667_v3  ;;  %13951 = vmatprep.subr.bf16.mxu1 %v20668_v4  ;;  %v20673_v7 = vld [vmem:[#allocation2 + $0x1b90] ss:$72 sps:$4 sm:$0xff]   ;;  %v20676_v9 = vld [vmem:[#allocation2 + $0x1c24] ss:$72 sps:$4 sm:$0xff]   ;;  %v20678_v10 = vld [vmem:[#allocation2 + $0x120] ss:$72 sps:$4 sm:$0xff]  }
  0x16   :  { %14080 = vmatprep.subr.bf16.mxu0 %v20670_v5  ;;  %v20679_v11 = vld [vmem:[#allocation2 + $0x1c20] ss:$72 sps:$4 sm:$0xff]   ;;  %v20680_v12 = vld [vmem:[#allocation2 + $0x1b4] ss:$72 sps:$4 sm:$0xff]   ;;  %v20684_v14 = vld [vmem:[#allocation2 + $0x1b0] ss:$72 sps:$4 sm:$0xff]  }
  0x17   :  { %v20682_v13 = vld [vmem:[#allocation2 + $0x1cb4] ss:$72 sps:$4 sm:$0xff]   ;;  %v20685_v15 = vld [vmem:[#allocation2 + $0x1cb0] ss:$72 sps:$4 sm:$0xff]   ;;  %v20686_v16 = vld [vmem:[#allocation2 + $0x244] ss:$72 sps:$4 sm:$0xff]  }
  0x18   :  { %13952 = vmatpush1.bf16.msra.mxu1 %v20672_v6  ;;  %v20688_v17 = vld [vmem:[#allocation2 + $0x1d44] ss:$72 sps:$4 sm:$0xff]   ;;  %v20690_v18 = vld [vmem:[#allocation2 + $0x240] ss:$72 sps:$4 sm:$0xff]   ;;  %v20692_v20 = vld [vmem:[#allocation2 + $0x2d4] ss:$72 sps:$4 sm:$0xff]  }
  0x19   :  { %14081 = vmatpush1.bf16.msra.mxu0 %v20673_v7  ;;  %13953 = vmatprep.subr.bf16.mxu1 %v20674_v8  ;;  %v20691_v19 = vld [vmem:[#allocation2 + $0x1d40] ss:$72 sps:$4 sm:$0xff]   ;;  %v20694_v21 = vld [vmem:[#allocation2 + $0x1dd4] ss:$72 sps:$4 sm:$0xff]   ;;  %v20696_v22 = vld [vmem:[#allocation2 + $0x2d0] ss:$72 sps:$4 sm:$0xff]  }
  0x1a   :  { %14082 = vmatprep.subr.bf16.mxu0 %v20676_v9  ;;  %v20697_v23 = vld [vmem:[#allocation2 + $0x1dd0] ss:$72 sps:$4 sm:$0xff]   ;;  %v20698_v24 = vld [vmem:[#allocation2 + $0x364] ss:$72 sps:$4 sm:$0xff]   ;;  %v20702_v26 = vld [vmem:[#allocation2 + $0x360] ss:$72 sps:$4 sm:$0xff]  }
  0x1b   :  { %v20700_v25 = vld [vmem:[#allocation2 + $0x1e64] ss:$72 sps:$4 sm:$0xff]   ;;  %v20703_v27 = vld [vmem:[#allocation2 + $0x1e60] ss:$72 sps:$4 sm:$0xff]   ;;  %v20704_v28 = vld [vmem:[#allocation2 + $0x3f4] ss:$72 sps:$4 sm:$0xff]  }
  0x1c   :  { %13954 = vmatpush1.bf16.msra.mxu1 %v20678_v10  ;;  %v20706_v29 = vld [vmem:[#allocation2 + $0x1ef4] ss:$72 sps:$4 sm:$0xff]   ;;  %v20708_v30 = vld [vmem:[#allocation2 + $0x3f0] ss:$72 sps:$4 sm:$0xff]   ;;  %v20710_v32 = vld [vmem:[#allocation2 + $0x484] ss:$72 sps:$4 sm:$0xff]  }
  0x1d   :  { %14083 = vmatpush1.bf16.msra.mxu0 %v20679_v11  ;;  %13955 = vmatprep.subr.bf16.mxu1 %v20680_v12  ;;  %v20709_v31 = vld [vmem:[#allocation2 + $0x1ef0] ss:$72 sps:$4 sm:$0xff]   ;;  %v20712_v33 = vld [vmem:[#allocation2 + $0x1f84] ss:$72 sps:$4 sm:$0xff]   ;;  %v20714_v34 = vld [vmem:[#allocation2 + $0x480] ss:$72 sps:$4 sm:$0xff]  }
  0x1e   :  { %14084 = vmatprep.subr.bf16.mxu0 %v20682_v13  ;;  %v20715_v35 = vld [vmem:[#allocation2 + $0x1f80] ss:$72 sps:$4 sm:$0xff]   ;;  %v20716_v36 = vld [vmem:[#allocation2 + $0x514] ss:$72 sps:$4 sm:$0xff]   ;;  %v20720_v38 = vld [vmem:[#allocation2 + $0x510] ss:$72 sps:$4 sm:$0xff]  }
  0x1f   :  { %v20718_v37 = vld [vmem:[#allocation2 + $0x2014] ss:$72 sps:$4 sm:$0xff]   ;;  %v20721_v39 = vld [vmem:[#allocation2 + $0x2010] ss:$72 sps:$4 sm:$0xff]   ;;  %v20722_v40 = vld [vmem:[#allocation2 + $0x5a4] ss:$72 sps:$4 sm:$0xff]  }
  0x20   :  { %13956 = vmatpush1.bf16.msra.mxu1 %v20684_v14  ;;  %v20724_v41 = vld [vmem:[#allocation2 + $0x20a4] ss:$72 sps:$4 sm:$0xff]   ;;  %v20726_v42 = vld [vmem:[#allocation2 + $0x5a0] ss:$72 sps:$4 sm:$0xff]   ;;  %v20728_v44 = vld [vmem:[#allocation2 + $0x634] ss:$72 sps:$4 sm:$0xff]  }
  0x21   :  { %14085 = vmatpush1.bf16.msra.mxu0 %v20685_v15  ;;  %13957 = vmatprep.subr.bf16.mxu1 %v20686_v16  ;;  %v20727_v43 = vld [vmem:[#allocation2 + $0x20a0] ss:$72 sps:$4 sm:$0xff]   ;;  %v20730_v45 = vld [vmem:[#allocation2 + $0x2134] ss:$72 sps:$4 sm:$0xff]   ;;  %v20732_v46 = vld [vmem:[#allocation2 + $0x630] ss:$72 sps:$4 sm:$0xff]  }
  0x22   :  { %14086 = vmatprep.subr.bf16.mxu0 %v20688_v17  ;;  %v20733_v47 = vld [vmem:[#allocation2 + $0x2130] ss:$72 sps:$4 sm:$0xff]   ;;  %v29_v48 = vld [vmem:[%s24883_s0] sm:$0xff]  ;;  %v20740_v58 = vld [vmem:[#allocation2 + $0x754] ss:$72 sps:$4 sm:$0xff]   ;;  %vm24218_vm0 = vmmov 0  }
  0x23   :  { %v37_v49 = vld [vmem:[%s24883_s0 + $0x40] sm:$0xff]  ;;  %v32_v53 = vld [vmem:[%s24883_s0 + $0x18] sm:$0xff] }
  0x24   :  { %13958 = vmatpush1.bf16.msra.mxu1 %v20690_v18  ;;  %v20734_v50 = vld [vmem:[#allocation2 + $0x6c4] ss:$72 sps:$4 sm:$0xff]   ;;  %v24257_v52 = vcombine.high %v29_v48, %v37_v49  ;;  %v40_v54 = vld [vmem:[%s24883_s0 + $0x58] sm:$0xff]  ;;  %v20738_v56 = vld [vmem:[#allocation2 + $0x6c0] ss:$72 sps:$4 sm:$0xff]   ;;  %v24269_v10 = vcombine.low %v29_v48, %v37_v49 }
  0x25   :  { %14087 = vmatpush1.bf16.msra.mxu0 %v20691_v19  ;;  %13959 = vmatprep.subr.bf16.mxu1 %v20692_v20  ;;  %v20736_v51 = vld [vmem:[#allocation2 + $0x21c4] ss:$72 sps:$4 sm:$0xff]   ;;  %v24266_v55 = vcombine.high %v32_v53, %v40_v54  ;;  %v20739_v57 = vld [vmem:[#allocation2 + $0x21c0] ss:$72 sps:$4 sm:$0xff]   ;;  %v20742_v59 = vld [vmem:[#allocation2 + $0x2254] ss:$72 sps:$4 sm:$0xff]   ;;  %v24271_v11 = vcombine.low %v32_v53, %v40_v54 }
  0x26   :  { %14088 = vmatprep.subr.bf16.mxu0 %v20694_v21  ;;  %13981 = vmatprep.mubr.bf16.mxu1 %v24257_v52  ;;  %v20744_v60 = vld [vmem:[#allocation2 + $0x750] ss:$72 sps:$4 sm:$0xff]   ;;  %v20746_v62 = vld [vmem:[#allocation2 + $0x7e4] ss:$72 sps:$4 sm:$0xff]   ;;  %v20750_v0 = vld [vmem:[#allocation2 + $0x7e0] ss:$72 sps:$4 sm:$0xff]  }
  0x27   :  { %14110 = vmatprep.mubr.bf16.mxu0 %v24266_v55  ;;  %v20745_v61 = vld [vmem:[#allocation2 + $0x2250] ss:$72 sps:$4 sm:$0xff]   ;;  %v20748_v63 = vld [vmem:[#allocation2 + $0x22e4] ss:$72 sps:$4 sm:$0xff]   ;;  %v20751_v1 = vld [vmem:[#allocation2 + $0x22e0] ss:$72 sps:$4 sm:$0xff]  }
  0x28   :  { %13960 = vmatpush1.bf16.msra.mxu1 %v20696_v22  ;;  %v20752_v2 = vld [vmem:[#allocation2 + $0x874] ss:$72 sps:$4 sm:$0xff]   ;;  %v20756_v4 = vld [vmem:[#allocation2 + $0x870] ss:$72 sps:$4 sm:$0xff]   ;;  %v20760_v6 = vld [vmem:[#allocation2 + $0x904] ss:$72 sps:$4 sm:$0xff]  }
  0x29   :  { %14089 = vmatpush1.bf16.msra.mxu0 %v20697_v23  ;;  %13961 = vmatprep.subr.bf16.mxu1 %v20698_v24  ;;  %v20754_v3 = vld [vmem:[#allocation2 + $0x2374] ss:$72 sps:$4 sm:$0xff]   ;;  %v20757_v5 = vld [vmem:[#allocation2 + $0x2370] ss:$72 sps:$4 sm:$0xff]   ;;  %v20763_v7 = vld [vmem:[#allocation2 + $0x2404] ss:$72 sps:$4 sm:$0xff]  }
  0x2a   :  { %14090 = vmatprep.subr.bf16.mxu0 %v20700_v25  ;;  %v20758_v8 = vld [vmem:[#allocation2 + $0x900] ss:$72 sps:$4 sm:$0xff]   ;;  %v20766_v12 = vld [vmem:[#allocation2 + $0x994] ss:$72 sps:$4 sm:$0xff]   ;;  %v20764_v14 = vld [vmem:[#allocation2 + $0x990] ss:$72 sps:$4 sm:$0xff]  }
  0x2b   :  { %v20761_v9 = vld [vmem:[#allocation2 + $0x2400] ss:$72 sps:$4 sm:$0xff]   ;;  %v20769_v13 = vld [vmem:[#allocation2 + $0x2494] ss:$72 sps:$4 sm:$0xff]   ;;  %v20767_v15 = vld [vmem:[#allocation2 + $0x2490] ss:$72 sps:$4 sm:$0xff]  }
  0x2c   :  { %13962 = vmatpush1.bf16.msra.mxu1 %v20702_v26  ;;  %v20772_v16 = vld [vmem:[#allocation2 + $0xa24] ss:$72 sps:$4 sm:$0xff]   ;;  %v20770_v18 = vld [vmem:[#allocation2 + $0xa20] ss:$72 sps:$4 sm:$0xff]   ;;  %v20778_v20 = vld [vmem:[#allocation2 + $0xab4] ss:$72 sps:$4 sm:$0xff]  }
  0x2d   :  { %14091 = vmatpush1.bf16.msra.mxu0 %v20703_v27  ;;  %13963 = vmatprep.subr.bf16.mxu1 %v20704_v28  ;;  %v20775_v17 = vld [vmem:[#allocation2 + $0x2524] ss:$72 sps:$4 sm:$0xff]   ;;  %v20773_v19 = vld [vmem:[#allocation2 + $0x2520] ss:$72 sps:$4 sm:$0xff]   ;;  %v20781_v21 = vld [vmem:[#allocation2 + $0x25b4] ss:$72 sps:$4 sm:$0xff]  }
  0x2e   :  { %14092 = vmatprep.subr.bf16.mxu0 %v20706_v29  ;;  %v20776_v22 = vld [vmem:[#allocation2 + $0xab0] ss:$72 sps:$4 sm:$0xff]   ;;  %v20784_v24 = vld [vmem:[#allocation2 + $0xb44] ss:$72 sps:$4 sm:$0xff]   ;;  %v20782_v26 = vld [vmem:[#allocation2 + $0xb40] ss:$72 sps:$4 sm:$0xff]  }
  0x2f   :  { %v20779_v23 = vld [vmem:[#allocation2 + $0x25b0] ss:$72 sps:$4 sm:$0xff]   ;;  %v20787_v25 = vld [vmem:[#allocation2 + $0x2644] ss:$72 sps:$4 sm:$0xff]   ;;  %v20785_v27 = vld [vmem:[#allocation2 + $0x2640] ss:$72 sps:$4 sm:$0xff]  }
  0x30   :  { %13964 = vmatpush1.bf16.msra.mxu1 %v20708_v30  ;;  %v20790_v28 = vld [vmem:[#allocation2 + $0xbd4] ss:$72 sps:$4 sm:$0xff]   ;;  %v20788_v30 = vld [vmem:[#allocation2 + $0xbd0] ss:$72 sps:$4 sm:$0xff]   ;;  %v20806_v48 = vld [vmem:[#allocation2 + $0xd80] ss:$72 sps:$4 sm:$0xff]  }
  0x31   :  { %14093 = vmatpush1.bf16.msra.mxu0 %v20709_v31  ;;  %13965 = vmatprep.subr.bf16.mxu1 %v20710_v32  ;;  %v20793_v29 = vld [vmem:[#allocation2 + $0x26d4] ss:$72 sps:$4 sm:$0xff]   ;;  %v20791_v31 = vld [vmem:[#allocation2 + $0x26d0] ss:$72 sps:$4 sm:$0xff]   ;;  %v20796_v32 = vld [vmem:[#allocation2 + $0xc64] ss:$72 sps:$4 sm:$0xff]  }
  0x32   :  { %14094 = vmatprep.subr.bf16.mxu0 %v20712_v33  ;;  %v20799_v33 = vld [vmem:[#allocation2 + $0x2764] ss:$72 sps:$4 sm:$0xff]   ;;  %v20809_v49 = vld [vmem:[#allocation2 + $0x2880] ss:$72 sps:$4 sm:$0xff]   ;;  %v20812_v53 = vld [vmem:[#allocation2 + $0xe10] ss:$72 sps:$4 sm:$0xff]  }
  0x33   :  { %v20815_v54 = vld [vmem:[#allocation2 + $0x2910] ss:$72 sps:$4 sm:$0xff]  }
  0x34   :  { %13966 = vmatpush1.bf16.msra.mxu1 %v20714_v34  ;;  %v20794_v34 = vld [vmem:[#allocation2 + $0xc60] ss:$72 sps:$4 sm:$0xff]  }
  0x35   :  { %14095 = vmatpush1.bf16.msra.mxu0 %v20715_v35  ;;  %13967 = vmatprep.subr.bf16.mxu1 %v20716_v36  ;;  %v20797_v35 = vld [vmem:[#allocation2 + $0x2760] ss:$72 sps:$4 sm:$0xff]  }
  0x36   :  { %14096 = vmatprep.subr.bf16.mxu0 %v20718_v37  ;;  %v24278_v36 = vld [vmem:[%s24883_s0 + $0x8] sm:$0xff] }
  0x37   :  { %v24283_v37 = vld [vmem:[%s24883_s0 + $0x48] sm:$0xff] }
  0x38   :  { %13968 = vmatpush1.bf16.msra.mxu1 %v20720_v38  ;;  %v20802_v38 = vld [vmem:[#allocation2 + $0xcf4] ss:$72 sps:$4 sm:$0xff]  }
  0x39   :  { %14097 = vmatpush1.bf16.msra.mxu0 %v20721_v39  ;;  %13969 = vmatprep.subr.bf16.mxu1 %v20722_v40  ;;  %v20805_v39 = vld [vmem:[#allocation2 + $0x27f4] ss:$72 sps:$4 sm:$0xff]   ;;  %v24287_v40 = vcombine.high %v24278_v36, %v24283_v37 }
  0x3a   :  { %14098 = vmatprep.subr.bf16.mxu0 %v20724_v41  ;;  %v24292_v41 = vld [vmem:[%s24883_s0 + $0x20] sm:$0xff] }
  0x3c   :  { %13970 = vmatpush1.bf16.msra.mxu1 %v20726_v42  ;;  %v24297_v42 = vld [vmem:[%s24883_s0 + $0x60] sm:$0xff] }
  0x3d   :  { %14099 = vmatpush1.bf16.msra.mxu0 %v20727_v43  ;;  %13971 = vmatprep.subr.bf16.mxu1 %v20728_v44  ;;  %v24302_v43 = vcombine.high %v24292_v41, %v24297_v42  ;;  %v20800_v44 = vld [vmem:[#allocation2 + $0xcf0] ss:$72 sps:$4 sm:$0xff]  }
  0x3e   :  { %14100 = vmatprep.subr.bf16.mxu0 %v20730_v45  ;;  %v20803_v45 = vld [vmem:[#allocation2 + $0x27f0] ss:$72 sps:$4 sm:$0xff]  }
  0x40   :  { %13972 = vmatpush1.bf16.msra.mxu1 %v20732_v46  ;;  %v20808_v46 = vld [vmem:[#allocation2 + $0xd84] ss:$72 sps:$4 sm:$0xff]  }
  0x41   :  { %14101 = vmatpush1.bf16.msra.mxu0 %v20733_v47  ;;  %13973 = vmatprep.subr.bf16.mxu1 %v20734_v50  ;;  %v20811_v47 = vld [vmem:[#allocation2 + $0x2884] ss:$72 sps:$4 sm:$0xff]   ;;  %v20814_v50 = vld [vmem:[#allocation2 + $0xe14] ss:$72 sps:$4 sm:$0xff]  }
  0x42   :  { %14102 = vmatprep.subr.bf16.mxu0 %v20736_v51  ;;  %v20817_v51 = vld [vmem:[#allocation2 + $0x2914] ss:$72 sps:$4 sm:$0xff]  }
  0x44   :  { %13974 = vmatpush1.bf16.msra.mxu1 %v20738_v56  ;;  %v20820_v56 = vld [vmem:[#allocation2 + $0xea4] ss:$72 sps:$4 sm:$0xff]  }
  0x45   :  { %14103 = vmatpush1.bf16.msra.mxu0 %v20739_v57  ;;  %13975 = vmatprep.subr.bf16.mxu1 %v20740_v58  ;;  %v20823_v57 = vld [vmem:[#allocation2 + $0x29a4] ss:$72 sps:$4 sm:$0xff]   ;;  %v20818_v58 = vld [vmem:[#allocation2 + $0xea0] ss:$72 sps:$4 sm:$0xff]  }
  0x46   :  { %14104 = vmatprep.subr.bf16.mxu0 %v20742_v59  ;;  %v20821_v59 = vld [vmem:[#allocation2 + $0x29a0] ss:$72 sps:$4 sm:$0xff]  }
  0x48   :  { %13976 = vmatpush1.bf16.msra.mxu1 %v20744_v60  ;;  %v20826_v60 = vld [vmem:[#allocation2 + $0xf34] ss:$72 sps:$4 sm:$0xff]  }
  0x49   :  { %14105 = vmatpush1.bf16.msra.mxu0 %v20745_v61  ;;  %13977 = vmatprep.subr.bf16.mxu1 %v20746_v62  ;;  %v20829_v61 = vld [vmem:[#allocation2 + $0x2a34] ss:$72 sps:$4 sm:$0xff]   ;;  %v20824_v62 = vld [vmem:[#allocation2 + $0xf30] ss:$72 sps:$4 sm:$0xff]  }
  0x4a   :  { %14106 = vmatprep.subr.bf16.mxu0 %v20748_v63  ;;  %v20827_v63 = vld [vmem:[#allocation2 + $0x2a30] ss:$72 sps:$4 sm:$0xff]  }
  0x4c   :  { %13978 = vmatpush1.bf16.msra.mxu1 %v20750_v0  ;;  %v20832_v0 = vld [vmem:[#allocation2 + $0xfc4] ss:$72 sps:$4 sm:$0xff]  }
  0x4d   :  { %14107 = vmatpush1.bf16.msra.mxu0 %v20751_v1  ;;  %13979 = vmatprep.subr.bf16.mxu1 %v20752_v2  ;;  %v20835_v1 = vld [vmem:[#allocation2 + $0x2ac4] ss:$72 sps:$4 sm:$0xff]   ;;  %v20830_v2 = vld [vmem:[#allocation2 + $0xfc0] ss:$72 sps:$4 sm:$0xff]  }
  0x4e   :  { %14108 = vmatprep.subr.bf16.mxu0 %v20754_v3  ;;  %v20833_v3 = vld [vmem:[#allocation2 + $0x2ac0] ss:$72 sps:$4 sm:$0xff]  }
  0x50   :  { %13980 = vmatpush1.bf16.msra.mxu1 %v20756_v4  ;;  %v20838_v4 = vld [vmem:[#allocation2 + $0x1054] ss:$72 sps:$4 sm:$0xff]  }
  0x51   :  { %14109 = vmatpush1.bf16.msra.mxu0 %v20757_v5  ;;  %13992 = vmatprep.subr.bf16.mxu1 %v20760_v6  ;;  %v20841_v5 = vld [vmem:[#allocation2 + $0x2b54] ss:$72 sps:$4 sm:$0xff]   ;;  %v20836_v6 = vld [vmem:[#allocation2 + $0x1050] ss:$72 sps:$4 sm:$0xff]  }
  0x52   :  { %14121 = vmatprep.subr.bf16.mxu0 %v20763_v7  ;;  %v20839_v7 = vld [vmem:[#allocation2 + $0x2b50] ss:$72 sps:$4 sm:$0xff]  }
  0x53   :  { %13982 = vmatmul.mubr.bf16.vlgmr.msra.gmra.mrb[0].mxu1 %v24269_v10 }
  0x54   :  { %14111 = vmatmul.mubr.bf16.vlgmr.msra.gmra.mrb[0].mxu0 %v24271_v11  ;;  %13993 = vmatpush1.bf16.msra.mxu1 %v20758_v8  ;;  %v20844_v8 = vld [vmem:[#allocation2 + $0x10e4] ss:$72 sps:$4 sm:$0xff]  }
  0x55   :  { %14122 = vmatpush1.bf16.msra.mxu0 %v20761_v9  ;;  %13994 = vmatprep.subr.bf16.mxu1 %v20766_v12  ;;  %v20847_v9 = vld [vmem:[#allocation2 + $0x2be4] ss:$72 sps:$4 sm:$0xff]   ;;  %v20842_v12 = vld [vmem:[#allocation2 + $0x10e0] ss:$72 sps:$4 sm:$0xff]  }
  0x56   :  { %14123 = vmatprep.subr.bf16.mxu0 %v20769_v13  ;;  %14024 = vmatprep.mubr.bf16.mxu1 %v24287_v40  ;;  %v20845_v13 = vld [vmem:[#allocation2 + $0x2be0] ss:$72 sps:$4 sm:$0xff]  }
  0x57   :  { %14153 = vmatprep.mubr.bf16.mxu0 %v24302_v43 }
  0x58   :  { %13995 = vmatpush1.bf16.msra.mxu1 %v20764_v14  ;;  %v20850_v14 = vld [vmem:[#allocation2 + $0x1174] ss:$72 sps:$4 sm:$0xff]  }
  0x59   :  { %14124 = vmatpush1.bf16.msra.mxu0 %v20767_v15  ;;  %13996 = vmatprep.subr.bf16.mxu1 %v20772_v16  ;;  %v20853_v15 = vld [vmem:[#allocation2 + $0x2c74] ss:$72 sps:$4 sm:$0xff]   ;;  %v20848_v16 = vld [vmem:[#allocation2 + $0x1170] ss:$72 sps:$4 sm:$0xff]  }
  0x5a   :  { %14125 = vmatprep.subr.bf16.mxu0 %v20775_v17  ;;  %v20851_v17 = vld [vmem:[#allocation2 + $0x2c70] ss:$72 sps:$4 sm:$0xff]  }
  0x5c   :  { %13997 = vmatpush1.bf16.msra.mxu1 %v20770_v18  ;;  %v20856_v18 = vld [vmem:[#allocation2 + $0x1204] ss:$72 sps:$4 sm:$0xff]  }
  0x5d   :  { %14126 = vmatpush1.bf16.msra.mxu0 %v20773_v19  ;;  %13998 = vmatprep.subr.bf16.mxu1 %v20778_v20  ;;  %v20859_v19 = vld [vmem:[#allocation2 + $0x2d04] ss:$72 sps:$4 sm:$0xff]   ;;  %v20854_v20 = vld [vmem:[#allocation2 + $0x1200] ss:$72 sps:$4 sm:$0xff]  }
  0x5e   :  { %14127 = vmatprep.subr.bf16.mxu0 %v20781_v21  ;;  %v20857_v21 = vld [vmem:[#allocation2 + $0x2d00] ss:$72 sps:$4 sm:$0xff]  }
  0x60   :  { %13999 = vmatpush1.bf16.msra.mxu1 %v20776_v22  ;;  %v24307_v22 = vcombine.low %v24278_v36, %v24283_v37  ;;  %v20866_v36 = vld [vmem:[#allocation2 + $0x1320] ss:$72 sps:$4 sm:$0xff]  }
  0x61   :  { %14128 = vmatpush1.bf16.msra.mxu0 %v20779_v23  ;;  %14000 = vmatprep.subr.bf16.mxu1 %v20784_v24  ;;  %v24311_v23 = vcombine.low %v24292_v41, %v24297_v42  ;;  %v20862_v24 = vld [vmem:[#allocation2 + $0x1294] ss:$72 sps:$4 sm:$0xff]   ;;  %v20869_v37 = vld [vmem:[#allocation2 + $0x2e20] ss:$72 sps:$4 sm:$0xff]   ;;  %v20872_v41 = vld [vmem:[#allocation2 + $0x13b0] ss:$72 sps:$4 sm:$0xff]  }
  0x62   :  { %14129 = vmatprep.subr.bf16.mxu0 %v20787_v25  ;;  %v20865_v25 = vld [vmem:[#allocation2 + $0x2d94] ss:$72 sps:$4 sm:$0xff]   ;;  %v20875_v42 = vld [vmem:[#allocation2 + $0x2eb0] ss:$72 sps:$4 sm:$0xff]  }
  0x64   :  { %14001 = vmatpush1.bf16.msra.mxu1 %v20782_v26  ;;  %v20860_v26 = vld [vmem:[#allocation2 + $0x1290] ss:$72 sps:$4 sm:$0xff]  }
  0x65   :  { %14130 = vmatpush1.bf16.msra.mxu0 %v20785_v27  ;;  %14002 = vmatprep.subr.bf16.mxu1 %v20790_v28  ;;  %v20863_v27 = vld [vmem:[#allocation2 + $0x2d90] ss:$72 sps:$4 sm:$0xff]  }
  0x66   :  { %14131 = vmatprep.subr.bf16.mxu0 %v20793_v29  ;;  %v24316_v28 = vld [vmem:[%s24883_s0 + $0x10] sm:$0xff] }
  0x67   :  { %v24323_v29 = vld [vmem:[%s24883_s0 + $0x50] sm:$0xff] }
  0x68   :  { %14003 = vmatpush1.bf16.msra.mxu1 %v20788_v30  ;;  %v24328_v30 = vld [vmem:[%s24883_s0 + $0x28] sm:$0xff] }
  0x69   :  { %14132 = vmatpush1.bf16.msra.mxu0 %v20791_v31  ;;  %14004 = vmatprep.subr.bf16.mxu1 %v20796_v32  ;;  %v24333_v31 = vld [vmem:[%s24883_s0 + $0x68] sm:$0xff] }
  0x6a   :  { %14133 = vmatprep.subr.bf16.mxu0 %v20799_v33  ;;  %v20868_v32 = vld [vmem:[#allocation2 + $0x1324] ss:$72 sps:$4 sm:$0xff]   ;;  %v24337_v33 = vcombine.high %v24316_v28, %v24323_v29 }
  0x6c   :  { %14005 = vmatpush1.bf16.msra.mxu1 %v20794_v34  ;;  %v24341_v34 = vcombine.high %v24328_v30, %v24333_v31 }
  0x6d   :  { %14134 = vmatpush1.bf16.msra.mxu0 %v20797_v35  ;;  %14006 = vmatprep.subr.bf16.mxu1 %v20802_v38  ;;  %v20871_v35 = vld [vmem:[#allocation2 + $0x2e24] ss:$72 sps:$4 sm:$0xff]   ;;  %v20874_v38 = vld [vmem:[#allocation2 + $0x13b4] ss:$72 sps:$4 sm:$0xff]  }
  0x6e   :  { %14135 = vmatprep.subr.bf16.mxu0 %v20805_v39  ;;  %v20877_v39 = vld [vmem:[#allocation2 + $0x2eb4] ss:$72 sps:$4 sm:$0xff]  }
  0x70   :  { %14007 = vmatpush1.bf16.msra.mxu1 %v20800_v44  ;;  %v20880_v44 = vld [vmem:[#allocation2 + $0x1444] ss:$72 sps:$4 sm:$0xff]  }
  0x71   :  { %14136 = vmatpush1.bf16.msra.mxu0 %v20803_v45  ;;  %14008 = vmatprep.subr.bf16.mxu1 %v20808_v46  ;;  %v20883_v45 = vld [vmem:[#allocation2 + $0x2f44] ss:$72 sps:$4 sm:$0xff]   ;;  %v20878_v46 = vld [vmem:[#allocation2 + $0x1440] ss:$72 sps:$4 sm:$0xff]  }
  0x72   :  { %14137 = vmatprep.subr.bf16.mxu0 %v20811_v47  ;;  %v20881_v47 = vld [vmem:[#allocation2 + $0x2f40] ss:$72 sps:$4 sm:$0xff]  }
  0x74   :  { %14009 = vmatpush1.bf16.msra.mxu1 %v20806_v48  ;;  %v20886_v48 = vld [vmem:[#allocation2 + $0x14d4] ss:$72 sps:$4 sm:$0xff]  }
  0x75   :  { %14138 = vmatpush1.bf16.msra.mxu0 %v20809_v49  ;;  %14010 = vmatprep.subr.bf16.mxu1 %v20814_v50  ;;  %v20889_v49 = vld [vmem:[#allocation2 + $0x2fd4] ss:$72 sps:$4 sm:$0xff]   ;;  %v20884_v50 = vld [vmem:[#allocation2 + $0x14d0] ss:$72 sps:$4 sm:$0xff]  }
  0x76   :  { %14139 = vmatprep.subr.bf16.mxu0 %v20817_v51  ;;  %v20887_v51 = vld [vmem:[#allocation2 + $0x2fd0] ss:$72 sps:$4 sm:$0xff]  }
  0x78   :  { %14011 = vmatpush1.bf16.msra.mxu1 %v20812_v53  ;;  %v20892_v53 = vld [vmem:[#allocation2 + $0x1564] ss:$72 sps:$4 sm:$0xff]  }
  0x79   :  { %14140 = vmatpush1.bf16.msra.mxu0 %v20815_v54  ;;  %14012 = vmatprep.subr.bf16.mxu1 %v20820_v56  ;;  %v20895_v54 = vld [vmem:[#allocation2 + $0x3064] ss:$72 sps:$4 sm:$0xff]   ;;  %v20890_v56 = vld [vmem:[#allocation2 + $0x1560] ss:$72 sps:$4 sm:$0xff]  }
  0x7a   :  { %14141 = vmatprep.subr.bf16.mxu0 %v20823_v57  ;;  %v20893_v57 = vld [vmem:[#allocation2 + $0x3060] ss:$72 sps:$4 sm:$0xff]  }
  0x7c   :  { %14013 = vmatpush1.bf16.msra.mxu1 %v20818_v58  ;;  %v20898_v58 = vld [vmem:[#allocation2 + $0x15f4] ss:$72 sps:$4 sm:$0xff]  }
  0x7d   :  { %14142 = vmatpush1.bf16.msra.mxu0 %v20821_v59  ;;  %14014 = vmatprep.subr.bf16.mxu1 %v20826_v60  ;;  %v20901_v59 = vld [vmem:[#allocation2 + $0x30f4] ss:$72 sps:$4 sm:$0xff]   ;;  %v20896_v60 = vld [vmem:[#allocation2 + $0x15f0] ss:$72 sps:$4 sm:$0xff]  }
  0x7e   :  { %14143 = vmatprep.subr.bf16.mxu0 %v20829_v61  ;;  %v20899_v61 = vld [vmem:[#allocation2 + $0x30f0] ss:$72 sps:$4 sm:$0xff]  }
  0x80   :  { %14015 = vmatpush1.bf16.msra.mxu1 %v20824_v62  ;;  %v20904_v62 = vld [vmem:[#allocation2 + $0x1684] ss:$72 sps:$4 sm:$0xff]  }
  0x81   :  { %14144 = vmatpush1.bf16.msra.mxu0 %v20827_v63  ;;  %14016 = vmatprep.subr.bf16.mxu1 %v20832_v0  ;;  %v20907_v63 = vld [vmem:[#allocation2 + $0x3184] ss:$72 sps:$4 sm:$0xff]   ;;  %v20902_v0 = vld [vmem:[#allocation2 + $0x1680] ss:$72 sps:$4 sm:$0xff]  }
  0x82   :  { %14145 = vmatprep.subr.bf16.mxu0 %v20835_v1  ;;  %v20905_v1 = vld [vmem:[#allocation2 + $0x3180] ss:$72 sps:$4 sm:$0xff]  }
  0x84   :  { %14017 = vmatpush1.bf16.msra.mxu1 %v20830_v2  ;;  %v20910_v2 = vld [vmem:[#allocation2 + $0x1714] ss:$72 sps:$4 sm:$0xff]  }
  0x85   :  { %14146 = vmatpush1.bf16.msra.mxu0 %v20833_v3  ;;  %14018 = vmatprep.subr.bf16.mxu1 %v20838_v4  ;;  %v20913_v3 = vld [vmem:[#allocation2 + $0x3214] ss:$72 sps:$4 sm:$0xff]   ;;  %v20908_v4 = vld [vmem:[#allocation2 + $0x1710] ss:$72 sps:$4 sm:$0xff]  }
  0x86   :  { %14147 = vmatprep.subr.bf16.mxu0 %v20841_v5  ;;  %v20911_v5 = vld [vmem:[#allocation2 + $0x3210] ss:$72 sps:$4 sm:$0xff]  }
  0x88   :  { %14019 = vmatpush1.bf16.msra.mxu1 %v20836_v6  ;;  %v20916_v6 = vld [vmem:[#allocation2 + $0x17a4] ss:$72 sps:$4 sm:$0xff]  }
  0x89   :  { %14148 = vmatpush1.bf16.msra.mxu0 %v20839_v7  ;;  %14020 = vmatprep.subr.bf16.mxu1 %v20844_v8  ;;  %v20919_v7 = vld [vmem:[#allocation2 + $0x32a4] ss:$72 sps:$4 sm:$0xff]   ;;  %v20914_v8 = vld [vmem:[#allocation2 + $0x17a0] ss:$72 sps:$4 sm:$0xff]  }
  0x8a   :  { %14149 = vmatprep.subr.bf16.mxu0 %v20847_v9  ;;  %v20917_v9 = vld [vmem:[#allocation2 + $0x32a0] ss:$72 sps:$4 sm:$0xff]  }
  0x8c   :  { %14021 = vmatpush1.bf16.msra.mxu1 %v20842_v12  ;;  %v20922_v12 = vld [vmem:[#allocation2 + $0x1834] ss:$72 sps:$4 sm:$0xff]  }
  0x8d   :  { %14150 = vmatpush1.bf16.msra.mxu0 %v20845_v13  ;;  %14022 = vmatprep.subr.bf16.mxu1 %v20850_v14  ;;  %v20925_v13 = vld [vmem:[#allocation2 + $0x3334] ss:$72 sps:$4 sm:$0xff]   ;;  %v20920_v14 = vld [vmem:[#allocation2 + $0x1830] ss:$72 sps:$4 sm:$0xff]  }
  0x8e   :  { %14151 = vmatprep.subr.bf16.mxu0 %v20853_v15  ;;  %v20923_v15 = vld [vmem:[#allocation2 + $0x3330] ss:$72 sps:$4 sm:$0xff]  }
  0x90   :  { %14023 = vmatpush1.bf16.msra.mxu1 %v20848_v16  ;;  %v20928_v16 = vld [vmem:[#allocation2 + $0x18c4] ss:$72 sps:$4 sm:$0xff]  }
  0x91   :  { %14152 = vmatpush1.bf16.msra.mxu0 %v20851_v17  ;;  %14035 = vmatprep.subr.bf16.mxu1 %v20856_v18  ;;  %v20931_v17 = vld [vmem:[#allocation2 + $0x33c4] ss:$72 sps:$4 sm:$0xff]   ;;  %v20926_v18 = vld [vmem:[#allocation2 + $0x18c0] ss:$72 sps:$4 sm:$0xff]  }
  0x92   :  { %14164 = vmatprep.subr.bf16.mxu0 %v20859_v19  ;;  %v20929_v19 = vld [vmem:[#allocation2 + $0x33c0] ss:$72 sps:$4 sm:$0xff]  }
  0x93   :  { %14025 = vmatmul.mubr.bf16.vlgmr.msra.gmra.mrb[0].mxu1 %v24307_v22 }
  0x94   :  { %14154 = vmatmul.mubr.bf16.vlgmr.msra.gmra.mrb[0].mxu0 %v24311_v23  ;;  %14036 = vmatpush1.bf16.msra.mxu1 %v20854_v20  ;;  %v20934_v20 = vld [vmem:[#allocation2 + $0x1954] ss:$72 sps:$4 sm:$0xff]  }
  0x95   :  { %14165 = vmatpush1.bf16.msra.mxu0 %v20857_v21  ;;  %14037 = vmatprep.subr.bf16.mxu1 %v20862_v24  ;;  %v20937_v21 = vld [vmem:[#allocation2 + $0x3454] ss:$72 sps:$4 sm:$0xff]   ;;  %v20932_v24 = vld [vmem:[#allocation2 + $0x1950] ss:$72 sps:$4 sm:$0xff]  }
  0x96   :  { %14166 = vmatprep.subr.bf16.mxu0 %v20865_v25  ;;  %14067 = vmatprep.mubr.bf16.mxu1 %v24337_v33  ;;  %v20935_v25 = vld [vmem:[#allocation2 + $0x3450] ss:$72 sps:$4 sm:$0xff]  }
  0x97   :  { %14196 = vmatprep.mubr.bf16.mxu0 %v24341_v34 }
  0x98   :  { %14038 = vmatpush1.bf16.msra.mxu1 %v20860_v26  ;;  %v20940_v26 = vld [vmem:[#allocation2 + $0x19e4] ss:$72 sps:$4 sm:$0xff]  }
  0x99   :  { %14167 = vmatpush1.bf16.msra.mxu0 %v20863_v27  ;;  %14039 = vmatprep.subr.bf16.mxu1 %v20868_v32  ;;  %v20943_v27 = vld [vmem:[#allocation2 + $0x34e4] ss:$72 sps:$4 sm:$0xff]   ;;  %v20938_v32 = vld [vmem:[#allocation2 + $0x19e0] ss:$72 sps:$4 sm:$0xff]  }
  0x9a   :  { %14168 = vmatprep.subr.bf16.mxu0 %v20871_v35  ;;  %v20941_v35 = vld [vmem:[#allocation2 + $0x34e0] ss:$72 sps:$4 sm:$0xff]  }
  0x9c   :  { %14040 = vmatpush1.bf16.msra.mxu1 %v20866_v36  ;;  %v20946_v36 = vld [vmem:[#allocation2 + $0x1a74] ss:$72 sps:$4 sm:$0xff]  }
  0x9d   :  { %14169 = vmatpush1.bf16.msra.mxu0 %v20869_v37  ;;  %14041 = vmatprep.subr.bf16.mxu1 %v20874_v38  ;;  %v20949_v37 = vld [vmem:[#allocation2 + $0x3574] ss:$72 sps:$4 sm:$0xff]   ;;  %v20944_v38 = vld [vmem:[#allocation2 + $0x1a70] ss:$72 sps:$4 sm:$0xff]  }
  0x9e   :  { %14170 = vmatprep.subr.bf16.mxu0 %v20877_v39  ;;  %v20947_v39 = vld [vmem:[#allocation2 + $0x3570] ss:$72 sps:$4 sm:$0xff]  }
  0xa0   :  { %14042 = vmatpush1.bf16.msra.mxu1 %v20872_v41  ;;  %v20952_v41 = vld [vmem:[#allocation2 + $0x3604] ss:$72 sps:$4 sm:$0xff]  }
  0xa1   :  { %14171 = vmatpush1.bf16.msra.mxu0 %v20875_v42  ;;  %14043 = vmatprep.subr.bf16.mxu1 %v20880_v44  ;;  %v20955_v42 = vld [vmem:[#allocation2 + $0xc] ss:$72 sps:$4 sm:$0xff]  }
  0xa2   :  { %14172 = vmatprep.subr.bf16.mxu0 %v20883_v45  ;;  %v24348_v44 = vld [vmem:[%s24883_s0 + $0x30] sm:$0xff]  ;;  %v24352_v45 = vcombine.low %v24316_v28, %v24323_v29 }
  0xa3   :  { %v20956_v29 = vld [vmem:[#allocation2 + $0x3690] ss:$72 sps:$4 sm:$0xff]  }
  0xa4   :  { %14044 = vmatpush1.bf16.msra.mxu1 %v20878_v46  ;;  %v24356_v46 = vcombine.low %v24328_v30, %v24333_v31  ;;  %v20959_v30 = vld [vmem:[#allocation2 + $0x98] ss:$72 sps:$4 sm:$0xff]   ;;  %v20964_v31 = vld [vmem:[#allocation2 + $0x3724] ss:$72 sps:$4 sm:$0xff]  }
  0xa5   :  { %14173 = vmatpush1.bf16.msra.mxu0 %v20881_v47  ;;  %14045 = vmatprep.subr.bf16.mxu1 %v20886_v48  ;;  %v24361_v47 = vld [vmem:[%s24883_s0 + $0x70] sm:$0xff]  ;;  %v20950_v48 = vld [vmem:[#allocation2 + $0x3600] ss:$72 sps:$4 sm:$0xff]  }
  0xa6   :  { %14174 = vmatprep.subr.bf16.mxu0 %v20889_v49  ;;  %v20953_v49 = vld [vmem:[#allocation2 + $0x8] ss:$72 sps:$4 sm:$0xff]   ;;  %v24365_v28 = vcombine.high %v24348_v44, %v24361_v47 }
  0xa8   :  { %14046 = vmatpush1.bf16.msra.mxu1 %v20884_v50  ;;  %v20958_v50 = vld [vmem:[#allocation2 + $0x3694] ss:$72 sps:$4 sm:$0xff]  }
  0xa9   :  { %14175 = vmatpush1.bf16.msra.mxu0 %v20887_v51  ;;  %14047 = vmatprep.subr.bf16.mxu1 %v20892_v53  ;;  %v20961_v51 = vld [vmem:[#allocation2 + $0x9c] ss:$72 sps:$4 sm:$0xff]   ;;  %v20967_v53 = vld [vmem:[#allocation2 + $0x12c] ss:$72 sps:$4 sm:$0xff]  }
  0xaa   :  { %14176 = vmatprep.subr.bf16.mxu0 %v20895_v54  ;;  %v20962_v54 = vld [vmem:[#allocation2 + $0x3720] ss:$72 sps:$4 sm:$0xff]  }
  0xac   :  { %14048 = vmatpush1.bf16.msra.mxu1 %v20890_v56  ;;  %v20965_v56 = vld [vmem:[#allocation2 + $0x128] ss:$72 sps:$4 sm:$0xff]  }
  0xad   :  { %14177 = vmatpush1.bf16.msra.mxu0 %v20893_v57  ;;  %14049 = vmatprep.subr.bf16.mxu1 %v20898_v58  ;;  %v20970_v57 = vld [vmem:[#allocation2 + $0x37b4] ss:$72 sps:$4 sm:$0xff]  }
  0xae   :  { %14178 = vmatprep.subr.bf16.mxu0 %v20901_v59  ;;  %v20973_v58 = vld [vmem:[#allocation2 + $0x1bc] ss:$72 sps:$4 sm:$0xff]   ;;  %v20968_v59 = vld [vmem:[#allocation2 + $0x37b0] ss:$72 sps:$4 sm:$0xff]  }
  0xb0   :  { %14050 = vmatpush1.bf16.msra.mxu1 %v20896_v60  ;;  %v20971_v60 = vld [vmem:[#allocation2 + $0x1b8] ss:$72 sps:$4 sm:$0xff]  }
  0xb1   :  { %14179 = vmatpush1.bf16.msra.mxu0 %v20899_v61  ;;  %14051 = vmatprep.subr.bf16.mxu1 %v20904_v62  ;;  %v20976_v61 = vld [vmem:[#allocation2 + $0x3844] ss:$72 sps:$4 sm:$0xff]  }
  0xb2   :  { %14180 = vmatprep.subr.bf16.mxu0 %v20907_v63  ;;  %v20979_v62 = vld [vmem:[#allocation2 + $0x24c] ss:$72 sps:$4 sm:$0xff]   ;;  %v20974_v63 = vld [vmem:[#allocation2 + $0x3840] ss:$72 sps:$4 sm:$0xff]  }
  0xb4   :  { %14052 = vmatpush1.bf16.msra.mxu1 %v20902_v0  ;;  %v20977_v0 = vld [vmem:[#allocation2 + $0x248] ss:$72 sps:$4 sm:$0xff]  }
  0xb5   :  { %14181 = vmatpush1.bf16.msra.mxu0 %v20905_v1  ;;  %14053 = vmatprep.subr.bf16.mxu1 %v20910_v2  ;;  %v20982_v1 = vld [vmem:[#allocation2 + $0x38d4] ss:$72 sps:$4 sm:$0xff]  }
  0xb6   :  { %14182 = vmatprep.subr.bf16.mxu0 %v20913_v3  ;;  %v20985_v2 = vld [vmem:[#allocation2 + $0x2dc] ss:$72 sps:$4 sm:$0xff]   ;;  %v20980_v3 = vld [vmem:[#allocation2 + $0x38d0] ss:$72 sps:$4 sm:$0xff]  }
  0xb8   :  { %14054 = vmatpush1.bf16.msra.mxu1 %v20908_v4  ;;  %v20983_v4 = vld [vmem:[#allocation2 + $0x2d8] ss:$72 sps:$4 sm:$0xff]  }
  0xb9   :  { %14183 = vmatpush1.bf16.msra.mxu0 %v20911_v5  ;;  %14055 = vmatprep.subr.bf16.mxu1 %v20916_v6  ;;  %v20988_v5 = vld [vmem:[#allocation2 + $0x3964] ss:$72 sps:$4 sm:$0xff]  }
  0xba   :  { %14184 = vmatprep.subr.bf16.mxu0 %v20919_v7  ;;  %v20991_v6 = vld [vmem:[#allocation2 + $0x36c] ss:$72 sps:$4 sm:$0xff]   ;;  %v20986_v7 = vld [vmem:[#allocation2 + $0x3960] ss:$72 sps:$4 sm:$0xff]  }
  0xbc   :  { %14056 = vmatpush1.bf16.msra.mxu1 %v20914_v8  ;;  %v20989_v8 = vld [vmem:[#allocation2 + $0x368] ss:$72 sps:$4 sm:$0xff]  }
  0xbd   :  { %14185 = vmatpush1.bf16.msra.mxu0 %v20917_v9  ;;  %14057 = vmatprep.subr.bf16.mxu1 %v20922_v12  ;;  %v20994_v9 = vld [vmem:[#allocation2 + $0x39f4] ss:$72 sps:$4 sm:$0xff]  }
  0xbe   :  { %14186 = vmatprep.subr.bf16.mxu0 %v20925_v13  ;;  %v20997_v12 = vld [vmem:[#allocation2 + $0x3fc] ss:$72 sps:$4 sm:$0xff]   ;;  %v20992_v13 = vld [vmem:[#allocation2 + $0x39f0] ss:$72 sps:$4 sm:$0xff]  }
  0xc0   :  { %14058 = vmatpush1.bf16.msra.mxu1 %v20920_v14  ;;  %v20995_v14 = vld [vmem:[#allocation2 + $0x3f8] ss:$72 sps:$4 sm:$0xff]  }
  0xc1   :  { %14187 = vmatpush1.bf16.msra.mxu0 %v20923_v15  ;;  %14059 = vmatprep.subr.bf16.mxu1 %v20928_v16  ;;  %v21000_v15 = vld [vmem:[#allocation2 + $0x3a84] ss:$72 sps:$4 sm:$0xff]  }
  0xc2   :  { %14188 = vmatprep.subr.bf16.mxu0 %v20931_v17  ;;  %v21003_v16 = vld [vmem:[#allocation2 + $0x48c] ss:$72 sps:$4 sm:$0xff]   ;;  %v20998_v17 = vld [vmem:[#allocation2 + $0x3a80] ss:$72 sps:$4 sm:$0xff]  }
  0xc4   :  { %14060 = vmatpush1.bf16.msra.mxu1 %v20926_v18  ;;  %v21001_v18 = vld [vmem:[#allocation2 + $0x488] ss:$72 sps:$4 sm:$0xff]  }
  0xc5   :  { %14189 = vmatpush1.bf16.msra.mxu0 %v20929_v19  ;;  %14061 = vmatprep.subr.bf16.mxu1 %v20934_v20  ;;  %v21006_v19 = vld [vmem:[#allocation2 + $0x3b14] ss:$72 sps:$4 sm:$0xff]  }
  0xc6   :  { %14190 = vmatprep.subr.bf16.mxu0 %v20937_v21  ;;  %v21009_v20 = vld [vmem:[#allocation2 + $0x51c] ss:$72 sps:$4 sm:$0xff]   ;;  %v21004_v21 = vld [vmem:[#allocation2 + $0x3b10] ss:$72 sps:$4 sm:$0xff]  }
  0xc8   :  { %14062 = vmatpush1.bf16.msra.mxu1 %v20932_v24  ;;  %v21007_v24 = vld [vmem:[#allocation2 + $0x518] ss:$72 sps:$4 sm:$0xff]  }
  0xc9   :  { %14191 = vmatpush1.bf16.msra.mxu0 %v20935_v25  ;;  %14063 = vmatprep.subr.bf16.mxu1 %v20940_v26  ;;  %v21012_v25 = vld [vmem:[#allocation2 + $0x3ba4] ss:$72 sps:$4 sm:$0xff]  }
  0xca   :  { %14192 = vmatprep.subr.bf16.mxu0 %v20943_v27  ;;  %v21015_v26 = vld [vmem:[#allocation2 + $0x5ac] ss:$72 sps:$4 sm:$0xff]   ;;  %v21010_v27 = vld [vmem:[#allocation2 + $0x3ba0] ss:$72 sps:$4 sm:$0xff]  }
  0xcc   :  { %14064 = vmatpush1.bf16.msra.mxu1 %v20938_v32  ;;  %v21013_v32 = vld [vmem:[#allocation2 + $0x5a8] ss:$72 sps:$4 sm:$0xff]  }
  0xcd   :  { %14193 = vmatpush1.bf16.msra.mxu0 %v20941_v35  ;;  %14065 = vmatprep.subr.bf16.mxu1 %v20946_v36  ;;  %v21018_v35 = vld [vmem:[#allocation2 + $0x3c34] ss:$72 sps:$4 sm:$0xff]  }
  0xce   :  { %14194 = vmatprep.subr.bf16.mxu0 %v20949_v37  ;;  %v21021_v36 = vld [vmem:[#allocation2 + $0x63c] ss:$72 sps:$4 sm:$0xff]   ;;  %v21016_v37 = vld [vmem:[#allocation2 + $0x3c30] ss:$72 sps:$4 sm:$0xff]  }
  0xd0   :  { %14066 = vmatpush1.bf16.msra.mxu1 %v20944_v38  ;;  %v21019_v38 = vld [vmem:[#allocation2 + $0x638] ss:$72 sps:$4 sm:$0xff]  }
  0xd1   :  { %14195 = vmatpush1.bf16.msra.mxu0 %v20947_v39  ;;  %14293 = vmatprep.subr.bf16.mxu1 %v20955_v42  ;;  %v21024_v39 = vld [vmem:[#allocation2 + $0x3cc4] ss:$72 sps:$4 sm:$0xff]   ;;  %v21022_v42 = vld [vmem:[#allocation2 + $0x3cc0] ss:$72 sps:$4 sm:$0xff]  }
  0xd2   :  { %14207 = vmatprep.subr.bf16.mxu0 %v20952_v41  ;;  %v21027_v41 = vld [vmem:[#allocation2 + $0x6cc] ss:$72 sps:$4 sm:$0xff]  }
  0xd3   :  { %14068 = vmatmul.mubr.bf16.vlgmr.msra.gmra.mrb[0].mxu1 %v24352_v45 }
  0xd4   :  { %14197 = vmatmul.mubr.bf16.vlgmr.msra.gmra.mrb[0].mxu0 %v24356_v46  ;;  %14294 = vmatpush1.bf16.msra.mxu1 %v20953_v49  ;;  %v21030_v49 = vld [vmem:[#allocation2 + $0x3d54] ss:$72 sps:$4 sm:$0xff]  }
  0xd5   :  { %14208 = vmatpush1.bf16.msra.mxu0 %v20950_v48  ;;  %14295 = vmatprep.subr.bf16.mxu1 %v20961_v51  ;;  %v21025_v48 = vld [vmem:[#allocation2 + $0x6c8] ss:$72 sps:$4 sm:$0xff]  }
  0xd6   :  { %14209 = vmatprep.subr.bf16.mxu0 %v20958_v50  ;;  %14239 = vmatprep.mubr.bf16.mxu0 %v24365_v28  ;;  %v21033_v50 = vld [vmem:[#allocation2 + $0x75c] ss:$72 sps:$4 sm:$0xff]   ;;  %v21028_v51 = vld [vmem:[#allocation2 + $0x3d50] ss:$72 sps:$4 sm:$0xff]  }
  0xd7   :  { %14325 = vmatprep.mubr.bf16.mxu1 %v24257_v52 }
  0xd8   :  { %14296 = vmatpush1.bf16.msra.mxu1 %v20959_v30  ;;  %v21036_v30 = vld [vmem:[#allocation2 + $0x3de4] ss:$72 sps:$4 sm:$0xff]  }
  0xd9   :  { %14210 = vmatpush1.bf16.msra.mxu0 %v20956_v29  ;;  %14297 = vmatprep.subr.bf16.mxu1 %v20967_v53  ;;  %v21031_v29 = vld [vmem:[#allocation2 + $0x758] ss:$72 sps:$4 sm:$0xff]  }
  0xda   :  { %14211 = vmatprep.subr.bf16.mxu0 %v20964_v31  ;;  %v21039_v31 = vld [vmem:[#allocation2 + $0x7ec] ss:$72 sps:$4 sm:$0xff]   ;;  %v21034_v53 = vld [vmem:[#allocation2 + $0x3de0] ss:$72 sps:$4 sm:$0xff]  }
  0xdc   :  { %14298 = vmatpush1.bf16.msra.mxu1 %v20965_v56  ;;  %v21042_v56 = vld [vmem:[#allocation2 + $0x3e74] ss:$72 sps:$4 sm:$0xff]  }
  0xdd   :  { %14212 = vmatpush1.bf16.msra.mxu0 %v20962_v54  ;;  %14299 = vmatprep.subr.bf16.mxu1 %v20973_v58  ;;  %v21037_v54 = vld [vmem:[#allocation2 + $0x7e8] ss:$72 sps:$4 sm:$0xff]  }
  0xde   :  { %14213 = vmatprep.subr.bf16.mxu0 %v20970_v57  ;;  %v21045_v57 = vld [vmem:[#allocation2 + $0x87c] ss:$72 sps:$4 sm:$0xff]   ;;  %v21040_v58 = vld [vmem:[#allocation2 + $0x3e70] ss:$72 sps:$4 sm:$0xff]  }
  0xe0   :  { %14300 = vmatpush1.bf16.msra.mxu1 %v20971_v60  ;;  %v21048_v60 = vld [vmem:[#allocation2 + $0x3f04] ss:$72 sps:$4 sm:$0xff]  }
  0xe1   :  { %14214 = vmatpush1.bf16.msra.mxu0 %v20968_v59  ;;  %14301 = vmatprep.subr.bf16.mxu1 %v20979_v62  ;;  %v21043_v59 = vld [vmem:[#allocation2 + $0x878] ss:$72 sps:$4 sm:$0xff]  }
  0xe2   :  { %14215 = vmatprep.subr.bf16.mxu0 %v20976_v61  ;;  %v21051_v61 = vld [vmem:[#allocation2 + $0x90c] ss:$72 sps:$4 sm:$0xff]   ;;  %v21046_v62 = vld [vmem:[#allocation2 + $0x3f00] ss:$72 sps:$4 sm:$0xff]  }
  0xe4   :  { %14302 = vmatpush1.bf16.msra.mxu1 %v20977_v0  ;;  %v24373_v0 = vcombine.low %v24348_v44, %v24361_v47  ;;  %v21052_v47 = vld [vmem:[#allocation2 + $0x3f90] ss:$72 sps:$4 sm:$0xff]  }
  0xe5   :  { %14216 = vmatpush1.bf16.msra.mxu0 %v20974_v63  ;;  %14303 = vmatprep.subr.bf16.mxu1 %v20985_v2  ;;  %v21049_v63 = vld [vmem:[#allocation2 + $0x908] ss:$72 sps:$4 sm:$0xff]   ;;  %v24383_v2 = vld [vmem:[%s24883_s0 + $0x78] sm:$0xff] }
  0xe6   :  { %14217 = vmatprep.subr.bf16.mxu0 %v20982_v1  ;;  %v24378_v1 = vld [vmem:[%s24883_s0 + $0x38] sm:$0xff] }
  0xe7   :  { %v24387_v44 = vcombine.high %v24378_v1, %v24383_v2 }
  0xe8   :  { %14304 = vmatpush1.bf16.msra.mxu1 %v20983_v4  ;;  %v21057_v4 = vld [vmem:[#allocation2 + $0x99c] ss:$72 sps:$4 sm:$0xff]  }
  0xe9   :  { %14218 = vmatpush1.bf16.msra.mxu0 %v20980_v3  ;;  %14305 = vmatprep.subr.bf16.mxu1 %v20991_v6  ;;  %v21054_v3 = vld [vmem:[#allocation2 + $0x3f94] ss:$72 sps:$4 sm:$0xff]   ;;  %v21060_v6 = vld [vmem:[#allocation2 + $0x4024] ss:$72 sps:$4 sm:$0xff]  }
  0xea   :  { %14219 = vmatprep.subr.bf16.mxu0 %v20988_v5  ;;  %v21055_v5 = vld [vmem:[#allocation2 + $0x998] ss:$72 sps:$4 sm:$0xff]  }
  0xec   :  { %14306 = vmatpush1.bf16.msra.mxu1 %v20989_v8  ;;  %v21058_v8 = vld [vmem:[#allocation2 + $0x4020] ss:$72 sps:$4 sm:$0xff]  }
  0xed   :  { %14220 = vmatpush1.bf16.msra.mxu0 %v20986_v7  ;;  %14307 = vmatprep.subr.bf16.mxu1 %v20997_v12  ;;  %v21063_v7 = vld [vmem:[#allocation2 + $0xa2c] ss:$72 sps:$4 sm:$0xff]  }
  0xee   :  { %14221 = vmatprep.subr.bf16.mxu0 %v20994_v9  ;;  %v21061_v9 = vld [vmem:[#allocation2 + $0xa28] ss:$72 sps:$4 sm:$0xff]   ;;  %v21066_v12 = vld [vmem:[#allocation2 + $0x40b4] ss:$72 sps:$4 sm:$0xff]  }
  0xf0   :  { %14308 = vmatpush1.bf16.msra.mxu1 %v20995_v14  ;;  %v21064_v14 = vld [vmem:[#allocation2 + $0x40b0] ss:$72 sps:$4 sm:$0xff]  }
  0xf1   :  { %14222 = vmatpush1.bf16.msra.mxu0 %v20992_v13  ;;  %14309 = vmatprep.subr.bf16.mxu1 %v21003_v16  ;;  %v21069_v13 = vld [vmem:[#allocation2 + $0xabc] ss:$72 sps:$4 sm:$0xff]  }
  0xf2   :  { %14223 = vmatprep.subr.bf16.mxu0 %v21000_v15  ;;  %v21067_v15 = vld [vmem:[#allocation2 + $0xab8] ss:$72 sps:$4 sm:$0xff]   ;;  %v21072_v16 = vld [vmem:[#allocation2 + $0x4144] ss:$72 sps:$4 sm:$0xff]  }
  0xf4   :  { %14310 = vmatpush1.bf16.msra.mxu1 %v21001_v18  ;;  %v21070_v18 = vld [vmem:[#allocation2 + $0x4140] ss:$72 sps:$4 sm:$0xff]  }
  0xf5   :  { %14224 = vmatpush1.bf16.msra.mxu0 %v20998_v17  ;;  %14311 = vmatprep.subr.bf16.mxu1 %v21009_v20  ;;  %v21075_v17 = vld [vmem:[#allocation2 + $0xb4c] ss:$72 sps:$4 sm:$0xff]  }
  0xf6   :  { %14225 = vmatprep.subr.bf16.mxu0 %v21006_v19  ;;  %v21073_v19 = vld [vmem:[#allocation2 + $0xb48] ss:$72 sps:$4 sm:$0xff]   ;;  %v21078_v20 = vld [vmem:[#allocation2 + $0x41d4] ss:$72 sps:$4 sm:$0xff]  }
  0xf8   :  { %14312 = vmatpush1.bf16.msra.mxu1 %v21007_v24  ;;  %v21076_v24 = vld [vmem:[#allocation2 + $0x41d0] ss:$72 sps:$4 sm:$0xff]  }
  0xf9   :  { %14226 = vmatpush1.bf16.msra.mxu0 %v21004_v21  ;;  %14313 = vmatprep.subr.bf16.mxu1 %v21015_v26  ;;  %v21081_v21 = vld [vmem:[#allocation2 + $0xbdc] ss:$72 sps:$4 sm:$0xff]  }
  0xfa   :  { %14227 = vmatprep.subr.bf16.mxu0 %v21012_v25  ;;  %v21079_v25 = vld [vmem:[#allocation2 + $0xbd8] ss:$72 sps:$4 sm:$0xff]   ;;  %v21084_v26 = vld [vmem:[#allocation2 + $0x4264] ss:$72 sps:$4 sm:$0xff]  }
  0xfc   :  { %14314 = vmatpush1.bf16.msra.mxu1 %v21013_v32  ;;  %v21082_v32 = vld [vmem:[#allocation2 + $0x4260] ss:$72 sps:$4 sm:$0xff]  }
  0xfd   :  { %14228 = vmatpush1.bf16.msra.mxu0 %v21010_v27  ;;  %14315 = vmatprep.subr.bf16.mxu1 %v21021_v36  ;;  %v21087_v27 = vld [vmem:[#allocation2 + $0xc6c] ss:$72 sps:$4 sm:$0xff]  }
  0xfe   :  { %14229 = vmatprep.subr.bf16.mxu0 %v21018_v35  ;;  %v21085_v35 = vld [vmem:[#allocation2 + $0xc68] ss:$72 sps:$4 sm:$0xff]   ;;  %v21090_v36 = vld [vmem:[#allocation2 + $0x42f4] ss:$72 sps:$4 sm:$0xff]  }
 0x100   :  { %14316 = vmatpush1.bf16.msra.mxu1 %v21019_v38  ;;  %v21088_v38 = vld [vmem:[#allocation2 + $0x42f0] ss:$72 sps:$4 sm:$0xff]  }
 0x101   :  { %14230 = vmatpush1.bf16.msra.mxu0 %v21016_v37  ;;  %14317 = vmatprep.subr.bf16.mxu1 %v21027_v41  ;;  %v21093_v37 = vld [vmem:[#allocation2 + $0xcfc] ss:$72 sps:$4 sm:$0xff]  }
 0x102   :  { %14231 = vmatprep.subr.bf16.mxu0 %v21024_v39  ;;  %v21091_v39 = vld [vmem:[#allocation2 + $0xcf8] ss:$72 sps:$4 sm:$0xff]   ;;  %v21096_v41 = vld [vmem:[#allocation2 + $0x4384] ss:$72 sps:$4 sm:$0xff]  }
 0x104   :  { %14318 = vmatpush1.bf16.msra.mxu1 %v21025_v48  ;;  %v21094_v48 = vld [vmem:[#allocation2 + $0x4380] ss:$72 sps:$4 sm:$0xff]  }
 0x105   :  { %14232 = vmatpush1.bf16.msra.mxu0 %v21022_v42  ;;  %14319 = vmatprep.subr.bf16.mxu1 %v21033_v50  ;;  %v21099_v42 = vld [vmem:[#allocation2 + $0xd8c] ss:$72 sps:$4 sm:$0xff]  }
 0x106   :  { %14233 = vmatprep.subr.bf16.mxu0 %v21030_v49  ;;  %v21097_v49 = vld [vmem:[#allocation2 + $0xd88] ss:$72 sps:$4 sm:$0xff]   ;;  %v21102_v50 = vld [vmem:[#allocation2 + $0x4414] ss:$72 sps:$4 sm:$0xff]  }
 0x108   :  { %14320 = vmatpush1.bf16.msra.mxu1 %v21031_v29  ;;  %v21100_v29 = vld [vmem:[#allocation2 + $0x4410] ss:$72 sps:$4 sm:$0xff]  }
 0x109   :  { %14234 = vmatpush1.bf16.msra.mxu0 %v21028_v51  ;;  %14321 = vmatprep.subr.bf16.mxu1 %v21039_v31  ;;  %v21105_v51 = vld [vmem:[#allocation2 + $0xe1c] ss:$72 sps:$4 sm:$0xff]  }
 0x10a   :  { %14235 = vmatprep.subr.bf16.mxu0 %v21036_v30  ;;  %v21103_v30 = vld [vmem:[#allocation2 + $0xe18] ss:$72 sps:$4 sm:$0xff]   ;;  %v21108_v31 = vld [vmem:[#allocation2 + $0x44a4] ss:$72 sps:$4 sm:$0xff]  }
 0x10c   :  { %14322 = vmatpush1.bf16.msra.mxu1 %v21037_v54  ;;  %v21106_v54 = vld [vmem:[#allocation2 + $0x44a0] ss:$72 sps:$4 sm:$0xff]  }
 0x10d   :  { %14236 = vmatpush1.bf16.msra.mxu0 %v21034_v53  ;;  %14323 = vmatprep.subr.bf16.mxu1 %v21045_v57  ;;  %v21111_v53 = vld [vmem:[#allocation2 + $0xeac] ss:$72 sps:$4 sm:$0xff]  }
 0x10e   :  { %14237 = vmatprep.subr.bf16.mxu0 %v21042_v56  ;;  %v21109_v56 = vld [vmem:[#allocation2 + $0xea8] ss:$72 sps:$4 sm:$0xff]   ;;  %v21114_v57 = vld [vmem:[#allocation2 + $0x4534] ss:$72 sps:$4 sm:$0xff]  }
 0x110   :  { %14324 = vmatpush1.bf16.msra.mxu1 %v21043_v59  ;;  %v21112_v59 = vld [vmem:[#allocation2 + $0x4530] ss:$72 sps:$4 sm:$0xff]  }
 0x111   :  { %14238 = vmatpush1.bf16.msra.mxu0 %v21040_v58  ;;  %14336 = vmatprep.subr.bf16.mxu1 %v21051_v61  ;;  %v21117_v58 = vld [vmem:[#allocation2 + $0xf3c] ss:$72 sps:$4 sm:$0xff]  }
 0x112   :  { %14250 = vmatprep.subr.bf16.mxu0 %v21048_v60  ;;  %v21115_v60 = vld [vmem:[#allocation2 + $0xf38] ss:$72 sps:$4 sm:$0xff]   ;;  %v21120_v61 = vld [vmem:[#allocation2 + $0x45c4] ss:$72 sps:$4 sm:$0xff]  }
 0x113   :  { %14326 = vmatmul.mubr.bf16.vlgmr.msra.gmra.mrb[4].mxu1 %v24269_v10 }
 0x114   :  { %14240 = vmatmul.mubr.bf16.vlgmr.msra.gmra.mrb[0].mxu0 %v24373_v0  ;;  %14337 = vmatpush1.bf16.msra.mxu1 %v21049_v63  ;;  %v21118_v63 = vld [vmem:[#allocation2 + $0x45c0] ss:$72 sps:$4 sm:$0xff]  }
 0x115   :  { %14251 = vmatpush1.bf16.msra.mxu0 %v21046_v62  ;;  %14338 = vmatprep.subr.bf16.mxu1 %v21057_v4  ;;  %v21123_v62 = vld [vmem:[#allocation2 + $0xfcc] ss:$72 sps:$4 sm:$0xff]  }
 0x116   :  { %14252 = vmatprep.subr.bf16.mxu0 %v21054_v3  ;;  %14282 = vmatprep.mubr.bf16.mxu0 %v24387_v44  ;;  %v21121_v3 = vld [vmem:[#allocation2 + $0xfc8] ss:$72 sps:$4 sm:$0xff]   ;;  %v21126_v4 = vld [vmem:[#allocation2 + $0x4654] ss:$72 sps:$4 sm:$0xff]  }
 0x117   :  { %14368 = vmatprep.mubr.bf16.mxu1 %v24287_v40 }
 0x118   :  { %14339 = vmatpush1.bf16.msra.mxu1 %v21055_v5  ;;  %v21124_v5 = vld [vmem:[#allocation2 + $0x4650] ss:$72 sps:$4 sm:$0xff]  }
 0x119   :  { %14253 = vmatpush1.bf16.msra.mxu0 %v21052_v47  ;;  %14340 = vmatprep.subr.bf16.mxu1 %v21063_v7  ;;  %v21129_v47 = vld [vmem:[#allocation2 + $0x105c] ss:$72 sps:$4 sm:$0xff]  }
 0x11a   :  { %14254 = vmatprep.subr.bf16.mxu0 %v21060_v6  ;;  %v21127_v6 = vld [vmem:[#allocation2 + $0x1058] ss:$72 sps:$4 sm:$0xff]   ;;  %v21132_v7 = vld [vmem:[#allocation2 + $0x46e4] ss:$72 sps:$4 sm:$0xff]  }
 0x11c   :  { %14341 = vmatpush1.bf16.msra.mxu1 %v21061_v9  ;;  %v21130_v9 = vld [vmem:[#allocation2 + $0x46e0] ss:$72 sps:$4 sm:$0xff]  }
 0x11d   :  { %14255 = vmatpush1.bf16.msra.mxu0 %v21058_v8  ;;  %14342 = vmatprep.subr.bf16.mxu1 %v21069_v13  ;;  %v21135_v8 = vld [vmem:[#allocation2 + $0x10ec] ss:$72 sps:$4 sm:$0xff]  }
 0x11e   :  { %14256 = vmatprep.subr.bf16.mxu0 %v21066_v12  ;;  %v21133_v12 = vld [vmem:[#allocation2 + $0x10e8] ss:$72 sps:$4 sm:$0xff]   ;;  %v21138_v13 = vld [vmem:[#allocation2 + $0x4774] ss:$72 sps:$4 sm:$0xff]  }
 0x120   :  { %14343 = vmatpush1.bf16.msra.mxu1 %v21067_v15  ;;  %v21136_v15 = vld [vmem:[#allocation2 + $0x4770] ss:$72 sps:$4 sm:$0xff]  }
 0x121   :  { %14257 = vmatpush1.bf16.msra.mxu0 %v21064_v14  ;;  %14344 = vmatprep.subr.bf16.mxu1 %v21075_v17  ;;  %v21141_v14 = vld [vmem:[#allocation2 + $0x117c] ss:$72 sps:$4 sm:$0xff]   ;;  %v21144_v17 = vld [vmem:[#allocation2 + $0x120c] ss:$72 sps:$4 sm:$0xff]  }
 0x122   :  { %14258 = vmatprep.subr.bf16.mxu0 %v21072_v16  ;;  %v21139_v16 = vld [vmem:[#allocation2 + $0x1178] ss:$72 sps:$4 sm:$0xff]  }
 0x124   :  { %14345 = vmatpush1.bf16.msra.mxu1 %v21073_v19  ;;  %v24395_v19 = vcombine.low %v24378_v1, %v24383_v2  ;;  %v21156_v1 = vld [vmem:[#allocation2 + $0x132c] ss:$72 sps:$4 sm:$0xff]  }
 0x125   :  { %14259 = vmatpush1.bf16.msra.mxu0 %v21070_v18  ;;  %14346 = vmatprep.subr.bf16.mxu1 %v21081_v21  ;;  %v21147_v18 = vld [vmem:[#allocation2 + $0x14] ss:$72 sps:$4 sm:$0xff]   ;;  %v21145_v21 = vld [vmem:[#allocation2 + $0x10] ss:$72 sps:$4 sm:$0xff]  }
 0x126   :  { %14260 = vmatprep.subr.bf16.mxu0 %v21078_v20  ;;  %v21142_v20 = vld [vmem:[#allocation2 + $0x1208] ss:$72 sps:$4 sm:$0xff]   ;;  %v21159_v2 = vld [vmem:[#allocation2 + $0x134] ss:$72 sps:$4 sm:$0xff]  }
 0x128   :  { %14347 = vmatpush1.bf16.msra.mxu1 %v21079_v25  ;;  %v21153_v25 = vld [vmem:[#allocation2 + $0xa4] ss:$72 sps:$4 sm:$0xff]  }
 0x129   :  { %14261 = vmatpush1.bf16.msra.mxu0 %v21076_v24  ;;  %14348 = vmatprep.subr.bf16.mxu1 %v21087_v27  ;;  %v21150_v24 = vld [vmem:[#allocation2 + $0x129c] ss:$72 sps:$4 sm:$0xff]   ;;  %v21151_v27 = vld [vmem:[#allocation2 + $0xa0] ss:$72 sps:$4 sm:$0xff]  }
 0x12a   :  { %14262 = vmatprep.subr.bf16.mxu0 %v21084_v26  ;;  %v21148_v26 = vld [vmem:[#allocation2 + $0x1298] ss:$72 sps:$4 sm:$0xff]  }
 0x12c   :  { %14349 = vmatpush1.bf16.msra.mxu1 %v21085_v35  ;;  %v21157_v35 = vld [vmem:[#allocation2 + $0x130] ss:$72 sps:$4 sm:$0xff]  }
 0x12d   :  { %14263 = vmatpush1.bf16.msra.mxu0 %v21082_v32  ;;  %14350 = vmatprep.subr.bf16.mxu1 %v21093_v37  ;;  %v21154_v32 = vld [vmem:[#allocation2 + $0x1328] ss:$72 sps:$4 sm:$0xff]   ;;  %v21165_v37 = vld [vmem:[#allocation2 + $0x1c4] ss:$72 sps:$4 sm:$0xff]  }
 0x12e   :  { %14264 = vmatprep.subr.bf16.mxu0 %v21090_v36  ;;  %v21162_v36 = vld [vmem:[#allocation2 + $0x13bc] ss:$72 sps:$4 sm:$0xff]  }
 0x130   :  { %14351 = vmatpush1.bf16.msra.mxu1 %v21091_v39  ;;  %v21163_v39 = vld [vmem:[#allocation2 + $0x1c0] ss:$72 sps:$4 sm:$0xff]  }
 0x131   :  { %14265 = vmatpush1.bf16.msra.mxu0 %v21088_v38  ;;  %14352 = vmatprep.subr.bf16.mxu1 %v21099_v42  ;;  %v21160_v38 = vld [vmem:[#allocation2 + $0x13b8] ss:$72 sps:$4 sm:$0xff]   ;;  %v21171_v42 = vld [vmem:[#allocation2 + $0x254] ss:$72 sps:$4 sm:$0xff]  }
 0x132   :  { %14266 = vmatprep.subr.bf16.mxu0 %v21096_v41  ;;  %v21168_v41 = vld [vmem:[#allocation2 + $0x144c] ss:$72 sps:$4 sm:$0xff]  }
 0x134   :  { %14353 = vmatpush1.bf16.msra.mxu1 %v21097_v49  ;;  %v21169_v49 = vld [vmem:[#allocation2 + $0x250] ss:$72 sps:$4 sm:$0xff]  }
 0x135   :  { %14267 = vmatpush1.bf16.msra.mxu0 %v21094_v48  ;;  %14354 = vmatprep.subr.bf16.mxu1 %v21105_v51  ;;  %v21166_v48 = vld [vmem:[#allocation2 + $0x1448] ss:$72 sps:$4 sm:$0xff]   ;;  %v21177_v51 = vld [vmem:[#allocation2 + $0x2e4] ss:$72 sps:$4 sm:$0xff]  }
 0x136   :  { %14268 = vmatprep.subr.bf16.mxu0 %v21102_v50  ;;  %v21174_v50 = vld [vmem:[#allocation2 + $0x14dc] ss:$72 sps:$4 sm:$0xff]  }
 0x138   :  { %14355 = vmatpush1.bf16.msra.mxu1 %v21103_v30  ;;  %v21175_v30 = vld [vmem:[#allocation2 + $0x2e0] ss:$72 sps:$4 sm:$0xff]  }
 0x139   :  { %14269 = vmatpush1.bf16.msra.mxu0 %v21100_v29  ;;  %14356 = vmatprep.subr.bf16.mxu1 %v21111_v53  ;;  %v21172_v29 = vld [vmem:[#allocation2 + $0x14d8] ss:$72 sps:$4 sm:$0xff]   ;;  %v21183_v53 = vld [vmem:[#allocation2 + $0x374] ss:$72 sps:$4 sm:$0xff]  }
 0x13a   :  { %14270 = vmatprep.subr.bf16.mxu0 %v21108_v31  ;;  %v21180_v31 = vld [vmem:[#allocation2 + $0x156c] ss:$72 sps:$4 sm:$0xff]  }
 0x13c   :  { %14357 = vmatpush1.bf16.msra.mxu1 %v21109_v56  ;;  %v21181_v56 = vld [vmem:[#allocation2 + $0x370] ss:$72 sps:$4 sm:$0xff]  }
 0x13d   :  { %14271 = vmatpush1.bf16.msra.mxu0 %v21106_v54  ;;  %14358 = vmatprep.subr.bf16.mxu1 %v21117_v58  ;;  %v21178_v54 = vld [vmem:[#allocation2 + $0x1568] ss:$72 sps:$4 sm:$0xff]   ;;  %v21189_v58 = vld [vmem:[#allocation2 + $0x404] ss:$72 sps:$4 sm:$0xff]  }
 0x13e   :  { %14272 = vmatprep.subr.bf16.mxu0 %v21114_v57  ;;  %v21186_v57 = vld [vmem:[#allocation2 + $0x15fc] ss:$72 sps:$4 sm:$0xff]  }
 0x140   :  { %14359 = vmatpush1.bf16.msra.mxu1 %v21115_v60  ;;  %v21187_v60 = vld [vmem:[#allocation2 + $0x400] ss:$72 sps:$4 sm:$0xff]  }
 0x141   :  { %14273 = vmatpush1.bf16.msra.mxu0 %v21112_v59  ;;  %14360 = vmatprep.subr.bf16.mxu1 %v21123_v62  ;;  %v21184_v59 = vld [vmem:[#allocation2 + $0x15f8] ss:$72 sps:$4 sm:$0xff]   ;;  %v21195_v62 = vld [vmem:[#allocation2 + $0x494] ss:$72 sps:$4 sm:$0xff]  }
 0x142   :  { %14274 = vmatprep.subr.bf16.mxu0 %v21120_v61  ;;  %v21192_v61 = vld [vmem:[#allocation2 + $0x168c] ss:$72 sps:$4 sm:$0xff]  }
 0x144   :  { %14361 = vmatpush1.bf16.msra.mxu1 %v21121_v3  ;;  %v21193_v3 = vld [vmem:[#allocation2 + $0x490] ss:$72 sps:$4 sm:$0xff]  }
 0x145   :  { %14275 = vmatpush1.bf16.msra.mxu0 %v21118_v63  ;;  %14362 = vmatprep.subr.bf16.mxu1 %v21129_v47  ;;  %v21190_v63 = vld [vmem:[#allocation2 + $0x1688] ss:$72 sps:$4 sm:$0xff]   ;;  %v21201_v47 = vld [vmem:[#allocation2 + $0x524] ss:$72 sps:$4 sm:$0xff]  }
 0x146   :  { %14276 = vmatprep.subr.bf16.mxu0 %v21126_v4  ;;  %v21198_v4 = vld [vmem:[#allocation2 + $0x171c] ss:$72 sps:$4 sm:$0xff]  }
 0x148   :  { %14363 = vmatpush1.bf16.msra.mxu1 %v21127_v6  ;;  %v21199_v6 = vld [vmem:[#allocation2 + $0x520] ss:$72 sps:$4 sm:$0xff]  }
 0x149   :  { %14277 = vmatpush1.bf16.msra.mxu0 %v21124_v5  ;;  %14364 = vmatprep.subr.bf16.mxu1 %v21135_v8  ;;  %v21196_v5 = vld [vmem:[#allocation2 + $0x1718] ss:$72 sps:$4 sm:$0xff]   ;;  %v21207_v8 = vld [vmem:[#allocation2 + $0x5b4] ss:$72 sps:$4 sm:$0xff]  }
 0x14a   :  { %14278 = vmatprep.subr.bf16.mxu0 %v21132_v7  ;;  %v21204_v7 = vld [vmem:[#allocation2 + $0x17ac] ss:$72 sps:$4 sm:$0xff]  }
 0x14c   :  { %14365 = vmatpush1.bf16.msra.mxu1 %v21133_v12  ;;  %v21205_v12 = vld [vmem:[#allocation2 + $0x5b0] ss:$72 sps:$4 sm:$0xff]  }
 0x14d   :  { %14279 = vmatpush1.bf16.msra.mxu0 %v21130_v9  ;;  %14366 = vmatprep.subr.bf16.mxu1 %v21141_v14  ;;  %v21202_v9 = vld [vmem:[#allocation2 + $0x17a8] ss:$72 sps:$4 sm:$0xff]   ;;  %v21213_v14 = vld [vmem:[#allocation2 + $0x644] ss:$72 sps:$4 sm:$0xff]  }
 0x14e   :  { %14280 = vmatprep.subr.bf16.mxu0 %v21138_v13  ;;  %v21210_v13 = vld [vmem:[#allocation2 + $0x183c] ss:$72 sps:$4 sm:$0xff]  }
 0x150   :  { %14367 = vmatpush1.bf16.msra.mxu1 %v21139_v16  ;;  %v21211_v16 = vld [vmem:[#allocation2 + $0x640] ss:$72 sps:$4 sm:$0xff]  }
 0x151   :  { %14281 = vmatpush1.bf16.msra.mxu0 %v21136_v15  ;;  %14379 = vmatprep.subr.bf16.mxu1 %v21144_v17  ;;  %v21208_v15 = vld [vmem:[#allocation2 + $0x1838] ss:$72 sps:$4 sm:$0xff]   ;;  %v21216_v17 = vld [vmem:[#allocation2 + $0x18cc] ss:$72 sps:$4 sm:$0xff]  }
 0x152   :  { %14637 = vmatprep.subr.bf16.mxu0 %v21147_v18  ;;  %v21219_v18 = vld [vmem:[#allocation2 + $0x6d4] ss:$72 sps:$4 sm:$0xff]  }
 0x153   :  { %14369 = vmatmul.mubr.bf16.vlgmr.msra.gmra.mrb[4].mxu1 %v24307_v22 }
 0x154   :  { %14283 = vmatmul.mubr.bf16.vlgmr.msra.gmra.mrb[0].mxu0 %v24395_v19  ;;  %14380 = vmatpush1.bf16.msra.mxu1 %v21142_v20  ;;  %v21214_v20 = vld [vmem:[#allocation2 + $0x18c8] ss:$72 sps:$4 sm:$0xff]  }
 0x155   :  { %14638 = vmatpush1.bf16.msra.mxu0 %v21145_v21  ;;  %14381 = vmatprep.subr.bf16.mxu1 %v21150_v24  ;;  %v21217_v21 = vld [vmem:[#allocation2 + $0x6d0] ss:$72 sps:$4 sm:$0xff]   ;;  %v21222_v24 = vld [vmem:[#allocation2 + $0x195c] ss:$72 sps:$4 sm:$0xff]  }
 0x156   :  { %14639 = vmatprep.subr.bf16.mxu0 %v21153_v25  ;;  %14411 = vmatprep.mubr.bf16.mxu1 %v24337_v33  ;;  %v21225_v25 = vld [vmem:[#allocation2 + $0x764] ss:$72 sps:$4 sm:$0xff]  }
 0x157   :  { %14669 = vmatprep.mubr.bf16.mxu0 %v24257_v52 }
 0x158   :  { %14382 = vmatpush1.bf16.msra.mxu1 %v21148_v26  ;;  %v21220_v26 = vld [vmem:[#allocation2 + $0x1958] ss:$72 sps:$4 sm:$0xff]  }
 0x159   :  { %14640 = vmatpush1.bf16.msra.mxu0 %v21151_v27  ;;  %14383 = vmatprep.subr.bf16.mxu1 %v21156_v1  ;;  %v21223_v27 = vld [vmem:[#allocation2 + $0x760] ss:$72 sps:$4 sm:$0xff]   ;;  %v21228_v1 = vld [vmem:[#allocation2 + $0x19ec] ss:$72 sps:$4 sm:$0xff]  }
 0x15a   :  { %14641 = vmatprep.subr.bf16.mxu0 %v21159_v2  ;;  %v21231_v2 = vld [vmem:[#allocation2 + $0x7f4] ss:$72 sps:$4 sm:$0xff]  }
 0x15c   :  { %14384 = vmatpush1.bf16.msra.mxu1 %v21154_v32  ;;  %v21226_v32 = vld [vmem:[#allocation2 + $0x19e8] ss:$72 sps:$4 sm:$0xff]  }
 0x15d   :  { %14642 = vmatpush1.bf16.msra.mxu0 %v21157_v35  ;;  %14385 = vmatprep.subr.bf16.mxu1 %v21162_v36  ;;  %v21229_v35 = vld [vmem:[#allocation2 + $0x7f0] ss:$72 sps:$4 sm:$0xff]   ;;  %v21234_v36 = vld [vmem:[#allocation2 + $0x1a7c] ss:$72 sps:$4 sm:$0xff]  }
 0x15e   :  { %14643 = vmatprep.subr.bf16.mxu0 %v21165_v37  ;;  %v21237_v37 = vld [vmem:[#allocation2 + $0x884] ss:$72 sps:$4 sm:$0xff]  }
 0x160   :  { %14386 = vmatpush1.bf16.msra.mxu1 %v21160_v38  ;;  %v21232_v38 = vld [vmem:[#allocation2 + $0x1a78] ss:$72 sps:$4 sm:$0xff]  }
 0x161   :  { %14644 = vmatpush1.bf16.msra.mxu0 %v21163_v39  ;;  %14387 = vmatprep.subr.bf16.mxu1 %v21168_v41  ;;  %v21235_v39 = vld [vmem:[#allocation2 + $0x880] ss:$72 sps:$4 sm:$0xff]   ;;  %v21240_v41 = vld [vmem:[#allocation2 + $0x1b0c] ss:$72 sps:$4 sm:$0xff]  }
 0x162   :  { %14645 = vmatprep.subr.bf16.mxu0 %v21171_v42  ;;  %v21243_v42 = vld [vmem:[#allocation2 + $0x914] ss:$72 sps:$4 sm:$0xff]  }
 0x164   :  { %14388 = vmatpush1.bf16.msra.mxu1 %v21166_v48  ;;  %v21238_v48 = vld [vmem:[#allocation2 + $0x1b08] ss:$72 sps:$4 sm:$0xff]  }
 0x165   :  { %14646 = vmatpush1.bf16.msra.mxu0 %v21169_v49  ;;  %14389 = vmatprep.subr.bf16.mxu1 %v21174_v50  ;;  %v21241_v49 = vld [vmem:[#allocation2 + $0x910] ss:$72 sps:$4 sm:$0xff]   ;;  %v21246_v50 = vld [vmem:[#allocation2 + $0x1b9c] ss:$72 sps:$4 sm:$0xff]  }
 0x166   :  { %14647 = vmatprep.subr.bf16.mxu0 %v21177_v51  ;;  %v21249_v51 = vld [vmem:[#allocation2 + $0x9a4] ss:$72 sps:$4 sm:$0xff]  }
 0x168   :  { %14390 = vmatpush1.bf16.msra.mxu1 %v21172_v29  ;;  %v21244_v29 = vld [vmem:[#allocation2 + $0x1b98] ss:$72 sps:$4 sm:$0xff]  }
 0x169   :  { %14648 = vmatpush1.bf16.msra.mxu0 %v21175_v30  ;;  %14391 = vmatprep.subr.bf16.mxu1 %v21180_v31  ;;  %v21247_v30 = vld [vmem:[#allocation2 + $0x9a0] ss:$72 sps:$4 sm:$0xff]   ;;  %v21252_v31 = vld [vmem:[#allocation2 + $0x1c2c] ss:$72 sps:$4 sm:$0xff]  }
 0x16a   :  { %14649 = vmatprep.subr.bf16.mxu0 %v21183_v53  ;;  %v21255_v53 = vld [vmem:[#allocation2 + $0xa34] ss:$72 sps:$4 sm:$0xff]  }
 0x16c   :  { %14392 = vmatpush1.bf16.msra.mxu1 %v21178_v54  ;;  %v21250_v54 = vld [vmem:[#allocation2 + $0x1c28] ss:$72 sps:$4 sm:$0xff]  }
 0x16d   :  { %14650 = vmatpush1.bf16.msra.mxu0 %v21181_v56  ;;  %14393 = vmatprep.subr.bf16.mxu1 %v21186_v57  ;;  %v21253_v56 = vld [vmem:[#allocation2 + $0xa30] ss:$72 sps:$4 sm:$0xff]   ;;  %v21258_v57 = vld [vmem:[#allocation2 + $0x1cbc] ss:$72 sps:$4 sm:$0xff]  }
 0x16e   :  { %14651 = vmatprep.subr.bf16.mxu0 %v21189_v58  ;;  %v21261_v58 = vld [vmem:[#allocation2 + $0xac4] ss:$72 sps:$4 sm:$0xff]  }
 0x170   :  { %14394 = vmatpush1.bf16.msra.mxu1 %v21184_v59  ;;  %v21256_v59 = vld [vmem:[#allocation2 + $0x1cb8] ss:$72 sps:$4 sm:$0xff]  }
 0x171   :  { %14652 = vmatpush1.bf16.msra.mxu0 %v21187_v60  ;;  %14395 = vmatprep.subr.bf16.mxu1 %v21192_v61  ;;  %v21259_v60 = vld [vmem:[#allocation2 + $0xac0] ss:$72 sps:$4 sm:$0xff]   ;;  %v21264_v61 = vld [vmem:[#allocation2 + $0x1d4c] ss:$72 sps:$4 sm:$0xff]  }
 0x172   :  { %14653 = vmatprep.subr.bf16.mxu0 %v21195_v62  ;;  %v21267_v62 = vld [vmem:[#allocation2 + $0xb54] ss:$72 sps:$4 sm:$0xff]  }
 0x174   :  { %14396 = vmatpush1.bf16.msra.mxu1 %v21190_v63  ;;  %v21262_v63 = vld [vmem:[#allocation2 + $0x1d48] ss:$72 sps:$4 sm:$0xff]  }
 0x175   :  { %14654 = vmatpush1.bf16.msra.mxu0 %v21193_v3  ;;  %14397 = vmatprep.subr.bf16.mxu1 %v21198_v4  ;;  %v21265_v3 = vld [vmem:[#allocation2 + $0xb50] ss:$72 sps:$4 sm:$0xff]   ;;  %v21270_v4 = vld [vmem:[#allocation2 + $0x1ddc] ss:$72 sps:$4 sm:$0xff]  }
 0x176   :  { %14655 = vmatprep.subr.bf16.mxu0 %v21201_v47  ;;  %v21273_v47 = vld [vmem:[#allocation2 + $0xbe4] ss:$72 sps:$4 sm:$0xff]  }
 0x178   :  { %14398 = vmatpush1.bf16.msra.mxu1 %v21196_v5  ;;  %v21268_v5 = vld [vmem:[#allocation2 + $0x1dd8] ss:$72 sps:$4 sm:$0xff]  }
 0x179   :  { %14656 = vmatpush1.bf16.msra.mxu0 %v21199_v6  ;;  %14399 = vmatprep.subr.bf16.mxu1 %v21204_v7  ;;  %v21271_v6 = vld [vmem:[#allocation2 + $0xbe0] ss:$72 sps:$4 sm:$0xff]   ;;  %v21276_v7 = vld [vmem:[#allocation2 + $0x1e6c] ss:$72 sps:$4 sm:$0xff]  }
 0x17a   :  { %14657 = vmatprep.subr.bf16.mxu0 %v21207_v8  ;;  %v21279_v8 = vld [vmem:[#allocation2 + $0xc74] ss:$72 sps:$4 sm:$0xff]  }
 0x17c   :  { %14400 = vmatpush1.bf16.msra.mxu1 %v21202_v9 }
 0x17d   :  { %14658 = vmatpush1.bf16.msra.mxu0 %v21205_v12  ;;  %14401 = vmatprep.subr.bf16.mxu1 %v21210_v13  ;;  %v21274_v12 = vld [vmem:[#allocation2 + $0x1e68] ss:$72 sps:$4 sm:$0xff]  }
 0x17e   :  { %14659 = vmatprep.subr.bf16.mxu0 %v21213_v14  ;;  %v21277_v13 = vld [vmem:[#allocation2 + $0xc70] ss:$72 sps:$4 sm:$0xff]  }
 0x180   :  { %14402 = vmatpush1.bf16.msra.mxu1 %v21208_v15 }
 0x181   :  { %14660 = vmatpush1.bf16.msra.mxu0 %v21211_v16  ;;  %14403 = vmatprep.subr.bf16.mxu1 %v21216_v17  ;;  %v21282_v17 = vld [vmem:[#allocation2 + $0x1efc] ss:$72 sps:$4 sm:$0xff]  }
 0x182   :  { %14661 = vmatprep.subr.bf16.mxu0 %v21219_v18  ;;  %v21285_v18 = vld [vmem:[#allocation2 + $0xd04] ss:$72 sps:$4 sm:$0xff]  }
 0x184   :  { %14404 = vmatpush1.bf16.msra.mxu1 %v21214_v20  ;;  %v21280_v20 = vld [vmem:[#allocation2 + $0x1ef8] ss:$72 sps:$4 sm:$0xff]  }
 0x185   :  { %14662 = vmatpush1.bf16.msra.mxu0 %v21217_v21  ;;  %14405 = vmatprep.subr.bf16.mxu1 %v21222_v24  ;;  %v21283_v21 = vld [vmem:[#allocation2 + $0xd00] ss:$72 sps:$4 sm:$0xff]   ;;  %v21288_v24 = vld [vmem:[#allocation2 + $0x1f8c] ss:$72 sps:$4 sm:$0xff]  }
 0x186   :  { %14663 = vmatprep.subr.bf16.mxu0 %v21225_v25  ;;  %v21291_v25 = vld [vmem:[#allocation2 + $0xd94] ss:$72 sps:$4 sm:$0xff]  }
 0x188   :  { %14406 = vmatpush1.bf16.msra.mxu1 %v21220_v26  ;;  %v21286_v26 = vld [vmem:[#allocation2 + $0x1f88] ss:$72 sps:$4 sm:$0xff]  }
 0x189   :  { %14664 = vmatpush1.bf16.msra.mxu0 %v21223_v27  ;;  %14407 = vmatprep.subr.bf16.mxu1 %v21228_v1  ;;  %v21289_v27 = vld [vmem:[#allocation2 + $0xd90] ss:$72 sps:$4 sm:$0xff]   ;;  %v21294_v1 = vld [vmem:[#allocation2 + $0x201c] ss:$72 sps:$4 sm:$0xff]  }
 0x18a   :  { %14665 = vmatprep.subr.bf16.mxu0 %v21231_v2  ;;  %v21297_v2 = vld [vmem:[#allocation2 + $0xe24] ss:$72 sps:$4 sm:$0xff]  }
 0x18c   :  { %14408 = vmatpush1.bf16.msra.mxu1 %v21226_v32  ;;  %v21292_v32 = vld [vmem:[#allocation2 + $0x2018] ss:$72 sps:$4 sm:$0xff]  }
 0x18d   :  { %14666 = vmatpush1.bf16.msra.mxu0 %v21229_v35  ;;  %14409 = vmatprep.subr.bf16.mxu1 %v21234_v36  ;;  %v21295_v35 = vld [vmem:[#allocation2 + $0xe20] ss:$72 sps:$4 sm:$0xff]   ;;  %v21300_v36 = vld [vmem:[#allocation2 + $0x20ac] ss:$72 sps:$4 sm:$0xff]  }
 0x18e   :  { %14667 = vmatprep.subr.bf16.mxu0 %v21237_v37  ;;  %v21303_v37 = vld [vmem:[#allocation2 + $0xeb4] ss:$72 sps:$4 sm:$0xff]  }
 0x190   :  { %14410 = vmatpush1.bf16.msra.mxu1 %v21232_v38  ;;  %v21298_v38 = vld [vmem:[#allocation2 + $0x20a8] ss:$72 sps:$4 sm:$0xff]  }
 0x191   :  { %14668 = vmatpush1.bf16.msra.mxu0 %v21235_v39  ;;  %14422 = vmatprep.subr.bf16.mxu1 %v21240_v41  ;;  %v21301_v39 = vld [vmem:[#allocation2 + $0xeb0] ss:$72 sps:$4 sm:$0xff]   ;;  %v21306_v41 = vld [vmem:[#allocation2 + $0x213c] ss:$72 sps:$4 sm:$0xff]  }
 0x192   :  { %14680 = vmatprep.subr.bf16.mxu0 %v21243_v42  ;;  %v21309_v42 = vld [vmem:[#allocation2 + $0xf44] ss:$72 sps:$4 sm:$0xff]  }
 0x193   :  { %14412 = vmatmul.mubr.bf16.vlgmr.msra.gmra.mrb[4].mxu1 %v24352_v45 }
 0x194   :  { %14670 = vmatmul.mubr.bf16.vlgmr.msra.gmra.mrb[4].mxu0 %v24269_v10  ;;  %14423 = vmatpush1.bf16.msra.mxu1 %v21238_v48  ;;  %v21304_v48 = vld [vmem:[#allocation2 + $0x2138] ss:$72 sps:$4 sm:$0xff]  }
 0x195   :  { %14681 = vmatpush1.bf16.msra.mxu0 %v21241_v49  ;;  %14424 = vmatprep.subr.bf16.mxu1 %v21246_v50  ;;  %v21307_v49 = vld [vmem:[#allocation2 + $0xf40] ss:$72 sps:$4 sm:$0xff]   ;;  %v21312_v50 = vld [vmem:[#allocation2 + $0x21cc] ss:$72 sps:$4 sm:$0xff]  }
 0x196   :  { %14682 = vmatprep.subr.bf16.mxu0 %v21249_v51  ;;  %14454 = vmatprep.mubr.bf16.mxu1 %v24266_v55  ;;  %v21315_v51 = vld [vmem:[#allocation2 + $0xfd4] ss:$72 sps:$4 sm:$0xff]  }
 0x197   :  { %14712 = vmatprep.mubr.bf16.mxu0 %v24287_v40 }
 0x198   :  { %14425 = vmatpush1.bf16.msra.mxu1 %v21244_v29  ;;  %v21310_v29 = vld [vmem:[#allocation2 + $0x21c8] ss:$72 sps:$4 sm:$0xff]  }
 0x199   :  { %14683 = vmatpush1.bf16.msra.mxu0 %v21247_v30  ;;  %14426 = vmatprep.subr.bf16.mxu1 %v21252_v31  ;;  %v21313_v30 = vld [vmem:[#allocation2 + $0xfd0] ss:$72 sps:$4 sm:$0xff]   ;;  %v21318_v31 = vld [vmem:[#allocation2 + $0x225c] ss:$72 sps:$4 sm:$0xff]  }
 0x19a   :  { %14684 = vmatprep.subr.bf16.mxu0 %v21255_v53  ;;  %v21321_v53 = vld [vmem:[#allocation2 + $0x1064] ss:$72 sps:$4 sm:$0xff]  }
 0x19c   :  { %14427 = vmatpush1.bf16.msra.mxu1 %v21250_v54  ;;  %v21316_v54 = vld [vmem:[#allocation2 + $0x2258] ss:$72 sps:$4 sm:$0xff]  }
 0x19d   :  { %14685 = vmatpush1.bf16.msra.mxu0 %v21253_v56  ;;  %14428 = vmatprep.subr.bf16.mxu1 %v21258_v57  ;;  %v21319_v56 = vld [vmem:[#allocation2 + $0x1060] ss:$72 sps:$4 sm:$0xff]   ;;  %v21324_v57 = vld [vmem:[#allocation2 + $0x22ec] ss:$72 sps:$4 sm:$0xff]  }
 0x19e   :  { %14686 = vmatprep.subr.bf16.mxu0 %v21261_v58  ;;  %v21327_v58 = vld [vmem:[#allocation2 + $0x10f4] ss:$72 sps:$4 sm:$0xff]  }
 0x1a0   :  { %14429 = vmatpush1.bf16.msra.mxu1 %v21256_v59  ;;  %v21322_v59 = vld [vmem:[#allocation2 + $0x22e8] ss:$72 sps:$4 sm:$0xff]  }
 0x1a1   :  { %14687 = vmatpush1.bf16.msra.mxu0 %v21259_v60  ;;  %14430 = vmatprep.subr.bf16.mxu1 %v21264_v61  ;;  %v21325_v60 = vld [vmem:[#allocation2 + $0x10f0] ss:$72 sps:$4 sm:$0xff]   ;;  %v21330_v61 = vld [vmem:[#allocation2 + $0x237c] ss:$72 sps:$4 sm:$0xff]  }
 0x1a2   :  { %14688 = vmatprep.subr.bf16.mxu0 %v21267_v62  ;;  %v21333_v62 = vld [vmem:[#allocation2 + $0x1184] ss:$72 sps:$4 sm:$0xff]  }
 0x1a4   :  { %14431 = vmatpush1.bf16.msra.mxu1 %v21262_v63  ;;  %v21328_v63 = vld [vmem:[#allocation2 + $0x2378] ss:$72 sps:$4 sm:$0xff]  }
 0x1a5   :  { %14689 = vmatpush1.bf16.msra.mxu0 %v21265_v3  ;;  %14432 = vmatprep.subr.bf16.mxu1 %v21270_v4  ;;  %v21331_v3 = vld [vmem:[#allocation2 + $0x1180] ss:$72 sps:$4 sm:$0xff]   ;;  %v21336_v4 = vld [vmem:[#allocation2 + $0x240c] ss:$72 sps:$4 sm:$0xff]  }
 0x1a6   :  { %14690 = vmatprep.subr.bf16.mxu0 %v21273_v47  ;;  %v24405_v9 = vpop.f32.mrb[0].mxu1  ;;  %v21339_v47 = vld [vmem:[#allocation2 + $0x1214] ss:$72 sps:$4 sm:$0xff]  }
 0x1a7   :  { %v24407_v14 = vpop.f32.mrb[1].mxu1 }
 0x1a8   :  { %v24409_v15 = vpop.f32.mrb[2].mxu1  ;;  %14433 = vmatpush1.bf16.msra.mxu1 %v21268_v5  ;;  %v21334_v5 = vld [vmem:[#allocation2 + $0x2408] ss:$72 sps:$4 sm:$0xff]  }
 0x1a9   :  { %14691 = vmatpush1.bf16.msra.mxu0 %v21271_v6  ;;  %v24411_v16 = vpop.f32.mrb[3].mxu1  ;;  %14434 = vmatprep.subr.bf16.mxu1 %v21276_v7  ;;  %v21337_v6 = vld [vmem:[#allocation2 + $0x1210] ss:$72 sps:$4 sm:$0xff]   ;;  %v21342_v7 = vld [vmem:[#allocation2 + $0x249c] ss:$72 sps:$4 sm:$0xff]  }
 0x1aa   :  { %14692 = vmatprep.subr.bf16.mxu0 %v21279_v8  ;;  %v21345_v8 = vld [vmem:[#allocation2 + $0x12a4] ss:$72 sps:$4 sm:$0xff]  }
 0x1ac   :  { %14435 = vmatpush1.bf16.msra.mxu1 %v21274_v12  ;;  %v21340_v12 = vld [vmem:[#allocation2 + $0x2498] ss:$72 sps:$4 sm:$0xff]  }
 0x1ad   :  { %14693 = vmatpush1.bf16.msra.mxu0 %v21277_v13  ;;  %14436 = vmatprep.subr.bf16.mxu1 %v21282_v17  ;;  %v21343_v13 = vld [vmem:[#allocation2 + $0x12a0] ss:$72 sps:$4 sm:$0xff]   ;;  %v21348_v17 = vld [vmem:[#allocation2 + $0x252c] ss:$72 sps:$4 sm:$0xff]  }
 0x1ae   :  { %14694 = vmatprep.subr.bf16.mxu0 %v21285_v18  ;;  %v21351_v18 = vld [vmem:[#allocation2 + $0x1334] ss:$72 sps:$4 sm:$0xff]  }
 0x1b0   :  { %14437 = vmatpush1.bf16.msra.mxu1 %v21280_v20  ;;  %v21346_v20 = vld [vmem:[#allocation2 + $0x2528] ss:$72 sps:$4 sm:$0xff]  }
 0x1b1   :  { %14695 = vmatpush1.bf16.msra.mxu0 %v21283_v21  ;;  %14438 = vmatprep.subr.bf16.mxu1 %v21288_v24  ;;  %v21349_v21 = vld [vmem:[#allocation2 + $0x1330] ss:$72 sps:$4 sm:$0xff]   ;;  %v21354_v24 = vld [vmem:[#allocation2 + $0x25bc] ss:$72 sps:$4 sm:$0xff]  }
 0x1b2   :  { %14696 = vmatprep.subr.bf16.mxu0 %v21291_v25  ;;  %v21357_v25 = vld [vmem:[#allocation2 + $0x13c4] ss:$72 sps:$4 sm:$0xff]  }
 0x1b4   :  { %14439 = vmatpush1.bf16.msra.mxu1 %v21286_v26  ;;  %v21352_v26 = vld [vmem:[#allocation2 + $0x25b8] ss:$72 sps:$4 sm:$0xff]  }
 0x1b5   :  { %14697 = vmatpush1.bf16.msra.mxu0 %v21289_v27  ;;  %14440 = vmatprep.subr.bf16.mxu1 %v21294_v1  ;;  %v21355_v27 = vld [vmem:[#allocation2 + $0x13c0] ss:$72 sps:$4 sm:$0xff]   ;;  %v21360_v1 = vld [vmem:[#allocation2 + $0x264c] ss:$72 sps:$4 sm:$0xff]  }
 0x1b6   :  { %14698 = vmatprep.subr.bf16.mxu0 %v21297_v2  ;;  %v21363_v2 = vld [vmem:[#allocation2 + $0x1454] ss:$72 sps:$4 sm:$0xff]  }
 0x1b8   :  { %14441 = vmatpush1.bf16.msra.mxu1 %v21292_v32  ;;  %v21358_v32 = vld [vmem:[#allocation2 + $0x2648] ss:$72 sps:$4 sm:$0xff]  }
 0x1b9   :  { %14699 = vmatpush1.bf16.msra.mxu0 %v21295_v35  ;;  %14442 = vmatprep.subr.bf16.mxu1 %v21300_v36  ;;  %v21361_v35 = vld [vmem:[#allocation2 + $0x1450] ss:$72 sps:$4 sm:$0xff]   ;;  %v21366_v36 = vld [vmem:[#allocation2 + $0x26dc] ss:$72 sps:$4 sm:$0xff]  }
 0x1ba   :  { %14700 = vmatprep.subr.bf16.mxu0 %v21303_v37  ;;  %v21369_v37 = vld [vmem:[#allocation2 + $0x14e4] ss:$72 sps:$4 sm:$0xff]  }
 0x1bc   :  { %14443 = vmatpush1.bf16.msra.mxu1 %v21298_v38  ;;  %v21364_v38 = vld [vmem:[#allocation2 + $0x26d8] ss:$72 sps:$4 sm:$0xff]  }
 0x1bd   :  { %14701 = vmatpush1.bf16.msra.mxu0 %v21301_v39  ;;  %14444 = vmatprep.subr.bf16.mxu1 %v21306_v41  ;;  %v21367_v39 = vld [vmem:[#allocation2 + $0x14e0] ss:$72 sps:$4 sm:$0xff]   ;;  %v21372_v41 = vld [vmem:[#allocation2 + $0x276c] ss:$72 sps:$4 sm:$0xff]  }
 0x1be   :  { %14702 = vmatprep.subr.bf16.mxu0 %v21309_v42  ;;  %v21375_v42 = vld [vmem:[#allocation2 + $0x1574] ss:$72 sps:$4 sm:$0xff]  }
 0x1c0   :  { %14445 = vmatpush1.bf16.msra.mxu1 %v21304_v48  ;;  %v21370_v48 = vld [vmem:[#allocation2 + $0x2768] ss:$72 sps:$4 sm:$0xff]  }
 0x1c1   :  { %14703 = vmatpush1.bf16.msra.mxu0 %v21307_v49  ;;  %14446 = vmatprep.subr.bf16.mxu1 %v21312_v50  ;;  %v21373_v49 = vld [vmem:[#allocation2 + $0x1570] ss:$72 sps:$4 sm:$0xff]   ;;  %v21378_v50 = vld [vmem:[#allocation2 + $0x27fc] ss:$72 sps:$4 sm:$0xff]  }
 0x1c2   :  { %14704 = vmatprep.subr.bf16.mxu0 %v21315_v51  ;;  %v21381_v51 = vld [vmem:[#allocation2 + $0x1604] ss:$72 sps:$4 sm:$0xff]  }
 0x1c4   :  { %14447 = vmatpush1.bf16.msra.mxu1 %v21310_v29  ;;  %v21376_v29 = vld [vmem:[#allocation2 + $0x27f8] ss:$72 sps:$4 sm:$0xff]  }
 0x1c5   :  { %14705 = vmatpush1.bf16.msra.mxu0 %v21313_v30  ;;  %14448 = vmatprep.subr.bf16.mxu1 %v21318_v31  ;;  %v21379_v30 = vld [vmem:[#allocation2 + $0x1600] ss:$72 sps:$4 sm:$0xff]   ;;  %v21384_v31 = vld [vmem:[#allocation2 + $0x288c] ss:$72 sps:$4 sm:$0xff]  }
 0x1c6   :  { %14706 = vmatprep.subr.bf16.mxu0 %v21321_v53  ;;  %v21387_v53 = vld [vmem:[#allocation2 + $0x1694] ss:$72 sps:$4 sm:$0xff]  }
 0x1c8   :  { %14449 = vmatpush1.bf16.msra.mxu1 %v21316_v54  ;;  %v21382_v54 = vld [vmem:[#allocation2 + $0x2888] ss:$72 sps:$4 sm:$0xff]  }
 0x1c9   :  { %14707 = vmatpush1.bf16.msra.mxu0 %v21319_v56  ;;  %14450 = vmatprep.subr.bf16.mxu1 %v21324_v57  ;;  %v21385_v56 = vld [vmem:[#allocation2 + $0x1690] ss:$72 sps:$4 sm:$0xff]   ;;  %v21390_v57 = vld [vmem:[#allocation2 + $0x291c] ss:$72 sps:$4 sm:$0xff]  }
 0x1ca   :  { %14708 = vmatprep.subr.bf16.mxu0 %v21327_v58  ;;  %v21393_v58 = vld [vmem:[#allocation2 + $0x1724] ss:$72 sps:$4 sm:$0xff]  }
 0x1cc   :  { %14451 = vmatpush1.bf16.msra.mxu1 %v21322_v59  ;;  %v21388_v59 = vld [vmem:[#allocation2 + $0x2918] ss:$72 sps:$4 sm:$0xff]  }
 0x1cd   :  { %14709 = vmatpush1.bf16.msra.mxu0 %v21325_v60  ;;  %14452 = vmatprep.subr.bf16.mxu1 %v21330_v61  ;;  %v21391_v60 = vld [vmem:[#allocation2 + $0x1720] ss:$72 sps:$4 sm:$0xff]   ;;  %v21396_v61 = vld [vmem:[#allocation2 + $0x29ac] ss:$72 sps:$4 sm:$0xff]  }
 0x1ce   :  { %14710 = vmatprep.subr.bf16.mxu0 %v21333_v62  ;;  %v21399_v62 = vld [vmem:[#allocation2 + $0x17b4] ss:$72 sps:$4 sm:$0xff]  }
 0x1d0   :  { %14453 = vmatpush1.bf16.msra.mxu1 %v21328_v63  ;;  %v21394_v63 = vld [vmem:[#allocation2 + $0x29a8] ss:$72 sps:$4 sm:$0xff]  }
 0x1d1   :  { %14711 = vmatpush1.bf16.msra.mxu0 %v21331_v3  ;;  %14465 = vmatprep.subr.bf16.mxu1 %v21336_v4  ;;  %v21397_v3 = vld [vmem:[#allocation2 + $0x17b0] ss:$72 sps:$4 sm:$0xff]   ;;  %v21402_v4 = vld [vmem:[#allocation2 + $0x2a3c] ss:$72 sps:$4 sm:$0xff]  }
 0x1d2   :  { %14723 = vmatprep.subr.bf16.mxu0 %v21339_v47  ;;  %v21405_v47 = vld [vmem:[#allocation2 + $0x1844] ss:$72 sps:$4 sm:$0xff]  }
 0x1d3   :  { %14455 = vmatmul.mubr.bf16.vlgmr.msra.gmra.mrb[4].mxu1 %v24271_v11 }
 0x1d4   :  { %14713 = vmatmul.mubr.bf16.vlgmr.msra.gmra.mrb[4].mxu0 %v24307_v22  ;;  %14466 = vmatpush1.bf16.msra.mxu1 %v21334_v5  ;;  %v21400_v5 = vld [vmem:[#allocation2 + $0x2a38] ss:$72 sps:$4 sm:$0xff]  }
 0x1d5   :  { %14724 = vmatpush1.bf16.msra.mxu0 %v21337_v6  ;;  %14467 = vmatprep.subr.bf16.mxu1 %v21342_v7  ;;  %v21403_v6 = vld [vmem:[#allocation2 + $0x1840] ss:$72 sps:$4 sm:$0xff]   ;;  %v21408_v7 = vld [vmem:[#allocation2 + $0x2acc] ss:$72 sps:$4 sm:$0xff]  }
 0x1d6   :  { %14725 = vmatprep.subr.bf16.mxu0 %v21345_v8  ;;  %14497 = vmatprep.mubr.bf16.mxu1 %v24302_v43  ;;  %v21411_v8 = vld [vmem:[#allocation2 + $0x18d4] ss:$72 sps:$4 sm:$0xff]  }
 0x1d7   :  { %14755 = vmatprep.mubr.bf16.mxu0 %v24337_v33 }
 0x1d8   :  { %14468 = vmatpush1.bf16.msra.mxu1 %v21340_v12  ;;  %v21406_v12 = vld [vmem:[#allocation2 + $0x2ac8] ss:$72 sps:$4 sm:$0xff]  }
 0x1d9   :  { %14726 = vmatpush1.bf16.msra.mxu0 %v21343_v13  ;;  %14469 = vmatprep.subr.bf16.mxu1 %v21348_v17  ;;  %v21409_v13 = vld [vmem:[#allocation2 + $0x18d0] ss:$72 sps:$4 sm:$0xff]   ;;  %v21414_v17 = vld [vmem:[#allocation2 + $0x2b5c] ss:$72 sps:$4 sm:$0xff]  }
 0x1da   :  { %14727 = vmatprep.subr.bf16.mxu0 %v21351_v18  ;;  %v21417_v18 = vld [vmem:[#allocation2 + $0x1964] ss:$72 sps:$4 sm:$0xff]  }
 0x1dc   :  { %14470 = vmatpush1.bf16.msra.mxu1 %v21346_v20  ;;  %v21412_v20 = vld [vmem:[#allocation2 + $0x2b58] ss:$72 sps:$4 sm:$0xff]  }
 0x1dd   :  { %14728 = vmatpush1.bf16.msra.mxu0 %v21349_v21  ;;  %14471 = vmatprep.subr.bf16.mxu1 %v21354_v24  ;;  %v21415_v21 = vld [vmem:[#allocation2 + $0x1960] ss:$72 sps:$4 sm:$0xff]   ;;  %v21420_v24 = vld [vmem:[#allocation2 + $0x2bec] ss:$72 sps:$4 sm:$0xff]  }
 0x1de   :  { %14729 = vmatprep.subr.bf16.mxu0 %v21357_v25  ;;  %v21423_v25 = vld [vmem:[#allocation2 + $0x19f4] ss:$72 sps:$4 sm:$0xff]  }
 0x1e0   :  { %14472 = vmatpush1.bf16.msra.mxu1 %v21352_v26  ;;  %v21418_v26 = vld [vmem:[#allocation2 + $0x2be8] ss:$72 sps:$4 sm:$0xff]  }
 0x1e1   :  { %14730 = vmatpush1.bf16.msra.mxu0 %v21355_v27  ;;  %14473 = vmatprep.subr.bf16.mxu1 %v21360_v1  ;;  %v21421_v27 = vld [vmem:[#allocation2 + $0x19f0] ss:$72 sps:$4 sm:$0xff]   ;;  %v21426_v1 = vld [vmem:[#allocation2 + $0x2c7c] ss:$72 sps:$4 sm:$0xff]  }
 0x1e2   :  { %14731 = vmatprep.subr.bf16.mxu0 %v21363_v2  ;;  %v21429_v2 = vld [vmem:[#allocation2 + $0x1a84] ss:$72 sps:$4 sm:$0xff]  }
 0x1e4   :  { %14474 = vmatpush1.bf16.msra.mxu1 %v21358_v32  ;;  %v21424_v32 = vld [vmem:[#allocation2 + $0x2c78] ss:$72 sps:$4 sm:$0xff]  }
 0x1e5   :  { %14732 = vmatpush1.bf16.msra.mxu0 %v21361_v35  ;;  %14475 = vmatprep.subr.bf16.mxu1 %v21366_v36  ;;  %v21427_v35 = vld [vmem:[#allocation2 + $0x1a80] ss:$72 sps:$4 sm:$0xff]   ;;  %v21432_v36 = vld [vmem:[#allocation2 + $0x2d0c] ss:$72 sps:$4 sm:$0xff]  }
 0x1e6   :  { %14733 = vmatprep.subr.bf16.mxu0 %v21369_v37  ;;  %v21435_v37 = vld [vmem:[#allocation2 + $0x1b14] ss:$72 sps:$4 sm:$0xff]  }
 0x1e8   :  { %14476 = vmatpush1.bf16.msra.mxu1 %v21364_v38  ;;  %v21430_v38 = vld [vmem:[#allocation2 + $0x2d08] ss:$72 sps:$4 sm:$0xff]  }
 0x1e9   :  { %14734 = vmatpush1.bf16.msra.mxu0 %v21367_v39  ;;  %14477 = vmatprep.subr.bf16.mxu1 %v21372_v41  ;;  %v21433_v39 = vld [vmem:[#allocation2 + $0x1b10] ss:$72 sps:$4 sm:$0xff]   ;;  %v21438_v41 = vld [vmem:[#allocation2 + $0x2d9c] ss:$72 sps:$4 sm:$0xff]  }
 0x1ea   :  { %14735 = vmatprep.subr.bf16.mxu0 %v21375_v42  ;;  %v21441_v42 = vld [vmem:[#allocation2 + $0x1ba4] ss:$72 sps:$4 sm:$0xff]  }
 0x1ec   :  { %14478 = vmatpush1.bf16.msra.mxu1 %v21370_v48  ;;  %v21436_v48 = vld [vmem:[#allocation2 + $0x2d98] ss:$72 sps:$4 sm:$0xff]  }
 0x1ed   :  { %14736 = vmatpush1.bf16.msra.mxu0 %v21373_v49  ;;  %14479 = vmatprep.subr.bf16.mxu1 %v21378_v50  ;;  %v21439_v49 = vld [vmem:[#allocation2 + $0x1ba0] ss:$72 sps:$4 sm:$0xff]   ;;  %v21444_v50 = vld [vmem:[#allocation2 + $0x2e2c] ss:$72 sps:$4 sm:$0xff]  }
 0x1ee   :  { %14737 = vmatprep.subr.bf16.mxu0 %v21381_v51  ;;  %v21447_v51 = vld [vmem:[#allocation2 + $0x1c34] ss:$72 sps:$4 sm:$0xff]  }
 0x1f0   :  { %14480 = vmatpush1.bf16.msra.mxu1 %v21376_v29  ;;  %v21442_v29 = vld [vmem:[#allocation2 + $0x2e28] ss:$72 sps:$4 sm:$0xff]  }
 0x1f1   :  { %14738 = vmatpush1.bf16.msra.mxu0 %v21379_v30  ;;  %14481 = vmatprep.subr.bf16.mxu1 %v21384_v31  ;;  %v21445_v30 = vld [vmem:[#allocation2 + $0x1c30] ss:$72 sps:$4 sm:$0xff]   ;;  %v21450_v31 = vld [vmem:[#allocation2 + $0x2ebc] ss:$72 sps:$4 sm:$0xff]  }
 0x1f2   :  { %14739 = vmatprep.subr.bf16.mxu0 %v21387_v53  ;;  %v21453_v53 = vld [vmem:[#allocation2 + $0x1cc4] ss:$72 sps:$4 sm:$0xff]  }
 0x1f4   :  { %14482 = vmatpush1.bf16.msra.mxu1 %v21382_v54  ;;  %v21448_v54 = vld [vmem:[#allocation2 + $0x2eb8] ss:$72 sps:$4 sm:$0xff]  }
 0x1f5   :  { %14740 = vmatpush1.bf16.msra.mxu0 %v21385_v56  ;;  %14483 = vmatprep.subr.bf16.mxu1 %v21390_v57  ;;  %v21451_v56 = vld [vmem:[#allocation2 + $0x1cc0] ss:$72 sps:$4 sm:$0xff]   ;;  %v21456_v57 = vld [vmem:[#allocation2 + $0x2f4c] ss:$72 sps:$4 sm:$0xff]  }
 0x1f6   :  { %14741 = vmatprep.subr.bf16.mxu0 %v21393_v58  ;;  %v21459_v58 = vld [vmem:[#allocation2 + $0x1d54] ss:$72 sps:$4 sm:$0xff]  }
 0x1f8   :  { %14484 = vmatpush1.bf16.msra.mxu1 %v21388_v59  ;;  %v21454_v59 = vld [vmem:[#allocation2 + $0x2f48] ss:$72 sps:$4 sm:$0xff]  }
 0x1f9   :  { %14742 = vmatpush1.bf16.msra.mxu0 %v21391_v60  ;;  %14485 = vmatprep.subr.bf16.mxu1 %v21396_v61  ;;  %v21457_v60 = vld [vmem:[#allocation2 + $0x1d50] ss:$72 sps:$4 sm:$0xff]   ;;  %v21462_v61 = vld [vmem:[#allocation2 + $0x2fdc] ss:$72 sps:$4 sm:$0xff]  }
 0x1fa   :  { %14743 = vmatprep.subr.bf16.mxu0 %v21399_v62  ;;  %v21465_v62 = vld [vmem:[#allocation2 + $0x1de4] ss:$72 sps:$4 sm:$0xff]  }
 0x1fc   :  { %14486 = vmatpush1.bf16.msra.mxu1 %v21394_v63  ;;  %v21460_v63 = vld [vmem:[#allocation2 + $0x2fd8] ss:$72 sps:$4 sm:$0xff]  }
 0x1fd   :  { %14744 = vmatpush1.bf16.msra.mxu0 %v21397_v3  ;;  %14487 = vmatprep.subr.bf16.mxu1 %v21402_v4  ;;  %v21463_v3 = vld [vmem:[#allocation2 + $0x1de0] ss:$72 sps:$4 sm:$0xff]   ;;  %v21468_v4 = vld [vmem:[#allocation2 + $0x306c] ss:$72 sps:$4 sm:$0xff]  }
 0x1fe   :  { %14745 = vmatprep.subr.bf16.mxu0 %v21405_v47  ;;  %v21471_v47 = vld [vmem:[#allocation2 + $0x1e74] ss:$72 sps:$4 sm:$0xff]  }
 0x200   :  { %14488 = vmatpush1.bf16.msra.mxu1 %v21400_v5 }
 0x201   :  { %14746 = vmatpush1.bf16.msra.mxu0 %v21403_v6  ;;  %14489 = vmatprep.subr.bf16.mxu1 %v21408_v7 }
 0x202   :  { %14747 = vmatprep.subr.bf16.mxu0 %v21411_v8 }
 0x204   :  { %14490 = vmatpush1.bf16.msra.mxu1 %v21406_v12 }
 0x205   :  { %14748 = vmatpush1.bf16.msra.mxu0 %v21409_v13  ;;  %14491 = vmatprep.subr.bf16.mxu1 %v21414_v17  ;;  %v21466_v13 = vld [vmem:[#allocation2 + $0x3068] ss:$72 sps:$4 sm:$0xff]  }
 0x206   :  { %14749 = vmatprep.subr.bf16.mxu0 %v21417_v18  ;;  %v21469_v17 = vld [vmem:[#allocation2 + $0x1e70] ss:$72 sps:$4 sm:$0xff]  }
 0x208   :  { %14492 = vmatpush1.bf16.msra.mxu1 %v21412_v20 }
 0x209   :  { %14750 = vmatpush1.bf16.msra.mxu0 %v21415_v21  ;;  %14493 = vmatprep.subr.bf16.mxu1 %v21420_v24  ;;  %v21474_v21 = vld [vmem:[#allocation2 + $0x30fc] ss:$72 sps:$4 sm:$0xff]  }
 0x20a   :  { %14751 = vmatprep.subr.bf16.mxu0 %v21423_v25  ;;  %v21477_v24 = vld [vmem:[#allocation2 + $0x1f04] ss:$72 sps:$4 sm:$0xff]   ;;  %v21475_v25 = vld [vmem:[#allocation2 + $0x1f00] ss:$72 sps:$4 sm:$0xff]  }
 0x20c   :  { %14494 = vmatpush1.bf16.msra.mxu1 %v21418_v26  ;;  %v21480_v26 = vld [vmem:[#allocation2 + $0x318c] ss:$72 sps:$4 sm:$0xff]  }
 0x20d   :  { %14752 = vmatpush1.bf16.msra.mxu0 %v21421_v27  ;;  %14495 = vmatprep.subr.bf16.mxu1 %v21426_v1  ;;  %v21483_v27 = vld [vmem:[#allocation2 + $0x1f94] ss:$72 sps:$4 sm:$0xff]   ;;  %v21481_v1 = vld [vmem:[#allocation2 + $0x1f90] ss:$72 sps:$4 sm:$0xff]  }
 0x20e   :  { %14753 = vmatprep.subr.bf16.mxu0 %v21429_v2  ;;  %v21486_v2 = vld [vmem:[#allocation2 + $0x321c] ss:$72 sps:$4 sm:$0xff]  }
 0x210   :  { %14496 = vmatpush1.bf16.msra.mxu1 %v21424_v32  ;;  %v21489_v32 = vld [vmem:[#allocation2 + $0x2024] ss:$72 sps:$4 sm:$0xff]  }
 0x211   :  { %14754 = vmatpush1.bf16.msra.mxu0 %v21427_v35  ;;  %14508 = vmatprep.subr.bf16.mxu1 %v21432_v36  ;;  %v21487_v35 = vld [vmem:[#allocation2 + $0x2020] ss:$72 sps:$4 sm:$0xff]   ;;  %v21492_v36 = vld [vmem:[#allocation2 + $0x32ac] ss:$72 sps:$4 sm:$0xff]  }
 0x212   :  { %14766 = vmatprep.subr.bf16.mxu0 %v21435_v37  ;;  %v21495_v37 = vld [vmem:[#allocation2 + $0x20b4] ss:$72 sps:$4 sm:$0xff]  }
 0x213   :  { %14498 = vmatmul.mubr.bf16.vlgmr.msra.gmra.mrb[4].mxu1 %v24311_v23 }
 0x214   :  { %14756 = vmatmul.mubr.bf16.vlgmr.msra.gmra.mrb[4].mxu0 %v24352_v45  ;;  %14509 = vmatpush1.bf16.msra.mxu1 %v21430_v38  ;;  %v21490_v38 = vld [vmem:[#allocation2 + $0x32a8] ss:$72 sps:$4 sm:$0xff]  }
 0x215   :  { %14767 = vmatpush1.bf16.msra.mxu0 %v21433_v39  ;;  %14510 = vmatprep.subr.bf16.mxu1 %v21438_v41  ;;  %v21493_v39 = vld [vmem:[#allocation2 + $0x20b0] ss:$72 sps:$4 sm:$0xff]   ;;  %v21498_v41 = vld [vmem:[#allocation2 + $0x333c] ss:$72 sps:$4 sm:$0xff]  }
 0x216   :  { %14768 = vmatprep.subr.bf16.mxu0 %v21441_v42  ;;  %14540 = vmatprep.mubr.bf16.mxu1 %v24341_v34  ;;  %v21501_v42 = vld [vmem:[#allocation2 + $0x2144] ss:$72 sps:$4 sm:$0xff]  }
 0x217   :  { %14798 = vmatprep.mubr.bf16.mxu0 %v24266_v55 }
 0x218   :  { %14511 = vmatpush1.bf16.msra.mxu1 %v21436_v48  ;;  %v21496_v48 = vld [vmem:[#allocation2 + $0x3338] ss:$72 sps:$4 sm:$0xff]  }
 0x219   :  { %14769 = vmatpush1.bf16.msra.mxu0 %v21439_v49  ;;  %14512 = vmatprep.subr.bf16.mxu1 %v21444_v50  ;;  %v21499_v49 = vld [vmem:[#allocation2 + $0x2140] ss:$72 sps:$4 sm:$0xff]   ;;  %v21504_v50 = vld [vmem:[#allocation2 + $0x33cc] ss:$72 sps:$4 sm:$0xff]  }
 0x21a   :  { %14770 = vmatprep.subr.bf16.mxu0 %v21447_v51  ;;  %v21507_v51 = vld [vmem:[#allocation2 + $0x21d4] ss:$72 sps:$4 sm:$0xff]  }
 0x21c   :  { %14513 = vmatpush1.bf16.msra.mxu1 %v21442_v29  ;;  %v21502_v29 = vld [vmem:[#allocation2 + $0x33c8] ss:$72 sps:$4 sm:$0xff]  }
 0x21d   :  { %14771 = vmatpush1.bf16.msra.mxu0 %v21445_v30  ;;  %14514 = vmatprep.subr.bf16.mxu1 %v21450_v31  ;;  %v21505_v30 = vld [vmem:[#allocation2 + $0x21d0] ss:$72 sps:$4 sm:$0xff]   ;;  %v21510_v31 = vld [vmem:[#allocation2 + $0x345c] ss:$72 sps:$4 sm:$0xff]  }
 0x21e   :  { %14772 = vmatprep.subr.bf16.mxu0 %v21453_v53  ;;  %v21513_v53 = vld [vmem:[#allocation2 + $0x2264] ss:$72 sps:$4 sm:$0xff]  }
 0x220   :  { %14515 = vmatpush1.bf16.msra.mxu1 %v21448_v54  ;;  %v21508_v54 = vld [vmem:[#allocation2 + $0x3458] ss:$72 sps:$4 sm:$0xff]  }
 0x221   :  { %14773 = vmatpush1.bf16.msra.mxu0 %v21451_v56  ;;  %14516 = vmatprep.subr.bf16.mxu1 %v21456_v57  ;;  %v21511_v56 = vld [vmem:[#allocation2 + $0x2260] ss:$72 sps:$4 sm:$0xff]   ;;  %v21516_v57 = vld [vmem:[#allocation2 + $0x34ec] ss:$72 sps:$4 sm:$0xff]  }
 0x222   :  { %14774 = vmatprep.subr.bf16.mxu0 %v21459_v58  ;;  %v21519_v58 = vld [vmem:[#allocation2 + $0x22f4] ss:$72 sps:$4 sm:$0xff]  }
 0x224   :  { %14517 = vmatpush1.bf16.msra.mxu1 %v21454_v59  ;;  %v21514_v59 = vld [vmem:[#allocation2 + $0x34e8] ss:$72 sps:$4 sm:$0xff]  }
 0x225   :  { %14775 = vmatpush1.bf16.msra.mxu0 %v21457_v60  ;;  %14518 = vmatprep.subr.bf16.mxu1 %v21462_v61  ;;  %v21517_v60 = vld [vmem:[#allocation2 + $0x22f0] ss:$72 sps:$4 sm:$0xff]   ;;  %v21522_v61 = vld [vmem:[#allocation2 + $0x357c] ss:$72 sps:$4 sm:$0xff]  }
 0x226   :  { %14776 = vmatprep.subr.bf16.mxu0 %v21465_v62  ;;  %v21525_v62 = vld [vmem:[#allocation2 + $0x2384] ss:$72 sps:$4 sm:$0xff]  }
 0x227   :  { %v14284_v5 = vpop.f32.mrb[0].mxu0 }
 0x228   :  { %v24422_v6 = vadd.f32 %v14284_v5, %v24405_v9  ;;  %v14286_v7 = vpop.f32.mrb[1].mxu0  ;;  %14519 = vmatpush1.bf16.msra.mxu1 %v21460_v63  ;;  %v21520_v63 = vld [vmem:[#allocation2 + $0x3578] ss:$72 sps:$4 sm:$0xff]   ;;  %v21526_v5 = vld [vmem:[#allocation2 + $0x3608] ss:$72 sps:$4 sm:$0xff]  }
 0x229   :  { %v24425_v8 = vadd.f32 %v14286_v7, %v24407_v14  ;;  %v14288_v12 = vpop.f32.mrb[2].mxu0  ;;  %14777 = vmatpush1.bf16.msra.mxu0 %v21463_v3  ;;  %14520 = vmatprep.subr.bf16.mxu1 %v21468_v4  ;;  %v21472_v14 = vld [vmem:[#allocation2 + $0x30f8] ss:$72 sps:$4 sm:$0xff]   ;;  %v21528_v4 = vld [vmem:[#allocation2 + $0x360c] ss:$72 sps:$4 sm:$0xff]  }
 0x22a   :  { %v24428_v18 = vadd.f32 %v14288_v12, %v24409_v15  ;;  %v14290_v20 = vpop.f32.mrb[3].mxu0  ;;  %14778 = vmatprep.subr.bf16.mxu0 %v21471_v47  ;;  %v21478_v15 = vld [vmem:[#allocation2 + $0x3188] ss:$72 sps:$4 sm:$0xff]   ;;  %v21531_v47 = vld [vmem:[#allocation2 + $0x2414] ss:$72 sps:$4 sm:$0xff]  }
 0x22b   :  { %v24431_v9 = vadd.f32 %v14290_v20, %v24411_v16  ;;  %v21484_v16 = vld [vmem:[#allocation2 + $0x3218] ss:$72 sps:$4 sm:$0xff]   ;;  %v21534_v12 = vld [vmem:[#allocation2 + $0x369c] ss:$72 sps:$4 sm:$0xff]  }
 0x22c   :  { %14521 = vmatpush1.bf16.msra.mxu1 %v21466_v13  ;;  %v21523_v3 = vld [vmem:[#allocation2 + $0x2380] ss:$72 sps:$4 sm:$0xff]   ;;  %v21529_v7 = vld [vmem:[#allocation2 + $0x2410] ss:$72 sps:$4 sm:$0xff]   ;;  %v21537_v13 = vld [vmem:[#allocation2 + $0x24a4] ss:$72 sps:$4 sm:$0xff]  }
 0x22d   :  { %14779 = vmatpush1.bf16.msra.mxu0 %v21469_v17  ;;  %14522 = vmatprep.subr.bf16.mxu1 %v21474_v21  ;;  %v21532_v17 = vld [vmem:[#allocation2 + $0x3698] ss:$72 sps:$4 sm:$0xff]   ;;  %v21540_v21 = vld [vmem:[#allocation2 + $0x372c] ss:$72 sps:$4 sm:$0xff]  }
 0x22e   :  { %14780 = vmatprep.subr.bf16.mxu0 %v21477_v24  ;;  %v21535_v20 = vld [vmem:[#allocation2 + $0x24a0] ss:$72 sps:$4 sm:$0xff]   ;;  %v21543_v24 = vld [vmem:[#allocation2 + $0x2534] ss:$72 sps:$4 sm:$0xff]  }
 0x230   :  { %14523 = vmatpush1.bf16.msra.mxu1 %v21472_v14  ;;  %v21538_v14 = vld [vmem:[#allocation2 + $0x3728] ss:$72 sps:$4 sm:$0xff]  }
 0x231   :  { %14781 = vmatpush1.bf16.msra.mxu0 %v21475_v25  ;;  %14524 = vmatprep.subr.bf16.mxu1 %v21480_v26  ;;  %v21541_v25 = vld [vmem:[#allocation2 + $0x2530] ss:$72 sps:$4 sm:$0xff]   ;;  %v21546_v26 = vld [vmem:[#allocation2 + $0x37bc] ss:$72 sps:$4 sm:$0xff]  }
 0x232   :  { %14782 = vmatprep.subr.bf16.mxu0 %v21483_v27  ;;  %v21549_v27 = vld [vmem:[#allocation2 + $0x25c4] ss:$72 sps:$4 sm:$0xff]  }
 0x234   :  { %14525 = vmatpush1.bf16.msra.mxu1 %v21478_v15  ;;  %v21544_v15 = vld [vmem:[#allocation2 + $0x37b8] ss:$72 sps:$4 sm:$0xff]  }
 0x235   :  { %14783 = vmatpush1.bf16.msra.mxu0 %v21481_v1  ;;  %14526 = vmatprep.subr.bf16.mxu1 %v21486_v2  ;;  %v21547_v1 = vld [vmem:[#allocation2 + $0x25c0] ss:$72 sps:$4 sm:$0xff]   ;;  %v21552_v2 = vld [vmem:[#allocation2 + $0x384c] ss:$72 sps:$4 sm:$0xff]  }
 0x236   :  { %14784 = vmatprep.subr.bf16.mxu0 %v21489_v32  ;;  %v21555_v32 = vld [vmem:[#allocation2 + $0x2654] ss:$72 sps:$4 sm:$0xff]  }
 0x238   :  { %14527 = vmatpush1.bf16.msra.mxu1 %v21484_v16  ;;  %v21550_v16 = vld [vmem:[#allocation2 + $0x3848] ss:$72 sps:$4 sm:$0xff]  }
 0x239   :  { %14785 = vmatpush1.bf16.msra.mxu0 %v21487_v35  ;;  %14528 = vmatprep.subr.bf16.mxu1 %v21492_v36  ;;  %v21553_v35 = vld [vmem:[#allocation2 + $0x2650] ss:$72 sps:$4 sm:$0xff]   ;;  %v21558_v36 = vld [vmem:[#allocation2 + $0x38dc] ss:$72 sps:$4 sm:$0xff]  }
 0x23a   :  { %14786 = vmatprep.subr.bf16.mxu0 %v21495_v37  ;;  %v21561_v37 = vld [vmem:[#allocation2 + $0x26e4] ss:$72 sps:$4 sm:$0xff]  }
 0x23c   :  { %14529 = vmatpush1.bf16.msra.mxu1 %v21490_v38  ;;  %v21556_v38 = vld [vmem:[#allocation2 + $0x38d8] ss:$72 sps:$4 sm:$0xff]  }
 0x23d   :  { %14787 = vmatpush1.bf16.msra.mxu0 %v21493_v39  ;;  %14530 = vmatprep.subr.bf16.mxu1 %v21498_v41  ;;  %v21559_v39 = vld [vmem:[#allocation2 + $0x26e0] ss:$72 sps:$4 sm:$0xff]   ;;  %v21564_v41 = vld [vmem:[#allocation2 + $0x396c] ss:$72 sps:$4 sm:$0xff]  }
 0x23e   :  { %14788 = vmatprep.subr.bf16.mxu0 %v21501_v42  ;;  %v21567_v42 = vld [vmem:[#allocation2 + $0x2774] ss:$72 sps:$4 sm:$0xff]  }
 0x240   :  { %14531 = vmatpush1.bf16.msra.mxu1 %v21496_v48  ;;  %v21562_v48 = vld [vmem:[#allocation2 + $0x3968] ss:$72 sps:$4 sm:$0xff]  }
 0x241   :  { %14789 = vmatpush1.bf16.msra.mxu0 %v21499_v49  ;;  %14532 = vmatprep.subr.bf16.mxu1 %v21504_v50  ;;  %v21565_v49 = vld [vmem:[#allocation2 + $0x2770] ss:$72 sps:$4 sm:$0xff]   ;;  %v21570_v50 = vld [vmem:[#allocation2 + $0x39fc] ss:$72 sps:$4 sm:$0xff]  }
 0x242   :  { %14790 = vmatprep.subr.bf16.mxu0 %v21507_v51  ;;  %v21573_v51 = vld [vmem:[#allocation2 + $0x2804] ss:$72 sps:$4 sm:$0xff]  }
 0x244   :  { %14533 = vmatpush1.bf16.msra.mxu1 %v21502_v29  ;;  %v21568_v29 = vld [vmem:[#allocation2 + $0x39f8] ss:$72 sps:$4 sm:$0xff]  }
 0x245   :  { %14791 = vmatpush1.bf16.msra.mxu0 %v21505_v30  ;;  %14534 = vmatprep.subr.bf16.mxu1 %v21510_v31  ;;  %v21571_v30 = vld [vmem:[#allocation2 + $0x2800] ss:$72 sps:$4 sm:$0xff]   ;;  %v21576_v31 = vld [vmem:[#allocation2 + $0x3a8c] ss:$72 sps:$4 sm:$0xff]  }
 0x246   :  { %14792 = vmatprep.subr.bf16.mxu0 %v21513_v53  ;;  %v21579_v53 = vld [vmem:[#allocation2 + $0x2894] ss:$72 sps:$4 sm:$0xff]  }
 0x248   :  { %14535 = vmatpush1.bf16.msra.mxu1 %v21508_v54  ;;  %v21574_v54 = vld [vmem:[#allocation2 + $0x3a88] ss:$72 sps:$4 sm:$0xff]  }
 0x249   :  { %14793 = vmatpush1.bf16.msra.mxu0 %v21511_v56  ;;  %14536 = vmatprep.subr.bf16.mxu1 %v21516_v57  ;;  %v21577_v56 = vld [vmem:[#allocation2 + $0x2890] ss:$72 sps:$4 sm:$0xff]   ;;  %v21582_v57 = vld [vmem:[#allocation2 + $0x3b1c] ss:$72 sps:$4 sm:$0xff]  }
 0x24a   :  { %14794 = vmatprep.subr.bf16.mxu0 %v21519_v58  ;;  %v21585_v58 = vld [vmem:[#allocation2 + $0x2924] ss:$72 sps:$4 sm:$0xff]  }
 0x24c   :  { %14537 = vmatpush1.bf16.msra.mxu1 %v21514_v59  ;;  %v21580_v59 = vld [vmem:[#allocation2 + $0x3b18] ss:$72 sps:$4 sm:$0xff]  }
 0x24d   :  { %14795 = vmatpush1.bf16.msra.mxu0 %v21517_v60  ;;  %14538 = vmatprep.subr.bf16.mxu1 %v21522_v61  ;;  %v21583_v60 = vld [vmem:[#allocation2 + $0x2920] ss:$72 sps:$4 sm:$0xff]   ;;  %v21588_v61 = vld [vmem:[#allocation2 + $0x3bac] ss:$72 sps:$4 sm:$0xff]  }
 0x24e   :  { %14796 = vmatprep.subr.bf16.mxu0 %v21525_v62  ;;  %v21591_v62 = vld [vmem:[#allocation2 + $0x29b4] ss:$72 sps:$4 sm:$0xff]  }
 0x250   :  { %14539 = vmatpush1.bf16.msra.mxu1 %v21520_v63  ;;  %v21586_v63 = vld [vmem:[#allocation2 + $0x3ba8] ss:$72 sps:$4 sm:$0xff]  }
 0x251   :  { %14797 = vmatpush1.bf16.msra.mxu0 %v21523_v3  ;;  %14551 = vmatprep.subr.bf16.mxu1 %v21528_v4  ;;  %v21589_v3 = vld [vmem:[#allocation2 + $0x29b0] ss:$72 sps:$4 sm:$0xff]   ;;  %v21594_v4 = vld [vmem:[#allocation2 + $0x3c3c] ss:$72 sps:$4 sm:$0xff]  }
 0x252   :  { %14809 = vmatprep.subr.bf16.mxu0 %v21531_v47  ;;  %v21597_v47 = vld [vmem:[#allocation2 + $0x2a44] ss:$72 sps:$4 sm:$0xff]  }
 0x253   :  { %14541 = vmatmul.mubr.bf16.vlgmr.msra.gmra.mrb[4].mxu1 %v24356_v46 }
 0x254   :  { %14799 = vmatmul.mubr.bf16.vlgmr.msra.gmra.mrb[4].mxu0 %v24271_v11  ;;  %14552 = vmatpush1.bf16.msra.mxu1 %v21526_v5  ;;  %v21592_v5 = vld [vmem:[#allocation2 + $0x3c38] ss:$72 sps:$4 sm:$0xff]  }
 0x255   :  { %14810 = vmatpush1.bf16.msra.mxu0 %v21529_v7  ;;  %14553 = vmatprep.subr.bf16.mxu1 %v21534_v12  ;;  %v21595_v7 = vld [vmem:[#allocation2 + $0x2a40] ss:$72 sps:$4 sm:$0xff]   ;;  %v21600_v12 = vld [vmem:[#allocation2 + $0x3ccc] ss:$72 sps:$4 sm:$0xff]  }
 0x256   :  { %14811 = vmatprep.subr.bf16.mxu0 %v21537_v13  ;;  %14583 = vmatprep.mubr.bf16.mxu1 %v24365_v28  ;;  %v21603_v13 = vld [vmem:[#allocation2 + $0x2ad4] ss:$72 sps:$4 sm:$0xff]  }
 0x257   :  { %14841 = vmatprep.mubr.bf16.mxu0 %v24302_v43 }
 0x258   :  { %14554 = vmatpush1.bf16.msra.mxu1 %v21532_v17  ;;  %v21598_v17 = vld [vmem:[#allocation2 + $0x3cc8] ss:$72 sps:$4 sm:$0xff]  }
 0x259   :  { %14812 = vmatpush1.bf16.msra.mxu0 %v21535_v20  ;;  %14555 = vmatprep.subr.bf16.mxu1 %v21540_v21  ;;  %v21601_v20 = vld [vmem:[#allocation2 + $0x2ad0] ss:$72 sps:$4 sm:$0xff]   ;;  %v21606_v21 = vld [vmem:[#allocation2 + $0x3d5c] ss:$72 sps:$4 sm:$0xff]  }
 0x25a   :  { %14813 = vmatprep.subr.bf16.mxu0 %v21543_v24  ;;  %v21609_v24 = vld [vmem:[#allocation2 + $0x2b64] ss:$72 sps:$4 sm:$0xff]  }
 0x25c   :  { %14556 = vmatpush1.bf16.msra.mxu1 %v21538_v14  ;;  %v21604_v14 = vld [vmem:[#allocation2 + $0x3d58] ss:$72 sps:$4 sm:$0xff]  }
 0x25d   :  { %14814 = vmatpush1.bf16.msra.mxu0 %v21541_v25  ;;  %14557 = vmatprep.subr.bf16.mxu1 %v21546_v26  ;;  %v21607_v25 = vld [vmem:[#allocation2 + $0x2b60] ss:$72 sps:$4 sm:$0xff]   ;;  %v21612_v26 = vld [vmem:[#allocation2 + $0x3dec] ss:$72 sps:$4 sm:$0xff]  }
 0x25e   :  { %14815 = vmatprep.subr.bf16.mxu0 %v21549_v27  ;;  %v21615_v27 = vld [vmem:[#allocation2 + $0x2bf4] ss:$72 sps:$4 sm:$0xff]  }
 0x260   :  { %14558 = vmatpush1.bf16.msra.mxu1 %v21544_v15  ;;  %v21610_v15 = vld [vmem:[#allocation2 + $0x3de8] ss:$72 sps:$4 sm:$0xff]  }
 0x261   :  { %14816 = vmatpush1.bf16.msra.mxu0 %v21547_v1  ;;  %14559 = vmatprep.subr.bf16.mxu1 %v21552_v2  ;;  %v21613_v1 = vld [vmem:[#allocation2 + $0x2bf0] ss:$72 sps:$4 sm:$0xff]   ;;  %v21618_v2 = vld [vmem:[#allocation2 + $0x3e7c] ss:$72 sps:$4 sm:$0xff]  }
 0x262   :  { %14817 = vmatprep.subr.bf16.mxu0 %v21555_v32  ;;  %v21621_v32 = vld [vmem:[#allocation2 + $0x2c84] ss:$72 sps:$4 sm:$0xff]  }
 0x264   :  { %14560 = vmatpush1.bf16.msra.mxu1 %v21550_v16  ;;  %v21616_v16 = vld [vmem:[#allocation2 + $0x3e78] ss:$72 sps:$4 sm:$0xff]  }
 0x265   :  { %14818 = vmatpush1.bf16.msra.mxu0 %v21553_v35  ;;  %14561 = vmatprep.subr.bf16.mxu1 %v21558_v36  ;;  %v21619_v35 = vld [vmem:[#allocation2 + $0x2c80] ss:$72 sps:$4 sm:$0xff]   ;;  %v21624_v36 = vld [vmem:[#allocation2 + $0x3f0c] ss:$72 sps:$4 sm:$0xff]  }
 0x266   :  { %14819 = vmatprep.subr.bf16.mxu0 %v21561_v37  ;;  %v21627_v37 = vld [vmem:[#allocation2 + $0x2d14] ss:$72 sps:$4 sm:$0xff]  }
 0x268   :  { %14562 = vmatpush1.bf16.msra.mxu1 %v21556_v38  ;;  %v21622_v38 = vld [vmem:[#allocation2 + $0x3f08] ss:$72 sps:$4 sm:$0xff]  }
 0x269   :  { %14820 = vmatpush1.bf16.msra.mxu0 %v21559_v39  ;;  %14563 = vmatprep.subr.bf16.mxu1 %v21564_v41  ;;  %v21625_v39 = vld [vmem:[#allocation2 + $0x2d10] ss:$72 sps:$4 sm:$0xff]   ;;  %v21630_v41 = vld [vmem:[#allocation2 + $0x3f9c] ss:$72 sps:$4 sm:$0xff]  }
 0x26a   :  { %14821 = vmatprep.subr.bf16.mxu0 %v21567_v42  ;;  %v21633_v42 = vld [vmem:[#allocation2 + $0x2da4] ss:$72 sps:$4 sm:$0xff]  }
 0x26c   :  { %14564 = vmatpush1.bf16.msra.mxu1 %v21562_v48  ;;  %v21628_v48 = vld [vmem:[#allocation2 + $0x3f98] ss:$72 sps:$4 sm:$0xff]  }
 0x26d   :  { %14822 = vmatpush1.bf16.msra.mxu0 %v21565_v49  ;;  %14565 = vmatprep.subr.bf16.mxu1 %v21570_v50  ;;  %v21631_v49 = vld [vmem:[#allocation2 + $0x2da0] ss:$72 sps:$4 sm:$0xff]   ;;  %v21636_v50 = vld [vmem:[#allocation2 + $0x402c] ss:$72 sps:$4 sm:$0xff]  }
 0x26e   :  { %14823 = vmatprep.subr.bf16.mxu0 %v21573_v51  ;;  %v21639_v51 = vld [vmem:[#allocation2 + $0x2e34] ss:$72 sps:$4 sm:$0xff]  }
 0x270   :  { %14566 = vmatpush1.bf16.msra.mxu1 %v21568_v29  ;;  %v21634_v29 = vld [vmem:[#allocation2 + $0x4028] ss:$72 sps:$4 sm:$0xff]  }
 0x271   :  { %14824 = vmatpush1.bf16.msra.mxu0 %v21571_v30  ;;  %14567 = vmatprep.subr.bf16.mxu1 %v21576_v31  ;;  %v21637_v30 = vld [vmem:[#allocation2 + $0x2e30] ss:$72 sps:$4 sm:$0xff]   ;;  %v21642_v31 = vld [vmem:[#allocation2 + $0x40bc] ss:$72 sps:$4 sm:$0xff]  }
 0x272   :  { %14825 = vmatprep.subr.bf16.mxu0 %v21579_v53  ;;  %v21645_v53 = vld [vmem:[#allocation2 + $0x2ec4] ss:$72 sps:$4 sm:$0xff]  }
 0x274   :  { %14568 = vmatpush1.bf16.msra.mxu1 %v21574_v54  ;;  %v21640_v54 = vld [vmem:[#allocation2 + $0x40b8] ss:$72 sps:$4 sm:$0xff]  }
 0x275   :  { %14826 = vmatpush1.bf16.msra.mxu0 %v21577_v56  ;;  %14569 = vmatprep.subr.bf16.mxu1 %v21582_v57  ;;  %v21643_v56 = vld [vmem:[#allocation2 + $0x2ec0] ss:$72 sps:$4 sm:$0xff]   ;;  %v21648_v57 = vld [vmem:[#allocation2 + $0x414c] ss:$72 sps:$4 sm:$0xff]  }
 0x276   :  { %14827 = vmatprep.subr.bf16.mxu0 %v21585_v58  ;;  %v21651_v58 = vld [vmem:[#allocation2 + $0x2f54] ss:$72 sps:$4 sm:$0xff]  }
 0x278   :  { %14570 = vmatpush1.bf16.msra.mxu1 %v21580_v59  ;;  %v21646_v59 = vld [vmem:[#allocation2 + $0x4148] ss:$72 sps:$4 sm:$0xff]  }
 0x279   :  { %14828 = vmatpush1.bf16.msra.mxu0 %v21583_v60  ;;  %14571 = vmatprep.subr.bf16.mxu1 %v21588_v61  ;;  %v21649_v60 = vld [vmem:[#allocation2 + $0x2f50] ss:$72 sps:$4 sm:$0xff]   ;;  %v21654_v61 = vld [vmem:[#allocation2 + $0x41dc] ss:$72 sps:$4 sm:$0xff]  }
 0x27a   :  { %14829 = vmatprep.subr.bf16.mxu0 %v21591_v62  ;;  %v21657_v62 = vld [vmem:[#allocation2 + $0x2fe4] ss:$72 sps:$4 sm:$0xff]  }
 0x27c   :  { %14572 = vmatpush1.bf16.msra.mxu1 %v21586_v63  ;;  %v21652_v63 = vld [vmem:[#allocation2 + $0x41d8] ss:$72 sps:$4 sm:$0xff]  }
 0x27d   :  { %14830 = vmatpush1.bf16.msra.mxu0 %v21589_v3  ;;  %14573 = vmatprep.subr.bf16.mxu1 %v21594_v4  ;;  %v21655_v3 = vld [vmem:[#allocation2 + $0x2fe0] ss:$72 sps:$4 sm:$0xff]   ;;  %v21660_v4 = vld [vmem:[#allocation2 + $0x426c] ss:$72 sps:$4 sm:$0xff]  }
 0x27e   :  { %14831 = vmatprep.subr.bf16.mxu0 %v21597_v47  ;;  %v21663_v47 = vld [vmem:[#allocation2 + $0x3074] ss:$72 sps:$4 sm:$0xff]  }
 0x280   :  { %14574 = vmatpush1.bf16.msra.mxu1 %v21592_v5  ;;  %v21658_v5 = vld [vmem:[#allocation2 + $0x4268] ss:$72 sps:$4 sm:$0xff]  }
 0x281   :  { %14832 = vmatpush1.bf16.msra.mxu0 %v21595_v7  ;;  %14575 = vmatprep.subr.bf16.mxu1 %v21600_v12  ;;  %v21661_v7 = vld [vmem:[#allocation2 + $0x3070] ss:$72 sps:$4 sm:$0xff]   ;;  %v21666_v12 = vld [vmem:[#allocation2 + $0x42fc] ss:$72 sps:$4 sm:$0xff]  }
 0x282   :  { %14833 = vmatprep.subr.bf16.mxu0 %v21603_v13  ;;  %v21669_v13 = vld [vmem:[#allocation2 + $0x3104] ss:$72 sps:$4 sm:$0xff]  }
 0x284   :  { %14576 = vmatpush1.bf16.msra.mxu1 %v21598_v17  ;;  %v21664_v17 = vld [vmem:[#allocation2 + $0x42f8] ss:$72 sps:$4 sm:$0xff]  }
 0x285   :  { %14834 = vmatpush1.bf16.msra.mxu0 %v21601_v20  ;;  %14577 = vmatprep.subr.bf16.mxu1 %v21606_v21  ;;  %v21667_v20 = vld [vmem:[#allocation2 + $0x3100] ss:$72 sps:$4 sm:$0xff]   ;;  %v21672_v21 = vld [vmem:[#allocation2 + $0x438c] ss:$72 sps:$4 sm:$0xff]  }
 0x286   :  { %14835 = vmatprep.subr.bf16.mxu0 %v21609_v24  ;;  %v21675_v24 = vld [vmem:[#allocation2 + $0x3194] ss:$72 sps:$4 sm:$0xff]  }
 0x288   :  { %14578 = vmatpush1.bf16.msra.mxu1 %v21604_v14  ;;  %v21670_v14 = vld [vmem:[#allocation2 + $0x4388] ss:$72 sps:$4 sm:$0xff]  }
 0x289   :  { %14836 = vmatpush1.bf16.msra.mxu0 %v21607_v25  ;;  %14579 = vmatprep.subr.bf16.mxu1 %v21612_v26  ;;  %v21673_v25 = vld [vmem:[#allocation2 + $0x3190] ss:$72 sps:$4 sm:$0xff]   ;;  %v21678_v26 = vld [vmem:[#allocation2 + $0x441c] ss:$72 sps:$4 sm:$0xff]  }
 0x28a   :  { %14837 = vmatprep.subr.bf16.mxu0 %v21615_v27  ;;  %v21681_v27 = vld [vmem:[#allocation2 + $0x3224] ss:$72 sps:$4 sm:$0xff]  }
 0x28c   :  { %14580 = vmatpush1.bf16.msra.mxu1 %v21610_v15  ;;  %v21676_v15 = vld [vmem:[#allocation2 + $0x4418] ss:$72 sps:$4 sm:$0xff]  }
 0x28d   :  { %14838 = vmatpush1.bf16.msra.mxu0 %v21613_v1  ;;  %14581 = vmatprep.subr.bf16.mxu1 %v21618_v2  ;;  %v21679_v1 = vld [vmem:[#allocation2 + $0x3220] ss:$72 sps:$4 sm:$0xff]   ;;  %v21684_v2 = vld [vmem:[#allocation2 + $0x44ac] ss:$72 sps:$4 sm:$0xff]  }
 0x28e   :  { %14839 = vmatprep.subr.bf16.mxu0 %v21621_v32  ;;  %v21687_v32 = vld [vmem:[#allocation2 + $0x32b4] ss:$72 sps:$4 sm:$0xff]  }
 0x290   :  { %14582 = vmatpush1.bf16.msra.mxu1 %v21616_v16  ;;  %v21682_v16 = vld [vmem:[#allocation2 + $0x44a8] ss:$72 sps:$4 sm:$0xff]  }
 0x291   :  { %14840 = vmatpush1.bf16.msra.mxu0 %v21619_v35  ;;  %14594 = vmatprep.subr.bf16.mxu1 %v21624_v36  ;;  %v21685_v35 = vld [vmem:[#allocation2 + $0x32b0] ss:$72 sps:$4 sm:$0xff]   ;;  %v21690_v36 = vld [vmem:[#allocation2 + $0x453c] ss:$72 sps:$4 sm:$0xff]  }
 0x292   :  { %14852 = vmatprep.subr.bf16.mxu0 %v21627_v37  ;;  %v21693_v37 = vld [vmem:[#allocation2 + $0x3344] ss:$72 sps:$4 sm:$0xff]  }
 0x293   :  { %14584 = vmatmul.mubr.bf16.vlgmr.msra.gmra.mrb[4].mxu1 %v24373_v0 }
 0x294   :  { %14842 = vmatmul.mubr.bf16.vlgmr.msra.gmra.mrb[4].mxu0 %v24311_v23  ;;  %14595 = vmatpush1.bf16.msra.mxu1 %v21622_v38  ;;  %v21688_v38 = vld [vmem:[#allocation2 + $0x4538] ss:$72 sps:$4 sm:$0xff]  }
 0x295   :  { %14853 = vmatpush1.bf16.msra.mxu0 %v21625_v39  ;;  %14596 = vmatprep.subr.bf16.mxu1 %v21630_v41  ;;  %v21691_v39 = vld [vmem:[#allocation2 + $0x3340] ss:$72 sps:$4 sm:$0xff]   ;;  %v21696_v41 = vld [vmem:[#allocation2 + $0x45cc] ss:$72 sps:$4 sm:$0xff]  }
 0x296   :  { %14854 = vmatprep.subr.bf16.mxu0 %v21633_v42  ;;  %14626 = vmatprep.mubr.bf16.mxu1 %v24387_v44  ;;  %v21699_v42 = vld [vmem:[#allocation2 + $0x33d4] ss:$72 sps:$4 sm:$0xff]  }
 0x297   :  { %14884 = vmatprep.mubr.bf16.mxu0 %v24341_v34 }
 0x298   :  { %14597 = vmatpush1.bf16.msra.mxu1 %v21628_v48  ;;  %v21694_v48 = vld [vmem:[#allocation2 + $0x45c8] ss:$72 sps:$4 sm:$0xff]  }
 0x299   :  { %14855 = vmatpush1.bf16.msra.mxu0 %v21631_v49  ;;  %14598 = vmatprep.subr.bf16.mxu1 %v21636_v50  ;;  %v21697_v49 = vld [vmem:[#allocation2 + $0x33d0] ss:$72 sps:$4 sm:$0xff]   ;;  %v21702_v50 = vld [vmem:[#allocation2 + $0x465c] ss:$72 sps:$4 sm:$0xff]  }
 0x29a   :  { %14856 = vmatprep.subr.bf16.mxu0 %v21639_v51  ;;  %v21705_v51 = vld [vmem:[#allocation2 + $0x3464] ss:$72 sps:$4 sm:$0xff]  }
 0x29c   :  { %14599 = vmatpush1.bf16.msra.mxu1 %v21634_v29  ;;  %v21700_v29 = vld [vmem:[#allocation2 + $0x4658] ss:$72 sps:$4 sm:$0xff]  }
 0x29d   :  { %14857 = vmatpush1.bf16.msra.mxu0 %v21637_v30  ;;  %14600 = vmatprep.subr.bf16.mxu1 %v21642_v31  ;;  %v21703_v30 = vld [vmem:[#allocation2 + $0x3460] ss:$72 sps:$4 sm:$0xff]   ;;  %v21708_v31 = vld [vmem:[#allocation2 + $0x46ec] ss:$72 sps:$4 sm:$0xff]  }
 0x29e   :  { %14858 = vmatprep.subr.bf16.mxu0 %v21645_v53  ;;  %v21711_v53 = vld [vmem:[#allocation2 + $0x34f4] ss:$72 sps:$4 sm:$0xff]  }
 0x2a0   :  { %14601 = vmatpush1.bf16.msra.mxu1 %v21640_v54  ;;  %v21706_v54 = vld [vmem:[#allocation2 + $0x46e8] ss:$72 sps:$4 sm:$0xff]  }
 0x2a1   :  { %14859 = vmatpush1.bf16.msra.mxu0 %v21643_v56  ;;  %14602 = vmatprep.subr.bf16.mxu1 %v21648_v57  ;;  %v21709_v56 = vld [vmem:[#allocation2 + $0x34f0] ss:$72 sps:$4 sm:$0xff]   ;;  %v21714_v57 = vld [vmem:[#allocation2 + $0x477c] ss:$72 sps:$4 sm:$0xff]  }
 0x2a2   :  { %14860 = vmatprep.subr.bf16.mxu0 %v21651_v58  ;;  %v21717_v58 = vld [vmem:[#allocation2 + $0x3584] ss:$72 sps:$4 sm:$0xff]  }
 0x2a4   :  { %14603 = vmatpush1.bf16.msra.mxu1 %v21646_v59  ;;  %v21712_v59 = vld [vmem:[#allocation2 + $0x4778] ss:$72 sps:$4 sm:$0xff]  }
 0x2a5   :  { %14861 = vmatpush1.bf16.msra.mxu0 %v21649_v60  ;;  %14604 = vmatprep.subr.bf16.mxu1 %v21654_v61  ;;  %v21715_v60 = vld [vmem:[#allocation2 + $0x3580] ss:$72 sps:$4 sm:$0xff]   ;;  %v21720_v61 = vld [vmem:[#allocation2 + $0x3614] ss:$72 sps:$4 sm:$0xff]  }
 0x2a6   :  { %14862 = vmatprep.subr.bf16.mxu0 %v21657_v62  ;;  %v21723_v62 = vld [vmem:[#allocation2 + $0x1c] ss:$72 sps:$4 sm:$0xff]  }
 0x2a8   :  { %14605 = vmatpush1.bf16.msra.mxu1 %v21652_v63  ;;  %v21718_v63 = vld [vmem:[#allocation2 + $0x3610] ss:$72 sps:$4 sm:$0xff]  }
 0x2a9   :  { %14863 = vmatpush1.bf16.msra.mxu0 %v21655_v3  ;;  %14606 = vmatprep.subr.bf16.mxu1 %v21660_v4  ;;  %v21721_v3 = vld [vmem:[#allocation2 + $0x18] ss:$72 sps:$4 sm:$0xff]   ;;  %v21726_v4 = vld [vmem:[#allocation2 + $0x36a4] ss:$72 sps:$4 sm:$0xff]  }
 0x2aa   :  { %14864 = vmatprep.subr.bf16.mxu0 %v21663_v47  ;;  %v21729_v47 = vld [vmem:[#allocation2 + $0xac] ss:$72 sps:$4 sm:$0xff]  }
 0x2ac   :  { %14607 = vmatpush1.bf16.msra.mxu1 %v21658_v5  ;;  %v21724_v5 = vld [vmem:[#allocation2 + $0x36a0] ss:$72 sps:$4 sm:$0xff]  }
 0x2ad   :  { %14865 = vmatpush1.bf16.msra.mxu0 %v21661_v7  ;;  %14608 = vmatprep.subr.bf16.mxu1 %v21666_v12  ;;  %v21727_v7 = vld [vmem:[#allocation2 + $0xa8] ss:$72 sps:$4 sm:$0xff]   ;;  %v21732_v12 = vld [vmem:[#allocation2 + $0x3734] ss:$72 sps:$4 sm:$0xff]  }
 0x2ae   :  { %14866 = vmatprep.subr.bf16.mxu0 %v21669_v13  ;;  %v21735_v13 = vld [vmem:[#allocation2 + $0x13c] ss:$72 sps:$4 sm:$0xff]  }
 0x2b0   :  { %14609 = vmatpush1.bf16.msra.mxu1 %v21664_v17  ;;  %v21730_v17 = vld [vmem:[#allocation2 + $0x3730] ss:$72 sps:$4 sm:$0xff]  }
 0x2b1   :  { %14867 = vmatpush1.bf16.msra.mxu0 %v21667_v20  ;;  %14610 = vmatprep.subr.bf16.mxu1 %v21672_v21  ;;  %v21733_v20 = vld [vmem:[#allocation2 + $0x138] ss:$72 sps:$4 sm:$0xff]   ;;  %v21738_v21 = vld [vmem:[#allocation2 + $0x37c4] ss:$72 sps:$4 sm:$0xff]  }
 0x2b2   :  { %14868 = vmatprep.subr.bf16.mxu0 %v21675_v24  ;;  %v21741_v24 = vld [vmem:[#allocation2 + $0x1cc] ss:$72 sps:$4 sm:$0xff]  }
 0x2b4   :  { %14611 = vmatpush1.bf16.msra.mxu1 %v21670_v14  ;;  %v21736_v14 = vld [vmem:[#allocation2 + $0x37c0] ss:$72 sps:$4 sm:$0xff]  }
 0x2b5   :  { %14869 = vmatpush1.bf16.msra.mxu0 %v21673_v25  ;;  %14612 = vmatprep.subr.bf16.mxu1 %v21678_v26  ;;  %v21739_v25 = vld [vmem:[#allocation2 + $0x1c8] ss:$72 sps:$4 sm:$0xff]   ;;  %v21744_v26 = vld [vmem:[#allocation2 + $0x3854] ss:$72 sps:$4 sm:$0xff]  }
 0x2b6   :  { %14870 = vmatprep.subr.bf16.mxu0 %v21681_v27  ;;  %v21747_v27 = vld [vmem:[#allocation2 + $0x25c] ss:$72 sps:$4 sm:$0xff]  }
 0x2b8   :  { %14613 = vmatpush1.bf16.msra.mxu1 %v21676_v15  ;;  %v21742_v15 = vld [vmem:[#allocation2 + $0x3850] ss:$72 sps:$4 sm:$0xff]  }
 0x2b9   :  { %14871 = vmatpush1.bf16.msra.mxu0 %v21679_v1  ;;  %14614 = vmatprep.subr.bf16.mxu1 %v21684_v2  ;;  %v21745_v1 = vld [vmem:[#allocation2 + $0x258] ss:$72 sps:$4 sm:$0xff]   ;;  %v21750_v2 = vld [vmem:[#allocation2 + $0x38e4] ss:$72 sps:$4 sm:$0xff]  }
 0x2ba   :  { %14872 = vmatprep.subr.bf16.mxu0 %v21687_v32  ;;  %v21753_v32 = vld [vmem:[#allocation2 + $0x2ec] ss:$72 sps:$4 sm:$0xff]  }
 0x2bc   :  { %14615 = vmatpush1.bf16.msra.mxu1 %v21682_v16  ;;  %v21748_v16 = vld [vmem:[#allocation2 + $0x38e0] ss:$72 sps:$4 sm:$0xff]  }
 0x2bd   :  { %14873 = vmatpush1.bf16.msra.mxu0 %v21685_v35  ;;  %14616 = vmatprep.subr.bf16.mxu1 %v21690_v36  ;;  %v21751_v35 = vld [vmem:[#allocation2 + $0x2e8] ss:$72 sps:$4 sm:$0xff]   ;;  %v21756_v36 = vld [vmem:[#allocation2 + $0x3974] ss:$72 sps:$4 sm:$0xff]  }
 0x2be   :  { %14874 = vmatprep.subr.bf16.mxu0 %v21693_v37  ;;  %v21759_v37 = vld [vmem:[#allocation2 + $0x37c] ss:$72 sps:$4 sm:$0xff]  }
 0x2c0   :  { %14617 = vmatpush1.bf16.msra.mxu1 %v21688_v38  ;;  %v21754_v38 = vld [vmem:[#allocation2 + $0x3970] ss:$72 sps:$4 sm:$0xff]  }
 0x2c1   :  { %14875 = vmatpush1.bf16.msra.mxu0 %v21691_v39  ;;  %14618 = vmatprep.subr.bf16.mxu1 %v21696_v41  ;;  %v21757_v39 = vld [vmem:[#allocation2 + $0x378] ss:$72 sps:$4 sm:$0xff]   ;;  %v21762_v41 = vld [vmem:[#allocation2 + $0x3a04] ss:$72 sps:$4 sm:$0xff]  }
 0x2c2   :  { %14876 = vmatprep.subr.bf16.mxu0 %v21699_v42  ;;  %v21765_v42 = vld [vmem:[#allocation2 + $0x40c] ss:$72 sps:$4 sm:$0xff]  }
 0x2c4   :  { %14619 = vmatpush1.bf16.msra.mxu1 %v21694_v48  ;;  %v21760_v48 = vld [vmem:[#allocation2 + $0x3a00] ss:$72 sps:$4 sm:$0xff]  }
 0x2c5   :  { %14877 = vmatpush1.bf16.msra.mxu0 %v21697_v49  ;;  %14620 = vmatprep.subr.bf16.mxu1 %v21702_v50  ;;  %v21763_v49 = vld [vmem:[#allocation2 + $0x408] ss:$72 sps:$4 sm:$0xff]   ;;  %v21768_v50 = vld [vmem:[#allocation2 + $0x3a94] ss:$72 sps:$4 sm:$0xff]  }
 0x2c6   :  { %14878 = vmatprep.subr.bf16.mxu0 %v21705_v51  ;;  %v21771_v51 = vld [vmem:[#allocation2 + $0x49c] ss:$72 sps:$4 sm:$0xff]  }
 0x2c8   :  { %14621 = vmatpush1.bf16.msra.mxu1 %v21700_v29  ;;  %v21766_v29 = vld [vmem:[#allocation2 + $0x3a90] ss:$72 sps:$4 sm:$0xff]  }
 0x2c9   :  { %14879 = vmatpush1.bf16.msra.mxu0 %v21703_v30  ;;  %14622 = vmatprep.subr.bf16.mxu1 %v21708_v31  ;;  %v21769_v30 = vld [vmem:[#allocation2 + $0x498] ss:$72 sps:$4 sm:$0xff]   ;;  %v21774_v31 = vld [vmem:[#allocation2 + $0x3b24] ss:$72 sps:$4 sm:$0xff]  }
 0x2ca   :  { %14880 = vmatprep.subr.bf16.mxu0 %v21711_v53  ;;  %v21777_v53 = vld [vmem:[#allocation2 + $0x52c] ss:$72 sps:$4 sm:$0xff]  }
 0x2cc   :  { %14623 = vmatpush1.bf16.msra.mxu1 %v21706_v54  ;;  %v21772_v54 = vld [vmem:[#allocation2 + $0x3b20] ss:$72 sps:$4 sm:$0xff]  }
 0x2cd   :  { %14881 = vmatpush1.bf16.msra.mxu0 %v21709_v56  ;;  %14624 = vmatprep.subr.bf16.mxu1 %v21714_v57  ;;  %v21775_v56 = vld [vmem:[#allocation2 + $0x528] ss:$72 sps:$4 sm:$0xff]   ;;  %v21780_v57 = vld [vmem:[#allocation2 + $0x3bb4] ss:$72 sps:$4 sm:$0xff]  }
 0x2ce   :  { %14882 = vmatprep.subr.bf16.mxu0 %v21717_v58  ;;  %v21783_v58 = vld [vmem:[#allocation2 + $0x5bc] ss:$72 sps:$4 sm:$0xff]  }
 0x2d0   :  { %14625 = vmatpush1.bf16.msra.mxu1 %v21712_v59  ;;  %v21778_v59 = vld [vmem:[#allocation2 + $0x3bb0] ss:$72 sps:$4 sm:$0xff]  }
 0x2d1   :  { %14883 = vmatpush1.bf16.msra.mxu0 %v21715_v60  ;;  %14981 = vmatprep.subr.bf16.mxu1 %v21723_v62  ;;  %v21781_v60 = vld [vmem:[#allocation2 + $0x5b8] ss:$72 sps:$4 sm:$0xff]   ;;  %v21789_v62 = vld [vmem:[#allocation2 + $0x64c] ss:$72 sps:$4 sm:$0xff]  }
 0x2d2   :  { %14895 = vmatprep.subr.bf16.mxu0 %v21720_v61  ;;  %v21786_v61 = vld [vmem:[#allocation2 + $0x3c44] ss:$72 sps:$4 sm:$0xff]  }
 0x2d3   :  { %14627 = vmatmul.mubr.bf16.vlgmr.msra.gmra.mrb[4].mxu1 %v24395_v19 }
 0x2d4   :  { %14885 = vmatmul.mubr.bf16.vlgmr.msra.gmra.mrb[4].mxu0 %v24356_v46  ;;  %14982 = vmatpush1.bf16.msra.mxu1 %v21721_v3  ;;  %v21787_v3 = vld [vmem:[#allocation2 + $0x648] ss:$72 sps:$4 sm:$0xff]  }
 0x2d5   :  { %14896 = vmatpush1.bf16.msra.mxu0 %v21718_v63  ;;  %14983 = vmatprep.subr.bf16.mxu1 %v21729_v47  ;;  %v21784_v63 = vld [vmem:[#allocation2 + $0x3c40] ss:$72 sps:$4 sm:$0xff]   ;;  %v21795_v47 = vld [vmem:[#allocation2 + $0x6dc] ss:$72 sps:$4 sm:$0xff]  }
 0x2d6   :  { %14897 = vmatprep.subr.bf16.mxu0 %v21726_v4  ;;  %14927 = vmatprep.mubr.bf16.mxu0 %v24365_v28  ;;  %v21792_v4 = vld [vmem:[#allocation2 + $0x3cd4] ss:$72 sps:$4 sm:$0xff]  }
 0x2d7   :  { %15013 = vmatprep.mubr.bf16.mxu1 %v24257_v52 }
 0x2d8   :  { %14984 = vmatpush1.bf16.msra.mxu1 %v21727_v7  ;;  %v21793_v7 = vld [vmem:[#allocation2 + $0x6d8] ss:$72 sps:$4 sm:$0xff]  }
 0x2d9   :  { %14898 = vmatpush1.bf16.msra.mxu0 %v21724_v5  ;;  %14985 = vmatprep.subr.bf16.mxu1 %v21735_v13  ;;  %v21790_v5 = vld [vmem:[#allocation2 + $0x3cd0] ss:$72 sps:$4 sm:$0xff]   ;;  %v21801_v13 = vld [vmem:[#allocation2 + $0x76c] ss:$72 sps:$4 sm:$0xff]  }
 0x2da   :  { %14899 = vmatprep.subr.bf16.mxu0 %v21732_v12  ;;  %v21798_v12 = vld [vmem:[#allocation2 + $0x3d64] ss:$72 sps:$4 sm:$0xff]  }
 0x2dc   :  { %14986 = vmatpush1.bf16.msra.mxu1 %v21733_v20  ;;  %v21799_v20 = vld [vmem:[#allocation2 + $0x768] ss:$72 sps:$4 sm:$0xff]  }
 0x2dd   :  { %14900 = vmatpush1.bf16.msra.mxu0 %v21730_v17  ;;  %14987 = vmatprep.subr.bf16.mxu1 %v21741_v24  ;;  %v21796_v17 = vld [vmem:[#allocation2 + $0x3d60] ss:$72 sps:$4 sm:$0xff]   ;;  %v21807_v24 = vld [vmem:[#allocation2 + $0x7fc] ss:$72 sps:$4 sm:$0xff]  }
 0x2de   :  { %14901 = vmatprep.subr.bf16.mxu0 %v21738_v21  ;;  %v21804_v21 = vld [vmem:[#allocation2 + $0x3df4] ss:$72 sps:$4 sm:$0xff]  }
 0x2e0   :  { %14988 = vmatpush1.bf16.msra.mxu1 %v21739_v25  ;;  %v21805_v25 = vld [vmem:[#allocation2 + $0x7f8] ss:$72 sps:$4 sm:$0xff]  }
 0x2e1   :  { %14902 = vmatpush1.bf16.msra.mxu0 %v21736_v14  ;;  %14989 = vmatprep.subr.bf16.mxu1 %v21747_v27  ;;  %v21802_v14 = vld [vmem:[#allocation2 + $0x3df0] ss:$72 sps:$4 sm:$0xff]   ;;  %v21813_v27 = vld [vmem:[#allocation2 + $0x88c] ss:$72 sps:$4 sm:$0xff]  }
 0x2e2   :  { %14903 = vmatprep.subr.bf16.mxu0 %v21744_v26  ;;  %v21810_v26 = vld [vmem:[#allocation2 + $0x3e84] ss:$72 sps:$4 sm:$0xff]  }
 0x2e4   :  { %14990 = vmatpush1.bf16.msra.mxu1 %v21745_v1  ;;  %v21811_v1 = vld [vmem:[#allocation2 + $0x888] ss:$72 sps:$4 sm:$0xff]  }
 0x2e5   :  { %14904 = vmatpush1.bf16.msra.mxu0 %v21742_v15  ;;  %14991 = vmatprep.subr.bf16.mxu1 %v21753_v32  ;;  %v21808_v15 = vld [vmem:[#allocation2 + $0x3e80] ss:$72 sps:$4 sm:$0xff]   ;;  %v21819_v32 = vld [vmem:[#allocation2 + $0x91c] ss:$72 sps:$4 sm:$0xff]  }
 0x2e6   :  { %14905 = vmatprep.subr.bf16.mxu0 %v21750_v2  ;;  %v21816_v2 = vld [vmem:[#allocation2 + $0x3f14] ss:$72 sps:$4 sm:$0xff]  }
 0x2e8   :  { %14992 = vmatpush1.bf16.msra.mxu1 %v21751_v35  ;;  %v21817_v35 = vld [vmem:[#allocation2 + $0x918] ss:$72 sps:$4 sm:$0xff]  }
 0x2e9   :  { %14906 = vmatpush1.bf16.msra.mxu0 %v21748_v16  ;;  %14993 = vmatprep.subr.bf16.mxu1 %v21759_v37  ;;  %v21814_v16 = vld [vmem:[#allocation2 + $0x3f10] ss:$72 sps:$4 sm:$0xff]   ;;  %v21825_v37 = vld [vmem:[#allocation2 + $0x9ac] ss:$72 sps:$4 sm:$0xff]  }
 0x2ea   :  { %14907 = vmatprep.subr.bf16.mxu0 %v21756_v36  ;;  %v21822_v36 = vld [vmem:[#allocation2 + $0x3fa4] ss:$72 sps:$4 sm:$0xff]  }
 0x2ec   :  { %14994 = vmatpush1.bf16.msra.mxu1 %v21757_v39  ;;  %v21823_v39 = vld [vmem:[#allocation2 + $0x9a8] ss:$72 sps:$4 sm:$0xff]  }
 0x2ed   :  { %14908 = vmatpush1.bf16.msra.mxu0 %v21754_v38  ;;  %14995 = vmatprep.subr.bf16.mxu1 %v21765_v42  ;;  %v21820_v38 = vld [vmem:[#allocation2 + $0x3fa0] ss:$72 sps:$4 sm:$0xff]   ;;  %v21831_v42 = vld [vmem:[#allocation2 + $0xa3c] ss:$72 sps:$4 sm:$0xff]  }
 0x2ee   :  { %14909 = vmatprep.subr.bf16.mxu0 %v21762_v41  ;;  %v21828_v41 = vld [vmem:[#allocation2 + $0x4034] ss:$72 sps:$4 sm:$0xff]  }
 0x2f0   :  { %14996 = vmatpush1.bf16.msra.mxu1 %v21763_v49  ;;  %v21829_v49 = vld [vmem:[#allocation2 + $0xa38] ss:$72 sps:$4 sm:$0xff]  }
 0x2f1   :  { %14910 = vmatpush1.bf16.msra.mxu0 %v21760_v48  ;;  %14997 = vmatprep.subr.bf16.mxu1 %v21771_v51  ;;  %v21826_v48 = vld [vmem:[#allocation2 + $0x4030] ss:$72 sps:$4 sm:$0xff]   ;;  %v21837_v51 = vld [vmem:[#allocation2 + $0xacc] ss:$72 sps:$4 sm:$0xff]  }
 0x2f2   :  { %14911 = vmatprep.subr.bf16.mxu0 %v21768_v50  ;;  %v21834_v50 = vld [vmem:[#allocation2 + $0x40c4] ss:$72 sps:$4 sm:$0xff]  }
 0x2f4   :  { %14998 = vmatpush1.bf16.msra.mxu1 %v21769_v30  ;;  %v21835_v30 = vld [vmem:[#allocation2 + $0xac8] ss:$72 sps:$4 sm:$0xff]  }
 0x2f5   :  { %14912 = vmatpush1.bf16.msra.mxu0 %v21766_v29  ;;  %14999 = vmatprep.subr.bf16.mxu1 %v21777_v53  ;;  %v21832_v29 = vld [vmem:[#allocation2 + $0x40c0] ss:$72 sps:$4 sm:$0xff]   ;;  %v21843_v53 = vld [vmem:[#allocation2 + $0xb5c] ss:$72 sps:$4 sm:$0xff]  }
 0x2f6   :  { %14913 = vmatprep.subr.bf16.mxu0 %v21774_v31  ;;  %v21840_v31 = vld [vmem:[#allocation2 + $0x4154] ss:$72 sps:$4 sm:$0xff]  }
 0x2f8   :  { %15000 = vmatpush1.bf16.msra.mxu1 %v21775_v56  ;;  %v21841_v56 = vld [vmem:[#allocation2 + $0xb58] ss:$72 sps:$4 sm:$0xff]  }
 0x2f9   :  { %14914 = vmatpush1.bf16.msra.mxu0 %v21772_v54  ;;  %15001 = vmatprep.subr.bf16.mxu1 %v21783_v58  ;;  %v21838_v54 = vld [vmem:[#allocation2 + $0x4150] ss:$72 sps:$4 sm:$0xff]   ;;  %v21849_v58 = vld [vmem:[#allocation2 + $0xbec] ss:$72 sps:$4 sm:$0xff]  }
 0x2fa   :  { %14915 = vmatprep.subr.bf16.mxu0 %v21780_v57  ;;  %v21846_v57 = vld [vmem:[#allocation2 + $0x41e4] ss:$72 sps:$4 sm:$0xff]  }
 0x2fc   :  { %15002 = vmatpush1.bf16.msra.mxu1 %v21781_v60  ;;  %v21847_v60 = vld [vmem:[#allocation2 + $0xbe8] ss:$72 sps:$4 sm:$0xff]  }
 0x2fd   :  { %14916 = vmatpush1.bf16.msra.mxu0 %v21778_v59  ;;  %15003 = vmatprep.subr.bf16.mxu1 %v21789_v62  ;;  %v21844_v59 = vld [vmem:[#allocation2 + $0x41e0] ss:$72 sps:$4 sm:$0xff]   ;;  %v21855_v62 = vld [vmem:[#allocation2 + $0xc7c] ss:$72 sps:$4 sm:$0xff]  }
 0x2fe   :  { %14917 = vmatprep.subr.bf16.mxu0 %v21786_v61  ;;  %v21852_v61 = vld [vmem:[#allocation2 + $0x4274] ss:$72 sps:$4 sm:$0xff]  }
 0x300   :  { %15004 = vmatpush1.bf16.msra.mxu1 %v21787_v3  ;;  %v21853_v3 = vld [vmem:[#allocation2 + $0xc78] ss:$72 sps:$4 sm:$0xff]  }
 0x301   :  { %14918 = vmatpush1.bf16.msra.mxu0 %v21784_v63  ;;  %15005 = vmatprep.subr.bf16.mxu1 %v21795_v47  ;;  %v21850_v63 = vld [vmem:[#allocation2 + $0x4270] ss:$72 sps:$4 sm:$0xff]   ;;  %v21861_v47 = vld [vmem:[#allocation2 + $0xd0c] ss:$72 sps:$4 sm:$0xff]  }
 0x302   :  { %14919 = vmatprep.subr.bf16.mxu0 %v21792_v4  ;;  %v21858_v4 = vld [vmem:[#allocation2 + $0x4304] ss:$72 sps:$4 sm:$0xff]  }
 0x304   :  { %15006 = vmatpush1.bf16.msra.mxu1 %v21793_v7  ;;  %v21859_v7 = vld [vmem:[#allocation2 + $0xd08] ss:$72 sps:$4 sm:$0xff]  }
 0x305   :  { %14920 = vmatpush1.bf16.msra.mxu0 %v21790_v5  ;;  %15007 = vmatprep.subr.bf16.mxu1 %v21801_v13  ;;  %v21856_v5 = vld [vmem:[#allocation2 + $0x4300] ss:$72 sps:$4 sm:$0xff]   ;;  %v21867_v13 = vld [vmem:[#allocation2 + $0xd9c] ss:$72 sps:$4 sm:$0xff]  }
 0x306   :  { %14921 = vmatprep.subr.bf16.mxu0 %v21798_v12  ;;  %v21864_v12 = vld [vmem:[#allocation2 + $0x4394] ss:$72 sps:$4 sm:$0xff]  }
 0x308   :  { %15008 = vmatpush1.bf16.msra.mxu1 %v21799_v20  ;;  %v21865_v20 = vld [vmem:[#allocation2 + $0xd98] ss:$72 sps:$4 sm:$0xff]  }
 0x309   :  { %14922 = vmatpush1.bf16.msra.mxu0 %v21796_v17  ;;  %15009 = vmatprep.subr.bf16.mxu1 %v21807_v24  ;;  %v21862_v17 = vld [vmem:[#allocation2 + $0x4390] ss:$72 sps:$4 sm:$0xff]   ;;  %v21873_v24 = vld [vmem:[#allocation2 + $0xe2c] ss:$72 sps:$4 sm:$0xff]  }
 0x30a   :  { %14923 = vmatprep.subr.bf16.mxu0 %v21804_v21  ;;  %v21870_v21 = vld [vmem:[#allocation2 + $0x4424] ss:$72 sps:$4 sm:$0xff]  }
 0x30c   :  { %15010 = vmatpush1.bf16.msra.mxu1 %v21805_v25  ;;  %v21871_v25 = vld [vmem:[#allocation2 + $0xe28] ss:$72 sps:$4 sm:$0xff]  }
 0x30d   :  { %14924 = vmatpush1.bf16.msra.mxu0 %v21802_v14  ;;  %15011 = vmatprep.subr.bf16.mxu1 %v21813_v27  ;;  %v21868_v14 = vld [vmem:[#allocation2 + $0x4420] ss:$72 sps:$4 sm:$0xff]   ;;  %v21879_v27 = vld [vmem:[#allocation2 + $0xebc] ss:$72 sps:$4 sm:$0xff]  }
 0x30e   :  { %14925 = vmatprep.subr.bf16.mxu0 %v21810_v26  ;;  %v21876_v26 = vld [vmem:[#allocation2 + $0x44b4] ss:$72 sps:$4 sm:$0xff]  }
 0x310   :  { %15012 = vmatpush1.bf16.msra.mxu1 %v21811_v1  ;;  %v21877_v1 = vld [vmem:[#allocation2 + $0xeb8] ss:$72 sps:$4 sm:$0xff]  }
 0x311   :  { %14926 = vmatpush1.bf16.msra.mxu0 %v21808_v15  ;;  %15024 = vmatprep.subr.bf16.mxu1 %v21819_v32  ;;  %v21874_v15 = vld [vmem:[#allocation2 + $0x44b0] ss:$72 sps:$4 sm:$0xff]   ;;  %v21885_v32 = vld [vmem:[#allocation2 + $0xf4c] ss:$72 sps:$4 sm:$0xff]  }
 0x312   :  { %14938 = vmatprep.subr.bf16.mxu0 %v21816_v2  ;;  %v21882_v2 = vld [vmem:[#allocation2 + $0x4544] ss:$72 sps:$4 sm:$0xff]  }
 0x313   :  { %15014 = vmatmul.mubr.bf16.vlgmr.msra.gmra.mrb[8].mxu1 %v24269_v10 }
 0x314   :  { %14928 = vmatmul.mubr.bf16.vlgmr.msra.gmra.mrb[4].mxu0 %v24373_v0  ;;  %15025 = vmatpush1.bf16.msra.mxu1 %v21817_v35  ;;  %v21883_v35 = vld [vmem:[#allocation2 + $0xf48] ss:$72 sps:$4 sm:$0xff]  }
 0x315   :  { %14939 = vmatpush1.bf16.msra.mxu0 %v21814_v16  ;;  %15026 = vmatprep.subr.bf16.mxu1 %v21825_v37  ;;  %v21880_v16 = vld [vmem:[#allocation2 + $0x4540] ss:$72 sps:$4 sm:$0xff]   ;;  %v21891_v37 = vld [vmem:[#allocation2 + $0xfdc] ss:$72 sps:$4 sm:$0xff]  }
 0x316   :  { %14940 = vmatprep.subr.bf16.mxu0 %v21822_v36  ;;  %14970 = vmatprep.mubr.bf16.mxu0 %v24387_v44  ;;  %v21888_v36 = vld [vmem:[#allocation2 + $0x45d4] ss:$72 sps:$4 sm:$0xff]  }
 0x317   :  { %15056 = vmatprep.mubr.bf16.mxu1 %v24287_v40 }
 0x318   :  { %15027 = vmatpush1.bf16.msra.mxu1 %v21823_v39  ;;  %v21889_v39 = vld [vmem:[#allocation2 + $0xfd8] ss:$72 sps:$4 sm:$0xff]  }
 0x319   :  { %14941 = vmatpush1.bf16.msra.mxu0 %v21820_v38  ;;  %15028 = vmatprep.subr.bf16.mxu1 %v21831_v42  ;;  %v21886_v38 = vld [vmem:[#allocation2 + $0x45d0] ss:$72 sps:$4 sm:$0xff]   ;;  %v21897_v42 = vld [vmem:[#allocation2 + $0x106c] ss:$72 sps:$4 sm:$0xff]  }
 0x31a   :  { %14942 = vmatprep.subr.bf16.mxu0 %v21828_v41  ;;  %v21894_v41 = vld [vmem:[#allocation2 + $0x4664] ss:$72 sps:$4 sm:$0xff]  }
 0x31c   :  { %15029 = vmatpush1.bf16.msra.mxu1 %v21829_v49  ;;  %v21895_v49 = vld [vmem:[#allocation2 + $0x1068] ss:$72 sps:$4 sm:$0xff]  }
 0x31d   :  { %14943 = vmatpush1.bf16.msra.mxu0 %v21826_v48  ;;  %15030 = vmatprep.subr.bf16.mxu1 %v21837_v51  ;;  %v21892_v48 = vld [vmem:[#allocation2 + $0x4660] ss:$72 sps:$4 sm:$0xff]   ;;  %v21903_v51 = vld [vmem:[#allocation2 + $0x10fc] ss:$72 sps:$4 sm:$0xff]  }
 0x31e   :  { %14944 = vmatprep.subr.bf16.mxu0 %v21834_v50  ;;  %v21900_v50 = vld [vmem:[#allocation2 + $0x46f4] ss:$72 sps:$4 sm:$0xff]  }
 0x320   :  { %15031 = vmatpush1.bf16.msra.mxu1 %v21835_v30  ;;  %v21901_v30 = vld [vmem:[#allocation2 + $0x10f8] ss:$72 sps:$4 sm:$0xff]  }
 0x321   :  { %14945 = vmatpush1.bf16.msra.mxu0 %v21832_v29  ;;  %15032 = vmatprep.subr.bf16.mxu1 %v21843_v53  ;;  %v21898_v29 = vld [vmem:[#allocation2 + $0x46f0] ss:$72 sps:$4 sm:$0xff]   ;;  %v21909_v53 = vld [vmem:[#allocation2 + $0x118c] ss:$72 sps:$4 sm:$0xff]  }
 0x322   :  { %14946 = vmatprep.subr.bf16.mxu0 %v21840_v31  ;;  %v21906_v31 = vld [vmem:[#allocation2 + $0x4784] ss:$72 sps:$4 sm:$0xff]  }
 0x324   :  { %15033 = vmatpush1.bf16.msra.mxu1 %v21841_v56  ;;  %v21907_v56 = vld [vmem:[#allocation2 + $0x1188] ss:$72 sps:$4 sm:$0xff]  }
 0x325   :  { %14947 = vmatpush1.bf16.msra.mxu0 %v21838_v54  ;;  %15034 = vmatprep.subr.bf16.mxu1 %v21849_v58  ;;  %v21904_v54 = vld [vmem:[#allocation2 + $0x4780] ss:$72 sps:$4 sm:$0xff]   ;;  %v21915_v58 = vld [vmem:[#allocation2 + $0x24] ss:$72 sps:$4 sm:$0xff]  }
 0x326   :  { %14948 = vmatprep.subr.bf16.mxu0 %v21846_v57  ;;  %v21912_v57 = vld [vmem:[#allocation2 + $0x121c] ss:$72 sps:$4 sm:$0xff]  }
 0x328   :  { %15035 = vmatpush1.bf16.msra.mxu1 %v21847_v60  ;;  %v21913_v60 = vld [vmem:[#allocation2 + $0x20] ss:$72 sps:$4 sm:$0xff]  }
 0x329   :  { %14949 = vmatpush1.bf16.msra.mxu0 %v21844_v59  ;;  %15036 = vmatprep.subr.bf16.mxu1 %v21855_v62  ;;  %v21910_v59 = vld [vmem:[#allocation2 + $0x1218] ss:$72 sps:$4 sm:$0xff]   ;;  %v21921_v62 = vld [vmem:[#allocation2 + $0xb4] ss:$72 sps:$4 sm:$0xff]  }
 0x32a   :  { %14950 = vmatprep.subr.bf16.mxu0 %v21852_v61  ;;  %v21918_v61 = vld [vmem:[#allocation2 + $0x12ac] ss:$72 sps:$4 sm:$0xff]  }
 0x32c   :  { %15037 = vmatpush1.bf16.msra.mxu1 %v21853_v3  ;;  %v21919_v3 = vld [vmem:[#allocation2 + $0xb0] ss:$72 sps:$4 sm:$0xff]  }
 0x32d   :  { %14951 = vmatpush1.bf16.msra.mxu0 %v21850_v63  ;;  %15038 = vmatprep.subr.bf16.mxu1 %v21861_v47  ;;  %v21916_v63 = vld [vmem:[#allocation2 + $0x12a8] ss:$72 sps:$4 sm:$0xff]   ;;  %v21927_v47 = vld [vmem:[#allocation2 + $0x144] ss:$72 sps:$4 sm:$0xff]  }
 0x32e   :  { %14952 = vmatprep.subr.bf16.mxu0 %v21858_v4  ;;  %v21924_v4 = vld [vmem:[#allocation2 + $0x133c] ss:$72 sps:$4 sm:$0xff]  }
 0x330   :  { %15039 = vmatpush1.bf16.msra.mxu1 %v21859_v7  ;;  %v21925_v7 = vld [vmem:[#allocation2 + $0x140] ss:$72 sps:$4 sm:$0xff]  }
 0x331   :  { %14953 = vmatpush1.bf16.msra.mxu0 %v21856_v5  ;;  %15040 = vmatprep.subr.bf16.mxu1 %v21867_v13  ;;  %v21922_v5 = vld [vmem:[#allocation2 + $0x1338] ss:$72 sps:$4 sm:$0xff]   ;;  %v21933_v13 = vld [vmem:[#allocation2 + $0x1d4] ss:$72 sps:$4 sm:$0xff]  }
 0x332   :  { %14954 = vmatprep.subr.bf16.mxu0 %v21864_v12  ;;  %v21930_v12 = vld [vmem:[#allocation2 + $0x13cc] ss:$72 sps:$4 sm:$0xff]  }
 0x334   :  { %15041 = vmatpush1.bf16.msra.mxu1 %v21865_v20  ;;  %v21931_v20 = vld [vmem:[#allocation2 + $0x1d0] ss:$72 sps:$4 sm:$0xff]  }
 0x335   :  { %14955 = vmatpush1.bf16.msra.mxu0 %v21862_v17  ;;  %15042 = vmatprep.subr.bf16.mxu1 %v21873_v24  ;;  %v21928_v17 = vld [vmem:[#allocation2 + $0x13c8] ss:$72 sps:$4 sm:$0xff]   ;;  %v21939_v24 = vld [vmem:[#allocation2 + $0x264] ss:$72 sps:$4 sm:$0xff]  }
 0x336   :  { %14956 = vmatprep.subr.bf16.mxu0 %v21870_v21  ;;  %v21936_v21 = vld [vmem:[#allocation2 + $0x145c] ss:$72 sps:$4 sm:$0xff]  }
 0x338   :  { %15043 = vmatpush1.bf16.msra.mxu1 %v21871_v25  ;;  %v21937_v25 = vld [vmem:[#allocation2 + $0x260] ss:$72 sps:$4 sm:$0xff]  }
 0x339   :  { %14957 = vmatpush1.bf16.msra.mxu0 %v21868_v14  ;;  %15044 = vmatprep.subr.bf16.mxu1 %v21879_v27  ;;  %v21934_v14 = vld [vmem:[#allocation2 + $0x1458] ss:$72 sps:$4 sm:$0xff]   ;;  %v21945_v27 = vld [vmem:[#allocation2 + $0x2f4] ss:$72 sps:$4 sm:$0xff]  }
 0x33a   :  { %14958 = vmatprep.subr.bf16.mxu0 %v21876_v26  ;;  %v21942_v26 = vld [vmem:[#allocation2 + $0x14ec] ss:$72 sps:$4 sm:$0xff]  }
 0x33c   :  { %15045 = vmatpush1.bf16.msra.mxu1 %v21877_v1  ;;  %v21943_v1 = vld [vmem:[#allocation2 + $0x2f0] ss:$72 sps:$4 sm:$0xff]  }
 0x33d   :  { %14959 = vmatpush1.bf16.msra.mxu0 %v21874_v15  ;;  %15046 = vmatprep.subr.bf16.mxu1 %v21885_v32  ;;  %v21940_v15 = vld [vmem:[#allocation2 + $0x14e8] ss:$72 sps:$4 sm:$0xff]   ;;  %v21951_v32 = vld [vmem:[#allocation2 + $0x384] ss:$72 sps:$4 sm:$0xff]  }
 0x33e   :  { %14960 = vmatprep.subr.bf16.mxu0 %v21882_v2  ;;  %v21948_v2 = vld [vmem:[#allocation2 + $0x157c] ss:$72 sps:$4 sm:$0xff]  }
 0x340   :  { %15047 = vmatpush1.bf16.msra.mxu1 %v21883_v35  ;;  %v21949_v35 = vld [vmem:[#allocation2 + $0x380] ss:$72 sps:$4 sm:$0xff]  }
 0x341   :  { %14961 = vmatpush1.bf16.msra.mxu0 %v21880_v16  ;;  %15048 = vmatprep.subr.bf16.mxu1 %v21891_v37  ;;  %v21946_v16 = vld [vmem:[#allocation2 + $0x1578] ss:$72 sps:$4 sm:$0xff]   ;;  %v21957_v37 = vld [vmem:[#allocation2 + $0x414] ss:$72 sps:$4 sm:$0xff]  }
 0x342   :  { %14962 = vmatprep.subr.bf16.mxu0 %v21888_v36  ;;  %v21954_v36 = vld [vmem:[#allocation2 + $0x160c] ss:$72 sps:$4 sm:$0xff]  }
 0x344   :  { %15049 = vmatpush1.bf16.msra.mxu1 %v21889_v39  ;;  %v21955_v39 = vld [vmem:[#allocation2 + $0x410] ss:$72 sps:$4 sm:$0xff]  }
 0x345   :  { %14963 = vmatpush1.bf16.msra.mxu0 %v21886_v38  ;;  %15050 = vmatprep.subr.bf16.mxu1 %v21897_v42  ;;  %v21952_v38 = vld [vmem:[#allocation2 + $0x1608] ss:$72 sps:$4 sm:$0xff]   ;;  %v21963_v42 = vld [vmem:[#allocation2 + $0x4a4] ss:$72 sps:$4 sm:$0xff]  }
 0x346   :  { %14964 = vmatprep.subr.bf16.mxu0 %v21894_v41  ;;  %v21960_v41 = vld [vmem:[#allocation2 + $0x169c] ss:$72 sps:$4 sm:$0xff]  }
 0x348   :  { %15051 = vmatpush1.bf16.msra.mxu1 %v21895_v49  ;;  %v21961_v49 = vld [vmem:[#allocation2 + $0x4a0] ss:$72 sps:$4 sm:$0xff]  }
 0x349   :  { %14965 = vmatpush1.bf16.msra.mxu0 %v21892_v48  ;;  %15052 = vmatprep.subr.bf16.mxu1 %v21903_v51  ;;  %v21958_v48 = vld [vmem:[#allocation2 + $0x1698] ss:$72 sps:$4 sm:$0xff]   ;;  %v21969_v51 = vld [vmem:[#allocation2 + $0x534] ss:$72 sps:$4 sm:$0xff]  }
 0x34a   :  { %14966 = vmatprep.subr.bf16.mxu0 %v21900_v50  ;;  %v21966_v50 = vld [vmem:[#allocation2 + $0x172c] ss:$72 sps:$4 sm:$0xff]  }
 0x34c   :  { %15053 = vmatpush1.bf16.msra.mxu1 %v21901_v30  ;;  %v21967_v30 = vld [vmem:[#allocation2 + $0x530] ss:$72 sps:$4 sm:$0xff]  }
 0x34d   :  { %14967 = vmatpush1.bf16.msra.mxu0 %v21898_v29  ;;  %15054 = vmatprep.subr.bf16.mxu1 %v21909_v53  ;;  %v21964_v29 = vld [vmem:[#allocation2 + $0x1728] ss:$72 sps:$4 sm:$0xff]   ;;  %v21975_v53 = vld [vmem:[#allocation2 + $0x5c4] ss:$72 sps:$4 sm:$0xff]  }
 0x34e   :  { %14968 = vmatprep.subr.bf16.mxu0 %v21906_v31  ;;  %v21972_v31 = vld [vmem:[#allocation2 + $0x17bc] ss:$72 sps:$4 sm:$0xff]  }
 0x350   :  { %15055 = vmatpush1.bf16.msra.mxu1 %v21907_v56  ;;  %v21973_v56 = vld [vmem:[#allocation2 + $0x5c0] ss:$72 sps:$4 sm:$0xff]  }
 0x351   :  { %14969 = vmatpush1.bf16.msra.mxu0 %v21904_v54  ;;  %15067 = vmatprep.subr.bf16.mxu1 %v21912_v57  ;;  %v21970_v54 = vld [vmem:[#allocation2 + $0x17b8] ss:$72 sps:$4 sm:$0xff]   ;;  %v21978_v57 = vld [vmem:[#allocation2 + $0x184c] ss:$72 sps:$4 sm:$0xff]  }
 0x352   :  { %15325 = vmatprep.subr.bf16.mxu0 %v21915_v58  ;;  %v21981_v58 = vld [vmem:[#allocation2 + $0x654] ss:$72 sps:$4 sm:$0xff]  }
 0x353   :  { %15057 = vmatmul.mubr.bf16.vlgmr.msra.gmra.mrb[8].mxu1 %v24307_v22 }
 0x354   :  { %14971 = vmatmul.mubr.bf16.vlgmr.msra.gmra.mrb[4].mxu0 %v24395_v19  ;;  %15068 = vmatpush1.bf16.msra.mxu1 %v21910_v59  ;;  %v21976_v59 = vld [vmem:[#allocation2 + $0x1848] ss:$72 sps:$4 sm:$0xff]  }
 0x355   :  { %15326 = vmatpush1.bf16.msra.mxu0 %v21913_v60  ;;  %15069 = vmatprep.subr.bf16.mxu1 %v21918_v61  ;;  %v21979_v60 = vld [vmem:[#allocation2 + $0x650] ss:$72 sps:$4 sm:$0xff]   ;;  %v21984_v61 = vld [vmem:[#allocation2 + $0x18dc] ss:$72 sps:$4 sm:$0xff]  }
 0x356   :  { %15327 = vmatprep.subr.bf16.mxu0 %v21921_v62  ;;  %15099 = vmatprep.mubr.bf16.mxu1 %v24337_v33  ;;  %v21987_v62 = vld [vmem:[#allocation2 + $0x6e4] ss:$72 sps:$4 sm:$0xff]  }
 0x357   :  { %15357 = vmatprep.mubr.bf16.mxu0 %v24257_v52 }
 0x358   :  { %15070 = vmatpush1.bf16.msra.mxu1 %v21916_v63  ;;  %v21982_v63 = vld [vmem:[#allocation2 + $0x18d8] ss:$72 sps:$4 sm:$0xff]  }
 0x359   :  { %15328 = vmatpush1.bf16.msra.mxu0 %v21919_v3  ;;  %15071 = vmatprep.subr.bf16.mxu1 %v21924_v4  ;;  %v21985_v3 = vld [vmem:[#allocation2 + $0x6e0] ss:$72 sps:$4 sm:$0xff]   ;;  %v21990_v4 = vld [vmem:[#allocation2 + $0x196c] ss:$72 sps:$4 sm:$0xff]  }
 0x35a   :  { %15329 = vmatprep.subr.bf16.mxu0 %v21927_v47  ;;  %v21993_v47 = vld [vmem:[#allocation2 + $0x774] ss:$72 sps:$4 sm:$0xff]  }
 0x35c   :  { %15072 = vmatpush1.bf16.msra.mxu1 %v21922_v5  ;;  %v21988_v5 = vld [vmem:[#allocation2 + $0x1968] ss:$72 sps:$4 sm:$0xff]  }
 0x35d   :  { %15330 = vmatpush1.bf16.msra.mxu0 %v21925_v7  ;;  %15073 = vmatprep.subr.bf16.mxu1 %v21930_v12  ;;  %v21991_v7 = vld [vmem:[#allocation2 + $0x770] ss:$72 sps:$4 sm:$0xff]   ;;  %v21996_v12 = vld [vmem:[#allocation2 + $0x19fc] ss:$72 sps:$4 sm:$0xff]  }
 0x35e   :  { %15331 = vmatprep.subr.bf16.mxu0 %v21933_v13  ;;  %v21999_v13 = vld [vmem:[#allocation2 + $0x804] ss:$72 sps:$4 sm:$0xff]  }
 0x360   :  { %15074 = vmatpush1.bf16.msra.mxu1 %v21928_v17  ;;  %v21994_v17 = vld [vmem:[#allocation2 + $0x19f8] ss:$72 sps:$4 sm:$0xff]  }
 0x361   :  { %15332 = vmatpush1.bf16.msra.mxu0 %v21931_v20  ;;  %15075 = vmatprep.subr.bf16.mxu1 %v21936_v21  ;;  %v21997_v20 = vld [vmem:[#allocation2 + $0x800] ss:$72 sps:$4 sm:$0xff]   ;;  %v22002_v21 = vld [vmem:[#allocation2 + $0x1a8c] ss:$72 sps:$4 sm:$0xff]  }
 0x362   :  { %15333 = vmatprep.subr.bf16.mxu0 %v21939_v24  ;;  %v22005_v24 = vld [vmem:[#allocation2 + $0x894] ss:$72 sps:$4 sm:$0xff]  }
 0x364   :  { %15076 = vmatpush1.bf16.msra.mxu1 %v21934_v14  ;;  %v22000_v14 = vld [vmem:[#allocation2 + $0x1a88] ss:$72 sps:$4 sm:$0xff]  }
 0x365   :  { %15334 = vmatpush1.bf16.msra.mxu0 %v21937_v25  ;;  %15077 = vmatprep.subr.bf16.mxu1 %v21942_v26  ;;  %v22003_v25 = vld [vmem:[#allocation2 + $0x890] ss:$72 sps:$4 sm:$0xff]   ;;  %v22008_v26 = vld [vmem:[#allocation2 + $0x1b1c] ss:$72 sps:$4 sm:$0xff]  }
 0x366   :  { %15335 = vmatprep.subr.bf16.mxu0 %v21945_v27  ;;  %v22011_v27 = vld [vmem:[#allocation2 + $0x924] ss:$72 sps:$4 sm:$0xff]  }
 0x368   :  { %15078 = vmatpush1.bf16.msra.mxu1 %v21940_v15  ;;  %v22006_v15 = vld [vmem:[#allocation2 + $0x1b18] ss:$72 sps:$4 sm:$0xff]  }
 0x369   :  { %15336 = vmatpush1.bf16.msra.mxu0 %v21943_v1  ;;  %15079 = vmatprep.subr.bf16.mxu1 %v21948_v2  ;;  %v22009_v1 = vld [vmem:[#allocation2 + $0x920] ss:$72 sps:$4 sm:$0xff]   ;;  %v22014_v2 = vld [vmem:[#allocation2 + $0x1bac] ss:$72 sps:$4 sm:$0xff]  }
 0x36a   :  { %15337 = vmatprep.subr.bf16.mxu0 %v21951_v32  ;;  %v22017_v32 = vld [vmem:[#allocation2 + $0x9b4] ss:$72 sps:$4 sm:$0xff]  }
 0x36c   :  { %15080 = vmatpush1.bf16.msra.mxu1 %v21946_v16  ;;  %v22012_v16 = vld [vmem:[#allocation2 + $0x1ba8] ss:$72 sps:$4 sm:$0xff]  }
 0x36d   :  { %15338 = vmatpush1.bf16.msra.mxu0 %v21949_v35  ;;  %15081 = vmatprep.subr.bf16.mxu1 %v21954_v36  ;;  %v22015_v35 = vld [vmem:[#allocation2 + $0x9b0] ss:$72 sps:$4 sm:$0xff]   ;;  %v22020_v36 = vld [vmem:[#allocation2 + $0x1c3c] ss:$72 sps:$4 sm:$0xff]  }
 0x36e   :  { %15339 = vmatprep.subr.bf16.mxu0 %v21957_v37  ;;  %v22023_v37 = vld [vmem:[#allocation2 + $0xa44] ss:$72 sps:$4 sm:$0xff]  }
 0x370   :  { %15082 = vmatpush1.bf16.msra.mxu1 %v21952_v38  ;;  %v22018_v38 = vld [vmem:[#allocation2 + $0x1c38] ss:$72 sps:$4 sm:$0xff]  }
 0x371   :  { %15340 = vmatpush1.bf16.msra.mxu0 %v21955_v39  ;;  %15083 = vmatprep.subr.bf16.mxu1 %v21960_v41  ;;  %v22021_v39 = vld [vmem:[#allocation2 + $0xa40] ss:$72 sps:$4 sm:$0xff]   ;;  %v22026_v41 = vld [vmem:[#allocation2 + $0x1ccc] ss:$72 sps:$4 sm:$0xff]  }
 0x372   :  { %15341 = vmatprep.subr.bf16.mxu0 %v21963_v42  ;;  %v22029_v42 = vld [vmem:[#allocation2 + $0xad4] ss:$72 sps:$4 sm:$0xff]  }
 0x374   :  { %15084 = vmatpush1.bf16.msra.mxu1 %v21958_v48  ;;  %v22024_v48 = vld [vmem:[#allocation2 + $0x1cc8] ss:$72 sps:$4 sm:$0xff]  }
 0x375   :  { %15342 = vmatpush1.bf16.msra.mxu0 %v21961_v49  ;;  %15085 = vmatprep.subr.bf16.mxu1 %v21966_v50  ;;  %v22027_v49 = vld [vmem:[#allocation2 + $0xad0] ss:$72 sps:$4 sm:$0xff]   ;;  %v22032_v50 = vld [vmem:[#allocation2 + $0x1d5c] ss:$72 sps:$4 sm:$0xff]  }
 0x376   :  { %15343 = vmatprep.subr.bf16.mxu0 %v21969_v51  ;;  %v22035_v51 = vld [vmem:[#allocation2 + $0xb64] ss:$72 sps:$4 sm:$0xff]  }
 0x378   :  { %15086 = vmatpush1.bf16.msra.mxu1 %v21964_v29  ;;  %v22030_v29 = vld [vmem:[#allocation2 + $0x1d58] ss:$72 sps:$4 sm:$0xff]  }
 0x379   :  { %15344 = vmatpush1.bf16.msra.mxu0 %v21967_v30  ;;  %15087 = vmatprep.subr.bf16.mxu1 %v21972_v31  ;;  %v22033_v30 = vld [vmem:[#allocation2 + $0xb60] ss:$72 sps:$4 sm:$0xff]   ;;  %v22038_v31 = vld [vmem:[#allocation2 + $0x1dec] ss:$72 sps:$4 sm:$0xff]  }
 0x37a   :  { %15345 = vmatprep.subr.bf16.mxu0 %v21975_v53  ;;  %v22041_v53 = vld [vmem:[#allocation2 + $0xbf4] ss:$72 sps:$4 sm:$0xff]  }
 0x37c   :  { %15088 = vmatpush1.bf16.msra.mxu1 %v21970_v54  ;;  %v22036_v54 = vld [vmem:[#allocation2 + $0x1de8] ss:$72 sps:$4 sm:$0xff]  }
 0x37d   :  { %15346 = vmatpush1.bf16.msra.mxu0 %v21973_v56  ;;  %15089 = vmatprep.subr.bf16.mxu1 %v21978_v57  ;;  %v22039_v56 = vld [vmem:[#allocation2 + $0xbf0] ss:$72 sps:$4 sm:$0xff]   ;;  %v22044_v57 = vld [vmem:[#allocation2 + $0x1e7c] ss:$72 sps:$4 sm:$0xff]  }
 0x37e   :  { %15347 = vmatprep.subr.bf16.mxu0 %v21981_v58  ;;  %v22047_v58 = vld [vmem:[#allocation2 + $0xc84] ss:$72 sps:$4 sm:$0xff]  }
 0x380   :  { %15090 = vmatpush1.bf16.msra.mxu1 %v21976_v59 }
 0x381   :  { %15348 = vmatpush1.bf16.msra.mxu0 %v21979_v60  ;;  %15091 = vmatprep.subr.bf16.mxu1 %v21984_v61  ;;  %v22042_v60 = vld [vmem:[#allocation2 + $0x1e78] ss:$72 sps:$4 sm:$0xff]  }
 0x382   :  { %15349 = vmatprep.subr.bf16.mxu0 %v21987_v62  ;;  %v22045_v61 = vld [vmem:[#allocation2 + $0xc80] ss:$72 sps:$4 sm:$0xff]  }
 0x384   :  { %15092 = vmatpush1.bf16.msra.mxu1 %v21982_v63 }
 0x385   :  { %15350 = vmatpush1.bf16.msra.mxu0 %v21985_v3  ;;  %15093 = vmatprep.subr.bf16.mxu1 %v21990_v4  ;;  %v22050_v4 = vld [vmem:[#allocation2 + $0x1f0c] ss:$72 sps:$4 sm:$0xff]  }
 0x386   :  { %15351 = vmatprep.subr.bf16.mxu0 %v21993_v47  ;;  %v22053_v47 = vld [vmem:[#allocation2 + $0xd14] ss:$72 sps:$4 sm:$0xff]  }
 0x388   :  { %15094 = vmatpush1.bf16.msra.mxu1 %v21988_v5  ;;  %v22048_v5 = vld [vmem:[#allocation2 + $0x1f08] ss:$72 sps:$4 sm:$0xff]  }
 0x389   :  { %15352 = vmatpush1.bf16.msra.mxu0 %v21991_v7  ;;  %15095 = vmatprep.subr.bf16.mxu1 %v21996_v12  ;;  %v22051_v7 = vld [vmem:[#allocation2 + $0xd10] ss:$72 sps:$4 sm:$0xff]   ;;  %v22056_v12 = vld [vmem:[#allocation2 + $0x1f9c] ss:$72 sps:$4 sm:$0xff]  }
 0x38a   :  { %15353 = vmatprep.subr.bf16.mxu0 %v21999_v13  ;;  %v22059_v13 = vld [vmem:[#allocation2 + $0xda4] ss:$72 sps:$4 sm:$0xff]  }
 0x38c   :  { %15096 = vmatpush1.bf16.msra.mxu1 %v21994_v17  ;;  %v22054_v17 = vld [vmem:[#allocation2 + $0x1f98] ss:$72 sps:$4 sm:$0xff]  }
 0x38d   :  { %15354 = vmatpush1.bf16.msra.mxu0 %v21997_v20  ;;  %15097 = vmatprep.subr.bf16.mxu1 %v22002_v21  ;;  %v22057_v20 = vld [vmem:[#allocation2 + $0xda0] ss:$72 sps:$4 sm:$0xff]   ;;  %v22062_v21 = vld [vmem:[#allocation2 + $0x202c] ss:$72 sps:$4 sm:$0xff]  }
 0x38e   :  { %15355 = vmatprep.subr.bf16.mxu0 %v22005_v24  ;;  %v22065_v24 = vld [vmem:[#allocation2 + $0xe34] ss:$72 sps:$4 sm:$0xff]  }
 0x390   :  { %15098 = vmatpush1.bf16.msra.mxu1 %v22000_v14  ;;  %v22060_v14 = vld [vmem:[#allocation2 + $0x2028] ss:$72 sps:$4 sm:$0xff]  }
 0x391   :  { %15356 = vmatpush1.bf16.msra.mxu0 %v22003_v25  ;;  %15110 = vmatprep.subr.bf16.mxu1 %v22008_v26  ;;  %v22063_v25 = vld [vmem:[#allocation2 + $0xe30] ss:$72 sps:$4 sm:$0xff]   ;;  %v22068_v26 = vld [vmem:[#allocation2 + $0x20bc] ss:$72 sps:$4 sm:$0xff]  }
 0x392   :  { %15368 = vmatprep.subr.bf16.mxu0 %v22011_v27  ;;  %v22071_v27 = vld [vmem:[#allocation2 + $0xec4] ss:$72 sps:$4 sm:$0xff]  }
 0x393   :  { %15100 = vmatmul.mubr.bf16.vlgmr.msra.gmra.mrb[8].mxu1 %v24352_v45 }
 0x394   :  { %15358 = vmatmul.mubr.bf16.vlgmr.msra.gmra.mrb[8].mxu0 %v24269_v10  ;;  %15111 = vmatpush1.bf16.msra.mxu1 %v22006_v15  ;;  %v22066_v15 = vld [vmem:[#allocation2 + $0x20b8] ss:$72 sps:$4 sm:$0xff]  }
 0x395   :  { %15369 = vmatpush1.bf16.msra.mxu0 %v22009_v1  ;;  %15112 = vmatprep.subr.bf16.mxu1 %v22014_v2  ;;  %v22069_v1 = vld [vmem:[#allocation2 + $0xec0] ss:$72 sps:$4 sm:$0xff]   ;;  %v22074_v2 = vld [vmem:[#allocation2 + $0x214c] ss:$72 sps:$4 sm:$0xff]  }
 0x396   :  { %15370 = vmatprep.subr.bf16.mxu0 %v22017_v32  ;;  %15142 = vmatprep.mubr.bf16.mxu1 %v24266_v55  ;;  %v22077_v32 = vld [vmem:[#allocation2 + $0xf54] ss:$72 sps:$4 sm:$0xff]  }
 0x397   :  { %15400 = vmatprep.mubr.bf16.mxu0 %v24287_v40 }
 0x398   :  { %15113 = vmatpush1.bf16.msra.mxu1 %v22012_v16  ;;  %v22072_v16 = vld [vmem:[#allocation2 + $0x2148] ss:$72 sps:$4 sm:$0xff]  }
 0x399   :  { %15371 = vmatpush1.bf16.msra.mxu0 %v22015_v35  ;;  %15114 = vmatprep.subr.bf16.mxu1 %v22020_v36  ;;  %v22075_v35 = vld [vmem:[#allocation2 + $0xf50] ss:$72 sps:$4 sm:$0xff]   ;;  %v22080_v36 = vld [vmem:[#allocation2 + $0x21dc] ss:$72 sps:$4 sm:$0xff]  }
 0x39a   :  { %15372 = vmatprep.subr.bf16.mxu0 %v22023_v37  ;;  %v22083_v37 = vld [vmem:[#allocation2 + $0xfe4] ss:$72 sps:$4 sm:$0xff]  }
 0x39c   :  { %15115 = vmatpush1.bf16.msra.mxu1 %v22018_v38  ;;  %v22078_v38 = vld [vmem:[#allocation2 + $0x21d8] ss:$72 sps:$4 sm:$0xff]  }
 0x39d   :  { %15373 = vmatpush1.bf16.msra.mxu0 %v22021_v39  ;;  %15116 = vmatprep.subr.bf16.mxu1 %v22026_v41  ;;  %v22081_v39 = vld [vmem:[#allocation2 + $0xfe0] ss:$72 sps:$4 sm:$0xff]   ;;  %v22086_v41 = vld [vmem:[#allocation2 + $0x226c] ss:$72 sps:$4 sm:$0xff]  }
 0x39e   :  { %15374 = vmatprep.subr.bf16.mxu0 %v22029_v42  ;;  %v22089_v42 = vld [vmem:[#allocation2 + $0x1074] ss:$72 sps:$4 sm:$0xff]  }
 0x3a0   :  { %15117 = vmatpush1.bf16.msra.mxu1 %v22024_v48  ;;  %v22084_v48 = vld [vmem:[#allocation2 + $0x2268] ss:$72 sps:$4 sm:$0xff]  }
 0x3a1   :  { %15375 = vmatpush1.bf16.msra.mxu0 %v22027_v49  ;;  %15118 = vmatprep.subr.bf16.mxu1 %v22032_v50  ;;  %v22087_v49 = vld [vmem:[#allocation2 + $0x1070] ss:$72 sps:$4 sm:$0xff]   ;;  %v22092_v50 = vld [vmem:[#allocation2 + $0x22fc] ss:$72 sps:$4 sm:$0xff]  }
 0x3a2   :  { %15376 = vmatprep.subr.bf16.mxu0 %v22035_v51  ;;  %v22095_v51 = vld [vmem:[#allocation2 + $0x1104] ss:$72 sps:$4 sm:$0xff]  }
 0x3a4   :  { %15119 = vmatpush1.bf16.msra.mxu1 %v22030_v29  ;;  %v22090_v29 = vld [vmem:[#allocation2 + $0x22f8] ss:$72 sps:$4 sm:$0xff]  }
 0x3a5   :  { %15377 = vmatpush1.bf16.msra.mxu0 %v22033_v30  ;;  %15120 = vmatprep.subr.bf16.mxu1 %v22038_v31  ;;  %v22093_v30 = vld [vmem:[#allocation2 + $0x1100] ss:$72 sps:$4 sm:$0xff]   ;;  %v22098_v31 = vld [vmem:[#allocation2 + $0x238c] ss:$72 sps:$4 sm:$0xff]  }
 0x3a6   :  { %15378 = vmatprep.subr.bf16.mxu0 %v22041_v53  ;;  %v24457_v59 = vpop.f32.mrb[4].mxu1  ;;  %v22101_v53 = vld [vmem:[#allocation2 + $0x1194] ss:$72 sps:$4 sm:$0xff]  }
 0x3a7   :  { %v24459_v62 = vpop.f32.mrb[5].mxu1 }
 0x3a8   :  { %v24461_v63 = vpop.f32.mrb[6].mxu1  ;;  %15121 = vmatpush1.bf16.msra.mxu1 %v22036_v54  ;;  %v22096_v54 = vld [vmem:[#allocation2 + $0x2388] ss:$72 sps:$4 sm:$0xff]  }
 0x3a9   :  { %15379 = vmatpush1.bf16.msra.mxu0 %v22039_v56  ;;  %v24463_v3 = vpop.f32.mrb[7].mxu1  ;;  %15122 = vmatprep.subr.bf16.mxu1 %v22044_v57  ;;  %v22099_v56 = vld [vmem:[#allocation2 + $0x1190] ss:$72 sps:$4 sm:$0xff]   ;;  %v22104_v57 = vld [vmem:[#allocation2 + $0x241c] ss:$72 sps:$4 sm:$0xff]  }
 0x3aa   :  { %15380 = vmatprep.subr.bf16.mxu0 %v22047_v58  ;;  %v22107_v58 = vld [vmem:[#allocation2 + $0x1224] ss:$72 sps:$4 sm:$0xff]  }
 0x3ac   :  { %15123 = vmatpush1.bf16.msra.mxu1 %v22042_v60  ;;  %v22102_v60 = vld [vmem:[#allocation2 + $0x2418] ss:$72 sps:$4 sm:$0xff]  }
 0x3ad   :  { %15381 = vmatpush1.bf16.msra.mxu0 %v22045_v61  ;;  %15124 = vmatprep.subr.bf16.mxu1 %v22050_v4  ;;  %v22105_v61 = vld [vmem:[#allocation2 + $0x1220] ss:$72 sps:$4 sm:$0xff]   ;;  %v22110_v4 = vld [vmem:[#allocation2 + $0x24ac] ss:$72 sps:$4 sm:$0xff]  }
 0x3ae   :  { %15382 = vmatprep.subr.bf16.mxu0 %v22053_v47  ;;  %v22113_v47 = vld [vmem:[#allocation2 + $0x12b4] ss:$72 sps:$4 sm:$0xff]  }
 0x3b0   :  { %15125 = vmatpush1.bf16.msra.mxu1 %v22048_v5  ;;  %v22108_v5 = vld [vmem:[#allocation2 + $0x24a8] ss:$72 sps:$4 sm:$0xff]  }
 0x3b1   :  { %15383 = vmatpush1.bf16.msra.mxu0 %v22051_v7  ;;  %15126 = vmatprep.subr.bf16.mxu1 %v22056_v12  ;;  %v22111_v7 = vld [vmem:[#allocation2 + $0x12b0] ss:$72 sps:$4 sm:$0xff]   ;;  %v22116_v12 = vld [vmem:[#allocation2 + $0x253c] ss:$72 sps:$4 sm:$0xff]  }
 0x3b2   :  { %15384 = vmatprep.subr.bf16.mxu0 %v22059_v13  ;;  %v22119_v13 = vld [vmem:[#allocation2 + $0x1344] ss:$72 sps:$4 sm:$0xff]  }
 0x3b4   :  { %15127 = vmatpush1.bf16.msra.mxu1 %v22054_v17  ;;  %v22114_v17 = vld [vmem:[#allocation2 + $0x2538] ss:$72 sps:$4 sm:$0xff]  }
 0x3b5   :  { %15385 = vmatpush1.bf16.msra.mxu0 %v22057_v20  ;;  %15128 = vmatprep.subr.bf16.mxu1 %v22062_v21  ;;  %v22117_v20 = vld [vmem:[#allocation2 + $0x1340] ss:$72 sps:$4 sm:$0xff]   ;;  %v22122_v21 = vld [vmem:[#allocation2 + $0x25cc] ss:$72 sps:$4 sm:$0xff]  }
 0x3b6   :  { %15386 = vmatprep.subr.bf16.mxu0 %v22065_v24  ;;  %v22125_v24 = vld [vmem:[#allocation2 + $0x13d4] ss:$72 sps:$4 sm:$0xff]  }
 0x3b8   :  { %15129 = vmatpush1.bf16.msra.mxu1 %v22060_v14  ;;  %v22120_v14 = vld [vmem:[#allocation2 + $0x25c8] ss:$72 sps:$4 sm:$0xff]  }
 0x3b9   :  { %15387 = vmatpush1.bf16.msra.mxu0 %v22063_v25  ;;  %15130 = vmatprep.subr.bf16.mxu1 %v22068_v26  ;;  %v22123_v25 = vld [vmem:[#allocation2 + $0x13d0] ss:$72 sps:$4 sm:$0xff]   ;;  %v22128_v26 = vld [vmem:[#allocation2 + $0x265c] ss:$72 sps:$4 sm:$0xff]  }
 0x3ba   :  { %15388 = vmatprep.subr.bf16.mxu0 %v22071_v27  ;;  %v22131_v27 = vld [vmem:[#allocation2 + $0x1464] ss:$72 sps:$4 sm:$0xff]  }
 0x3bc   :  { %15131 = vmatpush1.bf16.msra.mxu1 %v22066_v15  ;;  %v22126_v15 = vld [vmem:[#allocation2 + $0x2658] ss:$72 sps:$4 sm:$0xff]  }
 0x3bd   :  { %15389 = vmatpush1.bf16.msra.mxu0 %v22069_v1  ;;  %15132 = vmatprep.subr.bf16.mxu1 %v22074_v2  ;;  %v22129_v1 = vld [vmem:[#allocation2 + $0x1460] ss:$72 sps:$4 sm:$0xff]   ;;  %v22134_v2 = vld [vmem:[#allocation2 + $0x26ec] ss:$72 sps:$4 sm:$0xff]  }
 0x3be   :  { %15390 = vmatprep.subr.bf16.mxu0 %v22077_v32  ;;  %v22137_v32 = vld [vmem:[#allocation2 + $0x14f4] ss:$72 sps:$4 sm:$0xff]  }
 0x3c0   :  { %15133 = vmatpush1.bf16.msra.mxu1 %v22072_v16  ;;  %v22132_v16 = vld [vmem:[#allocation2 + $0x26e8] ss:$72 sps:$4 sm:$0xff]  }
 0x3c1   :  { %15391 = vmatpush1.bf16.msra.mxu0 %v22075_v35  ;;  %15134 = vmatprep.subr.bf16.mxu1 %v22080_v36  ;;  %v22135_v35 = vld [vmem:[#allocation2 + $0x14f0] ss:$72 sps:$4 sm:$0xff]   ;;  %v22140_v36 = vld [vmem:[#allocation2 + $0x277c] ss:$72 sps:$4 sm:$0xff]  }
 0x3c2   :  { %15392 = vmatprep.subr.bf16.mxu0 %v22083_v37  ;;  %v22143_v37 = vld [vmem:[#allocation2 + $0x1584] ss:$72 sps:$4 sm:$0xff]  }
 0x3c4   :  { %15135 = vmatpush1.bf16.msra.mxu1 %v22078_v38  ;;  %v22138_v38 = vld [vmem:[#allocation2 + $0x2778] ss:$72 sps:$4 sm:$0xff]  }
 0x3c5   :  { %15393 = vmatpush1.bf16.msra.mxu0 %v22081_v39  ;;  %15136 = vmatprep.subr.bf16.mxu1 %v22086_v41  ;;  %v22141_v39 = vld [vmem:[#allocation2 + $0x1580] ss:$72 sps:$4 sm:$0xff]   ;;  %v22146_v41 = vld [vmem:[#allocation2 + $0x280c] ss:$72 sps:$4 sm:$0xff]  }
 0x3c6   :  { %15394 = vmatprep.subr.bf16.mxu0 %v22089_v42  ;;  %v22149_v42 = vld [vmem:[#allocation2 + $0x1614] ss:$72 sps:$4 sm:$0xff]  }
 0x3c8   :  { %15137 = vmatpush1.bf16.msra.mxu1 %v22084_v48  ;;  %v22144_v48 = vld [vmem:[#allocation2 + $0x2808] ss:$72 sps:$4 sm:$0xff]  }
 0x3c9   :  { %15395 = vmatpush1.bf16.msra.mxu0 %v22087_v49  ;;  %15138 = vmatprep.subr.bf16.mxu1 %v22092_v50  ;;  %v22147_v49 = vld [vmem:[#allocation2 + $0x1610] ss:$72 sps:$4 sm:$0xff]   ;;  %v22152_v50 = vld [vmem:[#allocation2 + $0x289c] ss:$72 sps:$4 sm:$0xff]  }
 0x3ca   :  { %15396 = vmatprep.subr.bf16.mxu0 %v22095_v51  ;;  %v22155_v51 = vld [vmem:[#allocation2 + $0x16a4] ss:$72 sps:$4 sm:$0xff]  }
 0x3cc   :  { %15139 = vmatpush1.bf16.msra.mxu1 %v22090_v29  ;;  %v22150_v29 = vld [vmem:[#allocation2 + $0x2898] ss:$72 sps:$4 sm:$0xff]  }
 0x3cd   :  { %15397 = vmatpush1.bf16.msra.mxu0 %v22093_v30  ;;  %15140 = vmatprep.subr.bf16.mxu1 %v22098_v31  ;;  %v22153_v30 = vld [vmem:[#allocation2 + $0x16a0] ss:$72 sps:$4 sm:$0xff]   ;;  %v22158_v31 = vld [vmem:[#allocation2 + $0x292c] ss:$72 sps:$4 sm:$0xff]  }
 0x3ce   :  { %15398 = vmatprep.subr.bf16.mxu0 %v22101_v53  ;;  %v22161_v53 = vld [vmem:[#allocation2 + $0x1734] ss:$72 sps:$4 sm:$0xff]  }
 0x3d0   :  { %15141 = vmatpush1.bf16.msra.mxu1 %v22096_v54  ;;  %v22156_v54 = vld [vmem:[#allocation2 + $0x2928] ss:$72 sps:$4 sm:$0xff]  }
 0x3d1   :  { %15399 = vmatpush1.bf16.msra.mxu0 %v22099_v56  ;;  %15153 = vmatprep.subr.bf16.mxu1 %v22104_v57  ;;  %v22159_v56 = vld [vmem:[#allocation2 + $0x1730] ss:$72 sps:$4 sm:$0xff]   ;;  %v22164_v57 = vld [vmem:[#allocation2 + $0x29bc] ss:$72 sps:$4 sm:$0xff]  }
 0x3d2   :  { %15411 = vmatprep.subr.bf16.mxu0 %v22107_v58  ;;  %v22167_v58 = vld [vmem:[#allocation2 + $0x17c4] ss:$72 sps:$4 sm:$0xff]  }
 0x3d3   :  { %15143 = vmatmul.mubr.bf16.vlgmr.msra.gmra.mrb[8].mxu1 %v24271_v11 }
 0x3d4   :  { %15401 = vmatmul.mubr.bf16.vlgmr.msra.gmra.mrb[8].mxu0 %v24307_v22  ;;  %15154 = vmatpush1.bf16.msra.mxu1 %v22102_v60  ;;  %v22162_v60 = vld [vmem:[#allocation2 + $0x29b8] ss:$72 sps:$4 sm:$0xff]  }
 0x3d5   :  { %15412 = vmatpush1.bf16.msra.mxu0 %v22105_v61  ;;  %15155 = vmatprep.subr.bf16.mxu1 %v22110_v4  ;;  %v22165_v61 = vld [vmem:[#allocation2 + $0x17c0] ss:$72 sps:$4 sm:$0xff]   ;;  %v22170_v4 = vld [vmem:[#allocation2 + $0x2a4c] ss:$72 sps:$4 sm:$0xff]  }
 0x3d6   :  { %15413 = vmatprep.subr.bf16.mxu0 %v22113_v47  ;;  %15185 = vmatprep.mubr.bf16.mxu1 %v24302_v43  ;;  %v22173_v47 = vld [vmem:[#allocation2 + $0x1854] ss:$72 sps:$4 sm:$0xff]  }
 0x3d7   :  { %15443 = vmatprep.mubr.bf16.mxu0 %v24337_v33 }
 0x3d8   :  { %15156 = vmatpush1.bf16.msra.mxu1 %v22108_v5  ;;  %v22168_v5 = vld [vmem:[#allocation2 + $0x2a48] ss:$72 sps:$4 sm:$0xff]  }
 0x3d9   :  { %15414 = vmatpush1.bf16.msra.mxu0 %v22111_v7  ;;  %15157 = vmatprep.subr.bf16.mxu1 %v22116_v12  ;;  %v22171_v7 = vld [vmem:[#allocation2 + $0x1850] ss:$72 sps:$4 sm:$0xff]   ;;  %v22176_v12 = vld [vmem:[#allocation2 + $0x2adc] ss:$72 sps:$4 sm:$0xff]  }
 0x3da   :  { %15415 = vmatprep.subr.bf16.mxu0 %v22119_v13  ;;  %v22179_v13 = vld [vmem:[#allocation2 + $0x18e4] ss:$72 sps:$4 sm:$0xff]  }
 0x3dc   :  { %15158 = vmatpush1.bf16.msra.mxu1 %v22114_v17  ;;  %v22174_v17 = vld [vmem:[#allocation2 + $0x2ad8] ss:$72 sps:$4 sm:$0xff]  }
 0x3dd   :  { %15416 = vmatpush1.bf16.msra.mxu0 %v22117_v20  ;;  %15159 = vmatprep.subr.bf16.mxu1 %v22122_v21  ;;  %v22177_v20 = vld [vmem:[#allocation2 + $0x18e0] ss:$72 sps:$4 sm:$0xff]   ;;  %v22182_v21 = vld [vmem:[#allocation2 + $0x2b6c] ss:$72 sps:$4 sm:$0xff]  }
 0x3de   :  { %15417 = vmatprep.subr.bf16.mxu0 %v22125_v24  ;;  %v22185_v24 = vld [vmem:[#allocation2 + $0x1974] ss:$72 sps:$4 sm:$0xff]  }
 0x3e0   :  { %15160 = vmatpush1.bf16.msra.mxu1 %v22120_v14  ;;  %v22180_v14 = vld [vmem:[#allocation2 + $0x2b68] ss:$72 sps:$4 sm:$0xff]  }
 0x3e1   :  { %15418 = vmatpush1.bf16.msra.mxu0 %v22123_v25  ;;  %15161 = vmatprep.subr.bf16.mxu1 %v22128_v26  ;;  %v22183_v25 = vld [vmem:[#allocation2 + $0x1970] ss:$72 sps:$4 sm:$0xff]   ;;  %v22188_v26 = vld [vmem:[#allocation2 + $0x2bfc] ss:$72 sps:$4 sm:$0xff]  }
 0x3e2   :  { %15419 = vmatprep.subr.bf16.mxu0 %v22131_v27  ;;  %v22191_v27 = vld [vmem:[#allocation2 + $0x1a04] ss:$72 sps:$4 sm:$0xff]  }
 0x3e4   :  { %15162 = vmatpush1.bf16.msra.mxu1 %v22126_v15  ;;  %v22186_v15 = vld [vmem:[#allocation2 + $0x2bf8] ss:$72 sps:$4 sm:$0xff]  }
 0x3e5   :  { %15420 = vmatpush1.bf16.msra.mxu0 %v22129_v1  ;;  %15163 = vmatprep.subr.bf16.mxu1 %v22134_v2  ;;  %v22189_v1 = vld [vmem:[#allocation2 + $0x1a00] ss:$72 sps:$4 sm:$0xff]   ;;  %v22194_v2 = vld [vmem:[#allocation2 + $0x2c8c] ss:$72 sps:$4 sm:$0xff]  }
 0x3e6   :  { %15421 = vmatprep.subr.bf16.mxu0 %v22137_v32  ;;  %v22197_v32 = vld [vmem:[#allocation2 + $0x1a94] ss:$72 sps:$4 sm:$0xff]  }
 0x3e8   :  { %15164 = vmatpush1.bf16.msra.mxu1 %v22132_v16  ;;  %v22192_v16 = vld [vmem:[#allocation2 + $0x2c88] ss:$72 sps:$4 sm:$0xff]  }
 0x3e9   :  { %15422 = vmatpush1.bf16.msra.mxu0 %v22135_v35  ;;  %15165 = vmatprep.subr.bf16.mxu1 %v22140_v36  ;;  %v22195_v35 = vld [vmem:[#allocation2 + $0x1a90] ss:$72 sps:$4 sm:$0xff]   ;;  %v22200_v36 = vld [vmem:[#allocation2 + $0x2d1c] ss:$72 sps:$4 sm:$0xff]  }
 0x3ea   :  { %15423 = vmatprep.subr.bf16.mxu0 %v22143_v37  ;;  %v22203_v37 = vld [vmem:[#allocation2 + $0x1b24] ss:$72 sps:$4 sm:$0xff]  }
 0x3ec   :  { %15166 = vmatpush1.bf16.msra.mxu1 %v22138_v38  ;;  %v22198_v38 = vld [vmem:[#allocation2 + $0x2d18] ss:$72 sps:$4 sm:$0xff]  }
 0x3ed   :  { %15424 = vmatpush1.bf16.msra.mxu0 %v22141_v39  ;;  %15167 = vmatprep.subr.bf16.mxu1 %v22146_v41  ;;  %v22201_v39 = vld [vmem:[#allocation2 + $0x1b20] ss:$72 sps:$4 sm:$0xff]   ;;  %v22206_v41 = vld [vmem:[#allocation2 + $0x2dac] ss:$72 sps:$4 sm:$0xff]  }
 0x3ee   :  { %15425 = vmatprep.subr.bf16.mxu0 %v22149_v42  ;;  %v22209_v42 = vld [vmem:[#allocation2 + $0x1bb4] ss:$72 sps:$4 sm:$0xff]  }
 0x3f0   :  { %15168 = vmatpush1.bf16.msra.mxu1 %v22144_v48  ;;  %v22204_v48 = vld [vmem:[#allocation2 + $0x2da8] ss:$72 sps:$4 sm:$0xff]  }
 0x3f1   :  { %15426 = vmatpush1.bf16.msra.mxu0 %v22147_v49  ;;  %15169 = vmatprep.subr.bf16.mxu1 %v22152_v50  ;;  %v22207_v49 = vld [vmem:[#allocation2 + $0x1bb0] ss:$72 sps:$4 sm:$0xff]   ;;  %v22212_v50 = vld [vmem:[#allocation2 + $0x2e3c] ss:$72 sps:$4 sm:$0xff]  }
 0x3f2   :  { %15427 = vmatprep.subr.bf16.mxu0 %v22155_v51  ;;  %v22215_v51 = vld [vmem:[#allocation2 + $0x1c44] ss:$72 sps:$4 sm:$0xff]  }
 0x3f4   :  { %15170 = vmatpush1.bf16.msra.mxu1 %v22150_v29  ;;  %v22210_v29 = vld [vmem:[#allocation2 + $0x2e38] ss:$72 sps:$4 sm:$0xff]  }
 0x3f5   :  { %15428 = vmatpush1.bf16.msra.mxu0 %v22153_v30  ;;  %15171 = vmatprep.subr.bf16.mxu1 %v22158_v31  ;;  %v22213_v30 = vld [vmem:[#allocation2 + $0x1c40] ss:$72 sps:$4 sm:$0xff]   ;;  %v22218_v31 = vld [vmem:[#allocation2 + $0x2ecc] ss:$72 sps:$4 sm:$0xff]  }
 0x3f6   :  { %15429 = vmatprep.subr.bf16.mxu0 %v22161_v53  ;;  %v22221_v53 = vld [vmem:[#allocation2 + $0x1cd4] ss:$72 sps:$4 sm:$0xff]  }
 0x3f8   :  { %15172 = vmatpush1.bf16.msra.mxu1 %v22156_v54  ;;  %v22216_v54 = vld [vmem:[#allocation2 + $0x2ec8] ss:$72 sps:$4 sm:$0xff]  }
 0x3f9   :  { %15430 = vmatpush1.bf16.msra.mxu0 %v22159_v56  ;;  %15173 = vmatprep.subr.bf16.mxu1 %v22164_v57  ;;  %v22219_v56 = vld [vmem:[#allocation2 + $0x1cd0] ss:$72 sps:$4 sm:$0xff]   ;;  %v22224_v57 = vld [vmem:[#allocation2 + $0x2f5c] ss:$72 sps:$4 sm:$0xff]  }
 0x3fa   :  { %15431 = vmatprep.subr.bf16.mxu0 %v22167_v58  ;;  %v22227_v58 = vld [vmem:[#allocation2 + $0x1d64] ss:$72 sps:$4 sm:$0xff]  }
 0x3fc   :  { %15174 = vmatpush1.bf16.msra.mxu1 %v22162_v60  ;;  %v22222_v60 = vld [vmem:[#allocation2 + $0x2f58] ss:$72 sps:$4 sm:$0xff]  }
 0x3fd   :  { %15432 = vmatpush1.bf16.msra.mxu0 %v22165_v61  ;;  %15175 = vmatprep.subr.bf16.mxu1 %v22170_v4  ;;  %v22225_v61 = vld [vmem:[#allocation2 + $0x1d60] ss:$72 sps:$4 sm:$0xff]   ;;  %v22230_v4 = vld [vmem:[#allocation2 + $0x2fec] ss:$72 sps:$4 sm:$0xff]  }
 0x3fe   :  { %15433 = vmatprep.subr.bf16.mxu0 %v22173_v47  ;;  %v22233_v47 = vld [vmem:[#allocation2 + $0x1df4] ss:$72 sps:$4 sm:$0xff]  }
 0x400   :  { %15176 = vmatpush1.bf16.msra.mxu1 %v22168_v5  ;;  %v22228_v5 = vld [vmem:[#allocation2 + $0x2fe8] ss:$72 sps:$4 sm:$0xff]  }
 0x401   :  { %15434 = vmatpush1.bf16.msra.mxu0 %v22171_v7  ;;  %15177 = vmatprep.subr.bf16.mxu1 %v22176_v12  ;;  %v22231_v7 = vld [vmem:[#allocation2 + $0x1df0] ss:$72 sps:$4 sm:$0xff]   ;;  %v22236_v12 = vld [vmem:[#allocation2 + $0x307c] ss:$72 sps:$4 sm:$0xff]  }
 0x402   :  { %15435 = vmatprep.subr.bf16.mxu0 %v22179_v13  ;;  %v22239_v13 = vld [vmem:[#allocation2 + $0x1e84] ss:$72 sps:$4 sm:$0xff]  }
 0x404   :  { %15178 = vmatpush1.bf16.msra.mxu1 %v22174_v17 }
 0x405   :  { %15436 = vmatpush1.bf16.msra.mxu0 %v22177_v20  ;;  %15179 = vmatprep.subr.bf16.mxu1 %v22182_v21 }
 0x406   :  { %15437 = vmatprep.subr.bf16.mxu0 %v22185_v24  ;;  %v22234_v24 = vld [vmem:[#allocation2 + $0x3078] ss:$72 sps:$4 sm:$0xff]  }
 0x408   :  { %15180 = vmatpush1.bf16.msra.mxu1 %v22180_v14  ;;  %v22237_v14 = vld [vmem:[#allocation2 + $0x1e80] ss:$72 sps:$4 sm:$0xff]  }
 0x409   :  { %15438 = vmatpush1.bf16.msra.mxu0 %v22183_v25  ;;  %15181 = vmatprep.subr.bf16.mxu1 %v22188_v26  ;;  %v22242_v26 = vld [vmem:[#allocation2 + $0x310c] ss:$72 sps:$4 sm:$0xff]  }
 0x40a   :  { %15439 = vmatprep.subr.bf16.mxu0 %v22191_v27  ;;  %v22245_v27 = vld [vmem:[#allocation2 + $0x1f14] ss:$72 sps:$4 sm:$0xff]  }
 0x40c   :  { %15182 = vmatpush1.bf16.msra.mxu1 %v22186_v15  ;;  %v22240_v15 = vld [vmem:[#allocation2 + $0x3108] ss:$72 sps:$4 sm:$0xff]  }
 0x40d   :  { %15440 = vmatpush1.bf16.msra.mxu0 %v22189_v1  ;;  %15183 = vmatprep.subr.bf16.mxu1 %v22194_v2  ;;  %v22243_v1 = vld [vmem:[#allocation2 + $0x1f10] ss:$72 sps:$4 sm:$0xff]   ;;  %v22248_v2 = vld [vmem:[#allocation2 + $0x319c] ss:$72 sps:$4 sm:$0xff]  }
 0x40e   :  { %15441 = vmatprep.subr.bf16.mxu0 %v22197_v32  ;;  %v22251_v32 = vld [vmem:[#allocation2 + $0x1fa4] ss:$72 sps:$4 sm:$0xff]  }
 0x410   :  { %15184 = vmatpush1.bf16.msra.mxu1 %v22192_v16  ;;  %v22246_v16 = vld [vmem:[#allocation2 + $0x3198] ss:$72 sps:$4 sm:$0xff]  }
 0x411   :  { %15442 = vmatpush1.bf16.msra.mxu0 %v22195_v35  ;;  %15196 = vmatprep.subr.bf16.mxu1 %v22200_v36  ;;  %v22249_v35 = vld [vmem:[#allocation2 + $0x1fa0] ss:$72 sps:$4 sm:$0xff]   ;;  %v22254_v36 = vld [vmem:[#allocation2 + $0x322c] ss:$72 sps:$4 sm:$0xff]  }
 0x412   :  { %15454 = vmatprep.subr.bf16.mxu0 %v22203_v37  ;;  %v22257_v37 = vld [vmem:[#allocation2 + $0x2034] ss:$72 sps:$4 sm:$0xff]  }
 0x413   :  { %15186 = vmatmul.mubr.bf16.vlgmr.msra.gmra.mrb[8].mxu1 %v24311_v23 }
 0x414   :  { %15444 = vmatmul.mubr.bf16.vlgmr.msra.gmra.mrb[8].mxu0 %v24352_v45  ;;  %15197 = vmatpush1.bf16.msra.mxu1 %v22198_v38  ;;  %v22252_v38 = vld [vmem:[#allocation2 + $0x3228] ss:$72 sps:$4 sm:$0xff]  }
 0x415   :  { %15455 = vmatpush1.bf16.msra.mxu0 %v22201_v39  ;;  %15198 = vmatprep.subr.bf16.mxu1 %v22206_v41  ;;  %v22255_v39 = vld [vmem:[#allocation2 + $0x2030] ss:$72 sps:$4 sm:$0xff]   ;;  %v22260_v41 = vld [vmem:[#allocation2 + $0x32bc] ss:$72 sps:$4 sm:$0xff]  }
 0x416   :  { %15456 = vmatprep.subr.bf16.mxu0 %v22209_v42  ;;  %15228 = vmatprep.mubr.bf16.mxu1 %v24341_v34  ;;  %v22263_v42 = vld [vmem:[#allocation2 + $0x20c4] ss:$72 sps:$4 sm:$0xff]  }
 0x417   :  { %15486 = vmatprep.mubr.bf16.mxu0 %v24266_v55 }
 0x418   :  { %15199 = vmatpush1.bf16.msra.mxu1 %v22204_v48  ;;  %v22258_v48 = vld [vmem:[#allocation2 + $0x32b8] ss:$72 sps:$4 sm:$0xff]  }
 0x419   :  { %15457 = vmatpush1.bf16.msra.mxu0 %v22207_v49  ;;  %15200 = vmatprep.subr.bf16.mxu1 %v22212_v50  ;;  %v22261_v49 = vld [vmem:[#allocation2 + $0x20c0] ss:$72 sps:$4 sm:$0xff]   ;;  %v22266_v50 = vld [vmem:[#allocation2 + $0x334c] ss:$72 sps:$4 sm:$0xff]  }
 0x41a   :  { %15458 = vmatprep.subr.bf16.mxu0 %v22215_v51  ;;  %v22269_v51 = vld [vmem:[#allocation2 + $0x2154] ss:$72 sps:$4 sm:$0xff]  }
 0x41c   :  { %15201 = vmatpush1.bf16.msra.mxu1 %v22210_v29  ;;  %v22264_v29 = vld [vmem:[#allocation2 + $0x3348] ss:$72 sps:$4 sm:$0xff]  }
 0x41d   :  { %15459 = vmatpush1.bf16.msra.mxu0 %v22213_v30  ;;  %15202 = vmatprep.subr.bf16.mxu1 %v22218_v31  ;;  %v22267_v30 = vld [vmem:[#allocation2 + $0x2150] ss:$72 sps:$4 sm:$0xff]   ;;  %v22272_v31 = vld [vmem:[#allocation2 + $0x33dc] ss:$72 sps:$4 sm:$0xff]  }
 0x41e   :  { %15460 = vmatprep.subr.bf16.mxu0 %v22221_v53  ;;  %v22275_v53 = vld [vmem:[#allocation2 + $0x21e4] ss:$72 sps:$4 sm:$0xff]  }
 0x420   :  { %15203 = vmatpush1.bf16.msra.mxu1 %v22216_v54  ;;  %v22270_v54 = vld [vmem:[#allocation2 + $0x33d8] ss:$72 sps:$4 sm:$0xff]  }
 0x421   :  { %15461 = vmatpush1.bf16.msra.mxu0 %v22219_v56  ;;  %15204 = vmatprep.subr.bf16.mxu1 %v22224_v57  ;;  %v22273_v56 = vld [vmem:[#allocation2 + $0x21e0] ss:$72 sps:$4 sm:$0xff]   ;;  %v22278_v57 = vld [vmem:[#allocation2 + $0x346c] ss:$72 sps:$4 sm:$0xff]  }
 0x422   :  { %15462 = vmatprep.subr.bf16.mxu0 %v22227_v58  ;;  %v22281_v58 = vld [vmem:[#allocation2 + $0x2274] ss:$72 sps:$4 sm:$0xff]  }
 0x424   :  { %15205 = vmatpush1.bf16.msra.mxu1 %v22222_v60  ;;  %v22276_v60 = vld [vmem:[#allocation2 + $0x3468] ss:$72 sps:$4 sm:$0xff]  }
 0x425   :  { %15463 = vmatpush1.bf16.msra.mxu0 %v22225_v61  ;;  %15206 = vmatprep.subr.bf16.mxu1 %v22230_v4  ;;  %v22279_v61 = vld [vmem:[#allocation2 + $0x2270] ss:$72 sps:$4 sm:$0xff]   ;;  %v22284_v4 = vld [vmem:[#allocation2 + $0x34fc] ss:$72 sps:$4 sm:$0xff]  }
 0x426   :  { %15464 = vmatprep.subr.bf16.mxu0 %v22233_v47  ;;  %v22287_v47 = vld [vmem:[#allocation2 + $0x2304] ss:$72 sps:$4 sm:$0xff]  }
 0x427   :  { %v24473_v17 = vpop.f32.mrb[4].mxu0 }
 0x428   :  { %v24475_v20 = vpop.f32.mrb[5].mxu0  ;;  %15207 = vmatpush1.bf16.msra.mxu1 %v22228_v5  ;;  %v22282_v5 = vld [vmem:[#allocation2 + $0x34f8] ss:$72 sps:$4 sm:$0xff]  }
 0x429   :  { %v24477_v21 = vpop.f32.mrb[6].mxu0  ;;  %15465 = vmatpush1.bf16.msra.mxu0 %v22231_v7  ;;  %15208 = vmatprep.subr.bf16.mxu1 %v22236_v12  ;;  %v22285_v7 = vld [vmem:[#allocation2 + $0x2300] ss:$72 sps:$4 sm:$0xff]   ;;  %v22290_v12 = vld [vmem:[#allocation2 + $0x358c] ss:$72 sps:$4 sm:$0xff]  }
 0x42a   :  { %v24479_v25 = vpop.f32.mrb[7].mxu0  ;;  %15466 = vmatprep.subr.bf16.mxu0 %v22239_v13  ;;  %v22293_v13 = vld [vmem:[#allocation2 + $0x2394] ss:$72 sps:$4 sm:$0xff]  }
 0x42c   :  { %15209 = vmatpush1.bf16.msra.mxu1 %v22234_v24  ;;  %v22288_v24 = vld [vmem:[#allocation2 + $0x3588] ss:$72 sps:$4 sm:$0xff]  }
 0x42d   :  { %15467 = vmatpush1.bf16.msra.mxu0 %v22237_v14  ;;  %15210 = vmatprep.subr.bf16.mxu1 %v22242_v26  ;;  %v22291_v14 = vld [vmem:[#allocation2 + $0x2390] ss:$72 sps:$4 sm:$0xff]   ;;  %v22296_v26 = vld [vmem:[#allocation2 + $0x361c] ss:$72 sps:$4 sm:$0xff]  }
 0x42e   :  { %15468 = vmatprep.subr.bf16.mxu0 %v22245_v27  ;;  %v22299_v27 = vld [vmem:[#allocation2 + $0x2424] ss:$72 sps:$4 sm:$0xff]  }
 0x430   :  { %15211 = vmatpush1.bf16.msra.mxu1 %v22240_v15  ;;  %v22294_v15 = vld [vmem:[#allocation2 + $0x3618] ss:$72 sps:$4 sm:$0xff]  }
 0x431   :  { %15469 = vmatpush1.bf16.msra.mxu0 %v22243_v1  ;;  %15212 = vmatprep.subr.bf16.mxu1 %v22248_v2  ;;  %v22297_v1 = vld [vmem:[#allocation2 + $0x2420] ss:$72 sps:$4 sm:$0xff]   ;;  %v22302_v2 = vld [vmem:[#allocation2 + $0x36ac] ss:$72 sps:$4 sm:$0xff]  }
 0x432   :  { %15470 = vmatprep.subr.bf16.mxu0 %v22251_v32  ;;  %v22305_v32 = vld [vmem:[#allocation2 + $0x24b4] ss:$72 sps:$4 sm:$0xff]  }
 0x434   :  { %15213 = vmatpush1.bf16.msra.mxu1 %v22246_v16  ;;  %v22300_v16 = vld [vmem:[#allocation2 + $0x36a8] ss:$72 sps:$4 sm:$0xff]  }
 0x435   :  { %15471 = vmatpush1.bf16.msra.mxu0 %v22249_v35  ;;  %15214 = vmatprep.subr.bf16.mxu1 %v22254_v36  ;;  %v22303_v35 = vld [vmem:[#allocation2 + $0x24b0] ss:$72 sps:$4 sm:$0xff]   ;;  %v22308_v36 = vld [vmem:[#allocation2 + $0x373c] ss:$72 sps:$4 sm:$0xff]  }
 0x436   :  { %15472 = vmatprep.subr.bf16.mxu0 %v22257_v37  ;;  %v22311_v37 = vld [vmem:[#allocation2 + $0x2544] ss:$72 sps:$4 sm:$0xff]  }
 0x438   :  { %15215 = vmatpush1.bf16.msra.mxu1 %v22252_v38  ;;  %v22306_v38 = vld [vmem:[#allocation2 + $0x3738] ss:$72 sps:$4 sm:$0xff]  }
 0x439   :  { %15473 = vmatpush1.bf16.msra.mxu0 %v22255_v39  ;;  %15216 = vmatprep.subr.bf16.mxu1 %v22260_v41  ;;  %v22309_v39 = vld [vmem:[#allocation2 + $0x2540] ss:$72 sps:$4 sm:$0xff]   ;;  %v22314_v41 = vld [vmem:[#allocation2 + $0x37cc] ss:$72 sps:$4 sm:$0xff]  }
 0x43a   :  { %15474 = vmatprep.subr.bf16.mxu0 %v22263_v42  ;;  %v22317_v42 = vld [vmem:[#allocation2 + $0x25d4] ss:$72 sps:$4 sm:$0xff]  }
 0x43c   :  { %15217 = vmatpush1.bf16.msra.mxu1 %v22258_v48  ;;  %v22312_v48 = vld [vmem:[#allocation2 + $0x37c8] ss:$72 sps:$4 sm:$0xff]  }
 0x43d   :  { %15475 = vmatpush1.bf16.msra.mxu0 %v22261_v49  ;;  %15218 = vmatprep.subr.bf16.mxu1 %v22266_v50  ;;  %v22315_v49 = vld [vmem:[#allocation2 + $0x25d0] ss:$72 sps:$4 sm:$0xff]   ;;  %v22320_v50 = vld [vmem:[#allocation2 + $0x385c] ss:$72 sps:$4 sm:$0xff]  }
 0x43e   :  { %15476 = vmatprep.subr.bf16.mxu0 %v22269_v51  ;;  %v22323_v51 = vld [vmem:[#allocation2 + $0x2664] ss:$72 sps:$4 sm:$0xff]  }
 0x440   :  { %15219 = vmatpush1.bf16.msra.mxu1 %v22264_v29  ;;  %v22318_v29 = vld [vmem:[#allocation2 + $0x3858] ss:$72 sps:$4 sm:$0xff]  }
 0x441   :  { %15477 = vmatpush1.bf16.msra.mxu0 %v22267_v30  ;;  %15220 = vmatprep.subr.bf16.mxu1 %v22272_v31  ;;  %v22321_v30 = vld [vmem:[#allocation2 + $0x2660] ss:$72 sps:$4 sm:$0xff]   ;;  %v22326_v31 = vld [vmem:[#allocation2 + $0x38ec] ss:$72 sps:$4 sm:$0xff]  }
 0x442   :  { %15478 = vmatprep.subr.bf16.mxu0 %v22275_v53  ;;  %v22329_v53 = vld [vmem:[#allocation2 + $0x26f4] ss:$72 sps:$4 sm:$0xff]  }
 0x444   :  { %15221 = vmatpush1.bf16.msra.mxu1 %v22270_v54  ;;  %v22324_v54 = vld [vmem:[#allocation2 + $0x38e8] ss:$72 sps:$4 sm:$0xff]  }
 0x445   :  { %15479 = vmatpush1.bf16.msra.mxu0 %v22273_v56  ;;  %15222 = vmatprep.subr.bf16.mxu1 %v22278_v57  ;;  %v22327_v56 = vld [vmem:[#allocation2 + $0x26f0] ss:$72 sps:$4 sm:$0xff]   ;;  %v22332_v57 = vld [vmem:[#allocation2 + $0x397c] ss:$72 sps:$4 sm:$0xff]  }
 0x446   :  { %15480 = vmatprep.subr.bf16.mxu0 %v22281_v58  ;;  %v22335_v58 = vld [vmem:[#allocation2 + $0x2784] ss:$72 sps:$4 sm:$0xff]  }
 0x448   :  { %15223 = vmatpush1.bf16.msra.mxu1 %v22276_v60  ;;  %v22330_v60 = vld [vmem:[#allocation2 + $0x3978] ss:$72 sps:$4 sm:$0xff]  }
 0x449   :  { %15481 = vmatpush1.bf16.msra.mxu0 %v22279_v61  ;;  %15224 = vmatprep.subr.bf16.mxu1 %v22284_v4  ;;  %v22333_v61 = vld [vmem:[#allocation2 + $0x2780] ss:$72 sps:$4 sm:$0xff]   ;;  %v22338_v4 = vld [vmem:[#allocation2 + $0x3a0c] ss:$72 sps:$4 sm:$0xff]  }
 0x44a   :  { %15482 = vmatprep.subr.bf16.mxu0 %v22287_v47  ;;  %v22341_v47 = vld [vmem:[#allocation2 + $0x2814] ss:$72 sps:$4 sm:$0xff]  }
 0x44c   :  { %15225 = vmatpush1.bf16.msra.mxu1 %v22282_v5  ;;  %v22336_v5 = vld [vmem:[#allocation2 + $0x3a08] ss:$72 sps:$4 sm:$0xff]  }
 0x44d   :  { %15483 = vmatpush1.bf16.msra.mxu0 %v22285_v7  ;;  %15226 = vmatprep.subr.bf16.mxu1 %v22290_v12  ;;  %v22339_v7 = vld [vmem:[#allocation2 + $0x2810] ss:$72 sps:$4 sm:$0xff]   ;;  %v22344_v12 = vld [vmem:[#allocation2 + $0x3a9c] ss:$72 sps:$4 sm:$0xff]  }
 0x44e   :  { %15484 = vmatprep.subr.bf16.mxu0 %v22293_v13  ;;  %v22347_v13 = vld [vmem:[#allocation2 + $0x28a4] ss:$72 sps:$4 sm:$0xff]  }
 0x450   :  { %15227 = vmatpush1.bf16.msra.mxu1 %v22288_v24  ;;  %v22342_v24 = vld [vmem:[#allocation2 + $0x3a98] ss:$72 sps:$4 sm:$0xff]  }
 0x451   :  { %15485 = vmatpush1.bf16.msra.mxu0 %v22291_v14  ;;  %15239 = vmatprep.subr.bf16.mxu1 %v22296_v26  ;;  %v22345_v14 = vld [vmem:[#allocation2 + $0x28a0] ss:$72 sps:$4 sm:$0xff]   ;;  %v22350_v26 = vld [vmem:[#allocation2 + $0x3b2c] ss:$72 sps:$4 sm:$0xff]  }
 0x452   :  { %15497 = vmatprep.subr.bf16.mxu0 %v22299_v27  ;;  %v22353_v27 = vld [vmem:[#allocation2 + $0x2934] ss:$72 sps:$4 sm:$0xff]  }
 0x453   :  { %15229 = vmatmul.mubr.bf16.vlgmr.msra.gmra.mrb[8].mxu1 %v24356_v46 }
 0x454   :  { %15487 = vmatmul.mubr.bf16.vlgmr.msra.gmra.mrb[8].mxu0 %v24271_v11  ;;  %15240 = vmatpush1.bf16.msra.mxu1 %v22294_v15  ;;  %v22348_v15 = vld [vmem:[#allocation2 + $0x3b28] ss:$72 sps:$4 sm:$0xff]  }
 0x455   :  { %15498 = vmatpush1.bf16.msra.mxu0 %v22297_v1  ;;  %15241 = vmatprep.subr.bf16.mxu1 %v22302_v2  ;;  %v22351_v1 = vld [vmem:[#allocation2 + $0x2930] ss:$72 sps:$4 sm:$0xff]   ;;  %v22356_v2 = vld [vmem:[#allocation2 + $0x3bbc] ss:$72 sps:$4 sm:$0xff]  }
 0x456   :  { %15499 = vmatprep.subr.bf16.mxu0 %v22305_v32  ;;  %15271 = vmatprep.mubr.bf16.mxu1 %v24365_v28  ;;  %v22359_v32 = vld [vmem:[#allocation2 + $0x29c4] ss:$72 sps:$4 sm:$0xff]  }
 0x457   :  { %15529 = vmatprep.mubr.bf16.mxu0 %v24302_v43 }
 0x458   :  { %15242 = vmatpush1.bf16.msra.mxu1 %v22300_v16  ;;  %v22354_v16 = vld [vmem:[#allocation2 + $0x3bb8] ss:$72 sps:$4 sm:$0xff]  }
 0x459   :  { %15500 = vmatpush1.bf16.msra.mxu0 %v22303_v35  ;;  %15243 = vmatprep.subr.bf16.mxu1 %v22308_v36  ;;  %v22357_v35 = vld [vmem:[#allocation2 + $0x29c0] ss:$72 sps:$4 sm:$0xff]   ;;  %v22362_v36 = vld [vmem:[#allocation2 + $0x3c4c] ss:$72 sps:$4 sm:$0xff]  }
 0x45a   :  { %15501 = vmatprep.subr.bf16.mxu0 %v22311_v37  ;;  %v22365_v37 = vld [vmem:[#allocation2 + $0x2a54] ss:$72 sps:$4 sm:$0xff]  }
 0x45c   :  { %15244 = vmatpush1.bf16.msra.mxu1 %v22306_v38  ;;  %v22360_v38 = vld [vmem:[#allocation2 + $0x3c48] ss:$72 sps:$4 sm:$0xff]  }
 0x45d   :  { %15502 = vmatpush1.bf16.msra.mxu0 %v22309_v39  ;;  %15245 = vmatprep.subr.bf16.mxu1 %v22314_v41  ;;  %v22363_v39 = vld [vmem:[#allocation2 + $0x2a50] ss:$72 sps:$4 sm:$0xff]   ;;  %v22368_v41 = vld [vmem:[#allocation2 + $0x3cdc] ss:$72 sps:$4 sm:$0xff]  }
 0x45e   :  { %15503 = vmatprep.subr.bf16.mxu0 %v22317_v42  ;;  %v22371_v42 = vld [vmem:[#allocation2 + $0x2ae4] ss:$72 sps:$4 sm:$0xff]  }
 0x460   :  { %15246 = vmatpush1.bf16.msra.mxu1 %v22312_v48  ;;  %v22366_v48 = vld [vmem:[#allocation2 + $0x3cd8] ss:$72 sps:$4 sm:$0xff]  }
 0x461   :  { %15504 = vmatpush1.bf16.msra.mxu0 %v22315_v49  ;;  %15247 = vmatprep.subr.bf16.mxu1 %v22320_v50  ;;  %v22369_v49 = vld [vmem:[#allocation2 + $0x2ae0] ss:$72 sps:$4 sm:$0xff]   ;;  %v22374_v50 = vld [vmem:[#allocation2 + $0x3d6c] ss:$72 sps:$4 sm:$0xff]  }
 0x462   :  { %15505 = vmatprep.subr.bf16.mxu0 %v22323_v51  ;;  %v22377_v51 = vld [vmem:[#allocation2 + $0x2b74] ss:$72 sps:$4 sm:$0xff]  }
 0x464   :  { %15248 = vmatpush1.bf16.msra.mxu1 %v22318_v29  ;;  %v22372_v29 = vld [vmem:[#allocation2 + $0x3d68] ss:$72 sps:$4 sm:$0xff]  }
 0x465   :  { %15506 = vmatpush1.bf16.msra.mxu0 %v22321_v30  ;;  %15249 = vmatprep.subr.bf16.mxu1 %v22326_v31  ;;  %v22375_v30 = vld [vmem:[#allocation2 + $0x2b70] ss:$72 sps:$4 sm:$0xff]   ;;  %v22380_v31 = vld [vmem:[#allocation2 + $0x3dfc] ss:$72 sps:$4 sm:$0xff]  }
 0x466   :  { %15507 = vmatprep.subr.bf16.mxu0 %v22329_v53  ;;  %v22383_v53 = vld [vmem:[#allocation2 + $0x2c04] ss:$72 sps:$4 sm:$0xff]  }
 0x468   :  { %15250 = vmatpush1.bf16.msra.mxu1 %v22324_v54  ;;  %v22378_v54 = vld [vmem:[#allocation2 + $0x3df8] ss:$72 sps:$4 sm:$0xff]  }
 0x469   :  { %15508 = vmatpush1.bf16.msra.mxu0 %v22327_v56  ;;  %15251 = vmatprep.subr.bf16.mxu1 %v22332_v57  ;;  %v22381_v56 = vld [vmem:[#allocation2 + $0x2c00] ss:$72 sps:$4 sm:$0xff]   ;;  %v22386_v57 = vld [vmem:[#allocation2 + $0x3e8c] ss:$72 sps:$4 sm:$0xff]  }
 0x46a   :  { %15509 = vmatprep.subr.bf16.mxu0 %v22335_v58  ;;  %v22389_v58 = vld [vmem:[#allocation2 + $0x2c94] ss:$72 sps:$4 sm:$0xff]  }
 0x46c   :  { %15252 = vmatpush1.bf16.msra.mxu1 %v22330_v60  ;;  %v22384_v60 = vld [vmem:[#allocation2 + $0x3e88] ss:$72 sps:$4 sm:$0xff]  }
 0x46d   :  { %15510 = vmatpush1.bf16.msra.mxu0 %v22333_v61  ;;  %15253 = vmatprep.subr.bf16.mxu1 %v22338_v4  ;;  %v22387_v61 = vld [vmem:[#allocation2 + $0x2c90] ss:$72 sps:$4 sm:$0xff]   ;;  %v22392_v4 = vld [vmem:[#allocation2 + $0x3f1c] ss:$72 sps:$4 sm:$0xff]  }
 0x46e   :  { %15511 = vmatprep.subr.bf16.mxu0 %v22341_v47  ;;  %v22395_v47 = vld [vmem:[#allocation2 + $0x2d24] ss:$72 sps:$4 sm:$0xff]  }
 0x470   :  { %15254 = vmatpush1.bf16.msra.mxu1 %v22336_v5  ;;  %v22390_v5 = vld [vmem:[#allocation2 + $0x3f18] ss:$72 sps:$4 sm:$0xff]  }
 0x471   :  { %15512 = vmatpush1.bf16.msra.mxu0 %v22339_v7  ;;  %15255 = vmatprep.subr.bf16.mxu1 %v22344_v12  ;;  %v22393_v7 = vld [vmem:[#allocation2 + $0x2d20] ss:$72 sps:$4 sm:$0xff]   ;;  %v22398_v12 = vld [vmem:[#allocation2 + $0x3fac] ss:$72 sps:$4 sm:$0xff]  }
 0x472   :  { %15513 = vmatprep.subr.bf16.mxu0 %v22347_v13  ;;  %v22401_v13 = vld [vmem:[#allocation2 + $0x2db4] ss:$72 sps:$4 sm:$0xff]  }
 0x474   :  { %15256 = vmatpush1.bf16.msra.mxu1 %v22342_v24  ;;  %v22396_v24 = vld [vmem:[#allocation2 + $0x3fa8] ss:$72 sps:$4 sm:$0xff]  }
 0x475   :  { %15514 = vmatpush1.bf16.msra.mxu0 %v22345_v14  ;;  %15257 = vmatprep.subr.bf16.mxu1 %v22350_v26  ;;  %v22399_v14 = vld [vmem:[#allocation2 + $0x2db0] ss:$72 sps:$4 sm:$0xff]   ;;  %v22404_v26 = vld [vmem:[#allocation2 + $0x403c] ss:$72 sps:$4 sm:$0xff]  }
 0x476   :  { %15515 = vmatprep.subr.bf16.mxu0 %v22353_v27  ;;  %v22407_v27 = vld [vmem:[#allocation2 + $0x2e44] ss:$72 sps:$4 sm:$0xff]  }
 0x478   :  { %15258 = vmatpush1.bf16.msra.mxu1 %v22348_v15  ;;  %v22402_v15 = vld [vmem:[#allocation2 + $0x4038] ss:$72 sps:$4 sm:$0xff]  }
 0x479   :  { %15516 = vmatpush1.bf16.msra.mxu0 %v22351_v1  ;;  %15259 = vmatprep.subr.bf16.mxu1 %v22356_v2  ;;  %v22405_v1 = vld [vmem:[#allocation2 + $0x2e40] ss:$72 sps:$4 sm:$0xff]   ;;  %v22410_v2 = vld [vmem:[#allocation2 + $0x40cc] ss:$72 sps:$4 sm:$0xff]  }
 0x47a   :  { %15517 = vmatprep.subr.bf16.mxu0 %v22359_v32  ;;  %v22413_v32 = vld [vmem:[#allocation2 + $0x2ed4] ss:$72 sps:$4 sm:$0xff]  }
 0x47c   :  { %15260 = vmatpush1.bf16.msra.mxu1 %v22354_v16  ;;  %v22408_v16 = vld [vmem:[#allocation2 + $0x40c8] ss:$72 sps:$4 sm:$0xff]  }
 0x47d   :  { %15518 = vmatpush1.bf16.msra.mxu0 %v22357_v35  ;;  %15261 = vmatprep.subr.bf16.mxu1 %v22362_v36  ;;  %v22411_v35 = vld [vmem:[#allocation2 + $0x2ed0] ss:$72 sps:$4 sm:$0xff]   ;;  %v22416_v36 = vld [vmem:[#allocation2 + $0x415c] ss:$72 sps:$4 sm:$0xff]  }
 0x47e   :  { %15519 = vmatprep.subr.bf16.mxu0 %v22365_v37  ;;  %v22419_v37 = vld [vmem:[#allocation2 + $0x2f64] ss:$72 sps:$4 sm:$0xff]  }
 0x480   :  { %15262 = vmatpush1.bf16.msra.mxu1 %v22360_v38  ;;  %v22414_v38 = vld [vmem:[#allocation2 + $0x4158] ss:$72 sps:$4 sm:$0xff]  }
 0x481   :  { %15520 = vmatpush1.bf16.msra.mxu0 %v22363_v39  ;;  %15263 = vmatprep.subr.bf16.mxu1 %v22368_v41  ;;  %v22417_v39 = vld [vmem:[#allocation2 + $0x2f60] ss:$72 sps:$4 sm:$0xff]   ;;  %v22422_v41 = vld [vmem:[#allocation2 + $0x41ec] ss:$72 sps:$4 sm:$0xff]  }
 0x482   :  { %15521 = vmatprep.subr.bf16.mxu0 %v22371_v42  ;;  %v22425_v42 = vld [vmem:[#allocation2 + $0x2ff4] ss:$72 sps:$4 sm:$0xff]  }
 0x484   :  { %15264 = vmatpush1.bf16.msra.mxu1 %v22366_v48  ;;  %v22420_v48 = vld [vmem:[#allocation2 + $0x41e8] ss:$72 sps:$4 sm:$0xff]  }
 0x485   :  { %15522 = vmatpush1.bf16.msra.mxu0 %v22369_v49  ;;  %15265 = vmatprep.subr.bf16.mxu1 %v22374_v50  ;;  %v22423_v49 = vld [vmem:[#allocation2 + $0x2ff0] ss:$72 sps:$4 sm:$0xff]   ;;  %v22428_v50 = vld [vmem:[#allocation2 + $0x427c] ss:$72 sps:$4 sm:$0xff]  }
 0x486   :  { %15523 = vmatprep.subr.bf16.mxu0 %v22377_v51  ;;  %v22431_v51 = vld [vmem:[#allocation2 + $0x3084] ss:$72 sps:$4 sm:$0xff]  }
 0x488   :  { %15266 = vmatpush1.bf16.msra.mxu1 %v22372_v29  ;;  %v22426_v29 = vld [vmem:[#allocation2 + $0x4278] ss:$72 sps:$4 sm:$0xff]  }
 0x489   :  { %15524 = vmatpush1.bf16.msra.mxu0 %v22375_v30  ;;  %15267 = vmatprep.subr.bf16.mxu1 %v22380_v31  ;;  %v22429_v30 = vld [vmem:[#allocation2 + $0x3080] ss:$72 sps:$4 sm:$0xff]   ;;  %v22434_v31 = vld [vmem:[#allocation2 + $0x430c] ss:$72 sps:$4 sm:$0xff]  }
 0x48a   :  { %15525 = vmatprep.subr.bf16.mxu0 %v22383_v53  ;;  %v22437_v53 = vld [vmem:[#allocation2 + $0x3114] ss:$72 sps:$4 sm:$0xff]  }
 0x48c   :  { %15268 = vmatpush1.bf16.msra.mxu1 %v22378_v54  ;;  %v22432_v54 = vld [vmem:[#allocation2 + $0x4308] ss:$72 sps:$4 sm:$0xff]  }
 0x48d   :  { %15526 = vmatpush1.bf16.msra.mxu0 %v22381_v56  ;;  %15269 = vmatprep.subr.bf16.mxu1 %v22386_v57  ;;  %v22435_v56 = vld [vmem:[#allocation2 + $0x3110] ss:$72 sps:$4 sm:$0xff]   ;;  %v22440_v57 = vld [vmem:[#allocation2 + $0x439c] ss:$72 sps:$4 sm:$0xff]  }
 0x48e   :  { %15527 = vmatprep.subr.bf16.mxu0 %v22389_v58  ;;  %v22443_v58 = vld [vmem:[#allocation2 + $0x31a4] ss:$72 sps:$4 sm:$0xff]  }
 0x490   :  { %15270 = vmatpush1.bf16.msra.mxu1 %v22384_v60  ;;  %v22438_v60 = vld [vmem:[#allocation2 + $0x4398] ss:$72 sps:$4 sm:$0xff]  }
 0x491   :  { %15528 = vmatpush1.bf16.msra.mxu0 %v22387_v61  ;;  %15282 = vmatprep.subr.bf16.mxu1 %v22392_v4  ;;  %v22441_v61 = vld [vmem:[#allocation2 + $0x31a0] ss:$72 sps:$4 sm:$0xff]   ;;  %v22446_v4 = vld [vmem:[#allocation2 + $0x442c] ss:$72 sps:$4 sm:$0xff]  }
 0x492   :  { %15540 = vmatprep.subr.bf16.mxu0 %v22395_v47  ;;  %v22449_v47 = vld [vmem:[#allocation2 + $0x3234] ss:$72 sps:$4 sm:$0xff]  }
 0x493   :  { %15272 = vmatmul.mubr.bf16.vlgmr.msra.gmra.mrb[8].mxu1 %v24373_v0 }
 0x494   :  { %15530 = vmatmul.mubr.bf16.vlgmr.msra.gmra.mrb[8].mxu0 %v24311_v23  ;;  %15283 = vmatpush1.bf16.msra.mxu1 %v22390_v5  ;;  %v22444_v5 = vld [vmem:[#allocation2 + $0x4428] ss:$72 sps:$4 sm:$0xff]  }
 0x495   :  { %15541 = vmatpush1.bf16.msra.mxu0 %v22393_v7  ;;  %15284 = vmatprep.subr.bf16.mxu1 %v22398_v12  ;;  %v22447_v7 = vld [vmem:[#allocation2 + $0x3230] ss:$72 sps:$4 sm:$0xff]   ;;  %v22452_v12 = vld [vmem:[#allocation2 + $0x44bc] ss:$72 sps:$4 sm:$0xff]  }
 0x496   :  { %15542 = vmatprep.subr.bf16.mxu0 %v22401_v13  ;;  %15314 = vmatprep.mubr.bf16.mxu1 %v24387_v44  ;;  %v22455_v13 = vld [vmem:[#allocation2 + $0x32c4] ss:$72 sps:$4 sm:$0xff]  }
 0x497   :  { %15572 = vmatprep.mubr.bf16.mxu0 %v24341_v34 }
 0x498   :  { %15285 = vmatpush1.bf16.msra.mxu1 %v22396_v24  ;;  %v22450_v24 = vld [vmem:[#allocation2 + $0x44b8] ss:$72 sps:$4 sm:$0xff]  }
 0x499   :  { %15543 = vmatpush1.bf16.msra.mxu0 %v22399_v14  ;;  %15286 = vmatprep.subr.bf16.mxu1 %v22404_v26  ;;  %v22453_v14 = vld [vmem:[#allocation2 + $0x32c0] ss:$72 sps:$4 sm:$0xff]   ;;  %v22458_v26 = vld [vmem:[#allocation2 + $0x454c] ss:$72 sps:$4 sm:$0xff]  }
 0x49a   :  { %15544 = vmatprep.subr.bf16.mxu0 %v22407_v27  ;;  %v22461_v27 = vld [vmem:[#allocation2 + $0x3354] ss:$72 sps:$4 sm:$0xff]  }
 0x49c   :  { %15287 = vmatpush1.bf16.msra.mxu1 %v22402_v15  ;;  %v22456_v15 = vld [vmem:[#allocation2 + $0x4548] ss:$72 sps:$4 sm:$0xff]  }
 0x49d   :  { %15545 = vmatpush1.bf16.msra.mxu0 %v22405_v1  ;;  %15288 = vmatprep.subr.bf16.mxu1 %v22410_v2  ;;  %v22459_v1 = vld [vmem:[#allocation2 + $0x3350] ss:$72 sps:$4 sm:$0xff]   ;;  %v22464_v2 = vld [vmem:[#allocation2 + $0x45dc] ss:$72 sps:$4 sm:$0xff]  }
 0x49e   :  { %15546 = vmatprep.subr.bf16.mxu0 %v22413_v32  ;;  %v22467_v32 = vld [vmem:[#allocation2 + $0x33e4] ss:$72 sps:$4 sm:$0xff]  }
 0x4a0   :  { %15289 = vmatpush1.bf16.msra.mxu1 %v22408_v16  ;;  %v22462_v16 = vld [vmem:[#allocation2 + $0x45d8] ss:$72 sps:$4 sm:$0xff]  }
 0x4a1   :  { %15547 = vmatpush1.bf16.msra.mxu0 %v22411_v35  ;;  %15290 = vmatprep.subr.bf16.mxu1 %v22416_v36  ;;  %v22465_v35 = vld [vmem:[#allocation2 + $0x33e0] ss:$72 sps:$4 sm:$0xff]   ;;  %v22470_v36 = vld [vmem:[#allocation2 + $0x466c] ss:$72 sps:$4 sm:$0xff]  }
 0x4a2   :  { %15548 = vmatprep.subr.bf16.mxu0 %v22419_v37  ;;  %v22473_v37 = vld [vmem:[#allocation2 + $0x3474] ss:$72 sps:$4 sm:$0xff]  }
 0x4a4   :  { %15291 = vmatpush1.bf16.msra.mxu1 %v22414_v38  ;;  %v22468_v38 = vld [vmem:[#allocation2 + $0x4668] ss:$72 sps:$4 sm:$0xff]  }
 0x4a5   :  { %15549 = vmatpush1.bf16.msra.mxu0 %v22417_v39  ;;  %15292 = vmatprep.subr.bf16.mxu1 %v22422_v41  ;;  %v22471_v39 = vld [vmem:[#allocation2 + $0x3470] ss:$72 sps:$4 sm:$0xff]   ;;  %v22476_v41 = vld [vmem:[#allocation2 + $0x46fc] ss:$72 sps:$4 sm:$0xff]  }
 0x4a6   :  { %15550 = vmatprep.subr.bf16.mxu0 %v22425_v42  ;;  %v22479_v42 = vld [vmem:[#allocation2 + $0x3504] ss:$72 sps:$4 sm:$0xff]  }
 0x4a8   :  { %15293 = vmatpush1.bf16.msra.mxu1 %v22420_v48  ;;  %v22474_v48 = vld [vmem:[#allocation2 + $0x46f8] ss:$72 sps:$4 sm:$0xff]  }
 0x4a9   :  { %15551 = vmatpush1.bf16.msra.mxu0 %v22423_v49  ;;  %15294 = vmatprep.subr.bf16.mxu1 %v22428_v50  ;;  %v22477_v49 = vld [vmem:[#allocation2 + $0x3500] ss:$72 sps:$4 sm:$0xff]   ;;  %v22482_v50 = vld [vmem:[#allocation2 + $0x478c] ss:$72 sps:$4 sm:$0xff]  }
 0x4aa   :  { %15552 = vmatprep.subr.bf16.mxu0 %v22431_v51  ;;  %v22485_v51 = vld [vmem:[#allocation2 + $0x3594] ss:$72 sps:$4 sm:$0xff]  }
 0x4ac   :  { %15295 = vmatpush1.bf16.msra.mxu1 %v22426_v29  ;;  %v22480_v29 = vld [vmem:[#allocation2 + $0x4788] ss:$72 sps:$4 sm:$0xff]  }
 0x4ad   :  { %15553 = vmatpush1.bf16.msra.mxu0 %v22429_v30  ;;  %15296 = vmatprep.subr.bf16.mxu1 %v22434_v31  ;;  %v22483_v30 = vld [vmem:[#allocation2 + $0x3590] ss:$72 sps:$4 sm:$0xff]   ;;  %v22488_v31 = vld [vmem:[#allocation2 + $0x3624] ss:$72 sps:$4 sm:$0xff]  }
 0x4ae   :  { %15554 = vmatprep.subr.bf16.mxu0 %v22437_v53  ;;  %v22491_v53 = vld [vmem:[#allocation2 + $0x2c] ss:$72 sps:$4 sm:$0xff]  }
 0x4b0   :  { %15297 = vmatpush1.bf16.msra.mxu1 %v22432_v54  ;;  %v22486_v54 = vld [vmem:[#allocation2 + $0x3620] ss:$72 sps:$4 sm:$0xff]  }
 0x4b1   :  { %15555 = vmatpush1.bf16.msra.mxu0 %v22435_v56  ;;  %15298 = vmatprep.subr.bf16.mxu1 %v22440_v57  ;;  %v22489_v56 = vld [vmem:[#allocation2 + $0x28] ss:$72 sps:$4 sm:$0xff]   ;;  %v22494_v57 = vld [vmem:[#allocation2 + $0x36b4] ss:$72 sps:$4 sm:$0xff]  }
 0x4b2   :  { %15556 = vmatprep.subr.bf16.mxu0 %v22443_v58  ;;  %v22497_v58 = vld [vmem:[#allocation2 + $0xbc] ss:$72 sps:$4 sm:$0xff]  }
 0x4b4   :  { %15299 = vmatpush1.bf16.msra.mxu1 %v22438_v60  ;;  %v22492_v60 = vld [vmem:[#allocation2 + $0x36b0] ss:$72 sps:$4 sm:$0xff]  }
 0x4b5   :  { %15557 = vmatpush1.bf16.msra.mxu0 %v22441_v61  ;;  %15300 = vmatprep.subr.bf16.mxu1 %v22446_v4  ;;  %v22495_v61 = vld [vmem:[#allocation2 + $0xb8] ss:$72 sps:$4 sm:$0xff]   ;;  %v22500_v4 = vld [vmem:[#allocation2 + $0x3744] ss:$72 sps:$4 sm:$0xff]  }
 0x4b6   :  { %15558 = vmatprep.subr.bf16.mxu0 %v22449_v47  ;;  %v22503_v47 = vld [vmem:[#allocation2 + $0x14c] ss:$72 sps:$4 sm:$0xff]  }
 0x4b8   :  { %15301 = vmatpush1.bf16.msra.mxu1 %v22444_v5  ;;  %v22498_v5 = vld [vmem:[#allocation2 + $0x3740] ss:$72 sps:$4 sm:$0xff]  }
 0x4b9   :  { %15559 = vmatpush1.bf16.msra.mxu0 %v22447_v7  ;;  %15302 = vmatprep.subr.bf16.mxu1 %v22452_v12  ;;  %v22501_v7 = vld [vmem:[#allocation2 + $0x148] ss:$72 sps:$4 sm:$0xff]   ;;  %v22506_v12 = vld [vmem:[#allocation2 + $0x37d4] ss:$72 sps:$4 sm:$0xff]  }
 0x4ba   :  { %15560 = vmatprep.subr.bf16.mxu0 %v22455_v13  ;;  %v22509_v13 = vld [vmem:[#allocation2 + $0x1dc] ss:$72 sps:$4 sm:$0xff]  }
 0x4bc   :  { %15303 = vmatpush1.bf16.msra.mxu1 %v22450_v24  ;;  %v22504_v24 = vld [vmem:[#allocation2 + $0x37d0] ss:$72 sps:$4 sm:$0xff]  }
 0x4bd   :  { %15561 = vmatpush1.bf16.msra.mxu0 %v22453_v14  ;;  %15304 = vmatprep.subr.bf16.mxu1 %v22458_v26  ;;  %v22507_v14 = vld [vmem:[#allocation2 + $0x1d8] ss:$72 sps:$4 sm:$0xff]   ;;  %v22512_v26 = vld [vmem:[#allocation2 + $0x3864] ss:$72 sps:$4 sm:$0xff]  }
 0x4be   :  { %15562 = vmatprep.subr.bf16.mxu0 %v22461_v27  ;;  %v22515_v27 = vld [vmem:[#allocation2 + $0x26c] ss:$72 sps:$4 sm:$0xff]  }
 0x4c0   :  { %15305 = vmatpush1.bf16.msra.mxu1 %v22456_v15  ;;  %v22510_v15 = vld [vmem:[#allocation2 + $0x3860] ss:$72 sps:$4 sm:$0xff]  }
 0x4c1   :  { %15563 = vmatpush1.bf16.msra.mxu0 %v22459_v1  ;;  %15306 = vmatprep.subr.bf16.mxu1 %v22464_v2  ;;  %v22513_v1 = vld [vmem:[#allocation2 + $0x268] ss:$72 sps:$4 sm:$0xff]   ;;  %v22518_v2 = vld [vmem:[#allocation2 + $0x38f4] ss:$72 sps:$4 sm:$0xff]  }
 0x4c2   :  { %15564 = vmatprep.subr.bf16.mxu0 %v22467_v32  ;;  %v22521_v32 = vld [vmem:[#allocation2 + $0x2fc] ss:$72 sps:$4 sm:$0xff]  }
 0x4c4   :  { %15307 = vmatpush1.bf16.msra.mxu1 %v22462_v16  ;;  %v22516_v16 = vld [vmem:[#allocation2 + $0x38f0] ss:$72 sps:$4 sm:$0xff]  }
 0x4c5   :  { %15565 = vmatpush1.bf16.msra.mxu0 %v22465_v35  ;;  %15308 = vmatprep.subr.bf16.mxu1 %v22470_v36  ;;  %v22519_v35 = vld [vmem:[#allocation2 + $0x2f8] ss:$72 sps:$4 sm:$0xff]   ;;  %v22524_v36 = vld [vmem:[#allocation2 + $0x3984] ss:$72 sps:$4 sm:$0xff]  }
 0x4c6   :  { %15566 = vmatprep.subr.bf16.mxu0 %v22473_v37  ;;  %v22527_v37 = vld [vmem:[#allocation2 + $0x38c] ss:$72 sps:$4 sm:$0xff]  }
 0x4c8   :  { %15309 = vmatpush1.bf16.msra.mxu1 %v22468_v38  ;;  %v22522_v38 = vld [vmem:[#allocation2 + $0x3980] ss:$72 sps:$4 sm:$0xff]  }
 0x4c9   :  { %15567 = vmatpush1.bf16.msra.mxu0 %v22471_v39  ;;  %15310 = vmatprep.subr.bf16.mxu1 %v22476_v41  ;;  %v22525_v39 = vld [vmem:[#allocation2 + $0x388] ss:$72 sps:$4 sm:$0xff]   ;;  %v22530_v41 = vld [vmem:[#allocation2 + $0x3a14] ss:$72 sps:$4 sm:$0xff]  }
 0x4ca   :  { %15568 = vmatprep.subr.bf16.mxu0 %v22479_v42  ;;  %v22533_v42 = vld [vmem:[#allocation2 + $0x41c] ss:$72 sps:$4 sm:$0xff]  }
 0x4cc   :  { %15311 = vmatpush1.bf16.msra.mxu1 %v22474_v48  ;;  %v22528_v48 = vld [vmem:[#allocation2 + $0x3a10] ss:$72 sps:$4 sm:$0xff]  }
 0x4cd   :  { %15569 = vmatpush1.bf16.msra.mxu0 %v22477_v49  ;;  %15312 = vmatprep.subr.bf16.mxu1 %v22482_v50  ;;  %v22531_v49 = vld [vmem:[#allocation2 + $0x418] ss:$72 sps:$4 sm:$0xff]   ;;  %v22536_v50 = vld [vmem:[#allocation2 + $0x3aa4] ss:$72 sps:$4 sm:$0xff]  }
 0x4ce   :  { %15570 = vmatprep.subr.bf16.mxu0 %v22485_v51  ;;  %v22539_v51 = vld [vmem:[#allocation2 + $0x4ac] ss:$72 sps:$4 sm:$0xff]  }
 0x4d0   :  { %15313 = vmatpush1.bf16.msra.mxu1 %v22480_v29  ;;  %v22534_v29 = vld [vmem:[#allocation2 + $0x3aa0] ss:$72 sps:$4 sm:$0xff]  }
 0x4d1   :  { %15571 = vmatpush1.bf16.msra.mxu0 %v22483_v30  ;;  %15669 = vmatprep.subr.bf16.mxu1 %v22491_v53  ;;  %v22537_v30 = vld [vmem:[#allocation2 + $0x4a8] ss:$72 sps:$4 sm:$0xff]   ;;  %v22545_v53 = vld [vmem:[#allocation2 + $0x53c] ss:$72 sps:$4 sm:$0xff]  }
 0x4d2   :  { %15583 = vmatprep.subr.bf16.mxu0 %v22488_v31  ;;  %v22542_v31 = vld [vmem:[#allocation2 + $0x3b34] ss:$72 sps:$4 sm:$0xff]  }
 0x4d3   :  { %15315 = vmatmul.mubr.bf16.vlgmr.msra.gmra.mrb[8].mxu1 %v24395_v19 }
 0x4d4   :  { %15573 = vmatmul.mubr.bf16.vlgmr.msra.gmra.mrb[8].mxu0 %v24356_v46  ;;  %15670 = vmatpush1.bf16.msra.mxu1 %v22489_v56  ;;  %v22543_v56 = vld [vmem:[#allocation2 + $0x538] ss:$72 sps:$4 sm:$0xff]  }
 0x4d5   :  { %15584 = vmatpush1.bf16.msra.mxu0 %v22486_v54  ;;  %15671 = vmatprep.subr.bf16.mxu1 %v22497_v58  ;;  %v22540_v54 = vld [vmem:[#allocation2 + $0x3b30] ss:$72 sps:$4 sm:$0xff]   ;;  %v22551_v58 = vld [vmem:[#allocation2 + $0x5cc] ss:$72 sps:$4 sm:$0xff]  }
 0x4d6   :  { %15585 = vmatprep.subr.bf16.mxu0 %v22494_v57  ;;  %15615 = vmatprep.mubr.bf16.mxu0 %v24365_v28  ;;  %v22548_v57 = vld [vmem:[#allocation2 + $0x3bc4] ss:$72 sps:$4 sm:$0xff]  }
 0x4d7   :  { %15701 = vmatprep.mubr.bf16.mxu1 %v24257_v52 }
 0x4d8   :  { %15672 = vmatpush1.bf16.msra.mxu1 %v22495_v61  ;;  %v22549_v61 = vld [vmem:[#allocation2 + $0x5c8] ss:$72 sps:$4 sm:$0xff]  }
 0x4d9   :  { %15586 = vmatpush1.bf16.msra.mxu0 %v22492_v60  ;;  %15673 = vmatprep.subr.bf16.mxu1 %v22503_v47  ;;  %v22546_v60 = vld [vmem:[#allocation2 + $0x3bc0] ss:$72 sps:$4 sm:$0xff]   ;;  %v22557_v47 = vld [vmem:[#allocation2 + $0x65c] ss:$72 sps:$4 sm:$0xff]  }
 0x4da   :  { %15587 = vmatprep.subr.bf16.mxu0 %v22500_v4  ;;  %v22554_v4 = vld [vmem:[#allocation2 + $0x3c54] ss:$72 sps:$4 sm:$0xff]  }
 0x4dc   :  { %15674 = vmatpush1.bf16.msra.mxu1 %v22501_v7  ;;  %v22555_v7 = vld [vmem:[#allocation2 + $0x658] ss:$72 sps:$4 sm:$0xff]  }
 0x4dd   :  { %15588 = vmatpush1.bf16.msra.mxu0 %v22498_v5  ;;  %15675 = vmatprep.subr.bf16.mxu1 %v22509_v13  ;;  %v22552_v5 = vld [vmem:[#allocation2 + $0x3c50] ss:$72 sps:$4 sm:$0xff]   ;;  %v22563_v13 = vld [vmem:[#allocation2 + $0x6ec] ss:$72 sps:$4 sm:$0xff]  }
 0x4de   :  { %15589 = vmatprep.subr.bf16.mxu0 %v22506_v12  ;;  %v22560_v12 = vld [vmem:[#allocation2 + $0x3ce4] ss:$72 sps:$4 sm:$0xff]  }
 0x4e0   :  { %15676 = vmatpush1.bf16.msra.mxu1 %v22507_v14  ;;  %v22561_v14 = vld [vmem:[#allocation2 + $0x6e8] ss:$72 sps:$4 sm:$0xff]  }
 0x4e1   :  { %15590 = vmatpush1.bf16.msra.mxu0 %v22504_v24  ;;  %15677 = vmatprep.subr.bf16.mxu1 %v22515_v27  ;;  %v22558_v24 = vld [vmem:[#allocation2 + $0x3ce0] ss:$72 sps:$4 sm:$0xff]   ;;  %v22569_v27 = vld [vmem:[#allocation2 + $0x77c] ss:$72 sps:$4 sm:$0xff]  }
 0x4e2   :  { %15591 = vmatprep.subr.bf16.mxu0 %v22512_v26  ;;  %v22566_v26 = vld [vmem:[#allocation2 + $0x3d74] ss:$72 sps:$4 sm:$0xff]  }
 0x4e4   :  { %15678 = vmatpush1.bf16.msra.mxu1 %v22513_v1  ;;  %v22567_v1 = vld [vmem:[#allocation2 + $0x778] ss:$72 sps:$4 sm:$0xff]  }
 0x4e5   :  { %15592 = vmatpush1.bf16.msra.mxu0 %v22510_v15  ;;  %15679 = vmatprep.subr.bf16.mxu1 %v22521_v32  ;;  %v22564_v15 = vld [vmem:[#allocation2 + $0x3d70] ss:$72 sps:$4 sm:$0xff]   ;;  %v22575_v32 = vld [vmem:[#allocation2 + $0x80c] ss:$72 sps:$4 sm:$0xff]  }
 0x4e6   :  { %15593 = vmatprep.subr.bf16.mxu0 %v22518_v2  ;;  %v22572_v2 = vld [vmem:[#allocation2 + $0x3e04] ss:$72 sps:$4 sm:$0xff]  }
 0x4e8   :  { %15680 = vmatpush1.bf16.msra.mxu1 %v22519_v35  ;;  %v22573_v35 = vld [vmem:[#allocation2 + $0x808] ss:$72 sps:$4 sm:$0xff]  }
 0x4e9   :  { %15594 = vmatpush1.bf16.msra.mxu0 %v22516_v16  ;;  %15681 = vmatprep.subr.bf16.mxu1 %v22527_v37  ;;  %v22570_v16 = vld [vmem:[#allocation2 + $0x3e00] ss:$72 sps:$4 sm:$0xff]   ;;  %v22581_v37 = vld [vmem:[#allocation2 + $0x89c] ss:$72 sps:$4 sm:$0xff]  }
 0x4ea   :  { %15595 = vmatprep.subr.bf16.mxu0 %v22524_v36  ;;  %v22578_v36 = vld [vmem:[#allocation2 + $0x3e94] ss:$72 sps:$4 sm:$0xff]  }
 0x4ec   :  { %15682 = vmatpush1.bf16.msra.mxu1 %v22525_v39  ;;  %v22579_v39 = vld [vmem:[#allocation2 + $0x898] ss:$72 sps:$4 sm:$0xff]  }
 0x4ed   :  { %15596 = vmatpush1.bf16.msra.mxu0 %v22522_v38  ;;  %15683 = vmatprep.subr.bf16.mxu1 %v22533_v42  ;;  %v22576_v38 = vld [vmem:[#allocation2 + $0x3e90] ss:$72 sps:$4 sm:$0xff]   ;;  %v22587_v42 = vld [vmem:[#allocation2 + $0x92c] ss:$72 sps:$4 sm:$0xff]  }
 0x4ee   :  { %15597 = vmatprep.subr.bf16.mxu0 %v22530_v41  ;;  %v22584_v41 = vld [vmem:[#allocation2 + $0x3f24] ss:$72 sps:$4 sm:$0xff]  }
 0x4f0   :  { %15684 = vmatpush1.bf16.msra.mxu1 %v22531_v49  ;;  %v22585_v49 = vld [vmem:[#allocation2 + $0x928] ss:$72 sps:$4 sm:$0xff]  }
 0x4f1   :  { %15598 = vmatpush1.bf16.msra.mxu0 %v22528_v48  ;;  %15685 = vmatprep.subr.bf16.mxu1 %v22539_v51  ;;  %v22582_v48 = vld [vmem:[#allocation2 + $0x3f20] ss:$72 sps:$4 sm:$0xff]   ;;  %v22593_v51 = vld [vmem:[#allocation2 + $0x9bc] ss:$72 sps:$4 sm:$0xff]  }
 0x4f2   :  { %15599 = vmatprep.subr.bf16.mxu0 %v22536_v50  ;;  %v22590_v50 = vld [vmem:[#allocation2 + $0x3fb4] ss:$72 sps:$4 sm:$0xff]  }
 0x4f4   :  { %15686 = vmatpush1.bf16.msra.mxu1 %v22537_v30  ;;  %v22591_v30 = vld [vmem:[#allocation2 + $0x9b8] ss:$72 sps:$4 sm:$0xff]  }
 0x4f5   :  { %15600 = vmatpush1.bf16.msra.mxu0 %v22534_v29  ;;  %15687 = vmatprep.subr.bf16.mxu1 %v22545_v53  ;;  %v22588_v29 = vld [vmem:[#allocation2 + $0x3fb0] ss:$72 sps:$4 sm:$0xff]   ;;  %v22599_v53 = vld [vmem:[#allocation2 + $0xa4c] ss:$72 sps:$4 sm:$0xff]  }
 0x4f6   :  { %15601 = vmatprep.subr.bf16.mxu0 %v22542_v31  ;;  %v22596_v31 = vld [vmem:[#allocation2 + $0x4044] ss:$72 sps:$4 sm:$0xff]  }
 0x4f8   :  { %15688 = vmatpush1.bf16.msra.mxu1 %v22543_v56  ;;  %v22597_v56 = vld [vmem:[#allocation2 + $0xa48] ss:$72 sps:$4 sm:$0xff]  }
 0x4f9   :  { %15602 = vmatpush1.bf16.msra.mxu0 %v22540_v54  ;;  %15689 = vmatprep.subr.bf16.mxu1 %v22551_v58  ;;  %v22594_v54 = vld [vmem:[#allocation2 + $0x4040] ss:$72 sps:$4 sm:$0xff]   ;;  %v22605_v58 = vld [vmem:[#allocation2 + $0xadc] ss:$72 sps:$4 sm:$0xff]  }
 0x4fa   :  { %15603 = vmatprep.subr.bf16.mxu0 %v22548_v57  ;;  %v22602_v57 = vld [vmem:[#allocation2 + $0x40d4] ss:$72 sps:$4 sm:$0xff]  }
 0x4fc   :  { %15690 = vmatpush1.bf16.msra.mxu1 %v22549_v61  ;;  %v22603_v61 = vld [vmem:[#allocation2 + $0xad8] ss:$72 sps:$4 sm:$0xff]  }
 0x4fd   :  { %15604 = vmatpush1.bf16.msra.mxu0 %v22546_v60  ;;  %15691 = vmatprep.subr.bf16.mxu1 %v22557_v47  ;;  %v22600_v60 = vld [vmem:[#allocation2 + $0x40d0] ss:$72 sps:$4 sm:$0xff]   ;;  %v22611_v47 = vld [vmem:[#allocation2 + $0xb6c] ss:$72 sps:$4 sm:$0xff]  }
 0x4fe   :  { %15605 = vmatprep.subr.bf16.mxu0 %v22554_v4  ;;  %v22608_v4 = vld [vmem:[#allocation2 + $0x4164] ss:$72 sps:$4 sm:$0xff]  }
 0x500   :  { %15692 = vmatpush1.bf16.msra.mxu1 %v22555_v7  ;;  %v22609_v7 = vld [vmem:[#allocation2 + $0xb68] ss:$72 sps:$4 sm:$0xff]  }
 0x501   :  { %15606 = vmatpush1.bf16.msra.mxu0 %v22552_v5  ;;  %15693 = vmatprep.subr.bf16.mxu1 %v22563_v13  ;;  %v22606_v5 = vld [vmem:[#allocation2 + $0x4160] ss:$72 sps:$4 sm:$0xff]   ;;  %v22617_v13 = vld [vmem:[#allocation2 + $0xbfc] ss:$72 sps:$4 sm:$0xff]  }
 0x502   :  { %15607 = vmatprep.subr.bf16.mxu0 %v22560_v12  ;;  %v22614_v12 = vld [vmem:[#allocation2 + $0x41f4] ss:$72 sps:$4 sm:$0xff]  }
 0x504   :  { %15694 = vmatpush1.bf16.msra.mxu1 %v22561_v14  ;;  %v22615_v14 = vld [vmem:[#allocation2 + $0xbf8] ss:$72 sps:$4 sm:$0xff]  }
 0x505   :  { %15608 = vmatpush1.bf16.msra.mxu0 %v22558_v24  ;;  %15695 = vmatprep.subr.bf16.mxu1 %v22569_v27  ;;  %v22612_v24 = vld [vmem:[#allocation2 + $0x41f0] ss:$72 sps:$4 sm:$0xff]   ;;  %v22623_v27 = vld [vmem:[#allocation2 + $0xc8c] ss:$72 sps:$4 sm:$0xff]  }
 0x506   :  { %15609 = vmatprep.subr.bf16.mxu0 %v22566_v26  ;;  %v22620_v26 = vld [vmem:[#allocation2 + $0x4284] ss:$72 sps:$4 sm:$0xff]  }
 0x508   :  { %15696 = vmatpush1.bf16.msra.mxu1 %v22567_v1  ;;  %v22621_v1 = vld [vmem:[#allocation2 + $0xc88] ss:$72 sps:$4 sm:$0xff]  }
 0x509   :  { %15610 = vmatpush1.bf16.msra.mxu0 %v22564_v15  ;;  %15697 = vmatprep.subr.bf16.mxu1 %v22575_v32  ;;  %v22618_v15 = vld [vmem:[#allocation2 + $0x4280] ss:$72 sps:$4 sm:$0xff]   ;;  %v22629_v32 = vld [vmem:[#allocation2 + $0xd1c] ss:$72 sps:$4 sm:$0xff]  }
 0x50a   :  { %15611 = vmatprep.subr.bf16.mxu0 %v22572_v2  ;;  %v22626_v2 = vld [vmem:[#allocation2 + $0x4314] ss:$72 sps:$4 sm:$0xff]  }
 0x50c   :  { %15698 = vmatpush1.bf16.msra.mxu1 %v22573_v35  ;;  %v22627_v35 = vld [vmem:[#allocation2 + $0xd18] ss:$72 sps:$4 sm:$0xff]  }
 0x50d   :  { %15612 = vmatpush1.bf16.msra.mxu0 %v22570_v16  ;;  %15699 = vmatprep.subr.bf16.mxu1 %v22581_v37  ;;  %v22624_v16 = vld [vmem:[#allocation2 + $0x4310] ss:$72 sps:$4 sm:$0xff]   ;;  %v22635_v37 = vld [vmem:[#allocation2 + $0xdac] ss:$72 sps:$4 sm:$0xff]  }
 0x50e   :  { %15613 = vmatprep.subr.bf16.mxu0 %v22578_v36  ;;  %v22632_v36 = vld [vmem:[#allocation2 + $0x43a4] ss:$72 sps:$4 sm:$0xff]  }
 0x510   :  { %15700 = vmatpush1.bf16.msra.mxu1 %v22579_v39  ;;  %v22633_v39 = vld [vmem:[#allocation2 + $0xda8] ss:$72 sps:$4 sm:$0xff]  }
 0x511   :  { %15614 = vmatpush1.bf16.msra.mxu0 %v22576_v38  ;;  %15712 = vmatprep.subr.bf16.mxu1 %v22587_v42  ;;  %v22630_v38 = vld [vmem:[#allocation2 + $0x43a0] ss:$72 sps:$4 sm:$0xff]   ;;  %v22641_v42 = vld [vmem:[#allocation2 + $0xe3c] ss:$72 sps:$4 sm:$0xff]  }
 0x512   :  { %15626 = vmatprep.subr.bf16.mxu0 %v22584_v41  ;;  %v22638_v41 = vld [vmem:[#allocation2 + $0x4434] ss:$72 sps:$4 sm:$0xff]  }
 0x513   :  { %15702 = vmatmul.mubr.bf16.vlgmr.msra.gmra.mrb[12].mxu1 %v24269_v10 }
 0x514   :  { %15616 = vmatmul.mubr.bf16.vlgmr.msra.gmra.mrb[8].mxu0 %v24373_v0  ;;  %15713 = vmatpush1.bf16.msra.mxu1 %v22585_v49  ;;  %v22639_v49 = vld [vmem:[#allocation2 + $0xe38] ss:$72 sps:$4 sm:$0xff]  }
 0x515   :  { %15627 = vmatpush1.bf16.msra.mxu0 %v22582_v48  ;;  %15714 = vmatprep.subr.bf16.mxu1 %v22593_v51  ;;  %v22636_v48 = vld [vmem:[#allocation2 + $0x4430] ss:$72 sps:$4 sm:$0xff]   ;;  %v22647_v51 = vld [vmem:[#allocation2 + $0xecc] ss:$72 sps:$4 sm:$0xff]  }
 0x516   :  { %15628 = vmatprep.subr.bf16.mxu0 %v22590_v50  ;;  %15658 = vmatprep.mubr.bf16.mxu0 %v24387_v44  ;;  %v22644_v50 = vld [vmem:[#allocation2 + $0x44c4] ss:$72 sps:$4 sm:$0xff]  }
 0x517   :  { %15744 = vmatprep.mubr.bf16.mxu1 %v24287_v40 }
 0x518   :  { %15715 = vmatpush1.bf16.msra.mxu1 %v22591_v30  ;;  %v22645_v30 = vld [vmem:[#allocation2 + $0xec8] ss:$72 sps:$4 sm:$0xff]  }
 0x519   :  { %15629 = vmatpush1.bf16.msra.mxu0 %v22588_v29  ;;  %15716 = vmatprep.subr.bf16.mxu1 %v22599_v53  ;;  %v22642_v29 = vld [vmem:[#allocation2 + $0x44c0] ss:$72 sps:$4 sm:$0xff]   ;;  %v22653_v53 = vld [vmem:[#allocation2 + $0xf5c] ss:$72 sps:$4 sm:$0xff]  }
 0x51a   :  { %15630 = vmatprep.subr.bf16.mxu0 %v22596_v31  ;;  %v22650_v31 = vld [vmem:[#allocation2 + $0x4554] ss:$72 sps:$4 sm:$0xff]  }
 0x51c   :  { %15717 = vmatpush1.bf16.msra.mxu1 %v22597_v56  ;;  %v22651_v56 = vld [vmem:[#allocation2 + $0xf58] ss:$72 sps:$4 sm:$0xff]  }
 0x51d   :  { %15631 = vmatpush1.bf16.msra.mxu0 %v22594_v54  ;;  %15718 = vmatprep.subr.bf16.mxu1 %v22605_v58  ;;  %v22648_v54 = vld [vmem:[#allocation2 + $0x4550] ss:$72 sps:$4 sm:$0xff]   ;;  %v22659_v58 = vld [vmem:[#allocation2 + $0xfec] ss:$72 sps:$4 sm:$0xff]  }
 0x51e   :  { %15632 = vmatprep.subr.bf16.mxu0 %v22602_v57  ;;  %v22656_v57 = vld [vmem:[#allocation2 + $0x45e4] ss:$72 sps:$4 sm:$0xff]  }
 0x520   :  { %15719 = vmatpush1.bf16.msra.mxu1 %v22603_v61  ;;  %v22657_v61 = vld [vmem:[#allocation2 + $0xfe8] ss:$72 sps:$4 sm:$0xff]  }
 0x521   :  { %15633 = vmatpush1.bf16.msra.mxu0 %v22600_v60  ;;  %15720 = vmatprep.subr.bf16.mxu1 %v22611_v47  ;;  %v22654_v60 = vld [vmem:[#allocation2 + $0x45e0] ss:$72 sps:$4 sm:$0xff]   ;;  %v22665_v47 = vld [vmem:[#allocation2 + $0x107c] ss:$72 sps:$4 sm:$0xff]  }
 0x522   :  { %15634 = vmatprep.subr.bf16.mxu0 %v22608_v4  ;;  %v22662_v4 = vld [vmem:[#allocation2 + $0x4674] ss:$72 sps:$4 sm:$0xff]  }
 0x524   :  { %15721 = vmatpush1.bf16.msra.mxu1 %v22609_v7  ;;  %v22663_v7 = vld [vmem:[#allocation2 + $0x1078] ss:$72 sps:$4 sm:$0xff]  }
 0x525   :  { %15635 = vmatpush1.bf16.msra.mxu0 %v22606_v5  ;;  %15722 = vmatprep.subr.bf16.mxu1 %v22617_v13  ;;  %v22660_v5 = vld [vmem:[#allocation2 + $0x4670] ss:$72 sps:$4 sm:$0xff]   ;;  %v22671_v13 = vld [vmem:[#allocation2 + $0x110c] ss:$72 sps:$4 sm:$0xff]  }
 0x526   :  { %15636 = vmatprep.subr.bf16.mxu0 %v22614_v12  ;;  %v22668_v12 = vld [vmem:[#allocation2 + $0x4704] ss:$72 sps:$4 sm:$0xff]  }
 0x528   :  { %15723 = vmatpush1.bf16.msra.mxu1 %v22615_v14  ;;  %v22669_v14 = vld [vmem:[#allocation2 + $0x1108] ss:$72 sps:$4 sm:$0xff]  }
 0x529   :  { %15637 = vmatpush1.bf16.msra.mxu0 %v22612_v24  ;;  %15724 = vmatprep.subr.bf16.mxu1 %v22623_v27  ;;  %v22666_v24 = vld [vmem:[#allocation2 + $0x4700] ss:$72 sps:$4 sm:$0xff]   ;;  %v22677_v27 = vld [vmem:[#allocation2 + $0x119c] ss:$72 sps:$4 sm:$0xff]  }
 0x52a   :  { %15638 = vmatprep.subr.bf16.mxu0 %v22620_v26  ;;  %v22674_v26 = vld [vmem:[#allocation2 + $0x4794] ss:$72 sps:$4 sm:$0xff]  }
 0x52c   :  { %15725 = vmatpush1.bf16.msra.mxu1 %v22621_v1  ;;  %v22675_v1 = vld [vmem:[#allocation2 + $0x1198] ss:$72 sps:$4 sm:$0xff]  }
 0x52d   :  { %15639 = vmatpush1.bf16.msra.mxu0 %v22618_v15  ;;  %15726 = vmatprep.subr.bf16.mxu1 %v22629_v32  ;;  %v22672_v15 = vld [vmem:[#allocation2 + $0x4790] ss:$72 sps:$4 sm:$0xff]   ;;  %v22683_v32 = vld [vmem:[#allocation2 + $0x34] ss:$72 sps:$4 sm:$0xff]  }
 0x52e   :  { %15640 = vmatprep.subr.bf16.mxu0 %v22626_v2  ;;  %v22680_v2 = vld [vmem:[#allocation2 + $0x122c] ss:$72 sps:$4 sm:$0xff]  }
 0x530   :  { %15727 = vmatpush1.bf16.msra.mxu1 %v22627_v35  ;;  %v22681_v35 = vld [vmem:[#allocation2 + $0x30] ss:$72 sps:$4 sm:$0xff]  }
 0x531   :  { %15641 = vmatpush1.bf16.msra.mxu0 %v22624_v16  ;;  %15728 = vmatprep.subr.bf16.mxu1 %v22635_v37  ;;  %v22678_v16 = vld [vmem:[#allocation2 + $0x1228] ss:$72 sps:$4 sm:$0xff]   ;;  %v22689_v37 = vld [vmem:[#allocation2 + $0xc4] ss:$72 sps:$4 sm:$0xff]  }
 0x532   :  { %15642 = vmatprep.subr.bf16.mxu0 %v22632_v36  ;;  %v22686_v36 = vld [vmem:[#allocation2 + $0x12bc] ss:$72 sps:$4 sm:$0xff]  }
 0x534   :  { %15729 = vmatpush1.bf16.msra.mxu1 %v22633_v39  ;;  %v22687_v39 = vld [vmem:[#allocation2 + $0xc0] ss:$72 sps:$4 sm:$0xff]  }
 0x535   :  { %15643 = vmatpush1.bf16.msra.mxu0 %v22630_v38  ;;  %15730 = vmatprep.subr.bf16.mxu1 %v22641_v42  ;;  %v22684_v38 = vld [vmem:[#allocation2 + $0x12b8] ss:$72 sps:$4 sm:$0xff]   ;;  %v22695_v42 = vld [vmem:[#allocation2 + $0x154] ss:$72 sps:$4 sm:$0xff]  }
 0x536   :  { %15644 = vmatprep.subr.bf16.mxu0 %v22638_v41  ;;  %v22692_v41 = vld [vmem:[#allocation2 + $0x134c] ss:$72 sps:$4 sm:$0xff]  }
 0x538   :  { %15731 = vmatpush1.bf16.msra.mxu1 %v22639_v49  ;;  %v22693_v49 = vld [vmem:[#allocation2 + $0x150] ss:$72 sps:$4 sm:$0xff]  }
 0x539   :  { %15645 = vmatpush1.bf16.msra.mxu0 %v22636_v48  ;;  %15732 = vmatprep.subr.bf16.mxu1 %v22647_v51  ;;  %v22690_v48 = vld [vmem:[#allocation2 + $0x1348] ss:$72 sps:$4 sm:$0xff]   ;;  %v22701_v51 = vld [vmem:[#allocation2 + $0x1e4] ss:$72 sps:$4 sm:$0xff]  }
 0x53a   :  { %15646 = vmatprep.subr.bf16.mxu0 %v22644_v50  ;;  %v22698_v50 = vld [vmem:[#allocation2 + $0x13dc] ss:$72 sps:$4 sm:$0xff]  }
 0x53c   :  { %15733 = vmatpush1.bf16.msra.mxu1 %v22645_v30  ;;  %v22699_v30 = vld [vmem:[#allocation2 + $0x1e0] ss:$72 sps:$4 sm:$0xff]  }
 0x53d   :  { %15647 = vmatpush1.bf16.msra.mxu0 %v22642_v29  ;;  %15734 = vmatprep.subr.bf16.mxu1 %v22653_v53  ;;  %v22696_v29 = vld [vmem:[#allocation2 + $0x13d8] ss:$72 sps:$4 sm:$0xff]   ;;  %v22707_v53 = vld [vmem:[#allocation2 + $0x274] ss:$72 sps:$4 sm:$0xff]  }
 0x53e   :  { %15648 = vmatprep.subr.bf16.mxu0 %v22650_v31  ;;  %v22704_v31 = vld [vmem:[#allocation2 + $0x146c] ss:$72 sps:$4 sm:$0xff]  }
 0x540   :  { %15735 = vmatpush1.bf16.msra.mxu1 %v22651_v56  ;;  %v22705_v56 = vld [vmem:[#allocation2 + $0x270] ss:$72 sps:$4 sm:$0xff]  }
 0x541   :  { %15649 = vmatpush1.bf16.msra.mxu0 %v22648_v54  ;;  %15736 = vmatprep.subr.bf16.mxu1 %v22659_v58  ;;  %v22702_v54 = vld [vmem:[#allocation2 + $0x1468] ss:$72 sps:$4 sm:$0xff]   ;;  %v22713_v58 = vld [vmem:[#allocation2 + $0x304] ss:$72 sps:$4 sm:$0xff]  }
 0x542   :  { %15650 = vmatprep.subr.bf16.mxu0 %v22656_v57  ;;  %v22710_v57 = vld [vmem:[#allocation2 + $0x14fc] ss:$72 sps:$4 sm:$0xff]  }
 0x544   :  { %15737 = vmatpush1.bf16.msra.mxu1 %v22657_v61  ;;  %v22711_v61 = vld [vmem:[#allocation2 + $0x300] ss:$72 sps:$4 sm:$0xff]  }
 0x545   :  { %15651 = vmatpush1.bf16.msra.mxu0 %v22654_v60  ;;  %15738 = vmatprep.subr.bf16.mxu1 %v22665_v47  ;;  %v22708_v60 = vld [vmem:[#allocation2 + $0x14f8] ss:$72 sps:$4 sm:$0xff]   ;;  %v22719_v47 = vld [vmem:[#allocation2 + $0x394] ss:$72 sps:$4 sm:$0xff]  }
 0x546   :  { %15652 = vmatprep.subr.bf16.mxu0 %v22662_v4  ;;  %v22716_v4 = vld [vmem:[#allocation2 + $0x158c] ss:$72 sps:$4 sm:$0xff]  }
 0x548   :  { %15739 = vmatpush1.bf16.msra.mxu1 %v22663_v7  ;;  %v22717_v7 = vld [vmem:[#allocation2 + $0x390] ss:$72 sps:$4 sm:$0xff]  }
 0x549   :  { %15653 = vmatpush1.bf16.msra.mxu0 %v22660_v5  ;;  %15740 = vmatprep.subr.bf16.mxu1 %v22671_v13  ;;  %v22714_v5 = vld [vmem:[#allocation2 + $0x1588] ss:$72 sps:$4 sm:$0xff]   ;;  %v22725_v13 = vld [vmem:[#allocation2 + $0x424] ss:$72 sps:$4 sm:$0xff]  }
 0x54a   :  { %15654 = vmatprep.subr.bf16.mxu0 %v22668_v12  ;;  %v22722_v12 = vld [vmem:[#allocation2 + $0x161c] ss:$72 sps:$4 sm:$0xff]  }
 0x54c   :  { %15741 = vmatpush1.bf16.msra.mxu1 %v22669_v14  ;;  %v22723_v14 = vld [vmem:[#allocation2 + $0x420] ss:$72 sps:$4 sm:$0xff]  }
 0x54d   :  { %15655 = vmatpush1.bf16.msra.mxu0 %v22666_v24  ;;  %15742 = vmatprep.subr.bf16.mxu1 %v22677_v27  ;;  %v22720_v24 = vld [vmem:[#allocation2 + $0x1618] ss:$72 sps:$4 sm:$0xff]   ;;  %v22731_v27 = vld [vmem:[#allocation2 + $0x4b4] ss:$72 sps:$4 sm:$0xff]  }
 0x54e   :  { %15656 = vmatprep.subr.bf16.mxu0 %v22674_v26  ;;  %v22728_v26 = vld [vmem:[#allocation2 + $0x16ac] ss:$72 sps:$4 sm:$0xff]  }
 0x550   :  { %15743 = vmatpush1.bf16.msra.mxu1 %v22675_v1  ;;  %v22729_v1 = vld [vmem:[#allocation2 + $0x4b0] ss:$72 sps:$4 sm:$0xff]  }
 0x551   :  { %15657 = vmatpush1.bf16.msra.mxu0 %v22672_v15  ;;  %15755 = vmatprep.subr.bf16.mxu1 %v22680_v2  ;;  %v22726_v15 = vld [vmem:[#allocation2 + $0x16a8] ss:$72 sps:$4 sm:$0xff]   ;;  %v22734_v2 = vld [vmem:[#allocation2 + $0x173c] ss:$72 sps:$4 sm:$0xff]  }
 0x552   :  { %16013 = vmatprep.subr.bf16.mxu0 %v22683_v32  ;;  %v22737_v32 = vld [vmem:[#allocation2 + $0x544] ss:$72 sps:$4 sm:$0xff]  }
 0x553   :  { %15745 = vmatmul.mubr.bf16.vlgmr.msra.gmra.mrb[12].mxu1 %v24307_v22 }
 0x554   :  { %15659 = vmatmul.mubr.bf16.vlgmr.msra.gmra.mrb[8].mxu0 %v24395_v19  ;;  %15756 = vmatpush1.bf16.msra.mxu1 %v22678_v16  ;;  %v22732_v16 = vld [vmem:[#allocation2 + $0x1738] ss:$72 sps:$4 sm:$0xff]  }
 0x555   :  { %16014 = vmatpush1.bf16.msra.mxu0 %v22681_v35  ;;  %15757 = vmatprep.subr.bf16.mxu1 %v22686_v36  ;;  %v22735_v35 = vld [vmem:[#allocation2 + $0x540] ss:$72 sps:$4 sm:$0xff]   ;;  %v22740_v36 = vld [vmem:[#allocation2 + $0x17cc] ss:$72 sps:$4 sm:$0xff]  }
 0x556   :  { %16015 = vmatprep.subr.bf16.mxu0 %v22689_v37  ;;  %15787 = vmatprep.mubr.bf16.mxu1 %v24337_v33  ;;  %v22743_v37 = vld [vmem:[#allocation2 + $0x5d4] ss:$72 sps:$4 sm:$0xff]  }
 0x557   :  { %16045 = vmatprep.mubr.bf16.mxu0 %v24257_v52 }
 0x558   :  { %15758 = vmatpush1.bf16.msra.mxu1 %v22684_v38  ;;  %v22738_v38 = vld [vmem:[#allocation2 + $0x17c8] ss:$72 sps:$4 sm:$0xff]  }
 0x559   :  { %16016 = vmatpush1.bf16.msra.mxu0 %v22687_v39  ;;  %15759 = vmatprep.subr.bf16.mxu1 %v22692_v41  ;;  %v22741_v39 = vld [vmem:[#allocation2 + $0x5d0] ss:$72 sps:$4 sm:$0xff]   ;;  %v22746_v41 = vld [vmem:[#allocation2 + $0x185c] ss:$72 sps:$4 sm:$0xff]  }
 0x55a   :  { %16017 = vmatprep.subr.bf16.mxu0 %v22695_v42  ;;  %v22749_v42 = vld [vmem:[#allocation2 + $0x664] ss:$72 sps:$4 sm:$0xff]  }
 0x55c   :  { %15760 = vmatpush1.bf16.msra.mxu1 %v22690_v48  ;;  %v22744_v48 = vld [vmem:[#allocation2 + $0x1858] ss:$72 sps:$4 sm:$0xff]  }
 0x55d   :  { %16018 = vmatpush1.bf16.msra.mxu0 %v22693_v49  ;;  %15761 = vmatprep.subr.bf16.mxu1 %v22698_v50  ;;  %v22747_v49 = vld [vmem:[#allocation2 + $0x660] ss:$72 sps:$4 sm:$0xff]   ;;  %v22752_v50 = vld [vmem:[#allocation2 + $0x18ec] ss:$72 sps:$4 sm:$0xff]  }
 0x55e   :  { %16019 = vmatprep.subr.bf16.mxu0 %v22701_v51  ;;  %v22755_v51 = vld [vmem:[#allocation2 + $0x6f4] ss:$72 sps:$4 sm:$0xff]  }
 0x560   :  { %15762 = vmatpush1.bf16.msra.mxu1 %v22696_v29  ;;  %v22750_v29 = vld [vmem:[#allocation2 + $0x18e8] ss:$72 sps:$4 sm:$0xff]  }
 0x561   :  { %16020 = vmatpush1.bf16.msra.mxu0 %v22699_v30  ;;  %15763 = vmatprep.subr.bf16.mxu1 %v22704_v31  ;;  %v22753_v30 = vld [vmem:[#allocation2 + $0x6f0] ss:$72 sps:$4 sm:$0xff]   ;;  %v22758_v31 = vld [vmem:[#allocation2 + $0x197c] ss:$72 sps:$4 sm:$0xff]  }
 0x562   :  { %16021 = vmatprep.subr.bf16.mxu0 %v22707_v53  ;;  %v22761_v53 = vld [vmem:[#allocation2 + $0x784] ss:$72 sps:$4 sm:$0xff]  }
 0x564   :  { %15764 = vmatpush1.bf16.msra.mxu1 %v22702_v54  ;;  %v22756_v54 = vld [vmem:[#allocation2 + $0x1978] ss:$72 sps:$4 sm:$0xff]  }
 0x565   :  { %16022 = vmatpush1.bf16.msra.mxu0 %v22705_v56  ;;  %15765 = vmatprep.subr.bf16.mxu1 %v22710_v57  ;;  %v22759_v56 = vld [vmem:[#allocation2 + $0x780] ss:$72 sps:$4 sm:$0xff]   ;;  %v22764_v57 = vld [vmem:[#allocation2 + $0x1a0c] ss:$72 sps:$4 sm:$0xff]  }
 0x566   :  { %16023 = vmatprep.subr.bf16.mxu0 %v22713_v58  ;;  %v22767_v58 = vld [vmem:[#allocation2 + $0x814] ss:$72 sps:$4 sm:$0xff]  }
 0x568   :  { %15766 = vmatpush1.bf16.msra.mxu1 %v22708_v60  ;;  %v22762_v60 = vld [vmem:[#allocation2 + $0x1a08] ss:$72 sps:$4 sm:$0xff]  }
 0x569   :  { %16024 = vmatpush1.bf16.msra.mxu0 %v22711_v61  ;;  %15767 = vmatprep.subr.bf16.mxu1 %v22716_v4  ;;  %v22765_v61 = vld [vmem:[#allocation2 + $0x810] ss:$72 sps:$4 sm:$0xff]   ;;  %v22770_v4 = vld [vmem:[#allocation2 + $0x1a9c] ss:$72 sps:$4 sm:$0xff]  }
 0x56a   :  { %16025 = vmatprep.subr.bf16.mxu0 %v22719_v47  ;;  %v22773_v47 = vld [vmem:[#allocation2 + $0x8a4] ss:$72 sps:$4 sm:$0xff]  }
 0x56c   :  { %15768 = vmatpush1.bf16.msra.mxu1 %v22714_v5  ;;  %v22768_v5 = vld [vmem:[#allocation2 + $0x1a98] ss:$72 sps:$4 sm:$0xff]  }
 0x56d   :  { %16026 = vmatpush1.bf16.msra.mxu0 %v22717_v7  ;;  %15769 = vmatprep.subr.bf16.mxu1 %v22722_v12  ;;  %v22771_v7 = vld [vmem:[#allocation2 + $0x8a0] ss:$72 sps:$4 sm:$0xff]   ;;  %v22776_v12 = vld [vmem:[#allocation2 + $0x1b2c] ss:$72 sps:$4 sm:$0xff]  }
 0x56e   :  { %16027 = vmatprep.subr.bf16.mxu0 %v22725_v13  ;;  %v22779_v13 = vld [vmem:[#allocation2 + $0x934] ss:$72 sps:$4 sm:$0xff]  }
 0x570   :  { %15770 = vmatpush1.bf16.msra.mxu1 %v22720_v24  ;;  %v22774_v24 = vld [vmem:[#allocation2 + $0x1b28] ss:$72 sps:$4 sm:$0xff]  }
 0x571   :  { %16028 = vmatpush1.bf16.msra.mxu0 %v22723_v14  ;;  %15771 = vmatprep.subr.bf16.mxu1 %v22728_v26  ;;  %v22777_v14 = vld [vmem:[#allocation2 + $0x930] ss:$72 sps:$4 sm:$0xff]   ;;  %v22782_v26 = vld [vmem:[#allocation2 + $0x1bbc] ss:$72 sps:$4 sm:$0xff]  }
 0x572   :  { %16029 = vmatprep.subr.bf16.mxu0 %v22731_v27  ;;  %v22785_v27 = vld [vmem:[#allocation2 + $0x9c4] ss:$72 sps:$4 sm:$0xff]  }
 0x574   :  { %15772 = vmatpush1.bf16.msra.mxu1 %v22726_v15  ;;  %v22780_v15 = vld [vmem:[#allocation2 + $0x1bb8] ss:$72 sps:$4 sm:$0xff]  }
 0x575   :  { %16030 = vmatpush1.bf16.msra.mxu0 %v22729_v1  ;;  %15773 = vmatprep.subr.bf16.mxu1 %v22734_v2  ;;  %v22783_v1 = vld [vmem:[#allocation2 + $0x9c0] ss:$72 sps:$4 sm:$0xff]   ;;  %v22788_v2 = vld [vmem:[#allocation2 + $0x1c4c] ss:$72 sps:$4 sm:$0xff]  }
 0x576   :  { %16031 = vmatprep.subr.bf16.mxu0 %v22737_v32  ;;  %v22791_v32 = vld [vmem:[#allocation2 + $0xa54] ss:$72 sps:$4 sm:$0xff]  }
 0x578   :  { %15774 = vmatpush1.bf16.msra.mxu1 %v22732_v16  ;;  %v22786_v16 = vld [vmem:[#allocation2 + $0x1c48] ss:$72 sps:$4 sm:$0xff]  }
 0x579   :  { %16032 = vmatpush1.bf16.msra.mxu0 %v22735_v35  ;;  %15775 = vmatprep.subr.bf16.mxu1 %v22740_v36  ;;  %v22789_v35 = vld [vmem:[#allocation2 + $0xa50] ss:$72 sps:$4 sm:$0xff]   ;;  %v22794_v36 = vld [vmem:[#allocation2 + $0x1cdc] ss:$72 sps:$4 sm:$0xff]  }
 0x57a   :  { %16033 = vmatprep.subr.bf16.mxu0 %v22743_v37  ;;  %v22797_v37 = vld [vmem:[#allocation2 + $0xae4] ss:$72 sps:$4 sm:$0xff]  }
 0x57c   :  { %15776 = vmatpush1.bf16.msra.mxu1 %v22738_v38  ;;  %v22792_v38 = vld [vmem:[#allocation2 + $0x1cd8] ss:$72 sps:$4 sm:$0xff]  }
 0x57d   :  { %16034 = vmatpush1.bf16.msra.mxu0 %v22741_v39  ;;  %15777 = vmatprep.subr.bf16.mxu1 %v22746_v41  ;;  %v22795_v39 = vld [vmem:[#allocation2 + $0xae0] ss:$72 sps:$4 sm:$0xff]   ;;  %v22800_v41 = vld [vmem:[#allocation2 + $0x1d6c] ss:$72 sps:$4 sm:$0xff]  }
 0x57e   :  { %16035 = vmatprep.subr.bf16.mxu0 %v22749_v42  ;;  %v22803_v42 = vld [vmem:[#allocation2 + $0xb74] ss:$72 sps:$4 sm:$0xff]  }
 0x580   :  { %15778 = vmatpush1.bf16.msra.mxu1 %v22744_v48  ;;  %v22798_v48 = vld [vmem:[#allocation2 + $0x1d68] ss:$72 sps:$4 sm:$0xff]  }
 0x581   :  { %16036 = vmatpush1.bf16.msra.mxu0 %v22747_v49  ;;  %15779 = vmatprep.subr.bf16.mxu1 %v22752_v50  ;;  %v22801_v49 = vld [vmem:[#allocation2 + $0xb70] ss:$72 sps:$4 sm:$0xff]   ;;  %v22806_v50 = vld [vmem:[#allocation2 + $0x1dfc] ss:$72 sps:$4 sm:$0xff]  }
 0x582   :  { %16037 = vmatprep.subr.bf16.mxu0 %v22755_v51  ;;  %v22809_v51 = vld [vmem:[#allocation2 + $0xc04] ss:$72 sps:$4 sm:$0xff]  }
 0x584   :  { %15780 = vmatpush1.bf16.msra.mxu1 %v22750_v29  ;;  %v22804_v29 = vld [vmem:[#allocation2 + $0x1df8] ss:$72 sps:$4 sm:$0xff]  }
 0x585   :  { %16038 = vmatpush1.bf16.msra.mxu0 %v22753_v30  ;;  %15781 = vmatprep.subr.bf16.mxu1 %v22758_v31  ;;  %v22807_v30 = vld [vmem:[#allocation2 + $0xc00] ss:$72 sps:$4 sm:$0xff]   ;;  %v22812_v31 = vld [vmem:[#allocation2 + $0x1e8c] ss:$72 sps:$4 sm:$0xff]  }
 0x586   :  { %16039 = vmatprep.subr.bf16.mxu0 %v22761_v53  ;;  %v22815_v53 = vld [vmem:[#allocation2 + $0xc94] ss:$72 sps:$4 sm:$0xff]  }
 0x588   :  { %15782 = vmatpush1.bf16.msra.mxu1 %v22756_v54 }
 0x589   :  { %16040 = vmatpush1.bf16.msra.mxu0 %v22759_v56  ;;  %15783 = vmatprep.subr.bf16.mxu1 %v22764_v57 }
 0x58a   :  { %16041 = vmatprep.subr.bf16.mxu0 %v22767_v58  ;;  %v22810_v58 = vld [vmem:[#allocation2 + $0x1e88] ss:$72 sps:$4 sm:$0xff]  }
 0x58c   :  { %15784 = vmatpush1.bf16.msra.mxu1 %v22762_v60  ;;  %v22813_v60 = vld [vmem:[#allocation2 + $0xc90] ss:$72 sps:$4 sm:$0xff]  }
 0x58d   :  { %16042 = vmatpush1.bf16.msra.mxu0 %v22765_v61  ;;  %15785 = vmatprep.subr.bf16.mxu1 %v22770_v4  ;;  %v22818_v4 = vld [vmem:[#allocation2 + $0x1f1c] ss:$72 sps:$4 sm:$0xff]  }
 0x58e   :  { %16043 = vmatprep.subr.bf16.mxu0 %v22773_v47  ;;  %v22821_v47 = vld [vmem:[#allocation2 + $0xd24] ss:$72 sps:$4 sm:$0xff]  }
 0x590   :  { %15786 = vmatpush1.bf16.msra.mxu1 %v22768_v5  ;;  %v22816_v5 = vld [vmem:[#allocation2 + $0x1f18] ss:$72 sps:$4 sm:$0xff]  }
 0x591   :  { %16044 = vmatpush1.bf16.msra.mxu0 %v22771_v7  ;;  %15798 = vmatprep.subr.bf16.mxu1 %v22776_v12  ;;  %v22819_v7 = vld [vmem:[#allocation2 + $0xd20] ss:$72 sps:$4 sm:$0xff]   ;;  %v22824_v12 = vld [vmem:[#allocation2 + $0x1fac] ss:$72 sps:$4 sm:$0xff]  }
 0x592   :  { %16056 = vmatprep.subr.bf16.mxu0 %v22779_v13  ;;  %v22827_v13 = vld [vmem:[#allocation2 + $0xdb4] ss:$72 sps:$4 sm:$0xff]  }
 0x593   :  { %15788 = vmatmul.mubr.bf16.vlgmr.msra.gmra.mrb[12].mxu1 %v24352_v45 }
 0x594   :  { %16046 = vmatmul.mubr.bf16.vlgmr.msra.gmra.mrb[12].mxu0 %v24269_v10  ;;  %15799 = vmatpush1.bf16.msra.mxu1 %v22774_v24  ;;  %v22822_v24 = vld [vmem:[#allocation2 + $0x1fa8] ss:$72 sps:$4 sm:$0xff]  }
 0x595   :  { %16057 = vmatpush1.bf16.msra.mxu0 %v22777_v14  ;;  %15800 = vmatprep.subr.bf16.mxu1 %v22782_v26  ;;  %v22825_v14 = vld [vmem:[#allocation2 + $0xdb0] ss:$72 sps:$4 sm:$0xff]   ;;  %v22830_v26 = vld [vmem:[#allocation2 + $0x203c] ss:$72 sps:$4 sm:$0xff]  }
 0x596   :  { %16058 = vmatprep.subr.bf16.mxu0 %v22785_v27  ;;  %15830 = vmatprep.mubr.bf16.mxu1 %v24266_v55  ;;  %v22833_v27 = vld [vmem:[#allocation2 + $0xe44] ss:$72 sps:$4 sm:$0xff]  }
 0x597   :  { %16088 = vmatprep.mubr.bf16.mxu0 %v24287_v40 }
 0x598   :  { %15801 = vmatpush1.bf16.msra.mxu1 %v22780_v15  ;;  %v22828_v15 = vld [vmem:[#allocation2 + $0x2038] ss:$72 sps:$4 sm:$0xff]  }
 0x599   :  { %16059 = vmatpush1.bf16.msra.mxu0 %v22783_v1  ;;  %15802 = vmatprep.subr.bf16.mxu1 %v22788_v2  ;;  %v22831_v1 = vld [vmem:[#allocation2 + $0xe40] ss:$72 sps:$4 sm:$0xff]   ;;  %v22836_v2 = vld [vmem:[#allocation2 + $0x20cc] ss:$72 sps:$4 sm:$0xff]  }
 0x59a   :  { %16060 = vmatprep.subr.bf16.mxu0 %v22791_v32  ;;  %v22839_v32 = vld [vmem:[#allocation2 + $0xed4] ss:$72 sps:$4 sm:$0xff]  }
 0x59c   :  { %15803 = vmatpush1.bf16.msra.mxu1 %v22786_v16  ;;  %v22834_v16 = vld [vmem:[#allocation2 + $0x20c8] ss:$72 sps:$4 sm:$0xff]  }
 0x59d   :  { %16061 = vmatpush1.bf16.msra.mxu0 %v22789_v35  ;;  %15804 = vmatprep.subr.bf16.mxu1 %v22794_v36  ;;  %v22837_v35 = vld [vmem:[#allocation2 + $0xed0] ss:$72 sps:$4 sm:$0xff]   ;;  %v22842_v36 = vld [vmem:[#allocation2 + $0x215c] ss:$72 sps:$4 sm:$0xff]  }
 0x59e   :  { %16062 = vmatprep.subr.bf16.mxu0 %v22797_v37  ;;  %v22845_v37 = vld [vmem:[#allocation2 + $0xf64] ss:$72 sps:$4 sm:$0xff]  }
 0x5a0   :  { %15805 = vmatpush1.bf16.msra.mxu1 %v22792_v38  ;;  %v22840_v38 = vld [vmem:[#allocation2 + $0x2158] ss:$72 sps:$4 sm:$0xff]  }
 0x5a1   :  { %16063 = vmatpush1.bf16.msra.mxu0 %v22795_v39  ;;  %15806 = vmatprep.subr.bf16.mxu1 %v22800_v41  ;;  %v22843_v39 = vld [vmem:[#allocation2 + $0xf60] ss:$72 sps:$4 sm:$0xff]   ;;  %v22848_v41 = vld [vmem:[#allocation2 + $0x21ec] ss:$72 sps:$4 sm:$0xff]  }
 0x5a2   :  { %16064 = vmatprep.subr.bf16.mxu0 %v22803_v42  ;;  %v22851_v42 = vld [vmem:[#allocation2 + $0xff4] ss:$72 sps:$4 sm:$0xff]  }
 0x5a4   :  { %15807 = vmatpush1.bf16.msra.mxu1 %v22798_v48  ;;  %v22846_v48 = vld [vmem:[#allocation2 + $0x21e8] ss:$72 sps:$4 sm:$0xff]  }
 0x5a5   :  { %16065 = vmatpush1.bf16.msra.mxu0 %v22801_v49  ;;  %15808 = vmatprep.subr.bf16.mxu1 %v22806_v50  ;;  %v22849_v49 = vld [vmem:[#allocation2 + $0xff0] ss:$72 sps:$4 sm:$0xff]   ;;  %v22854_v50 = vld [vmem:[#allocation2 + $0x227c] ss:$72 sps:$4 sm:$0xff]  }
 0x5a6   :  { %16066 = vmatprep.subr.bf16.mxu0 %v22809_v51  ;;  %v24505_v54 = vpop.f32.mrb[8].mxu1  ;;  %v22857_v51 = vld [vmem:[#allocation2 + $0x1084] ss:$72 sps:$4 sm:$0xff]  }
 0x5a7   :  { %v24507_v56 = vpop.f32.mrb[9].mxu1 }
 0x5a8   :  { %v24509_v57 = vpop.f32.mrb[10].mxu1  ;;  %15809 = vmatpush1.bf16.msra.mxu1 %v22804_v29  ;;  %v22852_v29 = vld [vmem:[#allocation2 + $0x2278] ss:$72 sps:$4 sm:$0xff]  }
 0x5a9   :  { %16067 = vmatpush1.bf16.msra.mxu0 %v22807_v30  ;;  %v24511_v61 = vpop.f32.mrb[11].mxu1  ;;  %15810 = vmatprep.subr.bf16.mxu1 %v22812_v31  ;;  %v22855_v30 = vld [vmem:[#allocation2 + $0x1080] ss:$72 sps:$4 sm:$0xff]   ;;  %v22860_v31 = vld [vmem:[#allocation2 + $0x230c] ss:$72 sps:$4 sm:$0xff]  }
 0x5aa   :  { %16068 = vmatprep.subr.bf16.mxu0 %v22815_v53  ;;  %v22863_v53 = vld [vmem:[#allocation2 + $0x1114] ss:$72 sps:$4 sm:$0xff]  }
 0x5ac   :  { %15811 = vmatpush1.bf16.msra.mxu1 %v22810_v58  ;;  %v22858_v58 = vld [vmem:[#allocation2 + $0x2308] ss:$72 sps:$4 sm:$0xff]  }
 0x5ad   :  { %16069 = vmatpush1.bf16.msra.mxu0 %v22813_v60  ;;  %15812 = vmatprep.subr.bf16.mxu1 %v22818_v4  ;;  %v22861_v60 = vld [vmem:[#allocation2 + $0x1110] ss:$72 sps:$4 sm:$0xff]   ;;  %v22866_v4 = vld [vmem:[#allocation2 + $0x239c] ss:$72 sps:$4 sm:$0xff]  }
 0x5ae   :  { %16070 = vmatprep.subr.bf16.mxu0 %v22821_v47  ;;  %v22869_v47 = vld [vmem:[#allocation2 + $0x11a4] ss:$72 sps:$4 sm:$0xff]  }
 0x5b0   :  { %15813 = vmatpush1.bf16.msra.mxu1 %v22816_v5  ;;  %v22864_v5 = vld [vmem:[#allocation2 + $0x2398] ss:$72 sps:$4 sm:$0xff]  }
 0x5b1   :  { %16071 = vmatpush1.bf16.msra.mxu0 %v22819_v7  ;;  %15814 = vmatprep.subr.bf16.mxu1 %v22824_v12  ;;  %v22867_v7 = vld [vmem:[#allocation2 + $0x11a0] ss:$72 sps:$4 sm:$0xff]   ;;  %v22872_v12 = vld [vmem:[#allocation2 + $0x242c] ss:$72 sps:$4 sm:$0xff]  }
 0x5b2   :  { %16072 = vmatprep.subr.bf16.mxu0 %v22827_v13  ;;  %v22875_v13 = vld [vmem:[#allocation2 + $0x1234] ss:$72 sps:$4 sm:$0xff]  }
 0x5b4   :  { %15815 = vmatpush1.bf16.msra.mxu1 %v22822_v24  ;;  %v22870_v24 = vld [vmem:[#allocation2 + $0x2428] ss:$72 sps:$4 sm:$0xff]  }
 0x5b5   :  { %16073 = vmatpush1.bf16.msra.mxu0 %v22825_v14  ;;  %15816 = vmatprep.subr.bf16.mxu1 %v22830_v26  ;;  %v22873_v14 = vld [vmem:[#allocation2 + $0x1230] ss:$72 sps:$4 sm:$0xff]   ;;  %v22878_v26 = vld [vmem:[#allocation2 + $0x24bc] ss:$72 sps:$4 sm:$0xff]  }
 0x5b6   :  { %16074 = vmatprep.subr.bf16.mxu0 %v22833_v27  ;;  %v22881_v27 = vld [vmem:[#allocation2 + $0x12c4] ss:$72 sps:$4 sm:$0xff]  }
 0x5b8   :  { %15817 = vmatpush1.bf16.msra.mxu1 %v22828_v15  ;;  %v22876_v15 = vld [vmem:[#allocation2 + $0x24b8] ss:$72 sps:$4 sm:$0xff]  }
 0x5b9   :  { %16075 = vmatpush1.bf16.msra.mxu0 %v22831_v1  ;;  %15818 = vmatprep.subr.bf16.mxu1 %v22836_v2  ;;  %v22879_v1 = vld [vmem:[#allocation2 + $0x12c0] ss:$72 sps:$4 sm:$0xff]   ;;  %v22884_v2 = vld [vmem:[#allocation2 + $0x254c] ss:$72 sps:$4 sm:$0xff]  }
 0x5ba   :  { %16076 = vmatprep.subr.bf16.mxu0 %v22839_v32  ;;  %v22887_v32 = vld [vmem:[#allocation2 + $0x1354] ss:$72 sps:$4 sm:$0xff]  }
 0x5bc   :  { %15819 = vmatpush1.bf16.msra.mxu1 %v22834_v16  ;;  %v22882_v16 = vld [vmem:[#allocation2 + $0x2548] ss:$72 sps:$4 sm:$0xff]  }
 0x5bd   :  { %16077 = vmatpush1.bf16.msra.mxu0 %v22837_v35  ;;  %15820 = vmatprep.subr.bf16.mxu1 %v22842_v36  ;;  %v22885_v35 = vld [vmem:[#allocation2 + $0x1350] ss:$72 sps:$4 sm:$0xff]   ;;  %v22890_v36 = vld [vmem:[#allocation2 + $0x25dc] ss:$72 sps:$4 sm:$0xff]  }
 0x5be   :  { %16078 = vmatprep.subr.bf16.mxu0 %v22845_v37  ;;  %v22893_v37 = vld [vmem:[#allocation2 + $0x13e4] ss:$72 sps:$4 sm:$0xff]  }
 0x5c0   :  { %15821 = vmatpush1.bf16.msra.mxu1 %v22840_v38  ;;  %v22888_v38 = vld [vmem:[#allocation2 + $0x25d8] ss:$72 sps:$4 sm:$0xff]  }
 0x5c1   :  { %16079 = vmatpush1.bf16.msra.mxu0 %v22843_v39  ;;  %15822 = vmatprep.subr.bf16.mxu1 %v22848_v41  ;;  %v22891_v39 = vld [vmem:[#allocation2 + $0x13e0] ss:$72 sps:$4 sm:$0xff]   ;;  %v22896_v41 = vld [vmem:[#allocation2 + $0x266c] ss:$72 sps:$4 sm:$0xff]  }
 0x5c2   :  { %16080 = vmatprep.subr.bf16.mxu0 %v22851_v42  ;;  %v22899_v42 = vld [vmem:[#allocation2 + $0x1474] ss:$72 sps:$4 sm:$0xff]  }
 0x5c4   :  { %15823 = vmatpush1.bf16.msra.mxu1 %v22846_v48  ;;  %v22894_v48 = vld [vmem:[#allocation2 + $0x2668] ss:$72 sps:$4 sm:$0xff]  }
 0x5c5   :  { %16081 = vmatpush1.bf16.msra.mxu0 %v22849_v49  ;;  %15824 = vmatprep.subr.bf16.mxu1 %v22854_v50  ;;  %v22897_v49 = vld [vmem:[#allocation2 + $0x1470] ss:$72 sps:$4 sm:$0xff]   ;;  %v22902_v50 = vld [vmem:[#allocation2 + $0x26fc] ss:$72 sps:$4 sm:$0xff]  }
 0x5c6   :  { %16082 = vmatprep.subr.bf16.mxu0 %v22857_v51  ;;  %v22905_v51 = vld [vmem:[#allocation2 + $0x1504] ss:$72 sps:$4 sm:$0xff]  }
 0x5c8   :  { %15825 = vmatpush1.bf16.msra.mxu1 %v22852_v29  ;;  %v22900_v29 = vld [vmem:[#allocation2 + $0x26f8] ss:$72 sps:$4 sm:$0xff]  }
 0x5c9   :  { %16083 = vmatpush1.bf16.msra.mxu0 %v22855_v30  ;;  %15826 = vmatprep.subr.bf16.mxu1 %v22860_v31  ;;  %v22903_v30 = vld [vmem:[#allocation2 + $0x1500] ss:$72 sps:$4 sm:$0xff]   ;;  %v22908_v31 = vld [vmem:[#allocation2 + $0x278c] ss:$72 sps:$4 sm:$0xff]  }
 0x5ca   :  { %16084 = vmatprep.subr.bf16.mxu0 %v22863_v53  ;;  %v22911_v53 = vld [vmem:[#allocation2 + $0x1594] ss:$72 sps:$4 sm:$0xff]  }
 0x5cc   :  { %15827 = vmatpush1.bf16.msra.mxu1 %v22858_v58  ;;  %v22906_v58 = vld [vmem:[#allocation2 + $0x2788] ss:$72 sps:$4 sm:$0xff]  }
 0x5cd   :  { %16085 = vmatpush1.bf16.msra.mxu0 %v22861_v60  ;;  %15828 = vmatprep.subr.bf16.mxu1 %v22866_v4  ;;  %v22909_v60 = vld [vmem:[#allocation2 + $0x1590] ss:$72 sps:$4 sm:$0xff]   ;;  %v22914_v4 = vld [vmem:[#allocation2 + $0x281c] ss:$72 sps:$4 sm:$0xff]  }
 0x5ce   :  { %16086 = vmatprep.subr.bf16.mxu0 %v22869_v47  ;;  %v22917_v47 = vld [vmem:[#allocation2 + $0x1624] ss:$72 sps:$4 sm:$0xff]  }
 0x5d0   :  { %15829 = vmatpush1.bf16.msra.mxu1 %v22864_v5  ;;  %v22912_v5 = vld [vmem:[#allocation2 + $0x2818] ss:$72 sps:$4 sm:$0xff]  }
 0x5d1   :  { %16087 = vmatpush1.bf16.msra.mxu0 %v22867_v7  ;;  %15841 = vmatprep.subr.bf16.mxu1 %v22872_v12  ;;  %v22915_v7 = vld [vmem:[#allocation2 + $0x1620] ss:$72 sps:$4 sm:$0xff]   ;;  %v22920_v12 = vld [vmem:[#allocation2 + $0x28ac] ss:$72 sps:$4 sm:$0xff]  }
 0x5d2   :  { %16099 = vmatprep.subr.bf16.mxu0 %v22875_v13  ;;  %v22923_v13 = vld [vmem:[#allocation2 + $0x16b4] ss:$72 sps:$4 sm:$0xff]  }
 0x5d3   :  { %15831 = vmatmul.mubr.bf16.vlgmr.msra.gmra.mrb[12].mxu1 %v24271_v11 }
 0x5d4   :  { %16089 = vmatmul.mubr.bf16.vlgmr.msra.gmra.mrb[12].mxu0 %v24307_v22  ;;  %15842 = vmatpush1.bf16.msra.mxu1 %v22870_v24  ;;  %v22918_v24 = vld [vmem:[#allocation2 + $0x28a8] ss:$72 sps:$4 sm:$0xff]  }
 0x5d5   :  { %16100 = vmatpush1.bf16.msra.mxu0 %v22873_v14  ;;  %15843 = vmatprep.subr.bf16.mxu1 %v22878_v26  ;;  %v22921_v14 = vld [vmem:[#allocation2 + $0x16b0] ss:$72 sps:$4 sm:$0xff]   ;;  %v22926_v26 = vld [vmem:[#allocation2 + $0x293c] ss:$72 sps:$4 sm:$0xff]  }
 0x5d6   :  { %16101 = vmatprep.subr.bf16.mxu0 %v22881_v27  ;;  %15873 = vmatprep.mubr.bf16.mxu1 %v24302_v43  ;;  %v22929_v27 = vld [vmem:[#allocation2 + $0x1744] ss:$72 sps:$4 sm:$0xff]  }
 0x5d7   :  { %16131 = vmatprep.mubr.bf16.mxu0 %v24337_v33 }
 0x5d8   :  { %15844 = vmatpush1.bf16.msra.mxu1 %v22876_v15  ;;  %v22924_v15 = vld [vmem:[#allocation2 + $0x2938] ss:$72 sps:$4 sm:$0xff]  }
 0x5d9   :  { %16102 = vmatpush1.bf16.msra.mxu0 %v22879_v1  ;;  %15845 = vmatprep.subr.bf16.mxu1 %v22884_v2  ;;  %v22927_v1 = vld [vmem:[#allocation2 + $0x1740] ss:$72 sps:$4 sm:$0xff]   ;;  %v22932_v2 = vld [vmem:[#allocation2 + $0x29cc] ss:$72 sps:$4 sm:$0xff]  }
 0x5da   :  { %16103 = vmatprep.subr.bf16.mxu0 %v22887_v32  ;;  %v22935_v32 = vld [vmem:[#allocation2 + $0x17d4] ss:$72 sps:$4 sm:$0xff]  }
 0x5dc   :  { %15846 = vmatpush1.bf16.msra.mxu1 %v22882_v16  ;;  %v22930_v16 = vld [vmem:[#allocation2 + $0x29c8] ss:$72 sps:$4 sm:$0xff]  }
 0x5dd   :  { %16104 = vmatpush1.bf16.msra.mxu0 %v22885_v35  ;;  %15847 = vmatprep.subr.bf16.mxu1 %v22890_v36  ;;  %v22933_v35 = vld [vmem:[#allocation2 + $0x17d0] ss:$72 sps:$4 sm:$0xff]   ;;  %v22938_v36 = vld [vmem:[#allocation2 + $0x2a5c] ss:$72 sps:$4 sm:$0xff]  }
 0x5de   :  { %16105 = vmatprep.subr.bf16.mxu0 %v22893_v37  ;;  %v22941_v37 = vld [vmem:[#allocation2 + $0x1864] ss:$72 sps:$4 sm:$0xff]  }
 0x5e0   :  { %15848 = vmatpush1.bf16.msra.mxu1 %v22888_v38  ;;  %v22936_v38 = vld [vmem:[#allocation2 + $0x2a58] ss:$72 sps:$4 sm:$0xff]  }
 0x5e1   :  { %16106 = vmatpush1.bf16.msra.mxu0 %v22891_v39  ;;  %15849 = vmatprep.subr.bf16.mxu1 %v22896_v41  ;;  %v22939_v39 = vld [vmem:[#allocation2 + $0x1860] ss:$72 sps:$4 sm:$0xff]   ;;  %v22944_v41 = vld [vmem:[#allocation2 + $0x2aec] ss:$72 sps:$4 sm:$0xff]  }
 0x5e2   :  { %16107 = vmatprep.subr.bf16.mxu0 %v22899_v42  ;;  %v22947_v42 = vld [vmem:[#allocation2 + $0x18f4] ss:$72 sps:$4 sm:$0xff]  }
 0x5e4   :  { %15850 = vmatpush1.bf16.msra.mxu1 %v22894_v48  ;;  %v22942_v48 = vld [vmem:[#allocation2 + $0x2ae8] ss:$72 sps:$4 sm:$0xff]  }
 0x5e5   :  { %16108 = vmatpush1.bf16.msra.mxu0 %v22897_v49  ;;  %15851 = vmatprep.subr.bf16.mxu1 %v22902_v50  ;;  %v22945_v49 = vld [vmem:[#allocation2 + $0x18f0] ss:$72 sps:$4 sm:$0xff]   ;;  %v22950_v50 = vld [vmem:[#allocation2 + $0x2b7c] ss:$72 sps:$4 sm:$0xff]  }
 0x5e6   :  { %16109 = vmatprep.subr.bf16.mxu0 %v22905_v51  ;;  %v22953_v51 = vld [vmem:[#allocation2 + $0x1984] ss:$72 sps:$4 sm:$0xff]  }
 0x5e8   :  { %15852 = vmatpush1.bf16.msra.mxu1 %v22900_v29  ;;  %v22948_v29 = vld [vmem:[#allocation2 + $0x2b78] ss:$72 sps:$4 sm:$0xff]  }
 0x5e9   :  { %16110 = vmatpush1.bf16.msra.mxu0 %v22903_v30  ;;  %15853 = vmatprep.subr.bf16.mxu1 %v22908_v31  ;;  %v22951_v30 = vld [vmem:[#allocation2 + $0x1980] ss:$72 sps:$4 sm:$0xff]   ;;  %v22956_v31 = vld [vmem:[#allocation2 + $0x2c0c] ss:$72 sps:$4 sm:$0xff]  }
 0x5ea   :  { %16111 = vmatprep.subr.bf16.mxu0 %v22911_v53  ;;  %v22959_v53 = vld [vmem:[#allocation2 + $0x1a14] ss:$72 sps:$4 sm:$0xff]  }
 0x5ec   :  { %15854 = vmatpush1.bf16.msra.mxu1 %v22906_v58  ;;  %v22954_v58 = vld [vmem:[#allocation2 + $0x2c08] ss:$72 sps:$4 sm:$0xff]  }
 0x5ed   :  { %16112 = vmatpush1.bf16.msra.mxu0 %v22909_v60  ;;  %15855 = vmatprep.subr.bf16.mxu1 %v22914_v4  ;;  %v22957_v60 = vld [vmem:[#allocation2 + $0x1a10] ss:$72 sps:$4 sm:$0xff]   ;;  %v22962_v4 = vld [vmem:[#allocation2 + $0x2c9c] ss:$72 sps:$4 sm:$0xff]  }
 0x5ee   :  { %16113 = vmatprep.subr.bf16.mxu0 %v22917_v47  ;;  %v22965_v47 = vld [vmem:[#allocation2 + $0x1aa4] ss:$72 sps:$4 sm:$0xff]  }
 0x5f0   :  { %15856 = vmatpush1.bf16.msra.mxu1 %v22912_v5  ;;  %v22960_v5 = vld [vmem:[#allocation2 + $0x2c98] ss:$72 sps:$4 sm:$0xff]  }
 0x5f1   :  { %16114 = vmatpush1.bf16.msra.mxu0 %v22915_v7  ;;  %15857 = vmatprep.subr.bf16.mxu1 %v22920_v12  ;;  %v22963_v7 = vld [vmem:[#allocation2 + $0x1aa0] ss:$72 sps:$4 sm:$0xff]   ;;  %v22968_v12 = vld [vmem:[#allocation2 + $0x2d2c] ss:$72 sps:$4 sm:$0xff]  }
 0x5f2   :  { %16115 = vmatprep.subr.bf16.mxu0 %v22923_v13  ;;  %v22971_v13 = vld [vmem:[#allocation2 + $0x1b34] ss:$72 sps:$4 sm:$0xff]  }
 0x5f4   :  { %15858 = vmatpush1.bf16.msra.mxu1 %v22918_v24  ;;  %v22966_v24 = vld [vmem:[#allocation2 + $0x2d28] ss:$72 sps:$4 sm:$0xff]  }
 0x5f5   :  { %16116 = vmatpush1.bf16.msra.mxu0 %v22921_v14  ;;  %15859 = vmatprep.subr.bf16.mxu1 %v22926_v26  ;;  %v22969_v14 = vld [vmem:[#allocation2 + $0x1b30] ss:$72 sps:$4 sm:$0xff]   ;;  %v22974_v26 = vld [vmem:[#allocation2 + $0x2dbc] ss:$72 sps:$4 sm:$0xff]  }
 0x5f6   :  { %16117 = vmatprep.subr.bf16.mxu0 %v22929_v27  ;;  %v22977_v27 = vld [vmem:[#allocation2 + $0x1bc4] ss:$72 sps:$4 sm:$0xff]  }
 0x5f8   :  { %15860 = vmatpush1.bf16.msra.mxu1 %v22924_v15  ;;  %v22972_v15 = vld [vmem:[#allocation2 + $0x2db8] ss:$72 sps:$4 sm:$0xff]  }
 0x5f9   :  { %16118 = vmatpush1.bf16.msra.mxu0 %v22927_v1  ;;  %15861 = vmatprep.subr.bf16.mxu1 %v22932_v2  ;;  %v22975_v1 = vld [vmem:[#allocation2 + $0x1bc0] ss:$72 sps:$4 sm:$0xff]   ;;  %v22980_v2 = vld [vmem:[#allocation2 + $0x2e4c] ss:$72 sps:$4 sm:$0xff]  }
 0x5fa   :  { %16119 = vmatprep.subr.bf16.mxu0 %v22935_v32  ;;  %v22983_v32 = vld [vmem:[#allocation2 + $0x1c54] ss:$72 sps:$4 sm:$0xff]  }
 0x5fc   :  { %15862 = vmatpush1.bf16.msra.mxu1 %v22930_v16  ;;  %v22978_v16 = vld [vmem:[#allocation2 + $0x2e48] ss:$72 sps:$4 sm:$0xff]  }
 0x5fd   :  { %16120 = vmatpush1.bf16.msra.mxu0 %v22933_v35  ;;  %15863 = vmatprep.subr.bf16.mxu1 %v22938_v36  ;;  %v22981_v35 = vld [vmem:[#allocation2 + $0x1c50] ss:$72 sps:$4 sm:$0xff]   ;;  %v22986_v36 = vld [vmem:[#allocation2 + $0x2edc] ss:$72 sps:$4 sm:$0xff]  }
 0x5fe   :  { %16121 = vmatprep.subr.bf16.mxu0 %v22941_v37  ;;  %v22989_v37 = vld [vmem:[#allocation2 + $0x1ce4] ss:$72 sps:$4 sm:$0xff]  }
 0x600   :  { %15864 = vmatpush1.bf16.msra.mxu1 %v22936_v38  ;;  %v22984_v38 = vld [vmem:[#allocation2 + $0x2ed8] ss:$72 sps:$4 sm:$0xff]  }
 0x601   :  { %16122 = vmatpush1.bf16.msra.mxu0 %v22939_v39  ;;  %15865 = vmatprep.subr.bf16.mxu1 %v22944_v41  ;;  %v22987_v39 = vld [vmem:[#allocation2 + $0x1ce0] ss:$72 sps:$4 sm:$0xff]   ;;  %v22992_v41 = vld [vmem:[#allocation2 + $0x2f6c] ss:$72 sps:$4 sm:$0xff]  }
 0x602   :  { %16123 = vmatprep.subr.bf16.mxu0 %v22947_v42  ;;  %v22995_v42 = vld [vmem:[#allocation2 + $0x1d74] ss:$72 sps:$4 sm:$0xff]  }
 0x604   :  { %15866 = vmatpush1.bf16.msra.mxu1 %v22942_v48  ;;  %v22990_v48 = vld [vmem:[#allocation2 + $0x2f68] ss:$72 sps:$4 sm:$0xff]  }
 0x605   :  { %16124 = vmatpush1.bf16.msra.mxu0 %v22945_v49  ;;  %15867 = vmatprep.subr.bf16.mxu1 %v22950_v50  ;;  %v22993_v49 = vld [vmem:[#allocation2 + $0x1d70] ss:$72 sps:$4 sm:$0xff]   ;;  %v22998_v50 = vld [vmem:[#allocation2 + $0x2ffc] ss:$72 sps:$4 sm:$0xff]  }
 0x606   :  { %16125 = vmatprep.subr.bf16.mxu0 %v22953_v51  ;;  %v23001_v51 = vld [vmem:[#allocation2 + $0x1e04] ss:$72 sps:$4 sm:$0xff]  }
 0x608   :  { %15868 = vmatpush1.bf16.msra.mxu1 %v22948_v29  ;;  %v22996_v29 = vld [vmem:[#allocation2 + $0x2ff8] ss:$72 sps:$4 sm:$0xff]  }
 0x609   :  { %16126 = vmatpush1.bf16.msra.mxu0 %v22951_v30  ;;  %15869 = vmatprep.subr.bf16.mxu1 %v22956_v31  ;;  %v22999_v30 = vld [vmem:[#allocation2 + $0x1e00] ss:$72 sps:$4 sm:$0xff]   ;;  %v23004_v31 = vld [vmem:[#allocation2 + $0x308c] ss:$72 sps:$4 sm:$0xff]  }
 0x60a   :  { %16127 = vmatprep.subr.bf16.mxu0 %v22959_v53  ;;  %v23007_v53 = vld [vmem:[#allocation2 + $0x1e94] ss:$72 sps:$4 sm:$0xff]  }
 0x60c   :  { %15870 = vmatpush1.bf16.msra.mxu1 %v22954_v58 }
 0x60d   :  { %16128 = vmatpush1.bf16.msra.mxu0 %v22957_v60  ;;  %15871 = vmatprep.subr.bf16.mxu1 %v22962_v4  ;;  %v17045_v4 = vmul.f32 %v24422_v6, %v24422_v6  ;;  %v23008_v6 = vld [vmem:[#allocation2 + $0x3118] ss:$72 sps:$4 sm:$0xff]  }
 0x60e   :  { %16129 = vmatprep.subr.bf16.mxu0 %v22965_v47 }
 0x610   :  { %15872 = vmatpush1.bf16.msra.mxu1 %v22960_v5 }
 0x611   :  { %16130 = vmatpush1.bf16.msra.mxu0 %v22963_v7  ;;  %15884 = vmatprep.subr.bf16.mxu1 %v22968_v12  ;;  %v23002_v7 = vld [vmem:[#allocation2 + $0x3088] ss:$72 sps:$4 sm:$0xff]  }
 0x612   :  { %16142 = vmatprep.subr.bf16.mxu0 %v22971_v13  ;;  %v23005_v12 = vld [vmem:[#allocation2 + $0x1e90] ss:$72 sps:$4 sm:$0xff]  }
 0x613   :  { %15874 = vmatmul.mubr.bf16.vlgmr.msra.gmra.mrb[12].mxu1 %v24311_v23 }
 0x614   :  { %16132 = vmatmul.mubr.bf16.vlgmr.msra.gmra.mrb[12].mxu0 %v24352_v45  ;;  %15885 = vmatpush1.bf16.msra.mxu1 %v22966_v24  ;;  %v23010_v24 = vld [vmem:[#allocation2 + $0x311c] ss:$72 sps:$4 sm:$0xff]  }
 0x615   :  { %16143 = vmatpush1.bf16.msra.mxu0 %v22969_v14  ;;  %15886 = vmatprep.subr.bf16.mxu1 %v22974_v26  ;;  %v23013_v14 = vld [vmem:[#allocation2 + $0x1f24] ss:$72 sps:$4 sm:$0xff]   ;;  %v17054_v26 = vmul.f32 %v24428_v18, %v24428_v18  ;;  %v23017_v18 = vld [vmem:[#allocation2 + $0x1fb0] ss:$72 sps:$4 sm:$0xff]  }
 0x616   :  { %16144 = vmatprep.subr.bf16.mxu0 %v22977_v27  ;;  %15916 = vmatprep.mubr.bf16.mxu1 %v24341_v34 }
 0x617   :  { %16174 = vmatprep.mubr.bf16.mxu0 %v24266_v55 }
 0x618   :  { %15887 = vmatpush1.bf16.msra.mxu1 %v22972_v15 }
 0x619   :  { %16145 = vmatpush1.bf16.msra.mxu0 %v22975_v1  ;;  %15888 = vmatprep.subr.bf16.mxu1 %v22980_v2  ;;  %v23011_v2 = vld [vmem:[#allocation2 + $0x1f20] ss:$72 sps:$4 sm:$0xff]  }
 0x61a   :  { %16146 = vmatprep.subr.bf16.mxu0 %v22983_v32  ;;  %v23016_v32 = vld [vmem:[#allocation2 + $0x31ac] ss:$72 sps:$4 sm:$0xff]  }
 0x61c   :  { %15889 = vmatpush1.bf16.msra.mxu1 %v22978_v16  ;;  %v23019_v16 = vld [vmem:[#allocation2 + $0x1fb4] ss:$72 sps:$4 sm:$0xff]  }
 0x61d   :  { %16147 = vmatpush1.bf16.msra.mxu0 %v22981_v35  ;;  %15890 = vmatprep.subr.bf16.mxu1 %v22986_v36  ;;  %v23014_v36 = vld [vmem:[#allocation2 + $0x31a8] ss:$72 sps:$4 sm:$0xff]  }
 0x61e   :  { %16148 = vmatprep.subr.bf16.mxu0 %v22989_v37  ;;  %v23022_v37 = vld [vmem:[#allocation2 + $0x323c] ss:$72 sps:$4 sm:$0xff]  }
 0x620   :  { %15891 = vmatpush1.bf16.msra.mxu1 %v22984_v38  ;;  %v23025_v38 = vld [vmem:[#allocation2 + $0x2044] ss:$72 sps:$4 sm:$0xff]  }
 0x621   :  { %16149 = vmatpush1.bf16.msra.mxu0 %v22987_v39  ;;  %15892 = vmatprep.subr.bf16.mxu1 %v22992_v41  ;;  %v23020_v39 = vld [vmem:[#allocation2 + $0x3238] ss:$72 sps:$4 sm:$0xff]  }
 0x622   :  { %16150 = vmatprep.subr.bf16.mxu0 %v22995_v42  ;;  %v23023_v41 = vld [vmem:[#allocation2 + $0x2040] ss:$72 sps:$4 sm:$0xff]   ;;  %v23028_v42 = vld [vmem:[#allocation2 + $0x32cc] ss:$72 sps:$4 sm:$0xff]  }
 0x624   :  { %15893 = vmatpush1.bf16.msra.mxu1 %v22990_v48  ;;  %v23031_v48 = vld [vmem:[#allocation2 + $0x20d4] ss:$72 sps:$4 sm:$0xff]  }
 0x625   :  { %16151 = vmatpush1.bf16.msra.mxu0 %v22993_v49  ;;  %15894 = vmatprep.subr.bf16.mxu1 %v22998_v50  ;;  %v23026_v49 = vld [vmem:[#allocation2 + $0x32c8] ss:$72 sps:$4 sm:$0xff]  }
 0x626   :  { %16152 = vmatprep.subr.bf16.mxu0 %v23001_v51  ;;  %v23029_v50 = vld [vmem:[#allocation2 + $0x20d0] ss:$72 sps:$4 sm:$0xff]   ;;  %v23034_v51 = vld [vmem:[#allocation2 + $0x335c] ss:$72 sps:$4 sm:$0xff]  }
 0x627   :  { %v24521_v58 = vpop.f32.mrb[8].mxu0 }
 0x628   :  { %v15662_v60 = vpop.f32.mrb[9].mxu0  ;;  %15895 = vmatpush1.bf16.msra.mxu1 %v22996_v29  ;;  %v23037_v29 = vld [vmem:[#allocation2 + $0x2164] ss:$72 sps:$4 sm:$0xff]  }
 0x629   :  { %v17063_v47 = vmul.f32 %v15662_v60, %v15662_v60  ;;  %v24525_v5 = vpop.f32.mrb[10].mxu0  ;;  %16153 = vmatpush1.bf16.msra.mxu0 %v22999_v30  ;;  %15896 = vmatprep.subr.bf16.mxu1 %v23004_v31  ;;  %v23032_v30 = vld [vmem:[#allocation2 + $0x3358] ss:$72 sps:$4 sm:$0xff]   ;;  %v23043_v60 = vld [vmem:[#allocation2 + $0x21f4] ss:$72 sps:$4 sm:$0xff]  }
 0x62a   :  { %v15666_v13 = vpop.f32.mrb[11].mxu0  ;;  %16154 = vmatprep.subr.bf16.mxu0 %v23007_v53  ;;  %v23035_v31 = vld [vmem:[#allocation2 + $0x2160] ss:$72 sps:$4 sm:$0xff]   ;;  %v23040_v53 = vld [vmem:[#allocation2 + $0x33ec] ss:$72 sps:$4 sm:$0xff]  }
 0x62b   :  { %v24529_v27 = vadd.f32 %v17063_v47, %v17045_v4  ;;  %v17072_v15 = vmul.f32 %v15666_v13, %v15666_v13  ;;  %v23038_v4 = vld [vmem:[#allocation2 + $0x33e8] ss:$72 sps:$4 sm:$0xff]   ;;  %v23044_v13 = vld [vmem:[#allocation2 + $0x3478] ss:$72 sps:$4 sm:$0xff]  }
 0x62c   :  { %15897 = vmatpush1.bf16.msra.mxu1 %v23002_v7  ;;  %v23041_v47 = vld [vmem:[#allocation2 + $0x21f0] ss:$72 sps:$4 sm:$0xff]   ;;  %v23046_v7 = vld [vmem:[#allocation2 + $0x347c] ss:$72 sps:$4 sm:$0xff]  }
 0x62d   :  { %v24531_v1 = vadd.f32 %v17072_v15, %v17054_v26  ;;  %16155 = vmatpush1.bf16.msra.mxu0 %v23005_v12  ;;  %15898 = vmatprep.subr.bf16.mxu1 %v23010_v24  ;;  %v23049_v12 = vld [vmem:[#allocation2 + $0x2284] ss:$72 sps:$4 sm:$0xff]   ;;  %v23047_v24 = vld [vmem:[#allocation2 + $0x2280] ss:$72 sps:$4 sm:$0xff]   ;;  %v23055_v26 = vld [vmem:[#allocation2 + $0x2314] ss:$72 sps:$4 sm:$0xff]  }
 0x62e   :  { %16156 = vmatprep.subr.bf16.mxu0 %v23013_v14  ;;  %v23052_v14 = vld [vmem:[#allocation2 + $0x350c] ss:$72 sps:$4 sm:$0xff]   ;;  %v23050_v15 = vld [vmem:[#allocation2 + $0x3508] ss:$72 sps:$4 sm:$0xff]  }
 0x62f   :  { %v17099_v35 = vpack.c.bf16 %v24531_v1, %v24529_v27  ;;  %v24072_v27 = vld [vmem:[#allocation2 + $0x3be0] ss:$72 sps:$4 sm:$0xff]   ;;  %v24076_v1 = vld [vmem:[%s24885_s2 + $0x90] sm:$0xff]  }
 0x630   :  { %15899 = vmatpush1.bf16.msra.mxu1 %v23008_v6  ;;  %v23053_v6 = vld [vmem:[#allocation2 + $0x2310] ss:$72 sps:$4 sm:$0xff]  }
 0x631   :  { %16157 = vmatpush1.bf16.msra.mxu0 %v23011_v2  ;;  %15900 = vmatprep.subr.bf16.mxu1 %v23016_v32  ;;  %v23058_v2 = vld [vmem:[#allocation2 + $0x359c] ss:$72 sps:$4 sm:$0xff]  }
 0x632   :  { %16158 = vmatprep.subr.bf16.mxu0 %v23019_v16  ;;  %v23061_v32 = vld [vmem:[#allocation2 + $0x23a4] ss:$72 sps:$4 sm:$0xff]   ;;  %v23056_v16 = vld [vmem:[#allocation2 + $0x3598] ss:$72 sps:$4 sm:$0xff]  }
 0x634   :  { %15901 = vmatpush1.bf16.msra.mxu1 %v23014_v36  ;;  %v23059_v36 = vld [vmem:[#allocation2 + $0x23a0] ss:$72 sps:$4 sm:$0xff]  }
 0x635   :  { %16159 = vmatpush1.bf16.msra.mxu0 %v23017_v18  ;;  %15902 = vmatprep.subr.bf16.mxu1 %v23022_v37  ;;  %v23064_v18 = vld [vmem:[#allocation2 + $0x362c] ss:$72 sps:$4 sm:$0xff]  }
 0x636   :  { %16160 = vmatprep.subr.bf16.mxu0 %v23025_v38  ;;  %v23067_v37 = vld [vmem:[#allocation2 + $0x2434] ss:$72 sps:$4 sm:$0xff]   ;;  %v23062_v38 = vld [vmem:[#allocation2 + $0x3628] ss:$72 sps:$4 sm:$0xff]  }
 0x638   :  { %15903 = vmatpush1.bf16.msra.mxu1 %v23020_v39  ;;  %v23065_v39 = vld [vmem:[#allocation2 + $0x2430] ss:$72 sps:$4 sm:$0xff]  }
 0x639   :  { %16161 = vmatpush1.bf16.msra.mxu0 %v23023_v41  ;;  %15904 = vmatprep.subr.bf16.mxu1 %v23028_v42  ;;  %v23070_v41 = vld [vmem:[#allocation2 + $0x36bc] ss:$72 sps:$4 sm:$0xff]  }
 0x63a   :  { %16162 = vmatprep.subr.bf16.mxu0 %v23031_v48  ;;  %v23073_v42 = vld [vmem:[#allocation2 + $0x24c4] ss:$72 sps:$4 sm:$0xff]   ;;  %v23068_v48 = vld [vmem:[#allocation2 + $0x36b8] ss:$72 sps:$4 sm:$0xff]  }
 0x63c   :  { %15905 = vmatpush1.bf16.msra.mxu1 %v23026_v49  ;;  %v23071_v49 = vld [vmem:[#allocation2 + $0x24c0] ss:$72 sps:$4 sm:$0xff]  }
 0x63d   :  { %16163 = vmatpush1.bf16.msra.mxu0 %v23029_v50  ;;  %15906 = vmatprep.subr.bf16.mxu1 %v23034_v51  ;;  %v23076_v50 = vld [vmem:[#allocation2 + $0x374c] ss:$72 sps:$4 sm:$0xff]  }
 0x63e   :  { %16164 = vmatprep.subr.bf16.mxu0 %v23037_v29  ;;  %v23079_v51 = vld [vmem:[#allocation2 + $0x2554] ss:$72 sps:$4 sm:$0xff]   ;;  %v23074_v29 = vld [vmem:[#allocation2 + $0x3748] ss:$72 sps:$4 sm:$0xff]  }
 0x640   :  { %15907 = vmatpush1.bf16.msra.mxu1 %v23032_v30  ;;  %v23077_v30 = vld [vmem:[#allocation2 + $0x2550] ss:$72 sps:$4 sm:$0xff]  }
 0x641   :  { %16165 = vmatpush1.bf16.msra.mxu0 %v23035_v31  ;;  %15908 = vmatprep.subr.bf16.mxu1 %v23040_v53  ;;  %v23082_v31 = vld [vmem:[#allocation2 + $0x37dc] ss:$72 sps:$4 sm:$0xff]  }
 0x642   :  { %16166 = vmatprep.subr.bf16.mxu0 %v23043_v60  ;;  %v23085_v53 = vld [vmem:[#allocation2 + $0x25e4] ss:$72 sps:$4 sm:$0xff]   ;;  %v23080_v60 = vld [vmem:[#allocation2 + $0x37d8] ss:$72 sps:$4 sm:$0xff]  }
 0x644   :  { %15909 = vmatpush1.bf16.msra.mxu1 %v23038_v4  ;;  %v23083_v4 = vld [vmem:[#allocation2 + $0x25e0] ss:$72 sps:$4 sm:$0xff]  }
 0x645   :  { %16167 = vmatpush1.bf16.msra.mxu0 %v23041_v47  ;;  %15910 = vmatprep.subr.bf16.mxu1 %v23046_v7  ;;  %v23088_v47 = vld [vmem:[#allocation2 + $0x386c] ss:$72 sps:$4 sm:$0xff]  }
 0x646   :  { %16168 = vmatprep.subr.bf16.mxu0 %v23049_v12  ;;  %v23091_v7 = vld [vmem:[#allocation2 + $0x2674] ss:$72 sps:$4 sm:$0xff]   ;;  %v23086_v12 = vld [vmem:[#allocation2 + $0x3868] ss:$72 sps:$4 sm:$0xff]  }
 0x648   :  { %15911 = vmatpush1.bf16.msra.mxu1 %v23044_v13  ;;  %v23089_v13 = vld [vmem:[#allocation2 + $0x2670] ss:$72 sps:$4 sm:$0xff]  }
 0x649   :  { %16169 = vmatpush1.bf16.msra.mxu0 %v23047_v24  ;;  %15912 = vmatprep.subr.bf16.mxu1 %v23052_v14  ;;  %v23094_v24 = vld [vmem:[#allocation2 + $0x38fc] ss:$72 sps:$4 sm:$0xff]  }
 0x64a   :  { %16170 = vmatprep.subr.bf16.mxu0 %v23055_v26  ;;  %v23097_v14 = vld [vmem:[#allocation2 + $0x2704] ss:$72 sps:$4 sm:$0xff]   ;;  %v23092_v26 = vld [vmem:[#allocation2 + $0x38f8] ss:$72 sps:$4 sm:$0xff]  }
 0x64c   :  { %15913 = vmatpush1.bf16.msra.mxu1 %v23050_v15  ;;  %v23095_v15 = vld [vmem:[#allocation2 + $0x2700] ss:$72 sps:$4 sm:$0xff]  }
 0x64d   :  { %16171 = vmatpush1.bf16.msra.mxu0 %v23053_v6  ;;  %15914 = vmatprep.subr.bf16.mxu1 %v23058_v2  ;;  %v23100_v6 = vld [vmem:[#allocation2 + $0x398c] ss:$72 sps:$4 sm:$0xff]  }
 0x64e   :  { %16172 = vmatprep.subr.bf16.mxu0 %v23061_v32  ;;  %v23103_v2 = vld [vmem:[#allocation2 + $0x2794] ss:$72 sps:$4 sm:$0xff]   ;;  %v23098_v32 = vld [vmem:[#allocation2 + $0x3988] ss:$72 sps:$4 sm:$0xff]  }
 0x650   :  { %15915 = vmatpush1.bf16.msra.mxu1 %v23056_v16  ;;  %v23101_v16 = vld [vmem:[#allocation2 + $0x2790] ss:$72 sps:$4 sm:$0xff]  }
 0x651   :  { %16173 = vmatpush1.bf16.msra.mxu0 %v23059_v36  ;;  %15927 = vmatprep.subr.bf16.mxu1 %v23064_v18  ;;  %v23106_v36 = vld [vmem:[#allocation2 + $0x3a1c] ss:$72 sps:$4 sm:$0xff]  }
 0x652   :  { %16185 = vmatprep.subr.bf16.mxu0 %v23067_v37  ;;  %v23109_v18 = vld [vmem:[#allocation2 + $0x2824] ss:$72 sps:$4 sm:$0xff]   ;;  %v23104_v37 = vld [vmem:[#allocation2 + $0x3a18] ss:$72 sps:$4 sm:$0xff]  }
 0x653   :  { %15917 = vmatmul.mubr.bf16.vlgmr.msra.gmra.mrb[12].mxu1 %v24356_v46 }
 0x654   :  { %16175 = vmatmul.mubr.bf16.vlgmr.msra.gmra.mrb[12].mxu0 %v24271_v11  ;;  %15928 = vmatpush1.bf16.msra.mxu1 %v23062_v38  ;;  %v23107_v38 = vld [vmem:[#allocation2 + $0x2820] ss:$72 sps:$4 sm:$0xff]  }
 0x655   :  { %16186 = vmatpush1.bf16.msra.mxu0 %v23065_v39  ;;  %15929 = vmatprep.subr.bf16.mxu1 %v23070_v41  ;;  %v23112_v39 = vld [vmem:[#allocation2 + $0x3aac] ss:$72 sps:$4 sm:$0xff]  }
 0x656   :  { %16187 = vmatprep.subr.bf16.mxu0 %v23073_v42  ;;  %15959 = vmatprep.mubr.bf16.mxu1 %v24365_v28  ;;  %v23115_v41 = vld [vmem:[#allocation2 + $0x28b4] ss:$72 sps:$4 sm:$0xff]   ;;  %v23110_v42 = vld [vmem:[#allocation2 + $0x3aa8] ss:$72 sps:$4 sm:$0xff]  }
 0x657   :  { %16217 = vmatprep.mubr.bf16.mxu0 %v24302_v43 }
 0x658   :  { %15930 = vmatpush1.bf16.msra.mxu1 %v23068_v48  ;;  %v23113_v48 = vld [vmem:[#allocation2 + $0x28b0] ss:$72 sps:$4 sm:$0xff]  }
 0x659   :  { %16188 = vmatpush1.bf16.msra.mxu0 %v23071_v49  ;;  %15931 = vmatprep.subr.bf16.mxu1 %v23076_v50  ;;  %v23118_v49 = vld [vmem:[#allocation2 + $0x3b3c] ss:$72 sps:$4 sm:$0xff]  }
 0x65a   :  { %16189 = vmatprep.subr.bf16.mxu0 %v23079_v51  ;;  %v23121_v50 = vld [vmem:[#allocation2 + $0x2944] ss:$72 sps:$4 sm:$0xff]   ;;  %v23116_v51 = vld [vmem:[#allocation2 + $0x3b38] ss:$72 sps:$4 sm:$0xff]  }
 0x65c   :  { %15932 = vmatpush1.bf16.msra.mxu1 %v23074_v29  ;;  %v23119_v29 = vld [vmem:[#allocation2 + $0x2940] ss:$72 sps:$4 sm:$0xff]  }
 0x65d   :  { %16190 = vmatpush1.bf16.msra.mxu0 %v23077_v30  ;;  %15933 = vmatprep.subr.bf16.mxu1 %v23082_v31  ;;  %v23124_v30 = vld [vmem:[#allocation2 + $0x3bcc] ss:$72 sps:$4 sm:$0xff]  }
 0x65e   :  { %16191 = vmatprep.subr.bf16.mxu0 %v23085_v53  ;;  %v23127_v31 = vld [vmem:[#allocation2 + $0x29d4] ss:$72 sps:$4 sm:$0xff]   ;;  %v23122_v53 = vld [vmem:[#allocation2 + $0x3bc8] ss:$72 sps:$4 sm:$0xff]  }
 0x660   :  { %15934 = vmatpush1.bf16.msra.mxu1 %v23080_v60  ;;  %v23125_v60 = vld [vmem:[#allocation2 + $0x29d0] ss:$72 sps:$4 sm:$0xff]  }
 0x661   :  { %16192 = vmatpush1.bf16.msra.mxu0 %v23083_v4  ;;  %15935 = vmatprep.subr.bf16.mxu1 %v23088_v47  ;;  %v23130_v4 = vld [vmem:[#allocation2 + $0x3c5c] ss:$72 sps:$4 sm:$0xff]  }
 0x662   :  { %16193 = vmatprep.subr.bf16.mxu0 %v23091_v7  ;;  %v23133_v47 = vld [vmem:[#allocation2 + $0x2a64] ss:$72 sps:$4 sm:$0xff]   ;;  %v23128_v7 = vld [vmem:[#allocation2 + $0x3c58] ss:$72 sps:$4 sm:$0xff]  }
 0x664   :  { %15936 = vmatpush1.bf16.msra.mxu1 %v23086_v12  ;;  %v23131_v12 = vld [vmem:[#allocation2 + $0x2a60] ss:$72 sps:$4 sm:$0xff]  }
 0x665   :  { %16194 = vmatpush1.bf16.msra.mxu0 %v23089_v13  ;;  %15937 = vmatprep.subr.bf16.mxu1 %v23094_v24  ;;  %v23136_v13 = vld [vmem:[#allocation2 + $0x3cec] ss:$72 sps:$4 sm:$0xff]  }
 0x666   :  { %16195 = vmatprep.subr.bf16.mxu0 %v23097_v14  ;;  %v23139_v24 = vld [vmem:[#allocation2 + $0x2af4] ss:$72 sps:$4 sm:$0xff]   ;;  %v23134_v14 = vld [vmem:[#allocation2 + $0x3ce8] ss:$72 sps:$4 sm:$0xff]  }
 0x668   :  { %15938 = vmatpush1.bf16.msra.mxu1 %v23092_v26  ;;  %v23137_v26 = vld [vmem:[#allocation2 + $0x2af0] ss:$72 sps:$4 sm:$0xff]  }
 0x669   :  { %16196 = vmatpush1.bf16.msra.mxu0 %v23095_v15  ;;  %15939 = vmatprep.subr.bf16.mxu1 %v23100_v6  ;;  %v23142_v15 = vld [vmem:[#allocation2 + $0x3d7c] ss:$72 sps:$4 sm:$0xff]  }
 0x66a   :  { %16197 = vmatprep.subr.bf16.mxu0 %v23103_v2  ;;  %v23145_v6 = vld [vmem:[#allocation2 + $0x2b84] ss:$72 sps:$4 sm:$0xff]   ;;  %v23140_v2 = vld [vmem:[#allocation2 + $0x3d78] ss:$72 sps:$4 sm:$0xff]  }
 0x66c   :  { %15940 = vmatpush1.bf16.msra.mxu1 %v23098_v32  ;;  %v23143_v32 = vld [vmem:[#allocation2 + $0x2b80] ss:$72 sps:$4 sm:$0xff]  }
 0x66d   :  { %16198 = vmatpush1.bf16.msra.mxu0 %v23101_v16  ;;  %15941 = vmatprep.subr.bf16.mxu1 %v23106_v36  ;;  %v23148_v16 = vld [vmem:[#allocation2 + $0x3e0c] ss:$72 sps:$4 sm:$0xff]  }
 0x66e   :  { %16199 = vmatprep.subr.bf16.mxu0 %v23109_v18  ;;  %v23151_v36 = vld [vmem:[#allocation2 + $0x2c14] ss:$72 sps:$4 sm:$0xff]   ;;  %v23146_v18 = vld [vmem:[#allocation2 + $0x3e08] ss:$72 sps:$4 sm:$0xff]  }
 0x670   :  { %15942 = vmatpush1.bf16.msra.mxu1 %v23104_v37  ;;  %v23149_v37 = vld [vmem:[#allocation2 + $0x2c10] ss:$72 sps:$4 sm:$0xff]  }
 0x671   :  { %16200 = vmatpush1.bf16.msra.mxu0 %v23107_v38  ;;  %15943 = vmatprep.subr.bf16.mxu1 %v23112_v39  ;;  %v23154_v38 = vld [vmem:[#allocation2 + $0x3e9c] ss:$72 sps:$4 sm:$0xff]  }
 0x672   :  { %16201 = vmatprep.subr.bf16.mxu0 %v23115_v41  ;;  %v23157_v39 = vld [vmem:[#allocation2 + $0x2ca4] ss:$72 sps:$4 sm:$0xff]   ;;  %v23152_v41 = vld [vmem:[#allocation2 + $0x3e98] ss:$72 sps:$4 sm:$0xff]  }
 0x674   :  { %15944 = vmatpush1.bf16.msra.mxu1 %v23110_v42  ;;  %v23155_v42 = vld [vmem:[#allocation2 + $0x2ca0] ss:$72 sps:$4 sm:$0xff]  }
 0x675   :  { %16202 = vmatpush1.bf16.msra.mxu0 %v23113_v48  ;;  %15945 = vmatprep.subr.bf16.mxu1 %v23118_v49  ;;  %v23160_v48 = vld [vmem:[#allocation2 + $0x3f2c] ss:$72 sps:$4 sm:$0xff]  }
 0x676   :  { %16203 = vmatprep.subr.bf16.mxu0 %v23121_v50  ;;  %v23163_v49 = vld [vmem:[#allocation2 + $0x2d34] ss:$72 sps:$4 sm:$0xff]   ;;  %v23158_v50 = vld [vmem:[#allocation2 + $0x3f28] ss:$72 sps:$4 sm:$0xff]  }
 0x678   :  { %15946 = vmatpush1.bf16.msra.mxu1 %v23116_v51  ;;  %v23161_v51 = vld [vmem:[#allocation2 + $0x2d30] ss:$72 sps:$4 sm:$0xff]  }
 0x679   :  { %16204 = vmatpush1.bf16.msra.mxu0 %v23119_v29  ;;  %15947 = vmatprep.subr.bf16.mxu1 %v23124_v30  ;;  %v23166_v29 = vld [vmem:[#allocation2 + $0x3fbc] ss:$72 sps:$4 sm:$0xff]  }
 0x67a   :  { %16205 = vmatprep.subr.bf16.mxu0 %v23127_v31  ;;  %v23169_v30 = vld [vmem:[#allocation2 + $0x2dc4] ss:$72 sps:$4 sm:$0xff]   ;;  %v23164_v31 = vld [vmem:[#allocation2 + $0x3fb8] ss:$72 sps:$4 sm:$0xff]  }
 0x67c   :  { %15948 = vmatpush1.bf16.msra.mxu1 %v23122_v53  ;;  %v23167_v53 = vld [vmem:[#allocation2 + $0x2dc0] ss:$72 sps:$4 sm:$0xff]  }
 0x67d   :  { %16206 = vmatpush1.bf16.msra.mxu0 %v23125_v60  ;;  %15949 = vmatprep.subr.bf16.mxu1 %v23130_v4  ;;  %v23172_v60 = vld [vmem:[#allocation2 + $0x404c] ss:$72 sps:$4 sm:$0xff]  }
 0x67e   :  { %16207 = vmatprep.subr.bf16.mxu0 %v23133_v47  ;;  %v23175_v4 = vld [vmem:[#allocation2 + $0x2e54] ss:$72 sps:$4 sm:$0xff]   ;;  %v23170_v47 = vld [vmem:[#allocation2 + $0x4048] ss:$72 sps:$4 sm:$0xff]  }
 0x680   :  { %15950 = vmatpush1.bf16.msra.mxu1 %v23128_v7  ;;  %v23173_v7 = vld [vmem:[#allocation2 + $0x2e50] ss:$72 sps:$4 sm:$0xff]  }
 0x681   :  { %16208 = vmatpush1.bf16.msra.mxu0 %v23131_v12  ;;  %15951 = vmatprep.subr.bf16.mxu1 %v23136_v13  ;;  %v23178_v12 = vld [vmem:[#allocation2 + $0x40dc] ss:$72 sps:$4 sm:$0xff]  }
 0x682   :  { %16209 = vmatprep.subr.bf16.mxu0 %v23139_v24  ;;  %v23181_v13 = vld [vmem:[#allocation2 + $0x2ee4] ss:$72 sps:$4 sm:$0xff]   ;;  %v23176_v24 = vld [vmem:[#allocation2 + $0x40d8] ss:$72 sps:$4 sm:$0xff]  }
 0x684   :  { %15952 = vmatpush1.bf16.msra.mxu1 %v23134_v14  ;;  %v23179_v14 = vld [vmem:[#allocation2 + $0x2ee0] ss:$72 sps:$4 sm:$0xff]  }
 0x685   :  { %16210 = vmatpush1.bf16.msra.mxu0 %v23137_v26  ;;  %15953 = vmatprep.subr.bf16.mxu1 %v23142_v15  ;;  %v23184_v26 = vld [vmem:[#allocation2 + $0x416c] ss:$72 sps:$4 sm:$0xff]  }
 0x686   :  { %16211 = vmatprep.subr.bf16.mxu0 %v23145_v6  ;;  %v23187_v15 = vld [vmem:[#allocation2 + $0x2f74] ss:$72 sps:$4 sm:$0xff]   ;;  %v23182_v6 = vld [vmem:[#allocation2 + $0x4168] ss:$72 sps:$4 sm:$0xff]  }
 0x688   :  { %15954 = vmatpush1.bf16.msra.mxu1 %v23140_v2  ;;  %v23185_v2 = vld [vmem:[#allocation2 + $0x2f70] ss:$72 sps:$4 sm:$0xff]  }
 0x689   :  { %16212 = vmatpush1.bf16.msra.mxu0 %v23143_v32  ;;  %15955 = vmatprep.subr.bf16.mxu1 %v23148_v16  ;;  %v23190_v32 = vld [vmem:[#allocation2 + $0x41fc] ss:$72 sps:$4 sm:$0xff]  }
 0x68a   :  { %16213 = vmatprep.subr.bf16.mxu0 %v23151_v36  ;;  %v23193_v16 = vld [vmem:[#allocation2 + $0x3004] ss:$72 sps:$4 sm:$0xff]   ;;  %v23188_v36 = vld [vmem:[#allocation2 + $0x41f8] ss:$72 sps:$4 sm:$0xff]  }
 0x68c   :  { %15956 = vmatpush1.bf16.msra.mxu1 %v23146_v18  ;;  %v23191_v18 = vld [vmem:[#allocation2 + $0x3000] ss:$72 sps:$4 sm:$0xff]  }
 0x68d   :  { %16214 = vmatpush1.bf16.msra.mxu0 %v23149_v37  ;;  %15957 = vmatprep.subr.bf16.mxu1 %v23154_v38  ;;  %v23196_v37 = vld [vmem:[#allocation2 + $0x428c] ss:$72 sps:$4 sm:$0xff]  }
 0x68e   :  { %16215 = vmatprep.subr.bf16.mxu0 %v23157_v39  ;;  %v23199_v38 = vld [vmem:[#allocation2 + $0x3094] ss:$72 sps:$4 sm:$0xff]   ;;  %v23194_v39 = vld [vmem:[#allocation2 + $0x4288] ss:$72 sps:$4 sm:$0xff]  }
 0x690   :  { %15958 = vmatpush1.bf16.msra.mxu1 %v23152_v41  ;;  %v23197_v41 = vld [vmem:[#allocation2 + $0x3090] ss:$72 sps:$4 sm:$0xff]  }
 0x691   :  { %16216 = vmatpush1.bf16.msra.mxu0 %v23155_v42  ;;  %15970 = vmatprep.subr.bf16.mxu1 %v23160_v48  ;;  %v23202_v42 = vld [vmem:[#allocation2 + $0x431c] ss:$72 sps:$4 sm:$0xff]  }
 0x692   :  { %16228 = vmatprep.subr.bf16.mxu0 %v23163_v49  ;;  %v23205_v48 = vld [vmem:[#allocation2 + $0x3124] ss:$72 sps:$4 sm:$0xff]   ;;  %v23200_v49 = vld [vmem:[#allocation2 + $0x4318] ss:$72 sps:$4 sm:$0xff]  }
 0x693   :  { %15960 = vmatmul.mubr.bf16.vlgmr.msra.gmra.mrb[12].mxu1 %v24373_v0 }
 0x694   :  { %16218 = vmatmul.mubr.bf16.vlgmr.msra.gmra.mrb[12].mxu0 %v24311_v23  ;;  %15971 = vmatpush1.bf16.msra.mxu1 %v23158_v50  ;;  %v23203_v50 = vld [vmem:[#allocation2 + $0x3120] ss:$72 sps:$4 sm:$0xff]  }
 0x695   :  { %16229 = vmatpush1.bf16.msra.mxu0 %v23161_v51  ;;  %15972 = vmatprep.subr.bf16.mxu1 %v23166_v29  ;;  %v23208_v51 = vld [vmem:[#allocation2 + $0x43ac] ss:$72 sps:$4 sm:$0xff]  }
 0x696   :  { %16230 = vmatprep.subr.bf16.mxu0 %v23169_v30  ;;  %16002 = vmatprep.mubr.bf16.mxu1 %v24387_v44  ;;  %v23211_v29 = vld [vmem:[#allocation2 + $0x31b4] ss:$72 sps:$4 sm:$0xff]   ;;  %v23206_v30 = vld [vmem:[#allocation2 + $0x43a8] ss:$72 sps:$4 sm:$0xff]  }
 0x697   :  { %16260 = vmatprep.mubr.bf16.mxu0 %v24341_v34 }
 0x698   :  { %15973 = vmatpush1.bf16.msra.mxu1 %v23164_v31  ;;  %v23209_v31 = vld [vmem:[#allocation2 + $0x31b0] ss:$72 sps:$4 sm:$0xff]  }
 0x699   :  { %16231 = vmatpush1.bf16.msra.mxu0 %v23167_v53  ;;  %15974 = vmatprep.subr.bf16.mxu1 %v23172_v60  ;;  %v23214_v53 = vld [vmem:[#allocation2 + $0x443c] ss:$72 sps:$4 sm:$0xff]  }
 0x69a   :  { %16232 = vmatprep.subr.bf16.mxu0 %v23175_v4  ;;  %v23217_v60 = vld [vmem:[#allocation2 + $0x3244] ss:$72 sps:$4 sm:$0xff]   ;;  %v23212_v4 = vld [vmem:[#allocation2 + $0x4438] ss:$72 sps:$4 sm:$0xff]  }
 0x69c   :  { %15975 = vmatpush1.bf16.msra.mxu1 %v23170_v47  ;;  %v23215_v47 = vld [vmem:[#allocation2 + $0x3240] ss:$72 sps:$4 sm:$0xff]  }
 0x69d   :  { %16233 = vmatpush1.bf16.msra.mxu0 %v23173_v7  ;;  %15976 = vmatprep.subr.bf16.mxu1 %v23178_v12  ;;  %v23220_v7 = vld [vmem:[#allocation2 + $0x44cc] ss:$72 sps:$4 sm:$0xff]  }
 0x69e   :  { %16234 = vmatprep.subr.bf16.mxu0 %v23181_v13  ;;  %v23223_v12 = vld [vmem:[#allocation2 + $0x32d4] ss:$72 sps:$4 sm:$0xff]   ;;  %v23218_v13 = vld [vmem:[#allocation2 + $0x44c8] ss:$72 sps:$4 sm:$0xff]  }
 0x6a0   :  { %15977 = vmatpush1.bf16.msra.mxu1 %v23176_v24  ;;  %v23221_v24 = vld [vmem:[#allocation2 + $0x32d0] ss:$72 sps:$4 sm:$0xff]  }
 0x6a1   :  { %16235 = vmatpush1.bf16.msra.mxu0 %v23179_v14  ;;  %15978 = vmatprep.subr.bf16.mxu1 %v23184_v26  ;;  %v23226_v14 = vld [vmem:[#allocation2 + $0x455c] ss:$72 sps:$4 sm:$0xff]  }
 0x6a2   :  { %16236 = vmatprep.subr.bf16.mxu0 %v23187_v15  ;;  %v23229_v26 = vld [vmem:[#allocation2 + $0x3364] ss:$72 sps:$4 sm:$0xff]   ;;  %v23224_v15 = vld [vmem:[#allocation2 + $0x4558] ss:$72 sps:$4 sm:$0xff]  }
 0x6a4   :  { %15979 = vmatpush1.bf16.msra.mxu1 %v23182_v6  ;;  %v23227_v6 = vld [vmem:[#allocation2 + $0x3360] ss:$72 sps:$4 sm:$0xff]  }
 0x6a5   :  { %16237 = vmatpush1.bf16.msra.mxu0 %v23185_v2  ;;  %15980 = vmatprep.subr.bf16.mxu1 %v23190_v32  ;;  %v23232_v2 = vld [vmem:[#allocation2 + $0x45ec] ss:$72 sps:$4 sm:$0xff]  }
 0x6a6   :  { %16238 = vmatprep.subr.bf16.mxu0 %v23193_v16  ;;  %v23235_v32 = vld [vmem:[#allocation2 + $0x33f4] ss:$72 sps:$4 sm:$0xff]   ;;  %v23230_v16 = vld [vmem:[#allocation2 + $0x45e8] ss:$72 sps:$4 sm:$0xff]  }
 0x6a8   :  { %15981 = vmatpush1.bf16.msra.mxu1 %v23188_v36  ;;  %v23233_v36 = vld [vmem:[#allocation2 + $0x33f0] ss:$72 sps:$4 sm:$0xff]  }
 0x6a9   :  { %16239 = vmatpush1.bf16.msra.mxu0 %v23191_v18  ;;  %15982 = vmatprep.subr.bf16.mxu1 %v23196_v37  ;;  %v23238_v18 = vld [vmem:[#allocation2 + $0x467c] ss:$72 sps:$4 sm:$0xff]  }
 0x6aa   :  { %16240 = vmatprep.subr.bf16.mxu0 %v23199_v38  ;;  %v23241_v37 = vld [vmem:[#allocation2 + $0x3484] ss:$72 sps:$4 sm:$0xff]   ;;  %v23236_v38 = vld [vmem:[#allocation2 + $0x4678] ss:$72 sps:$4 sm:$0xff]  }
 0x6ac   :  { %15983 = vmatpush1.bf16.msra.mxu1 %v23194_v39  ;;  %v23239_v39 = vld [vmem:[#allocation2 + $0x3480] ss:$72 sps:$4 sm:$0xff]  }
 0x6ad   :  { %16241 = vmatpush1.bf16.msra.mxu0 %v23197_v41  ;;  %15984 = vmatprep.subr.bf16.mxu1 %v23202_v42  ;;  %v23244_v41 = vld [vmem:[#allocation2 + $0x470c] ss:$72 sps:$4 sm:$0xff]  }
 0x6ae   :  { %16242 = vmatprep.subr.bf16.mxu0 %v23205_v48  ;;  %v23247_v42 = vld [vmem:[#allocation2 + $0x3514] ss:$72 sps:$4 sm:$0xff]   ;;  %v23242_v48 = vld [vmem:[#allocation2 + $0x4708] ss:$72 sps:$4 sm:$0xff]  }
 0x6b0   :  { %15985 = vmatpush1.bf16.msra.mxu1 %v23200_v49  ;;  %v23245_v49 = vld [vmem:[#allocation2 + $0x3510] ss:$72 sps:$4 sm:$0xff]  }
 0x6b1   :  { %16243 = vmatpush1.bf16.msra.mxu0 %v23203_v50  ;;  %15986 = vmatprep.subr.bf16.mxu1 %v23208_v51  ;;  %v23250_v50 = vld [vmem:[#allocation2 + $0x479c] ss:$72 sps:$4 sm:$0xff]  }
 0x6b2   :  { %16244 = vmatprep.subr.bf16.mxu0 %v23211_v29  ;;  %v23253_v51 = vld [vmem:[#allocation2 + $0x35a4] ss:$72 sps:$4 sm:$0xff]   ;;  %v23248_v29 = vld [vmem:[#allocation2 + $0x4798] ss:$72 sps:$4 sm:$0xff]  }
 0x6b4   :  { %15987 = vmatpush1.bf16.msra.mxu1 %v23206_v30  ;;  %v23251_v30 = vld [vmem:[#allocation2 + $0x35a0] ss:$72 sps:$4 sm:$0xff]  }
 0x6b5   :  { %16245 = vmatpush1.bf16.msra.mxu0 %v23209_v31  ;;  %15988 = vmatprep.subr.bf16.mxu1 %v23214_v53  ;;  %v23256_v31 = vld [vmem:[#allocation2 + $0x3634] ss:$72 sps:$4 sm:$0xff]  }
 0x6b6   :  { %16246 = vmatprep.subr.bf16.mxu0 %v23217_v60  ;;  %v23259_v53 = vld [vmem:[#allocation2 + $0x3c] ss:$72 sps:$4 sm:$0xff]   ;;  %v23254_v60 = vld [vmem:[#allocation2 + $0x3630] ss:$72 sps:$4 sm:$0xff]  }
 0x6b8   :  { %15989 = vmatpush1.bf16.msra.mxu1 %v23212_v4  ;;  %v23257_v4 = vld [vmem:[#allocation2 + $0x38] ss:$72 sps:$4 sm:$0xff]  }
 0x6b9   :  { %16247 = vmatpush1.bf16.msra.mxu0 %v23215_v47  ;;  %15990 = vmatprep.subr.bf16.mxu1 %v23220_v7  ;;  %v23262_v47 = vld [vmem:[#allocation2 + $0x36c4] ss:$72 sps:$4 sm:$0xff]  }
 0x6ba   :  { %16248 = vmatprep.subr.bf16.mxu0 %v23223_v12  ;;  %v23265_v7 = vld [vmem:[#allocation2 + $0xcc] ss:$72 sps:$4 sm:$0xff]   ;;  %v23260_v12 = vld [vmem:[#allocation2 + $0x36c0] ss:$72 sps:$4 sm:$0xff]  }
 0x6bc   :  { %15991 = vmatpush1.bf16.msra.mxu1 %v23218_v13  ;;  %v23263_v13 = vld [vmem:[#allocation2 + $0xc8] ss:$72 sps:$4 sm:$0xff]  }
 0x6bd   :  { %16249 = vmatpush1.bf16.msra.mxu0 %v23221_v24  ;;  %15992 = vmatprep.subr.bf16.mxu1 %v23226_v14  ;;  %v23268_v24 = vld [vmem:[#allocation2 + $0x3754] ss:$72 sps:$4 sm:$0xff]  }
 0x6be   :  { %16250 = vmatprep.subr.bf16.mxu0 %v23229_v26  ;;  %v23271_v14 = vld [vmem:[#allocation2 + $0x15c] ss:$72 sps:$4 sm:$0xff]   ;;  %v23266_v26 = vld [vmem:[#allocation2 + $0x3750] ss:$72 sps:$4 sm:$0xff]  }
 0x6c0   :  { %15993 = vmatpush1.bf16.msra.mxu1 %v23224_v15  ;;  %v23269_v15 = vld [vmem:[#allocation2 + $0x158] ss:$72 sps:$4 sm:$0xff]  }
 0x6c1   :  { %16251 = vmatpush1.bf16.msra.mxu0 %v23227_v6  ;;  %15994 = vmatprep.subr.bf16.mxu1 %v23232_v2  ;;  %v23274_v6 = vld [vmem:[#allocation2 + $0x37e4] ss:$72 sps:$4 sm:$0xff]  }
 0x6c2   :  { %16252 = vmatprep.subr.bf16.mxu0 %v23235_v32  ;;  %v23277_v2 = vld [vmem:[#allocation2 + $0x1ec] ss:$72 sps:$4 sm:$0xff]   ;;  %v23272_v32 = vld [vmem:[#allocation2 + $0x37e0] ss:$72 sps:$4 sm:$0xff]  }
 0x6c4   :  { %15995 = vmatpush1.bf16.msra.mxu1 %v23230_v16  ;;  %v23275_v16 = vld [vmem:[#allocation2 + $0x1e8] ss:$72 sps:$4 sm:$0xff]  }
 0x6c5   :  { %16253 = vmatpush1.bf16.msra.mxu0 %v23233_v36  ;;  %15996 = vmatprep.subr.bf16.mxu1 %v23238_v18  ;;  %v23280_v36 = vld [vmem:[#allocation2 + $0x3874] ss:$72 sps:$4 sm:$0xff]  }
 0x6c6   :  { %16254 = vmatprep.subr.bf16.mxu0 %v23241_v37  ;;  %v23283_v18 = vld [vmem:[#allocation2 + $0x27c] ss:$72 sps:$4 sm:$0xff]   ;;  %v23278_v37 = vld [vmem:[#allocation2 + $0x3870] ss:$72 sps:$4 sm:$0xff]  }
 0x6c8   :  { %15997 = vmatpush1.bf16.msra.mxu1 %v23236_v38  ;;  %v23281_v38 = vld [vmem:[#allocation2 + $0x278] ss:$72 sps:$4 sm:$0xff]  }
 0x6c9   :  { %16255 = vmatpush1.bf16.msra.mxu0 %v23239_v39  ;;  %15998 = vmatprep.subr.bf16.mxu1 %v23244_v41  ;;  %v23286_v39 = vld [vmem:[#allocation2 + $0x3904] ss:$72 sps:$4 sm:$0xff]  }
 0x6ca   :  { %16256 = vmatprep.subr.bf16.mxu0 %v23247_v42  ;;  %v23289_v41 = vld [vmem:[#allocation2 + $0x30c] ss:$72 sps:$4 sm:$0xff]   ;;  %v23284_v42 = vld [vmem:[#allocation2 + $0x3900] ss:$72 sps:$4 sm:$0xff]  }
 0x6cc   :  { %15999 = vmatpush1.bf16.msra.mxu1 %v23242_v48  ;;  %v23287_v48 = vld [vmem:[#allocation2 + $0x308] ss:$72 sps:$4 sm:$0xff]  }
 0x6cd   :  { %16257 = vmatpush1.bf16.msra.mxu0 %v23245_v49  ;;  %16000 = vmatprep.subr.bf16.mxu1 %v23250_v50  ;;  %v23292_v49 = vld [vmem:[#allocation2 + $0x3994] ss:$72 sps:$4 sm:$0xff]  }
 0x6ce   :  { %16258 = vmatprep.subr.bf16.mxu0 %v23253_v51  ;;  %v23295_v50 = vld [vmem:[#allocation2 + $0x39c] ss:$72 sps:$4 sm:$0xff]   ;;  %v23290_v51 = vld [vmem:[#allocation2 + $0x3990] ss:$72 sps:$4 sm:$0xff]  }
 0x6d0   :  { %16001 = vmatpush1.bf16.msra.mxu1 %v23248_v29  ;;  %v23293_v29 = vld [vmem:[#allocation2 + $0x398] ss:$72 sps:$4 sm:$0xff]  }
 0x6d1   :  { %16259 = vmatpush1.bf16.msra.mxu0 %v23251_v30  ;;  %16357 = vmatprep.subr.bf16.mxu1 %v23259_v53  ;;  %v23298_v30 = vld [vmem:[#allocation2 + $0x3a24] ss:$72 sps:$4 sm:$0xff]   ;;  %v23296_v53 = vld [vmem:[#allocation2 + $0x3a20] ss:$72 sps:$4 sm:$0xff]  }
 0x6d2   :  { %16271 = vmatprep.subr.bf16.mxu0 %v23256_v31  ;;  %v23301_v31 = vld [vmem:[#allocation2 + $0x42c] ss:$72 sps:$4 sm:$0xff]  }
 0x6d3   :  { %16003 = vmatmul.mubr.bf16.vlgmr.msra.gmra.mrb[12].mxu1 %v24395_v19 }
 0x6d4   :  { %16261 = vmatmul.mubr.bf16.vlgmr.msra.gmra.mrb[12].mxu0 %v24356_v46  ;;  %16358 = vmatpush1.bf16.msra.mxu1 %v23257_v4  ;;  %v23304_v4 = vld [vmem:[#allocation2 + $0x3ab4] ss:$72 sps:$4 sm:$0xff]  }
 0x6d5   :  { %16272 = vmatpush1.bf16.msra.mxu0 %v23254_v60  ;;  %16359 = vmatprep.subr.bf16.mxu1 %v23265_v7  ;;  %v23299_v60 = vld [vmem:[#allocation2 + $0x428] ss:$72 sps:$4 sm:$0xff]  }
 0x6d6   :  { %16273 = vmatprep.subr.bf16.mxu0 %v23262_v47  ;;  %16303 = vmatprep.mubr.bf16.mxu0 %v24365_v28  ;;  %v23307_v47 = vld [vmem:[#allocation2 + $0x4bc] ss:$72 sps:$4 sm:$0xff]   ;;  %v23302_v7 = vld [vmem:[#allocation2 + $0x3ab0] ss:$72 sps:$4 sm:$0xff]  }
 0x6d7   :  { %16389 = vmatprep.mubr.bf16.mxu1 %v24257_v52 }
 0x6d8   :  { %16360 = vmatpush1.bf16.msra.mxu1 %v23263_v13  ;;  %v23310_v13 = vld [vmem:[#allocation2 + $0x3b44] ss:$72 sps:$4 sm:$0xff]  }
 0x6d9   :  { %16274 = vmatpush1.bf16.msra.mxu0 %v23260_v12  ;;  %16361 = vmatprep.subr.bf16.mxu1 %v23271_v14  ;;  %v23305_v12 = vld [vmem:[#allocation2 + $0x4b8] ss:$72 sps:$4 sm:$0xff]  }
 0x6da   :  { %16275 = vmatprep.subr.bf16.mxu0 %v23268_v24  ;;  %v23313_v24 = vld [vmem:[#allocation2 + $0x54c] ss:$72 sps:$4 sm:$0xff]   ;;  %v23308_v14 = vld [vmem:[#allocation2 + $0x3b40] ss:$72 sps:$4 sm:$0xff]  }
 0x6dc   :  { %16362 = vmatpush1.bf16.msra.mxu1 %v23269_v15  ;;  %v23316_v15 = vld [vmem:[#allocation2 + $0x3bd4] ss:$72 sps:$4 sm:$0xff]  }
 0x6dd   :  { %16276 = vmatpush1.bf16.msra.mxu0 %v23266_v26  ;;  %16363 = vmatprep.subr.bf16.mxu1 %v23277_v2  ;;  %v23311_v26 = vld [vmem:[#allocation2 + $0x548] ss:$72 sps:$4 sm:$0xff]  }
 0x6de   :  { %16277 = vmatprep.subr.bf16.mxu0 %v23274_v6  ;;  %v23319_v6 = vld [vmem:[#allocation2 + $0x5dc] ss:$72 sps:$4 sm:$0xff]   ;;  %v23314_v2 = vld [vmem:[#allocation2 + $0x3bd0] ss:$72 sps:$4 sm:$0xff]  }
 0x6e0   :  { %16364 = vmatpush1.bf16.msra.mxu1 %v23275_v16  ;;  %v23322_v16 = vld [vmem:[#allocation2 + $0x3c64] ss:$72 sps:$4 sm:$0xff]  }
 0x6e1   :  { %16278 = vmatpush1.bf16.msra.mxu0 %v23272_v32  ;;  %16365 = vmatprep.subr.bf16.mxu1 %v23283_v18  ;;  %v23317_v32 = vld [vmem:[#allocation2 + $0x5d8] ss:$72 sps:$4 sm:$0xff]  }
 0x6e2   :  { %16279 = vmatprep.subr.bf16.mxu0 %v23280_v36  ;;  %v23325_v36 = vld [vmem:[#allocation2 + $0x66c] ss:$72 sps:$4 sm:$0xff]   ;;  %v23320_v18 = vld [vmem:[#allocation2 + $0x3c60] ss:$72 sps:$4 sm:$0xff]  }
 0x6e4   :  { %16366 = vmatpush1.bf16.msra.mxu1 %v23281_v38  ;;  %v23328_v38 = vld [vmem:[#allocation2 + $0x3cf4] ss:$72 sps:$4 sm:$0xff]  }
 0x6e5   :  { %16280 = vmatpush1.bf16.msra.mxu0 %v23278_v37  ;;  %16367 = vmatprep.subr.bf16.mxu1 %v23289_v41  ;;  %v23323_v37 = vld [vmem:[#allocation2 + $0x668] ss:$72 sps:$4 sm:$0xff]  }
 0x6e6   :  { %16281 = vmatprep.subr.bf16.mxu0 %v23286_v39  ;;  %v23331_v39 = vld [vmem:[#allocation2 + $0x6fc] ss:$72 sps:$4 sm:$0xff]   ;;  %v23326_v41 = vld [vmem:[#allocation2 + $0x3cf0] ss:$72 sps:$4 sm:$0xff]  }
 0x6e8   :  { %16368 = vmatpush1.bf16.msra.mxu1 %v23287_v48  ;;  %v23334_v48 = vld [vmem:[#allocation2 + $0x3d84] ss:$72 sps:$4 sm:$0xff]  }
 0x6e9   :  { %16282 = vmatpush1.bf16.msra.mxu0 %v23284_v42  ;;  %16369 = vmatprep.subr.bf16.mxu1 %v23295_v50  ;;  %v23329_v42 = vld [vmem:[#allocation2 + $0x6f8] ss:$72 sps:$4 sm:$0xff]  }
 0x6ea   :  { %16283 = vmatprep.subr.bf16.mxu0 %v23292_v49  ;;  %v23337_v49 = vld [vmem:[#allocation2 + $0x78c] ss:$72 sps:$4 sm:$0xff]   ;;  %v23332_v50 = vld [vmem:[#allocation2 + $0x3d80] ss:$72 sps:$4 sm:$0xff]  }
 0x6ec   :  { %16370 = vmatpush1.bf16.msra.mxu1 %v23293_v29  ;;  %v23340_v29 = vld [vmem:[#allocation2 + $0x3e14] ss:$72 sps:$4 sm:$0xff]  }
 0x6ed   :  { %16284 = vmatpush1.bf16.msra.mxu0 %v23290_v51  ;;  %16371 = vmatprep.subr.bf16.mxu1 %v23301_v31  ;;  %v23335_v51 = vld [vmem:[#allocation2 + $0x788] ss:$72 sps:$4 sm:$0xff]  }
 0x6ee   :  { %16285 = vmatprep.subr.bf16.mxu0 %v23298_v30  ;;  %v23343_v30 = vld [vmem:[#allocation2 + $0x81c] ss:$72 sps:$4 sm:$0xff]   ;;  %v23338_v31 = vld [vmem:[#allocation2 + $0x3e10] ss:$72 sps:$4 sm:$0xff]  }
 0x6f0   :  { %16372 = vmatpush1.bf16.msra.mxu1 %v23299_v60  ;;  %v23346_v60 = vld [vmem:[#allocation2 + $0x3ea4] ss:$72 sps:$4 sm:$0xff]  }
 0x6f1   :  { %16286 = vmatpush1.bf16.msra.mxu0 %v23296_v53  ;;  %16373 = vmatprep.subr.bf16.mxu1 %v23307_v47  ;;  %v23341_v53 = vld [vmem:[#allocation2 + $0x818] ss:$72 sps:$4 sm:$0xff]  }
 0x6f2   :  { %16287 = vmatprep.subr.bf16.mxu0 %v23304_v4  ;;  %v23349_v4 = vld [vmem:[#allocation2 + $0x8ac] ss:$72 sps:$4 sm:$0xff]   ;;  %v23344_v47 = vld [vmem:[#allocation2 + $0x3ea0] ss:$72 sps:$4 sm:$0xff]  }
 0x6f4   :  { %16374 = vmatpush1.bf16.msra.mxu1 %v23305_v12  ;;  %v23352_v12 = vld [vmem:[#allocation2 + $0x3f34] ss:$72 sps:$4 sm:$0xff]  }
 0x6f5   :  { %16288 = vmatpush1.bf16.msra.mxu0 %v23302_v7  ;;  %16375 = vmatprep.subr.bf16.mxu1 %v23313_v24  ;;  %v23347_v7 = vld [vmem:[#allocation2 + $0x8a8] ss:$72 sps:$4 sm:$0xff]  }
 0x6f6   :  { %16289 = vmatprep.subr.bf16.mxu0 %v23310_v13  ;;  %v23355_v13 = vld [vmem:[#allocation2 + $0x93c] ss:$72 sps:$4 sm:$0xff]   ;;  %v23350_v24 = vld [vmem:[#allocation2 + $0x3f30] ss:$72 sps:$4 sm:$0xff]  }
 0x6f8   :  { %16376 = vmatpush1.bf16.msra.mxu1 %v23311_v26  ;;  %v23358_v26 = vld [vmem:[#allocation2 + $0x3fc4] ss:$72 sps:$4 sm:$0xff]  }
 0x6f9   :  { %16290 = vmatpush1.bf16.msra.mxu0 %v23308_v14  ;;  %16377 = vmatprep.subr.bf16.mxu1 %v23319_v6  ;;  %v23353_v14 = vld [vmem:[#allocation2 + $0x938] ss:$72 sps:$4 sm:$0xff]  }
 0x6fa   :  { %16291 = vmatprep.subr.bf16.mxu0 %v23316_v15  ;;  %v23361_v15 = vld [vmem:[#allocation2 + $0x9cc] ss:$72 sps:$4 sm:$0xff]   ;;  %v23356_v6 = vld [vmem:[#allocation2 + $0x3fc0] ss:$72 sps:$4 sm:$0xff]  }
 0x6fc   :  { %16378 = vmatpush1.bf16.msra.mxu1 %v23317_v32  ;;  %v23364_v32 = vld [vmem:[#allocation2 + $0x4054] ss:$72 sps:$4 sm:$0xff]  }
 0x6fd   :  { %16292 = vmatpush1.bf16.msra.mxu0 %v23314_v2  ;;  %16379 = vmatprep.subr.bf16.mxu1 %v23325_v36  ;;  %v23359_v2 = vld [vmem:[#allocation2 + $0x9c8] ss:$72 sps:$4 sm:$0xff]  }
 0x6fe   :  { %16293 = vmatprep.subr.bf16.mxu0 %v23322_v16  ;;  %v23367_v16 = vld [vmem:[#allocation2 + $0xa5c] ss:$72 sps:$4 sm:$0xff]   ;;  %v23362_v36 = vld [vmem:[#allocation2 + $0x4050] ss:$72 sps:$4 sm:$0xff]  }
 0x700   :  { %16380 = vmatpush1.bf16.msra.mxu1 %v23323_v37  ;;  %v23370_v37 = vld [vmem:[#allocation2 + $0x40e4] ss:$72 sps:$4 sm:$0xff]  }
 0x701   :  { %16294 = vmatpush1.bf16.msra.mxu0 %v23320_v18  ;;  %16381 = vmatprep.subr.bf16.mxu1 %v23331_v39  ;;  %v23365_v18 = vld [vmem:[#allocation2 + $0xa58] ss:$72 sps:$4 sm:$0xff]  }
 0x702   :  { %16295 = vmatprep.subr.bf16.mxu0 %v23328_v38  ;;  %v23373_v38 = vld [vmem:[#allocation2 + $0xaec] ss:$72 sps:$4 sm:$0xff]   ;;  %v23368_v39 = vld [vmem:[#allocation2 + $0x40e0] ss:$72 sps:$4 sm:$0xff]  }
 0x704   :  { %16382 = vmatpush1.bf16.msra.mxu1 %v23329_v42  ;;  %v23376_v42 = vld [vmem:[#allocation2 + $0x4174] ss:$72 sps:$4 sm:$0xff]  }
 0x705   :  { %16296 = vmatpush1.bf16.msra.mxu0 %v23326_v41  ;;  %16383 = vmatprep.subr.bf16.mxu1 %v23337_v49  ;;  %v23371_v41 = vld [vmem:[#allocation2 + $0xae8] ss:$72 sps:$4 sm:$0xff]  }
 0x706   :  { %16297 = vmatprep.subr.bf16.mxu0 %v23334_v48  ;;  %v23379_v48 = vld [vmem:[#allocation2 + $0xb7c] ss:$72 sps:$4 sm:$0xff]   ;;  %v23374_v49 = vld [vmem:[#allocation2 + $0x4170] ss:$72 sps:$4 sm:$0xff]  }
 0x708   :  { %16384 = vmatpush1.bf16.msra.mxu1 %v23335_v51  ;;  %v23382_v51 = vld [vmem:[#allocation2 + $0x4204] ss:$72 sps:$4 sm:$0xff]  }
 0x709   :  { %16298 = vmatpush1.bf16.msra.mxu0 %v23332_v50  ;;  %16385 = vmatprep.subr.bf16.mxu1 %v23343_v30  ;;  %v23377_v50 = vld [vmem:[#allocation2 + $0xb78] ss:$72 sps:$4 sm:$0xff]  }
 0x70a   :  { %16299 = vmatprep.subr.bf16.mxu0 %v23340_v29  ;;  %v23385_v29 = vld [vmem:[#allocation2 + $0xc0c] ss:$72 sps:$4 sm:$0xff]   ;;  %v23380_v30 = vld [vmem:[#allocation2 + $0x4200] ss:$72 sps:$4 sm:$0xff]  }
 0x70c   :  { %16386 = vmatpush1.bf16.msra.mxu1 %v23341_v53  ;;  %v23388_v53 = vld [vmem:[#allocation2 + $0x4294] ss:$72 sps:$4 sm:$0xff]  }
 0x70d   :  { %16300 = vmatpush1.bf16.msra.mxu0 %v23338_v31  ;;  %16387 = vmatprep.subr.bf16.mxu1 %v23349_v4  ;;  %v23383_v31 = vld [vmem:[#allocation2 + $0xc08] ss:$72 sps:$4 sm:$0xff]  }
 0x70e   :  { %16301 = vmatprep.subr.bf16.mxu0 %v23346_v60  ;;  %v23391_v60 = vld [vmem:[#allocation2 + $0xc9c] ss:$72 sps:$4 sm:$0xff]   ;;  %v23386_v4 = vld [vmem:[#allocation2 + $0x4290] ss:$72 sps:$4 sm:$0xff]  }
 0x710   :  { %16388 = vmatpush1.bf16.msra.mxu1 %v23347_v7  ;;  %v23394_v7 = vld [vmem:[#allocation2 + $0x4324] ss:$72 sps:$4 sm:$0xff]  }
 0x711   :  { %16302 = vmatpush1.bf16.msra.mxu0 %v23344_v47  ;;  %16400 = vmatprep.subr.bf16.mxu1 %v23355_v13  ;;  %v23389_v47 = vld [vmem:[#allocation2 + $0xc98] ss:$72 sps:$4 sm:$0xff]  }
 0x712   :  { %16314 = vmatprep.subr.bf16.mxu0 %v23352_v12  ;;  %v23397_v12 = vld [vmem:[#allocation2 + $0xd2c] ss:$72 sps:$4 sm:$0xff]   ;;  %v23392_v13 = vld [vmem:[#allocation2 + $0x4320] ss:$72 sps:$4 sm:$0xff]  }
 0x713   :  { %16390 = vmatmul.mubr.bf16.vlgmr.msra.gmra.mrb[16].mxu1 %v24269_v10 }
 0x714   :  { %16304 = vmatmul.mubr.bf16.vlgmr.msra.gmra.mrb[12].mxu0 %v24373_v0  ;;  %16401 = vmatpush1.bf16.msra.mxu1 %v23353_v14  ;;  %v23400_v14 = vld [vmem:[#allocation2 + $0x43b4] ss:$72 sps:$4 sm:$0xff]  }
 0x715   :  { %16315 = vmatpush1.bf16.msra.mxu0 %v23350_v24  ;;  %16402 = vmatprep.subr.bf16.mxu1 %v23361_v15  ;;  %v23395_v24 = vld [vmem:[#allocation2 + $0xd28] ss:$72 sps:$4 sm:$0xff]  }
 0x716   :  { %16316 = vmatprep.subr.bf16.mxu0 %v23358_v26  ;;  %16346 = vmatprep.mubr.bf16.mxu0 %v24387_v44  ;;  %v23403_v26 = vld [vmem:[#allocation2 + $0xdbc] ss:$72 sps:$4 sm:$0xff]   ;;  %v23398_v15 = vld [vmem:[#allocation2 + $0x43b0] ss:$72 sps:$4 sm:$0xff]  }
 0x717   :  { %16432 = vmatprep.mubr.bf16.mxu1 %v24287_v40 }
 0x718   :  { %16403 = vmatpush1.bf16.msra.mxu1 %v23359_v2  ;;  %v23406_v2 = vld [vmem:[#allocation2 + $0x4444] ss:$72 sps:$4 sm:$0xff]  }
 0x719   :  { %16317 = vmatpush1.bf16.msra.mxu0 %v23356_v6  ;;  %16404 = vmatprep.subr.bf16.mxu1 %v23367_v16  ;;  %v23401_v6 = vld [vmem:[#allocation2 + $0xdb8] ss:$72 sps:$4 sm:$0xff]  }
 0x71a   :  { %16318 = vmatprep.subr.bf16.mxu0 %v23364_v32  ;;  %v23409_v32 = vld [vmem:[#allocation2 + $0xe4c] ss:$72 sps:$4 sm:$0xff]   ;;  %v23404_v16 = vld [vmem:[#allocation2 + $0x4440] ss:$72 sps:$4 sm:$0xff]  }
 0x71c   :  { %16405 = vmatpush1.bf16.msra.mxu1 %v23365_v18  ;;  %v23412_v18 = vld [vmem:[#allocation2 + $0x44d4] ss:$72 sps:$4 sm:$0xff]  }
 0x71d   :  { %16319 = vmatpush1.bf16.msra.mxu0 %v23362_v36  ;;  %16406 = vmatprep.subr.bf16.mxu1 %v23373_v38  ;;  %v23407_v36 = vld [vmem:[#allocation2 + $0xe48] ss:$72 sps:$4 sm:$0xff]  }
 0x71e   :  { %16320 = vmatprep.subr.bf16.mxu0 %v23370_v37  ;;  %v23415_v37 = vld [vmem:[#allocation2 + $0xedc] ss:$72 sps:$4 sm:$0xff]   ;;  %v23410_v38 = vld [vmem:[#allocation2 + $0x44d0] ss:$72 sps:$4 sm:$0xff]  }
 0x720   :  { %16407 = vmatpush1.bf16.msra.mxu1 %v23371_v41  ;;  %v23418_v41 = vld [vmem:[#allocation2 + $0x4564] ss:$72 sps:$4 sm:$0xff]  }
 0x721   :  { %16321 = vmatpush1.bf16.msra.mxu0 %v23368_v39  ;;  %16408 = vmatprep.subr.bf16.mxu1 %v23379_v48  ;;  %v23413_v39 = vld [vmem:[#allocation2 + $0xed8] ss:$72 sps:$4 sm:$0xff]  }
 0x722   :  { %16322 = vmatprep.subr.bf16.mxu0 %v23376_v42  ;;  %v23421_v42 = vld [vmem:[#allocation2 + $0xf6c] ss:$72 sps:$4 sm:$0xff]   ;;  %v23416_v48 = vld [vmem:[#allocation2 + $0x4560] ss:$72 sps:$4 sm:$0xff]  }
 0x724   :  { %16409 = vmatpush1.bf16.msra.mxu1 %v23377_v50  ;;  %v23424_v50 = vld [vmem:[#allocation2 + $0x45f4] ss:$72 sps:$4 sm:$0xff]  }
 0x725   :  { %16323 = vmatpush1.bf16.msra.mxu0 %v23374_v49  ;;  %16410 = vmatprep.subr.bf16.mxu1 %v23385_v29  ;;  %v23419_v49 = vld [vmem:[#allocation2 + $0xf68] ss:$72 sps:$4 sm:$0xff]  }
 0x726   :  { %16324 = vmatprep.subr.bf16.mxu0 %v23382_v51  ;;  %v23427_v51 = vld [vmem:[#allocation2 + $0xffc] ss:$72 sps:$4 sm:$0xff]   ;;  %v23422_v29 = vld [vmem:[#allocation2 + $0x45f0] ss:$72 sps:$4 sm:$0xff]  }
 0x728   :  { %16411 = vmatpush1.bf16.msra.mxu1 %v23383_v31  ;;  %v23430_v31 = vld [vmem:[#allocation2 + $0x4684] ss:$72 sps:$4 sm:$0xff]  }
 0x729   :  { %16325 = vmatpush1.bf16.msra.mxu0 %v23380_v30  ;;  %16412 = vmatprep.subr.bf16.mxu1 %v23391_v60  ;;  %v23425_v30 = vld [vmem:[#allocation2 + $0xff8] ss:$72 sps:$4 sm:$0xff]  }
 0x72a   :  { %16326 = vmatprep.subr.bf16.mxu0 %v23388_v53  ;;  %v23433_v53 = vld [vmem:[#allocation2 + $0x108c] ss:$72 sps:$4 sm:$0xff]   ;;  %v23428_v60 = vld [vmem:[#allocation2 + $0x4680] ss:$72 sps:$4 sm:$0xff]  }
 0x72c   :  { %16413 = vmatpush1.bf16.msra.mxu1 %v23389_v47  ;;  %v23436_v47 = vld [vmem:[#allocation2 + $0x4714] ss:$72 sps:$4 sm:$0xff]  }
 0x72d   :  { %16327 = vmatpush1.bf16.msra.mxu0 %v23386_v4  ;;  %16414 = vmatprep.subr.bf16.mxu1 %v23397_v12  ;;  %v23431_v4 = vld [vmem:[#allocation2 + $0x1088] ss:$72 sps:$4 sm:$0xff]  }
 0x72e   :  { %16328 = vmatprep.subr.bf16.mxu0 %v23394_v7  ;;  %v23439_v7 = vld [vmem:[#allocation2 + $0x111c] ss:$72 sps:$4 sm:$0xff]   ;;  %v23434_v12 = vld [vmem:[#allocation2 + $0x4710] ss:$72 sps:$4 sm:$0xff]  }
 0x730   :  { %16415 = vmatpush1.bf16.msra.mxu1 %v23395_v24  ;;  %v23442_v24 = vld [vmem:[#allocation2 + $0x47a4] ss:$72 sps:$4 sm:$0xff]  }
 0x731   :  { %16329 = vmatpush1.bf16.msra.mxu0 %v23392_v13  ;;  %16416 = vmatprep.subr.bf16.mxu1 %v23403_v26  ;;  %v23437_v13 = vld [vmem:[#allocation2 + $0x1118] ss:$72 sps:$4 sm:$0xff]  }
 0x732   :  { %16330 = vmatprep.subr.bf16.mxu0 %v23400_v14  ;;  %v23445_v14 = vld [vmem:[#allocation2 + $0x11ac] ss:$72 sps:$4 sm:$0xff]   ;;  %v23440_v26 = vld [vmem:[#allocation2 + $0x47a0] ss:$72 sps:$4 sm:$0xff]  }
 0x734   :  { %16417 = vmatpush1.bf16.msra.mxu1 %v23401_v6  ;;  %v23448_v6 = vld [vmem:[#allocation2 + $0x123c] ss:$72 sps:$4 sm:$0xff]  }
 0x735   :  { %16331 = vmatpush1.bf16.msra.mxu0 %v23398_v15  ;;  %16418 = vmatprep.subr.bf16.mxu1 %v23409_v32  ;;  %v23443_v15 = vld [vmem:[#allocation2 + $0x11a8] ss:$72 sps:$4 sm:$0xff]   ;;  %v23446_v32 = vld [vmem:[#allocation2 + $0x1238] ss:$72 sps:$4 sm:$0xff]  }
 0x736   :  { %16332 = vmatprep.subr.bf16.mxu0 %v23406_v2  ;;  %v23451_v2 = vld [vmem:[#allocation2 + $0x44] ss:$72 sps:$4 sm:$0xff]  }
 0x738   :  { %16419 = vmatpush1.bf16.msra.mxu1 %v23407_v36  ;;  %v23454_v36 = vld [vmem:[#allocation2 + $0x12cc] ss:$72 sps:$4 sm:$0xff]  }
 0x739   :  { %16333 = vmatpush1.bf16.msra.mxu0 %v23404_v16  ;;  %16420 = vmatprep.subr.bf16.mxu1 %v23415_v37  ;;  %v23449_v16 = vld [vmem:[#allocation2 + $0x40] ss:$72 sps:$4 sm:$0xff]  }
 0x73a   :  { %16334 = vmatprep.subr.bf16.mxu0 %v23412_v18  ;;  %v23457_v18 = vld [vmem:[#allocation2 + $0xd4] ss:$72 sps:$4 sm:$0xff]   ;;  %v23452_v37 = vld [vmem:[#allocation2 + $0x12c8] ss:$72 sps:$4 sm:$0xff]  }
 0x73c   :  { %16421 = vmatpush1.bf16.msra.mxu1 %v23413_v39  ;;  %v23460_v39 = vld [vmem:[#allocation2 + $0x135c] ss:$72 sps:$4 sm:$0xff]  }
 0x73d   :  { %16335 = vmatpush1.bf16.msra.mxu0 %v23410_v38  ;;  %16422 = vmatprep.subr.bf16.mxu1 %v23421_v42  ;;  %v23455_v38 = vld [vmem:[#allocation2 + $0xd0] ss:$72 sps:$4 sm:$0xff]  }
 0x73e   :  { %16336 = vmatprep.subr.bf16.mxu0 %v23418_v41  ;;  %v23463_v41 = vld [vmem:[#allocation2 + $0x164] ss:$72 sps:$4 sm:$0xff]   ;;  %v23458_v42 = vld [vmem:[#allocation2 + $0x1358] ss:$72 sps:$4 sm:$0xff]  }
 0x740   :  { %16423 = vmatpush1.bf16.msra.mxu1 %v23419_v49  ;;  %v23466_v49 = vld [vmem:[#allocation2 + $0x13ec] ss:$72 sps:$4 sm:$0xff]  }
 0x741   :  { %16337 = vmatpush1.bf16.msra.mxu0 %v23416_v48  ;;  %16424 = vmatprep.subr.bf16.mxu1 %v23427_v51  ;;  %v23461_v48 = vld [vmem:[#allocation2 + $0x160] ss:$72 sps:$4 sm:$0xff]  }
 0x742   :  { %16338 = vmatprep.subr.bf16.mxu0 %v23424_v50  ;;  %v23469_v50 = vld [vmem:[#allocation2 + $0x1f4] ss:$72 sps:$4 sm:$0xff]   ;;  %v23464_v51 = vld [vmem:[#allocation2 + $0x13e8] ss:$72 sps:$4 sm:$0xff]  }
 0x744   :  { %16425 = vmatpush1.bf16.msra.mxu1 %v23425_v30  ;;  %v23472_v30 = vld [vmem:[#allocation2 + $0x147c] ss:$72 sps:$4 sm:$0xff]  }
 0x745   :  { %16339 = vmatpush1.bf16.msra.mxu0 %v23422_v29  ;;  %16426 = vmatprep.subr.bf16.mxu1 %v23433_v53  ;;  %v23467_v29 = vld [vmem:[#allocation2 + $0x1f0] ss:$72 sps:$4 sm:$0xff]  }
 0x746   :  { %16340 = vmatprep.subr.bf16.mxu0 %v23430_v31  ;;  %v23475_v31 = vld [vmem:[#allocation2 + $0x284] ss:$72 sps:$4 sm:$0xff]   ;;  %v23470_v53 = vld [vmem:[#allocation2 + $0x1478] ss:$72 sps:$4 sm:$0xff]  }
 0x748   :  { %16427 = vmatpush1.bf16.msra.mxu1 %v23431_v4  ;;  %v23481_v4 = vld [vmem:[#allocation2 + $0x314] ss:$72 sps:$4 sm:$0xff]  }
 0x749   :  { %16341 = vmatpush1.bf16.msra.mxu0 %v23428_v60  ;;  %16428 = vmatprep.subr.bf16.mxu1 %v23439_v7  ;;  %v23478_v60 = vld [vmem:[#allocation2 + $0x150c] ss:$72 sps:$4 sm:$0xff]   ;;  %v23479_v7 = vld [vmem:[#allocation2 + $0x310] ss:$72 sps:$4 sm:$0xff]  }
 0x74a   :  { %16342 = vmatprep.subr.bf16.mxu0 %v23436_v47  ;;  %v23476_v47 = vld [vmem:[#allocation2 + $0x1508] ss:$72 sps:$4 sm:$0xff]  }
 0x74c   :  { %16429 = vmatpush1.bf16.msra.mxu1 %v23437_v13  ;;  %v23487_v13 = vld [vmem:[#allocation2 + $0x3a4] ss:$72 sps:$4 sm:$0xff]  }
 0x74d   :  { %16343 = vmatpush1.bf16.msra.mxu0 %v23434_v12  ;;  %16430 = vmatprep.subr.bf16.mxu1 %v23445_v14  ;;  %v23484_v12 = vld [vmem:[#allocation2 + $0x159c] ss:$72 sps:$4 sm:$0xff]   ;;  %v23485_v14 = vld [vmem:[#allocation2 + $0x3a0] ss:$72 sps:$4 sm:$0xff]  }
 0x74e   :  { %16344 = vmatprep.subr.bf16.mxu0 %v23442_v24  ;;  %v23482_v24 = vld [vmem:[#allocation2 + $0x1598] ss:$72 sps:$4 sm:$0xff]  }
 0x750   :  { %16431 = vmatpush1.bf16.msra.mxu1 %v23443_v15  ;;  %v23493_v15 = vld [vmem:[#allocation2 + $0x434] ss:$72 sps:$4 sm:$0xff]  }
 0x751   :  { %16345 = vmatpush1.bf16.msra.mxu0 %v23440_v26  ;;  %16443 = vmatprep.subr.bf16.mxu1 %v23448_v6  ;;  %v23490_v26 = vld [vmem:[#allocation2 + $0x162c] ss:$72 sps:$4 sm:$0xff]   ;;  %v23488_v6 = vld [vmem:[#allocation2 + $0x1628] ss:$72 sps:$4 sm:$0xff]  }
 0x752   :  { %16701 = vmatprep.subr.bf16.mxu0 %v23451_v2  ;;  %v23491_v2 = vld [vmem:[#allocation2 + $0x430] ss:$72 sps:$4 sm:$0xff]  }
 0x753   :  { %16433 = vmatmul.mubr.bf16.vlgmr.msra.gmra.mrb[16].mxu1 %v24307_v22 }
 0x754   :  { %16347 = vmatmul.mubr.bf16.vlgmr.msra.gmra.mrb[12].mxu0 %v24395_v19  ;;  %16444 = vmatpush1.bf16.msra.mxu1 %v23446_v32  ;;  %v23496_v32 = vld [vmem:[#allocation2 + $0x16bc] ss:$72 sps:$4 sm:$0xff]  }
 0x755   :  { %16702 = vmatpush1.bf16.msra.mxu0 %v23449_v16  ;;  %16445 = vmatprep.subr.bf16.mxu1 %v23454_v36  ;;  %v23499_v16 = vld [vmem:[#allocation2 + $0x4c4] ss:$72 sps:$4 sm:$0xff]   ;;  %v23494_v36 = vld [vmem:[#allocation2 + $0x16b8] ss:$72 sps:$4 sm:$0xff]  }
 0x756   :  { %16703 = vmatprep.subr.bf16.mxu0 %v23457_v18  ;;  %16475 = vmatprep.mubr.bf16.mxu1 %v24337_v33  ;;  %v23497_v18 = vld [vmem:[#allocation2 + $0x4c0] ss:$72 sps:$4 sm:$0xff]  }
 0x757   :  { %16733 = vmatprep.mubr.bf16.mxu0 %v24257_v52  ;;  %v23473_v52 = vld [vmem:[#allocation2 + $0x280] ss:$72 sps:$4 sm:$0xff]  }
 0x758   :  { %16446 = vmatpush1.bf16.msra.mxu1 %v23452_v37  ;;  %v23502_v37 = vld [vmem:[#allocation2 + $0x174c] ss:$72 sps:$4 sm:$0xff]  }
 0x759   :  { %16704 = vmatpush1.bf16.msra.mxu0 %v23455_v38  ;;  %16447 = vmatprep.subr.bf16.mxu1 %v23460_v39  ;;  %v23505_v38 = vld [vmem:[#allocation2 + $0x554] ss:$72 sps:$4 sm:$0xff]   ;;  %v23500_v39 = vld [vmem:[#allocation2 + $0x1748] ss:$72 sps:$4 sm:$0xff]  }
 0x75a   :  { %16705 = vmatprep.subr.bf16.mxu0 %v23463_v41  ;;  %v23503_v41 = vld [vmem:[#allocation2 + $0x550] ss:$72 sps:$4 sm:$0xff]  }
 0x75c   :  { %16448 = vmatpush1.bf16.msra.mxu1 %v23458_v42  ;;  %v23508_v42 = vld [vmem:[#allocation2 + $0x17dc] ss:$72 sps:$4 sm:$0xff]  }
 0x75d   :  { %16706 = vmatpush1.bf16.msra.mxu0 %v23461_v48  ;;  %16449 = vmatprep.subr.bf16.mxu1 %v23466_v49  ;;  %v23511_v48 = vld [vmem:[#allocation2 + $0x5e4] ss:$72 sps:$4 sm:$0xff]   ;;  %v23506_v49 = vld [vmem:[#allocation2 + $0x17d8] ss:$72 sps:$4 sm:$0xff]  }
 0x75e   :  { %16707 = vmatprep.subr.bf16.mxu0 %v23469_v50  ;;  %v23509_v50 = vld [vmem:[#allocation2 + $0x5e0] ss:$72 sps:$4 sm:$0xff]  }
 0x760   :  { %16450 = vmatpush1.bf16.msra.mxu1 %v23464_v51  ;;  %v23514_v51 = vld [vmem:[#allocation2 + $0x186c] ss:$72 sps:$4 sm:$0xff]  }
 0x761   :  { %16708 = vmatpush1.bf16.msra.mxu0 %v23467_v29  ;;  %16451 = vmatprep.subr.bf16.mxu1 %v23472_v30  ;;  %v23517_v29 = vld [vmem:[#allocation2 + $0x674] ss:$72 sps:$4 sm:$0xff]   ;;  %v23512_v30 = vld [vmem:[#allocation2 + $0x1868] ss:$72 sps:$4 sm:$0xff]  }
 0x762   :  { %16709 = vmatprep.subr.bf16.mxu0 %v23475_v31  ;;  %v23515_v31 = vld [vmem:[#allocation2 + $0x670] ss:$72 sps:$4 sm:$0xff]  }
 0x764   :  { %16452 = vmatpush1.bf16.msra.mxu1 %v23470_v53  ;;  %v23520_v53 = vld [vmem:[#allocation2 + $0x18fc] ss:$72 sps:$4 sm:$0xff]  }
 0x765   :  { %16710 = vmatpush1.bf16.msra.mxu0 %v23473_v52  ;;  %16453 = vmatprep.subr.bf16.mxu1 %v23478_v60  ;;  %v23523_v52 = vld [vmem:[#allocation2 + $0x704] ss:$72 sps:$4 sm:$0xff]   ;;  %v23518_v60 = vld [vmem:[#allocation2 + $0x18f8] ss:$72 sps:$4 sm:$0xff]  }
 0x766   :  { %16711 = vmatprep.subr.bf16.mxu0 %v23481_v4  ;;  %v23521_v4 = vld [vmem:[#allocation2 + $0x700] ss:$72 sps:$4 sm:$0xff]  }
 0x768   :  { %16454 = vmatpush1.bf16.msra.mxu1 %v23476_v47  ;;  %v23526_v47 = vld [vmem:[#allocation2 + $0x198c] ss:$72 sps:$4 sm:$0xff]  }
 0x769   :  { %16712 = vmatpush1.bf16.msra.mxu0 %v23479_v7  ;;  %16455 = vmatprep.subr.bf16.mxu1 %v23484_v12  ;;  %v23529_v7 = vld [vmem:[#allocation2 + $0x794] ss:$72 sps:$4 sm:$0xff]   ;;  %v23524_v12 = vld [vmem:[#allocation2 + $0x1988] ss:$72 sps:$4 sm:$0xff]  }
 0x76a   :  { %16713 = vmatprep.subr.bf16.mxu0 %v23487_v13  ;;  %v23527_v13 = vld [vmem:[#allocation2 + $0x790] ss:$72 sps:$4 sm:$0xff]  }
 0x76c   :  { %16456 = vmatpush1.bf16.msra.mxu1 %v23482_v24  ;;  %v23532_v24 = vld [vmem:[#allocation2 + $0x1a1c] ss:$72 sps:$4 sm:$0xff]  }
 0x76d   :  { %16714 = vmatpush1.bf16.msra.mxu0 %v23485_v14  ;;  %16457 = vmatprep.subr.bf16.mxu1 %v23490_v26  ;;  %v23535_v14 = vld [vmem:[#allocation2 + $0x824] ss:$72 sps:$4 sm:$0xff]   ;;  %v23530_v26 = vld [vmem:[#allocation2 + $0x1a18] ss:$72 sps:$4 sm:$0xff]  }
 0x76e   :  { %16715 = vmatprep.subr.bf16.mxu0 %v23493_v15  ;;  %v23533_v15 = vld [vmem:[#allocation2 + $0x820] ss:$72 sps:$4 sm:$0xff]  }
 0x770   :  { %16458 = vmatpush1.bf16.msra.mxu1 %v23488_v6  ;;  %v23538_v6 = vld [vmem:[#allocation2 + $0x1aac] ss:$72 sps:$4 sm:$0xff]  }
 0x771   :  { %16716 = vmatpush1.bf16.msra.mxu0 %v23491_v2  ;;  %16459 = vmatprep.subr.bf16.mxu1 %v23496_v32  ;;  %v23541_v2 = vld [vmem:[#allocation2 + $0x8b4] ss:$72 sps:$4 sm:$0xff]   ;;  %v23536_v32 = vld [vmem:[#allocation2 + $0x1aa8] ss:$72 sps:$4 sm:$0xff]  }
 0x772   :  { %16717 = vmatprep.subr.bf16.mxu0 %v23499_v16  ;;  %v23539_v16 = vld [vmem:[#allocation2 + $0x8b0] ss:$72 sps:$4 sm:$0xff]  }
 0x774   :  { %16460 = vmatpush1.bf16.msra.mxu1 %v23494_v36  ;;  %v23544_v36 = vld [vmem:[#allocation2 + $0x1b3c] ss:$72 sps:$4 sm:$0xff]  }
 0x775   :  { %16718 = vmatpush1.bf16.msra.mxu0 %v23497_v18  ;;  %16461 = vmatprep.subr.bf16.mxu1 %v23502_v37  ;;  %v23547_v18 = vld [vmem:[#allocation2 + $0x944] ss:$72 sps:$4 sm:$0xff]   ;;  %v23542_v37 = vld [vmem:[#allocation2 + $0x1b38] ss:$72 sps:$4 sm:$0xff]  }
 0x776   :  { %16719 = vmatprep.subr.bf16.mxu0 %v23505_v38  ;;  %v23545_v38 = vld [vmem:[#allocation2 + $0x940] ss:$72 sps:$4 sm:$0xff]  }
 0x778   :  { %16462 = vmatpush1.bf16.msra.mxu1 %v23500_v39  ;;  %v23550_v39 = vld [vmem:[#allocation2 + $0x1bcc] ss:$72 sps:$4 sm:$0xff]  }
 0x779   :  { %16720 = vmatpush1.bf16.msra.mxu0 %v23503_v41  ;;  %16463 = vmatprep.subr.bf16.mxu1 %v23508_v42  ;;  %v23553_v41 = vld [vmem:[#allocation2 + $0x9d4] ss:$72 sps:$4 sm:$0xff]   ;;  %v23548_v42 = vld [vmem:[#allocation2 + $0x1bc8] ss:$72 sps:$4 sm:$0xff]  }
 0x77a   :  { %16721 = vmatprep.subr.bf16.mxu0 %v23511_v48  ;;  %v23551_v48 = vld [vmem:[#allocation2 + $0x9d0] ss:$72 sps:$4 sm:$0xff]  }
 0x77c   :  { %16464 = vmatpush1.bf16.msra.mxu1 %v23506_v49  ;;  %v23556_v49 = vld [vmem:[#allocation2 + $0x1c5c] ss:$72 sps:$4 sm:$0xff]  }
 0x77d   :  { %16722 = vmatpush1.bf16.msra.mxu0 %v23509_v50  ;;  %16465 = vmatprep.subr.bf16.mxu1 %v23514_v51  ;;  %v23559_v50 = vld [vmem:[#allocation2 + $0xa64] ss:$72 sps:$4 sm:$0xff]   ;;  %v23554_v51 = vld [vmem:[#allocation2 + $0x1c58] ss:$72 sps:$4 sm:$0xff]  }
 0x77e   :  { %16723 = vmatprep.subr.bf16.mxu0 %v23517_v29  ;;  %v23557_v29 = vld [vmem:[#allocation2 + $0xa60] ss:$72 sps:$4 sm:$0xff]  }
 0x780   :  { %16466 = vmatpush1.bf16.msra.mxu1 %v23512_v30  ;;  %v23562_v30 = vld [vmem:[#allocation2 + $0x1cec] ss:$72 sps:$4 sm:$0xff]  }
 0x781   :  { %16724 = vmatpush1.bf16.msra.mxu0 %v23515_v31  ;;  %16467 = vmatprep.subr.bf16.mxu1 %v23520_v53  ;;  %v23560_v31 = vld [vmem:[#allocation2 + $0x1ce8] ss:$72 sps:$4 sm:$0xff]  }
 0x782   :  { %16725 = vmatprep.subr.bf16.mxu0 %v23523_v52  ;;  %v23563_v53 = vld [vmem:[#allocation2 + $0xaf0] ss:$72 sps:$4 sm:$0xff]   ;;  %v23568_v52 = vld [vmem:[#allocation2 + $0x1d7c] ss:$72 sps:$4 sm:$0xff]  }
 0x784   :  { %16468 = vmatpush1.bf16.msra.mxu1 %v23518_v60  ;;  %v23571_v60 = vld [vmem:[#allocation2 + $0xb84] ss:$72 sps:$4 sm:$0xff]  }
 0x785   :  { %16726 = vmatpush1.bf16.msra.mxu0 %v23521_v4  ;;  %16469 = vmatprep.subr.bf16.mxu1 %v23526_v47  ;;  %v23566_v4 = vld [vmem:[#allocation2 + $0x1d78] ss:$72 sps:$4 sm:$0xff]   ;;  %v23574_v47 = vld [vmem:[#allocation2 + $0x1e0c] ss:$72 sps:$4 sm:$0xff]  }
 0x786   :  { %16727 = vmatprep.subr.bf16.mxu0 %v23529_v7  ;;  %v23577_v7 = vld [vmem:[#allocation2 + $0xc14] ss:$72 sps:$4 sm:$0xff]  }
 0x788   :  { %16470 = vmatpush1.bf16.msra.mxu1 %v23524_v12  ;;  %v23572_v12 = vld [vmem:[#allocation2 + $0x1e08] ss:$72 sps:$4 sm:$0xff]  }
 0x789   :  { %16728 = vmatpush1.bf16.msra.mxu0 %v23527_v13  ;;  %16471 = vmatprep.subr.bf16.mxu1 %v23532_v24  ;;  %v23575_v13 = vld [vmem:[#allocation2 + $0xc10] ss:$72 sps:$4 sm:$0xff]   ;;  %v23580_v24 = vld [vmem:[#allocation2 + $0x1e9c] ss:$72 sps:$4 sm:$0xff]  }
 0x78a   :  { %16729 = vmatprep.subr.bf16.mxu0 %v23535_v14  ;;  %v23583_v14 = vld [vmem:[#allocation2 + $0xca4] ss:$72 sps:$4 sm:$0xff]  }
 0x78c   :  { %16472 = vmatpush1.bf16.msra.mxu1 %v23530_v26 }
 0x78d   :  { %16730 = vmatpush1.bf16.msra.mxu0 %v23533_v15  ;;  %16473 = vmatprep.subr.bf16.mxu1 %v23538_v6  ;;  %v17046_v15 = vmul.f32 %v24425_v8, %v24425_v8  ;;  %v23586_v8 = vld [vmem:[#allocation2 + $0x1f2c] ss:$72 sps:$4 sm:$0xff]  }
 0x78e   :  { %16731 = vmatprep.subr.bf16.mxu0 %v23541_v2 }
 0x790   :  { %16474 = vmatpush1.bf16.msra.mxu1 %v23536_v32  ;;  %v17047_v32 = vmul.f32 %v24457_v59, %v24457_v59  ;;  %v17056_v59 = vmul.f32 %v24461_v63, %v24461_v63 }
 0x791   :  { %16732 = vmatpush1.bf16.msra.mxu0 %v23539_v16  ;;  %16486 = vmatprep.subr.bf16.mxu1 %v23544_v36 }
 0x792   :  { %16744 = vmatprep.subr.bf16.mxu0 %v23547_v18  ;;  %v23578_v18 = vld [vmem:[#allocation2 + $0x1e98] ss:$72 sps:$4 sm:$0xff]  }
 0x793   :  { %16476 = vmatmul.mubr.bf16.vlgmr.msra.gmra.mrb[16].mxu1 %v24352_v45 }
 0x794   :  { %16734 = vmatmul.mubr.bf16.vlgmr.msra.gmra.mrb[16].mxu0 %v24269_v10  ;;  %16487 = vmatpush1.bf16.msra.mxu1 %v23542_v37  ;;  %v23565_v10 = vld [vmem:[#allocation2 + $0xaf4] ss:$72 sps:$4 sm:$0xff]   ;;  %v23581_v37 = vld [vmem:[#allocation2 + $0xca0] ss:$72 sps:$4 sm:$0xff]  }
 0x795   :  { %16745 = vmatpush1.bf16.msra.mxu0 %v23545_v38  ;;  %16488 = vmatprep.subr.bf16.mxu1 %v23550_v39  ;;  %v17055_v38 = vmul.f32 %v24431_v9, %v24431_v9  ;;  %v23584_v9 = vld [vmem:[#allocation2 + $0x1f28] ss:$72 sps:$4 sm:$0xff]  }
 0x796   :  { %16746 = vmatprep.subr.bf16.mxu0 %v23553_v41  ;;  %16518 = vmatprep.mubr.bf16.mxu1 %v24266_v55 }
 0x797   :  { %16776 = vmatprep.mubr.bf16.mxu0 %v24287_v40  ;;  %v23569_v40 = vld [vmem:[#allocation2 + $0xb80] ss:$72 sps:$4 sm:$0xff]  }
 0x798   :  { %16489 = vmatpush1.bf16.msra.mxu1 %v23548_v42 }
 0x799   :  { %16747 = vmatpush1.bf16.msra.mxu0 %v23551_v48  ;;  %16490 = vmatprep.subr.bf16.mxu1 %v23556_v49  ;;  %v23589_v48 = vld [vmem:[#allocation2 + $0xd34] ss:$72 sps:$4 sm:$0xff]  }
 0x79a   :  { %16748 = vmatprep.subr.bf16.mxu0 %v23559_v50 }
 0x79c   :  { %16491 = vmatpush1.bf16.msra.mxu1 %v23554_v51 }
 0x79d   :  { %16749 = vmatpush1.bf16.msra.mxu0 %v23557_v29  ;;  %16492 = vmatprep.subr.bf16.mxu1 %v23562_v30  ;;  %v23587_v30 = vld [vmem:[#allocation2 + $0xd30] ss:$72 sps:$4 sm:$0xff]  }
 0x79e   :  { %16750 = vmatprep.subr.bf16.mxu0 %v23565_v10  ;;  %v23592_v10 = vld [vmem:[#allocation2 + $0x1fbc] ss:$72 sps:$4 sm:$0xff]  }
 0x7a0   :  { %16493 = vmatpush1.bf16.msra.mxu1 %v23560_v31  ;;  %v23595_v31 = vld [vmem:[#allocation2 + $0xdc4] ss:$72 sps:$4 sm:$0xff]  }
 0x7a1   :  { %16751 = vmatpush1.bf16.msra.mxu0 %v23563_v53  ;;  %16494 = vmatprep.subr.bf16.mxu1 %v23568_v52  ;;  %v23590_v52 = vld [vmem:[#allocation2 + $0x1fb8] ss:$72 sps:$4 sm:$0xff]  }
 0x7a2   :  { %16752 = vmatprep.subr.bf16.mxu0 %v23571_v60  ;;  %v23593_v60 = vld [vmem:[#allocation2 + $0xdc0] ss:$72 sps:$4 sm:$0xff]  }
 0x7a4   :  { %16495 = vmatpush1.bf16.msra.mxu1 %v23566_v4  ;;  %v23598_v4 = vld [vmem:[#allocation2 + $0x204c] ss:$72 sps:$4 sm:$0xff]  }
 0x7a5   :  { %16753 = vmatpush1.bf16.msra.mxu0 %v23569_v40  ;;  %16496 = vmatprep.subr.bf16.mxu1 %v23574_v47  ;;  %v23601_v40 = vld [vmem:[#allocation2 + $0xe54] ss:$72 sps:$4 sm:$0xff]   ;;  %v23596_v47 = vld [vmem:[#allocation2 + $0x2048] ss:$72 sps:$4 sm:$0xff]  }
 0x7a6   :  { %16754 = vmatprep.subr.bf16.mxu0 %v23577_v7  ;;  %v16004_v26 = vpop.f32.mrb[12].mxu1  ;;  %v23599_v7 = vld [vmem:[#allocation2 + $0xe50] ss:$72 sps:$4 sm:$0xff]  }
 0x7a7   :  { %v17064_v6 = vmul.f32 %v16004_v26, %v16004_v26  ;;  %v16006_v2 = vpop.f32.mrb[13].mxu1  ;;  %v23610_v26 = vld [vmem:[#allocation2 + $0x216c] ss:$72 sps:$4 sm:$0xff]  }
 0x7a8   :  { %v17065_v16 = vmul.f32 %v16006_v2, %v16006_v2  ;;  %v16008_v36 = vpop.f32.mrb[14].mxu1  ;;  %16497 = vmatpush1.bf16.msra.mxu1 %v23572_v12  ;;  %v23604_v12 = vld [vmem:[#allocation2 + $0x20dc] ss:$72 sps:$4 sm:$0xff]   ;;  %v23611_v2 = vld [vmem:[#allocation2 + $0xf70] ss:$72 sps:$4 sm:$0xff]  }
 0x7a9   :  { %16755 = vmatpush1.bf16.msra.mxu0 %v23575_v13  ;;  %v24565_v39 = vadd.f32 %v17064_v6, %v17046_v15  ;;  %v17073_v41 = vmul.f32 %v16008_v36, %v16008_v36  ;;  %v16010_v42 = vpop.f32.mrb[15].mxu1  ;;  %16498 = vmatprep.subr.bf16.mxu1 %v23580_v24  ;;  %v23607_v13 = vld [vmem:[#allocation2 + $0xee4] ss:$72 sps:$4 sm:$0xff]   ;;  %v23602_v24 = vld [vmem:[#allocation2 + $0x20d8] ss:$72 sps:$4 sm:$0xff]  }
 0x7aa   :  { %16756 = vmatprep.subr.bf16.mxu0 %v23583_v14  ;;  %v24569_v49 = vadd.f32 %v17065_v16, %v17047_v32  ;;  %v17074_v50 = vmul.f32 %v16010_v42, %v16010_v42  ;;  %v23605_v14 = vld [vmem:[#allocation2 + $0xee0] ss:$72 sps:$4 sm:$0xff]   ;;  %v23613_v15 = vld [vmem:[#allocation2 + $0xf74] ss:$72 sps:$4 sm:$0xff]   ;;  %v23619_v16 = vld [vmem:[#allocation2 + $0x1004] ss:$72 sps:$4 sm:$0xff]  }
 0x7ab   :  { %v24571_v51 = vadd.f32 %v17073_v41, %v17055_v38  ;;  %v23608_v6 = vld [vmem:[#allocation2 + $0x2168] ss:$72 sps:$4 sm:$0xff]   ;;  %v23616_v32 = vld [vmem:[#allocation2 + $0x21fc] ss:$72 sps:$4 sm:$0xff]   ;;  %v23614_v36 = vld [vmem:[#allocation2 + $0x21f8] ss:$72 sps:$4 sm:$0xff]  }
 0x7ac   :  { %v24573_v29 = vadd.f32 %v17074_v50, %v17056_v59  ;;  %16499 = vmatpush1.bf16.msra.mxu1 %v23578_v18  ;;  %v23617_v18 = vld [vmem:[#allocation2 + $0x1000] ss:$72 sps:$4 sm:$0xff]   ;;  %v23625_v38 = vld [vmem:[#allocation2 + $0x1094] ss:$72 sps:$4 sm:$0xff]   ;;  %v23623_v42 = vld [vmem:[#allocation2 + $0x1090] ss:$72 sps:$4 sm:$0xff]  }
 0x7ad   :  { %16757 = vmatpush1.bf16.msra.mxu0 %v23581_v37  ;;  %16500 = vmatprep.subr.bf16.mxu1 %v23586_v8  ;;  %v17100_v53 = vpack.c.bf16 %v24571_v51, %v24565_v39  ;;  %v23622_v37 = vld [vmem:[#allocation2 + $0x228c] ss:$72 sps:$4 sm:$0xff]   ;;  %v23620_v41 = vld [vmem:[#allocation2 + $0x2288] ss:$72 sps:$4 sm:$0xff]   ;;  %v23628_v8 = vld [vmem:[#allocation2 + $0x231c] ss:$72 sps:$4 sm:$0xff]  }
 0x7ae   :  { %16758 = vmatprep.subr.bf16.mxu0 %v23589_v48  ;;  %v17101_v63 = vpack.c.bf16 %v24573_v29, %v24569_v49  ;;  %v23631_v48 = vld [vmem:[#allocation2 + $0x1124] ss:$72 sps:$4 sm:$0xff]   ;;  %v23626_v59 = vld [vmem:[#allocation2 + $0x2318] ss:$72 sps:$4 sm:$0xff]   ;;  %v24039_v39 = vld [vmem:[#allocation2 + $0x37f4] ss:$72 sps:$4 sm:$0xff]  }
 0x7af   :  { %v23629_v50 = vld [vmem:[#allocation2 + $0x1120] ss:$72 sps:$4 sm:$0xff]   ;;  %v24040_v51 = vld [vmem:[%s24885_s2 + $0x58] sm:$0xff]  }
 0x7b0   :  { %16501 = vmatpush1.bf16.msra.mxu1 %v23584_v9  ;;  %v23634_v9 = vld [vmem:[#allocation2 + $0x23ac] ss:$72 sps:$4 sm:$0xff]   ;;  %v24108_v49 = vld [vmem:[#allocation2 + $0x4060] ss:$72 sps:$4 sm:$0xff]   ;;  %v24156_v29 = vld [vmem:[%s24885_s2 + $0x158] sm:$0xff]  }
 0x7b1   :  { %16759 = vmatpush1.bf16.msra.mxu0 %v23587_v30  ;;  %16502 = vmatprep.subr.bf16.mxu1 %v23592_v10  ;;  %v23637_v30 = vld [vmem:[#allocation2 + $0x11b4] ss:$72 sps:$4 sm:$0xff]   ;;  %v23632_v10 = vld [vmem:[#allocation2 + $0x23a8] ss:$72 sps:$4 sm:$0xff]  }
 0x7b2   :  { %16760 = vmatprep.subr.bf16.mxu0 %v23595_v31  ;;  %v23635_v31 = vld [vmem:[#allocation2 + $0x11b0] ss:$72 sps:$4 sm:$0xff]  }
 0x7b4   :  { %16503 = vmatpush1.bf16.msra.mxu1 %v23590_v52  ;;  %v23640_v52 = vld [vmem:[#allocation2 + $0x243c] ss:$72 sps:$4 sm:$0xff]  }
 0x7b5   :  { %16761 = vmatpush1.bf16.msra.mxu0 %v23593_v60  ;;  %16504 = vmatprep.subr.bf16.mxu1 %v23598_v4  ;;  %v23643_v60 = vld [vmem:[#allocation2 + $0x1244] ss:$72 sps:$4 sm:$0xff]   ;;  %v23638_v4 = vld [vmem:[#allocation2 + $0x2438] ss:$72 sps:$4 sm:$0xff]  }
 0x7b6   :  { %16762 = vmatprep.subr.bf16.mxu0 %v23601_v40  ;;  %v23641_v40 = vld [vmem:[#allocation2 + $0x1240] ss:$72 sps:$4 sm:$0xff]  }
 0x7b8   :  { %16505 = vmatpush1.bf16.msra.mxu1 %v23596_v47  ;;  %v23646_v47 = vld [vmem:[#allocation2 + $0x24cc] ss:$72 sps:$4 sm:$0xff]  }
 0x7b9   :  { %16763 = vmatpush1.bf16.msra.mxu0 %v23599_v7  ;;  %16506 = vmatprep.subr.bf16.mxu1 %v23604_v12  ;;  %v23649_v7 = vld [vmem:[#allocation2 + $0x12d4] ss:$72 sps:$4 sm:$0xff]   ;;  %v23644_v12 = vld [vmem:[#allocation2 + $0x24c8] ss:$72 sps:$4 sm:$0xff]  }
 0x7ba   :  { %16764 = vmatprep.subr.bf16.mxu0 %v23607_v13  ;;  %v23647_v13 = vld [vmem:[#allocation2 + $0x12d0] ss:$72 sps:$4 sm:$0xff]  }
 0x7bc   :  { %16507 = vmatpush1.bf16.msra.mxu1 %v23602_v24  ;;  %v23652_v24 = vld [vmem:[#allocation2 + $0x255c] ss:$72 sps:$4 sm:$0xff]  }
 0x7bd   :  { %16765 = vmatpush1.bf16.msra.mxu0 %v23605_v14  ;;  %16508 = vmatprep.subr.bf16.mxu1 %v23610_v26  ;;  %v23655_v14 = vld [vmem:[#allocation2 + $0x1364] ss:$72 sps:$4 sm:$0xff]   ;;  %v23650_v26 = vld [vmem:[#allocation2 + $0x2558] ss:$72 sps:$4 sm:$0xff]  }
 0x7be   :  { %16766 = vmatprep.subr.bf16.mxu0 %v23613_v15  ;;  %v23653_v15 = vld [vmem:[#allocation2 + $0x1360] ss:$72 sps:$4 sm:$0xff]  }
 0x7c0   :  { %16509 = vmatpush1.bf16.msra.mxu1 %v23608_v6  ;;  %v23658_v6 = vld [vmem:[#allocation2 + $0x25ec] ss:$72 sps:$4 sm:$0xff]  }
 0x7c1   :  { %16767 = vmatpush1.bf16.msra.mxu0 %v23611_v2  ;;  %16510 = vmatprep.subr.bf16.mxu1 %v23616_v32  ;;  %v23656_v2 = vld [vmem:[#allocation2 + $0x25e8] ss:$72 sps:$4 sm:$0xff]  }
 0x7c2   :  { %16768 = vmatprep.subr.bf16.mxu0 %v23619_v16  ;;  %v23659_v32 = vld [vmem:[#allocation2 + $0x13f0] ss:$72 sps:$4 sm:$0xff]   ;;  %v23664_v16 = vld [vmem:[#allocation2 + $0x267c] ss:$72 sps:$4 sm:$0xff]  }
 0x7c4   :  { %16511 = vmatpush1.bf16.msra.mxu1 %v23614_v36  ;;  %v23667_v36 = vld [vmem:[#allocation2 + $0x1484] ss:$72 sps:$4 sm:$0xff]  }
 0x7c5   :  { %16769 = vmatpush1.bf16.msra.mxu0 %v23617_v18  ;;  %16512 = vmatprep.subr.bf16.mxu1 %v23622_v37  ;;  %v23662_v18 = vld [vmem:[#allocation2 + $0x2678] ss:$72 sps:$4 sm:$0xff]   ;;  %v23670_v37 = vld [vmem:[#allocation2 + $0x270c] ss:$72 sps:$4 sm:$0xff]  }
 0x7c6   :  { %16770 = vmatprep.subr.bf16.mxu0 %v23625_v38  ;;  %v23673_v38 = vld [vmem:[#allocation2 + $0x1514] ss:$72 sps:$4 sm:$0xff]  }
 0x7c8   :  { %16513 = vmatpush1.bf16.msra.mxu1 %v23620_v41  ;;  %v23668_v41 = vld [vmem:[#allocation2 + $0x2708] ss:$72 sps:$4 sm:$0xff]  }
 0x7c9   :  { %16771 = vmatpush1.bf16.msra.mxu0 %v23623_v42  ;;  %16514 = vmatprep.subr.bf16.mxu1 %v23628_v8  ;;  %v23671_v42 = vld [vmem:[#allocation2 + $0x1510] ss:$72 sps:$4 sm:$0xff]   ;;  %v23676_v8 = vld [vmem:[#allocation2 + $0x279c] ss:$72 sps:$4 sm:$0xff]  }
 0x7ca   :  { %16772 = vmatprep.subr.bf16.mxu0 %v23631_v48  ;;  %v23679_v48 = vld [vmem:[#allocation2 + $0x15a4] ss:$72 sps:$4 sm:$0xff]  }
 0x7cc   :  { %16515 = vmatpush1.bf16.msra.mxu1 %v23626_v59  ;;  %v23674_v59 = vld [vmem:[#allocation2 + $0x2798] ss:$72 sps:$4 sm:$0xff]  }
 0x7cd   :  { %16773 = vmatpush1.bf16.msra.mxu0 %v23629_v50  ;;  %16516 = vmatprep.subr.bf16.mxu1 %v23634_v9  ;;  %v23677_v50 = vld [vmem:[#allocation2 + $0x15a0] ss:$72 sps:$4 sm:$0xff]   ;;  %v23682_v9 = vld [vmem:[#allocation2 + $0x282c] ss:$72 sps:$4 sm:$0xff]  }
 0x7ce   :  { %16774 = vmatprep.subr.bf16.mxu0 %v23637_v30  ;;  %v23685_v30 = vld [vmem:[#allocation2 + $0x1634] ss:$72 sps:$4 sm:$0xff]  }
 0x7d0   :  { %16517 = vmatpush1.bf16.msra.mxu1 %v23632_v10  ;;  %v23680_v10 = vld [vmem:[#allocation2 + $0x2828] ss:$72 sps:$4 sm:$0xff]  }
 0x7d1   :  { %16775 = vmatpush1.bf16.msra.mxu0 %v23635_v31  ;;  %16529 = vmatprep.subr.bf16.mxu1 %v23640_v52  ;;  %v23683_v31 = vld [vmem:[#allocation2 + $0x1630] ss:$72 sps:$4 sm:$0xff]   ;;  %v23688_v52 = vld [vmem:[#allocation2 + $0x28bc] ss:$72 sps:$4 sm:$0xff]  }
 0x7d2   :  { %16787 = vmatprep.subr.bf16.mxu0 %v23643_v60  ;;  %v23691_v60 = vld [vmem:[#allocation2 + $0x16c4] ss:$72 sps:$4 sm:$0xff]  }
 0x7d3   :  { %16519 = vmatmul.mubr.bf16.vlgmr.msra.gmra.mrb[16].mxu1 %v24271_v11 }
 0x7d4   :  { %16777 = vmatmul.mubr.bf16.vlgmr.msra.gmra.mrb[16].mxu0 %v24307_v22  ;;  %16530 = vmatpush1.bf16.msra.mxu1 %v23638_v4  ;;  %v23661_v22 = vld [vmem:[#allocation2 + $0x13f4] ss:$72 sps:$4 sm:$0xff]   ;;  %v23686_v4 = vld [vmem:[#allocation2 + $0x28b8] ss:$72 sps:$4 sm:$0xff]  }
 0x7d5   :  { %16788 = vmatpush1.bf16.msra.mxu0 %v23641_v40  ;;  %16531 = vmatprep.subr.bf16.mxu1 %v23646_v47  ;;  %v23689_v40 = vld [vmem:[#allocation2 + $0x16c0] ss:$72 sps:$4 sm:$0xff]   ;;  %v23694_v47 = vld [vmem:[#allocation2 + $0x294c] ss:$72 sps:$4 sm:$0xff]  }
 0x7d6   :  { %16789 = vmatprep.subr.bf16.mxu0 %v23649_v7  ;;  %16561 = vmatprep.mubr.bf16.mxu1 %v24302_v43  ;;  %v23697_v7 = vld [vmem:[#allocation2 + $0x1754] ss:$72 sps:$4 sm:$0xff]  }
 0x7d7   :  { %16819 = vmatprep.mubr.bf16.mxu0 %v24337_v33  ;;  %v23665_v33 = vld [vmem:[#allocation2 + $0x1480] ss:$72 sps:$4 sm:$0xff]  }
 0x7d8   :  { %16532 = vmatpush1.bf16.msra.mxu1 %v23644_v12  ;;  %v23692_v12 = vld [vmem:[#allocation2 + $0x2948] ss:$72 sps:$4 sm:$0xff]  }
 0x7d9   :  { %16790 = vmatpush1.bf16.msra.mxu0 %v23647_v13  ;;  %16533 = vmatprep.subr.bf16.mxu1 %v23652_v24  ;;  %v23695_v13 = vld [vmem:[#allocation2 + $0x1750] ss:$72 sps:$4 sm:$0xff]   ;;  %v23700_v24 = vld [vmem:[#allocation2 + $0x29dc] ss:$72 sps:$4 sm:$0xff]  }
 0x7da   :  { %16791 = vmatprep.subr.bf16.mxu0 %v23655_v14  ;;  %v23703_v14 = vld [vmem:[#allocation2 + $0x17e4] ss:$72 sps:$4 sm:$0xff]  }
 0x7dc   :  { %16534 = vmatpush1.bf16.msra.mxu1 %v23650_v26  ;;  %v23698_v26 = vld [vmem:[#allocation2 + $0x29d8] ss:$72 sps:$4 sm:$0xff]  }
 0x7dd   :  { %16792 = vmatpush1.bf16.msra.mxu0 %v23653_v15  ;;  %16535 = vmatprep.subr.bf16.mxu1 %v23658_v6  ;;  %v23701_v15 = vld [vmem:[#allocation2 + $0x17e0] ss:$72 sps:$4 sm:$0xff]   ;;  %v23706_v6 = vld [vmem:[#allocation2 + $0x2a6c] ss:$72 sps:$4 sm:$0xff]  }
 0x7de   :  { %16793 = vmatprep.subr.bf16.mxu0 %v23661_v22  ;;  %v23709_v22 = vld [vmem:[#allocation2 + $0x1874] ss:$72 sps:$4 sm:$0xff]  }
 0x7e0   :  { %16536 = vmatpush1.bf16.msra.mxu1 %v23656_v2  ;;  %v23704_v2 = vld [vmem:[#allocation2 + $0x2a68] ss:$72 sps:$4 sm:$0xff]  }
 0x7e1   :  { %16794 = vmatpush1.bf16.msra.mxu0 %v23659_v32  ;;  %16537 = vmatprep.subr.bf16.mxu1 %v23664_v16  ;;  %v23707_v32 = vld [vmem:[#allocation2 + $0x1870] ss:$72 sps:$4 sm:$0xff]   ;;  %v23712_v16 = vld [vmem:[#allocation2 + $0x2afc] ss:$72 sps:$4 sm:$0xff]  }
 0x7e2   :  { %16795 = vmatprep.subr.bf16.mxu0 %v23667_v36  ;;  %v23715_v36 = vld [vmem:[#allocation2 + $0x1904] ss:$72 sps:$4 sm:$0xff]  }
 0x7e4   :  { %16538 = vmatpush1.bf16.msra.mxu1 %v23662_v18  ;;  %v23710_v18 = vld [vmem:[#allocation2 + $0x2af8] ss:$72 sps:$4 sm:$0xff]  }
 0x7e5   :  { %16796 = vmatpush1.bf16.msra.mxu0 %v23665_v33  ;;  %16539 = vmatprep.subr.bf16.mxu1 %v23670_v37  ;;  %v23713_v33 = vld [vmem:[#allocation2 + $0x1900] ss:$72 sps:$4 sm:$0xff]   ;;  %v23718_v37 = vld [vmem:[#allocation2 + $0x2b8c] ss:$72 sps:$4 sm:$0xff]  }
 0x7e6   :  { %16797 = vmatprep.subr.bf16.mxu0 %v23673_v38  ;;  %v23721_v38 = vld [vmem:[#allocation2 + $0x1994] ss:$72 sps:$4 sm:$0xff]  }
 0x7e8   :  { %16540 = vmatpush1.bf16.msra.mxu1 %v23668_v41  ;;  %v23716_v41 = vld [vmem:[#allocation2 + $0x2b88] ss:$72 sps:$4 sm:$0xff]  }
 0x7e9   :  { %16798 = vmatpush1.bf16.msra.mxu0 %v23671_v42  ;;  %16541 = vmatprep.subr.bf16.mxu1 %v23676_v8  ;;  %v23719_v42 = vld [vmem:[#allocation2 + $0x1990] ss:$72 sps:$4 sm:$0xff]   ;;  %v23724_v8 = vld [vmem:[#allocation2 + $0x2c1c] ss:$72 sps:$4 sm:$0xff]  }
 0x7ea   :  { %16799 = vmatprep.subr.bf16.mxu0 %v23679_v48  ;;  %v23727_v48 = vld [vmem:[#allocation2 + $0x1a24] ss:$72 sps:$4 sm:$0xff]  }
 0x7ec   :  { %16542 = vmatpush1.bf16.msra.mxu1 %v23674_v59  ;;  %v23722_v59 = vld [vmem:[#allocation2 + $0x2c18] ss:$72 sps:$4 sm:$0xff]  }
 0x7ed   :  { %16800 = vmatpush1.bf16.msra.mxu0 %v23677_v50  ;;  %16543 = vmatprep.subr.bf16.mxu1 %v23682_v9  ;;  %v23725_v50 = vld [vmem:[#allocation2 + $0x1a20] ss:$72 sps:$4 sm:$0xff]   ;;  %v23730_v9 = vld [vmem:[#allocation2 + $0x2cac] ss:$72 sps:$4 sm:$0xff]  }
 0x7ee   :  { %16801 = vmatprep.subr.bf16.mxu0 %v23685_v30  ;;  %v23733_v30 = vld [vmem:[#allocation2 + $0x1ab4] ss:$72 sps:$4 sm:$0xff]  }
 0x7f0   :  { %16544 = vmatpush1.bf16.msra.mxu1 %v23680_v10  ;;  %v23728_v10 = vld [vmem:[#allocation2 + $0x2ca8] ss:$72 sps:$4 sm:$0xff]  }
 0x7f1   :  { %16802 = vmatpush1.bf16.msra.mxu0 %v23683_v31  ;;  %16545 = vmatprep.subr.bf16.mxu1 %v23688_v52  ;;  %v23731_v31 = vld [vmem:[#allocation2 + $0x1ab0] ss:$72 sps:$4 sm:$0xff]   ;;  %v23736_v52 = vld [vmem:[#allocation2 + $0x2d3c] ss:$72 sps:$4 sm:$0xff]  }
 0x7f2   :  { %16803 = vmatprep.subr.bf16.mxu0 %v23691_v60  ;;  %v23739_v60 = vld [vmem:[#allocation2 + $0x1b44] ss:$72 sps:$4 sm:$0xff]  }
 0x7f4   :  { %16546 = vmatpush1.bf16.msra.mxu1 %v23686_v4  ;;  %v23734_v4 = vld [vmem:[#allocation2 + $0x2d38] ss:$72 sps:$4 sm:$0xff]  }
 0x7f5   :  { %16804 = vmatpush1.bf16.msra.mxu0 %v23689_v40  ;;  %16547 = vmatprep.subr.bf16.mxu1 %v23694_v47  ;;  %v23737_v40 = vld [vmem:[#allocation2 + $0x1b40] ss:$72 sps:$4 sm:$0xff]   ;;  %v23742_v47 = vld [vmem:[#allocation2 + $0x2dcc] ss:$72 sps:$4 sm:$0xff]  }
 0x7f6   :  { %16805 = vmatprep.subr.bf16.mxu0 %v23697_v7  ;;  %v23745_v7 = vld [vmem:[#allocation2 + $0x1bd4] ss:$72 sps:$4 sm:$0xff]  }
 0x7f8   :  { %16548 = vmatpush1.bf16.msra.mxu1 %v23692_v12  ;;  %v23740_v12 = vld [vmem:[#allocation2 + $0x2dc8] ss:$72 sps:$4 sm:$0xff]  }
 0x7f9   :  { %16806 = vmatpush1.bf16.msra.mxu0 %v23695_v13  ;;  %16549 = vmatprep.subr.bf16.mxu1 %v23700_v24  ;;  %v23743_v13 = vld [vmem:[#allocation2 + $0x1bd0] ss:$72 sps:$4 sm:$0xff]   ;;  %v23748_v24 = vld [vmem:[#allocation2 + $0x2e5c] ss:$72 sps:$4 sm:$0xff]  }
 0x7fa   :  { %16807 = vmatprep.subr.bf16.mxu0 %v23703_v14  ;;  %v23751_v14 = vld [vmem:[#allocation2 + $0x1c64] ss:$72 sps:$4 sm:$0xff]  }
 0x7fc   :  { %16550 = vmatpush1.bf16.msra.mxu1 %v23698_v26  ;;  %v23746_v26 = vld [vmem:[#allocation2 + $0x2e58] ss:$72 sps:$4 sm:$0xff]  }
 0x7fd   :  { %16808 = vmatpush1.bf16.msra.mxu0 %v23701_v15  ;;  %16551 = vmatprep.subr.bf16.mxu1 %v23706_v6  ;;  %v23749_v15 = vld [vmem:[#allocation2 + $0x1c60] ss:$72 sps:$4 sm:$0xff]   ;;  %v23754_v6 = vld [vmem:[#allocation2 + $0x2eec] ss:$72 sps:$4 sm:$0xff]  }
 0x7fe   :  { %16809 = vmatprep.subr.bf16.mxu0 %v23709_v22  ;;  %v23752_v22 = vld [vmem:[#allocation2 + $0x2ee8] ss:$72 sps:$4 sm:$0xff]  }
 0x800   :  { %16552 = vmatpush1.bf16.msra.mxu1 %v23704_v2  ;;  %v23755_v2 = vld [vmem:[#allocation2 + $0x1cf0] ss:$72 sps:$4 sm:$0xff]  }
 0x801   :  { %16810 = vmatpush1.bf16.msra.mxu0 %v23707_v32  ;;  %16553 = vmatprep.subr.bf16.mxu1 %v23712_v16  ;;  %v23760_v32 = vld [vmem:[#allocation2 + $0x2f7c] ss:$72 sps:$4 sm:$0xff]  }
 0x802   :  { %16811 = vmatprep.subr.bf16.mxu0 %v23715_v36  ;;  %v23763_v16 = vld [vmem:[#allocation2 + $0x1d84] ss:$72 sps:$4 sm:$0xff]   ;;  %v23758_v36 = vld [vmem:[#allocation2 + $0x2f78] ss:$72 sps:$4 sm:$0xff]  }
 0x804   :  { %16554 = vmatpush1.bf16.msra.mxu1 %v23710_v18  ;;  %v23766_v18 = vld [vmem:[#allocation2 + $0x300c] ss:$72 sps:$4 sm:$0xff]  }
 0x805   :  { %16812 = vmatpush1.bf16.msra.mxu0 %v23713_v33  ;;  %16555 = vmatprep.subr.bf16.mxu1 %v23718_v37  ;;  %v23769_v33 = vld [vmem:[#allocation2 + $0x1e14] ss:$72 sps:$4 sm:$0xff]   ;;  %v23764_v37 = vld [vmem:[#allocation2 + $0x3008] ss:$72 sps:$4 sm:$0xff]  }
 0x806   :  { %16813 = vmatprep.subr.bf16.mxu0 %v23721_v38  ;;  %v23767_v38 = vld [vmem:[#allocation2 + $0x1e10] ss:$72 sps:$4 sm:$0xff]  }
 0x808   :  { %16556 = vmatpush1.bf16.msra.mxu1 %v23716_v41  ;;  %v23772_v41 = vld [vmem:[#allocation2 + $0x309c] ss:$72 sps:$4 sm:$0xff]  }
 0x809   :  { %16814 = vmatpush1.bf16.msra.mxu0 %v23719_v42  ;;  %16557 = vmatprep.subr.bf16.mxu1 %v23724_v8  ;;  %v23775_v42 = vld [vmem:[#allocation2 + $0x1ea4] ss:$72 sps:$4 sm:$0xff]  }
 0x80a   :  { %16815 = vmatprep.subr.bf16.mxu0 %v23727_v48  ;;  %v17048_v48 = vmul.f32 %v24459_v62, %v24459_v62  ;;  %v23778_v62 = vld [vmem:[#allocation2 + $0x312c] ss:$72 sps:$4 sm:$0xff]  }
 0x80c   :  { %16558 = vmatpush1.bf16.msra.mxu1 %v23722_v59 }
 0x80d   :  { %16816 = vmatpush1.bf16.msra.mxu0 %v23725_v50  ;;  %16559 = vmatprep.subr.bf16.mxu1 %v23730_v9  ;;  %v17049_v9 = vmul.f32 %v24473_v17, %v24473_v17  ;;  %v17058_v17 = vmul.f32 %v24477_v21, %v24477_v21 }
 0x80e   :  { %16817 = vmatprep.subr.bf16.mxu0 %v23733_v30 }
 0x810   :  { %16560 = vmatpush1.bf16.msra.mxu1 %v23728_v10 }
 0x811   :  { %16818 = vmatpush1.bf16.msra.mxu0 %v23731_v31  ;;  %16572 = vmatprep.subr.bf16.mxu1 %v23736_v52  ;;  %v23770_v31 = vld [vmem:[#allocation2 + $0x3098] ss:$72 sps:$4 sm:$0xff]  }
 0x812   :  { %16830 = vmatprep.subr.bf16.mxu0 %v23739_v60  ;;  %v23773_v52 = vld [vmem:[#allocation2 + $0x1ea0] ss:$72 sps:$4 sm:$0xff]   ;;  %v17057_v60 = vmul.f32 %v24463_v3, %v24463_v3 }
 0x813   :  { %16562 = vmatmul.mubr.bf16.vlgmr.msra.gmra.mrb[16].mxu1 %v24311_v23  ;;  %v23776_v3 = vld [vmem:[#allocation2 + $0x3128] ss:$72 sps:$4 sm:$0xff]  }
 0x814   :  { %16820 = vmatmul.mubr.bf16.vlgmr.msra.gmra.mrb[16].mxu0 %v24352_v45  ;;  %16573 = vmatpush1.bf16.msra.mxu1 %v23734_v4  ;;  %v23757_v45 = vld [vmem:[#allocation2 + $0x1cf4] ss:$72 sps:$4 sm:$0xff]  }
 0x815   :  { %16831 = vmatpush1.bf16.msra.mxu0 %v23737_v40  ;;  %16574 = vmatprep.subr.bf16.mxu1 %v23742_v47 }
 0x816   :  { %16832 = vmatprep.subr.bf16.mxu0 %v23745_v7  ;;  %16604 = vmatprep.mubr.bf16.mxu1 %v24341_v34  ;;  %v23781_v7 = vld [vmem:[#allocation2 + $0x1f34] ss:$72 sps:$4 sm:$0xff]  }
 0x817   :  { %16862 = vmatprep.mubr.bf16.mxu0 %v24266_v55  ;;  %v23761_v55 = vld [vmem:[#allocation2 + $0x1d80] ss:$72 sps:$4 sm:$0xff]  }
 0x818   :  { %16575 = vmatpush1.bf16.msra.mxu1 %v23740_v12 }
 0x819   :  { %16833 = vmatpush1.bf16.msra.mxu0 %v23743_v13  ;;  %16576 = vmatprep.subr.bf16.mxu1 %v23748_v24 }
 0x81a   :  { %16834 = vmatprep.subr.bf16.mxu0 %v23751_v14 }
 0x81c   :  { %16577 = vmatpush1.bf16.msra.mxu1 %v23746_v26  ;;  %v23779_v26 = vld [vmem:[#allocation2 + $0x1f30] ss:$72 sps:$4 sm:$0xff]  }
 0x81d   :  { %16835 = vmatpush1.bf16.msra.mxu0 %v23749_v15  ;;  %16578 = vmatprep.subr.bf16.mxu1 %v23754_v6  ;;  %v23784_v15 = vld [vmem:[#allocation2 + $0x31bc] ss:$72 sps:$4 sm:$0xff]  }
 0x81e   :  { %16836 = vmatprep.subr.bf16.mxu0 %v23757_v45  ;;  %v23787_v6 = vld [vmem:[#allocation2 + $0x1fc4] ss:$72 sps:$4 sm:$0xff]  }
 0x820   :  { %16579 = vmatpush1.bf16.msra.mxu1 %v23752_v22  ;;  %v23782_v22 = vld [vmem:[#allocation2 + $0x31b8] ss:$72 sps:$4 sm:$0xff]  }
 0x821   :  { %16837 = vmatpush1.bf16.msra.mxu0 %v23755_v2  ;;  %16580 = vmatprep.subr.bf16.mxu1 %v23760_v32  ;;  %v23785_v2 = vld [vmem:[#allocation2 + $0x1fc0] ss:$72 sps:$4 sm:$0xff]   ;;  %v23790_v32 = vld [vmem:[#allocation2 + $0x324c] ss:$72 sps:$4 sm:$0xff]  }
 0x822   :  { %16838 = vmatprep.subr.bf16.mxu0 %v23763_v16  ;;  %v23793_v16 = vld [vmem:[#allocation2 + $0x2054] ss:$72 sps:$4 sm:$0xff]  }
 0x824   :  { %16581 = vmatpush1.bf16.msra.mxu1 %v23758_v36  ;;  %v23788_v36 = vld [vmem:[#allocation2 + $0x3248] ss:$72 sps:$4 sm:$0xff]  }
 0x825   :  { %16839 = vmatpush1.bf16.msra.mxu0 %v23761_v55  ;;  %16582 = vmatprep.subr.bf16.mxu1 %v23766_v18  ;;  %v23791_v55 = vld [vmem:[#allocation2 + $0x2050] ss:$72 sps:$4 sm:$0xff]   ;;  %v23796_v18 = vld [vmem:[#allocation2 + $0x32dc] ss:$72 sps:$4 sm:$0xff]  }
 0x826   :  { %16840 = vmatprep.subr.bf16.mxu0 %v23769_v33  ;;  %v23799_v33 = vld [vmem:[#allocation2 + $0x20e4] ss:$72 sps:$4 sm:$0xff]  }
 0x827   :  { %v16348_v8 = vpop.f32.mrb[12].mxu0 }
 0x828   :  { %v17066_v59 = vmul.f32 %v16348_v8, %v16348_v8  ;;  %v16350_v50 = vpop.f32.mrb[13].mxu0  ;;  %16583 = vmatpush1.bf16.msra.mxu1 %v23764_v37  ;;  %v23794_v37 = vld [vmem:[#allocation2 + $0x32d8] ss:$72 sps:$4 sm:$0xff]   ;;  %v23800_v8 = vld [vmem:[#allocation2 + $0x3368] ss:$72 sps:$4 sm:$0xff]  }
 0x829   :  { %v17067_v30 = vmul.f32 %v16350_v50, %v16350_v50  ;;  %v16352_v10 = vpop.f32.mrb[14].mxu0  ;;  %16841 = vmatpush1.bf16.msra.mxu0 %v23767_v38  ;;  %16584 = vmatprep.subr.bf16.mxu1 %v23772_v41  ;;  %v23797_v38 = vld [vmem:[#allocation2 + $0x20e0] ss:$72 sps:$4 sm:$0xff]   ;;  %v23802_v41 = vld [vmem:[#allocation2 + $0x336c] ss:$72 sps:$4 sm:$0xff]  }
 0x82a   :  { %v24593_v4 = vadd.f32 %v17066_v59, %v17048_v48  ;;  %v17075_v40 = vmul.f32 %v16352_v10, %v16352_v10  ;;  %v16354_v47 = vpop.f32.mrb[15].mxu0  ;;  %16842 = vmatprep.subr.bf16.mxu0 %v23775_v42  ;;  %v23805_v42 = vld [vmem:[#allocation2 + $0x2174] ss:$72 sps:$4 sm:$0xff]   ;;  %v23803_v48 = vld [vmem:[#allocation2 + $0x2170] ss:$72 sps:$4 sm:$0xff]  }
 0x82b   :  { %v24597_v12 = vadd.f32 %v17067_v30, %v17049_v9  ;;  %v17076_v13 = vmul.f32 %v16354_v47, %v16354_v47  ;;  %v23808_v59 = vld [vmem:[#allocation2 + $0x33fc] ss:$72 sps:$4 sm:$0xff]   ;;  %v23806_v9 = vld [vmem:[#allocation2 + $0x33f8] ss:$72 sps:$4 sm:$0xff]   ;;  %v23814_v10 = vld [vmem:[#allocation2 + $0x348c] ss:$72 sps:$4 sm:$0xff]  }
 0x82c   :  { %v24599_v24 = vadd.f32 %v17075_v40, %v17057_v60  ;;  %16585 = vmatpush1.bf16.msra.mxu1 %v23770_v31  ;;  %v23811_v50 = vld [vmem:[#allocation2 + $0x2204] ss:$72 sps:$4 sm:$0xff]   ;;  %v23809_v30 = vld [vmem:[#allocation2 + $0x2200] ss:$72 sps:$4 sm:$0xff]   ;;  %v23817_v31 = vld [vmem:[#allocation2 + $0x2294] ss:$72 sps:$4 sm:$0xff]  }
 0x82d   :  { %v24601_v14 = vadd.f32 %v17076_v13, %v17058_v17  ;;  %16843 = vmatpush1.bf16.msra.mxu0 %v23773_v52  ;;  %16586 = vmatprep.subr.bf16.mxu1 %v23778_v62  ;;  %v23812_v52 = vld [vmem:[#allocation2 + $0x3488] ss:$72 sps:$4 sm:$0xff]   ;;  %v23820_v40 = vld [vmem:[#allocation2 + $0x351c] ss:$72 sps:$4 sm:$0xff]   ;;  %v23818_v62 = vld [vmem:[#allocation2 + $0x3518] ss:$72 sps:$4 sm:$0xff]  }
 0x82e   :  { %16844 = vmatprep.subr.bf16.mxu0 %v23781_v7  ;;  %v17102_v45 = vpack.c.bf16 %v24599_v24, %v24593_v4  ;;  %v23815_v60 = vld [vmem:[#allocation2 + $0x2290] ss:$72 sps:$4 sm:$0xff]   ;;  %v23823_v47 = vld [vmem:[#allocation2 + $0x2324] ss:$72 sps:$4 sm:$0xff]   ;;  %v23821_v7 = vld [vmem:[#allocation2 + $0x2320] ss:$72 sps:$4 sm:$0xff]  }
 0x82f   :  { %v17103_v21 = vpack.c.bf16 %v24601_v14, %v24597_v12  ;;  %v23826_v17 = vld [vmem:[#allocation2 + $0x35ac] ss:$72 sps:$4 sm:$0xff]   ;;  %v24080_v4 = vld [vmem:[%s24885_s2 + $0xd8] sm:$0xff]  }
 0x830   :  { %16587 = vmatpush1.bf16.msra.mxu1 %v23776_v3  ;;  %v23829_v13 = vld [vmem:[#allocation2 + $0x23b4] ss:$72 sps:$4 sm:$0xff]   ;;  %v23824_v3 = vld [vmem:[#allocation2 + $0x35a8] ss:$72 sps:$4 sm:$0xff]  }
 0x831   :  { %16845 = vmatpush1.bf16.msra.mxu0 %v23779_v26  ;;  %16588 = vmatprep.subr.bf16.mxu1 %v23784_v15  ;;  %v23827_v26 = vld [vmem:[#allocation2 + $0x23b0] ss:$72 sps:$4 sm:$0xff]   ;;  %v23832_v15 = vld [vmem:[#allocation2 + $0x363c] ss:$72 sps:$4 sm:$0xff]  }
 0x832   :  { %16846 = vmatprep.subr.bf16.mxu0 %v23787_v6  ;;  %v23835_v6 = vld [vmem:[#allocation2 + $0x2444] ss:$72 sps:$4 sm:$0xff]   ;;  %v24077_v24 = vld [vmem:[#allocation2 + $0x3c70] ss:$72 sps:$4 sm:$0xff]  }
 0x833   :  { %v24172_v12 = vld [vmem:[%s24885_s2 + $0x1d8] sm:$0xff]  }
 0x834   :  { %16589 = vmatpush1.bf16.msra.mxu1 %v23782_v22  ;;  %v23830_v22 = vld [vmem:[#allocation2 + $0x3638] ss:$72 sps:$4 sm:$0xff]  }
 0x835   :  { %16847 = vmatpush1.bf16.msra.mxu0 %v23785_v2  ;;  %16590 = vmatprep.subr.bf16.mxu1 %v23790_v32  ;;  %v23833_v2 = vld [vmem:[#allocation2 + $0x2440] ss:$72 sps:$4 sm:$0xff]   ;;  %v23838_v32 = vld [vmem:[#allocation2 + $0x36cc] ss:$72 sps:$4 sm:$0xff]   ;;  %v24173_v14 = vld [vmem:[%s24885_s2 + $0x198] sm:$0xff]  }
 0x836   :  { %16848 = vmatprep.subr.bf16.mxu0 %v23793_v16  ;;  %v23841_v16 = vld [vmem:[#allocation2 + $0x24d4] ss:$72 sps:$4 sm:$0xff]  }
 0x838   :  { %16591 = vmatpush1.bf16.msra.mxu1 %v23788_v36  ;;  %v23836_v36 = vld [vmem:[#allocation2 + $0x36c8] ss:$72 sps:$4 sm:$0xff]  }
 0x839   :  { %16849 = vmatpush1.bf16.msra.mxu0 %v23791_v55  ;;  %16592 = vmatprep.subr.bf16.mxu1 %v23796_v18  ;;  %v23839_v55 = vld [vmem:[#allocation2 + $0x24d0] ss:$72 sps:$4 sm:$0xff]   ;;  %v23844_v18 = vld [vmem:[#allocation2 + $0x375c] ss:$72 sps:$4 sm:$0xff]  }
 0x83a   :  { %16850 = vmatprep.subr.bf16.mxu0 %v23799_v33  ;;  %v23847_v33 = vld [vmem:[#allocation2 + $0x2564] ss:$72 sps:$4 sm:$0xff]  }
 0x83c   :  { %16593 = vmatpush1.bf16.msra.mxu1 %v23794_v37  ;;  %v23842_v37 = vld [vmem:[#allocation2 + $0x3758] ss:$72 sps:$4 sm:$0xff]  }
 0x83d   :  { %16851 = vmatpush1.bf16.msra.mxu0 %v23797_v38  ;;  %16594 = vmatprep.subr.bf16.mxu1 %v23802_v41  ;;  %v23845_v38 = vld [vmem:[#allocation2 + $0x2560] ss:$72 sps:$4 sm:$0xff]   ;;  %v23850_v41 = vld [vmem:[#allocation2 + $0x37ec] ss:$72 sps:$4 sm:$0xff]  }
 0x83e   :  { %16852 = vmatprep.subr.bf16.mxu0 %v23805_v42  ;;  %v23848_v42 = vld [vmem:[#allocation2 + $0x37e8] ss:$72 sps:$4 sm:$0xff]  }
 0x840   :  { %16595 = vmatpush1.bf16.msra.mxu1 %v23800_v8  ;;  %v23851_v8 = vld [vmem:[#allocation2 + $0x25f0] ss:$72 sps:$4 sm:$0xff]  }
 0x841   :  { %16853 = vmatpush1.bf16.msra.mxu0 %v23803_v48  ;;  %16596 = vmatprep.subr.bf16.mxu1 %v23808_v59  ;;  %v23856_v48 = vld [vmem:[#allocation2 + $0x387c] ss:$72 sps:$4 sm:$0xff]  }
 0x842   :  { %16854 = vmatprep.subr.bf16.mxu0 %v23811_v50  ;;  %v23859_v59 = vld [vmem:[#allocation2 + $0x2684] ss:$72 sps:$4 sm:$0xff]   ;;  %v23854_v50 = vld [vmem:[#allocation2 + $0x3878] ss:$72 sps:$4 sm:$0xff]  }
 0x844   :  { %16597 = vmatpush1.bf16.msra.mxu1 %v23806_v9  ;;  %v23862_v9 = vld [vmem:[#allocation2 + $0x390c] ss:$72 sps:$4 sm:$0xff]  }
 0x845   :  { %16855 = vmatpush1.bf16.msra.mxu0 %v23809_v30  ;;  %16598 = vmatprep.subr.bf16.mxu1 %v23814_v10  ;;  %v23865_v30 = vld [vmem:[#allocation2 + $0x2714] ss:$72 sps:$4 sm:$0xff]   ;;  %v23860_v10 = vld [vmem:[#allocation2 + $0x3908] ss:$72 sps:$4 sm:$0xff]  }
 0x846   :  { %16856 = vmatprep.subr.bf16.mxu0 %v23817_v31  ;;  %v23863_v31 = vld [vmem:[#allocation2 + $0x2710] ss:$72 sps:$4 sm:$0xff]  }
 0x848   :  { %16599 = vmatpush1.bf16.msra.mxu1 %v23812_v52  ;;  %v23868_v52 = vld [vmem:[#allocation2 + $0x399c] ss:$72 sps:$4 sm:$0xff]  }
 0x849   :  { %16857 = vmatpush1.bf16.msra.mxu0 %v23815_v60  ;;  %16600 = vmatprep.subr.bf16.mxu1 %v23820_v40  ;;  %v23871_v60 = vld [vmem:[#allocation2 + $0x27a4] ss:$72 sps:$4 sm:$0xff]   ;;  %v23866_v40 = vld [vmem:[#allocation2 + $0x3998] ss:$72 sps:$4 sm:$0xff]  }
 0x84a   :  { %16858 = vmatprep.subr.bf16.mxu0 %v23823_v47  ;;  %v23869_v47 = vld [vmem:[#allocation2 + $0x27a0] ss:$72 sps:$4 sm:$0xff]  }
 0x84c   :  { %16601 = vmatpush1.bf16.msra.mxu1 %v23818_v62  ;;  %v23874_v62 = vld [vmem:[#allocation2 + $0x3a2c] ss:$72 sps:$4 sm:$0xff]  }
 0x84d   :  { %16859 = vmatpush1.bf16.msra.mxu0 %v23821_v7  ;;  %16602 = vmatprep.subr.bf16.mxu1 %v23826_v17  ;;  %v23877_v7 = vld [vmem:[#allocation2 + $0x2834] ss:$72 sps:$4 sm:$0xff]   ;;  %v23872_v17 = vld [vmem:[#allocation2 + $0x3a28] ss:$72 sps:$4 sm:$0xff]  }
 0x84e   :  { %16860 = vmatprep.subr.bf16.mxu0 %v23829_v13  ;;  %v23875_v13 = vld [vmem:[#allocation2 + $0x2830] ss:$72 sps:$4 sm:$0xff]  }
 0x850   :  { %16603 = vmatpush1.bf16.msra.mxu1 %v23824_v3  ;;  %v23880_v3 = vld [vmem:[#allocation2 + $0x3abc] ss:$72 sps:$4 sm:$0xff]  }
 0x851   :  { %16861 = vmatpush1.bf16.msra.mxu0 %v23827_v26  ;;  %16615 = vmatprep.subr.bf16.mxu1 %v23832_v15  ;;  %v23883_v26 = vld [vmem:[#allocation2 + $0x28c4] ss:$72 sps:$4 sm:$0xff]   ;;  %v23878_v15 = vld [vmem:[#allocation2 + $0x3ab8] ss:$72 sps:$4 sm:$0xff]  }
 0x852   :  { %16873 = vmatprep.subr.bf16.mxu0 %v23835_v6  ;;  %v23881_v6 = vld [vmem:[#allocation2 + $0x28c0] ss:$72 sps:$4 sm:$0xff]  }
 0x853   :  { %16605 = vmatmul.mubr.bf16.vlgmr.msra.gmra.mrb[16].mxu1 %v24356_v46 }
 0x854   :  { %16863 = vmatmul.mubr.bf16.vlgmr.msra.gmra.mrb[16].mxu0 %v24271_v11  ;;  %16616 = vmatpush1.bf16.msra.mxu1 %v23830_v22  ;;  %v23853_v11 = vld [vmem:[#allocation2 + $0x25f4] ss:$72 sps:$4 sm:$0xff]  }
 0x855   :  { %16874 = vmatpush1.bf16.msra.mxu0 %v23833_v2  ;;  %16617 = vmatprep.subr.bf16.mxu1 %v23838_v32  ;;  %v23886_v22 = vld [vmem:[#allocation2 + $0x3b4c] ss:$72 sps:$4 sm:$0xff]   ;;  %v23884_v32 = vld [vmem:[#allocation2 + $0x3b48] ss:$72 sps:$4 sm:$0xff]  }
 0x856   :  { %16875 = vmatprep.subr.bf16.mxu0 %v23841_v16  ;;  %16647 = vmatprep.mubr.bf16.mxu1 %v24365_v28  ;;  %v23889_v2 = vld [vmem:[#allocation2 + $0x2954] ss:$72 sps:$4 sm:$0xff]   ;;  %v23887_v16 = vld [vmem:[#allocation2 + $0x2950] ss:$72 sps:$4 sm:$0xff]  }
 0x857   :  { %16905 = vmatprep.mubr.bf16.mxu0 %v24302_v43  ;;  %v23857_v43 = vld [vmem:[#allocation2 + $0x2680] ss:$72 sps:$4 sm:$0xff]  }
 0x858   :  { %16618 = vmatpush1.bf16.msra.mxu1 %v23836_v36  ;;  %v23892_v36 = vld [vmem:[#allocation2 + $0x3bdc] ss:$72 sps:$4 sm:$0xff]  }
 0x859   :  { %16876 = vmatpush1.bf16.msra.mxu0 %v23839_v55  ;;  %16619 = vmatprep.subr.bf16.mxu1 %v23844_v18  ;;  %v23895_v55 = vld [vmem:[#allocation2 + $0x29e4] ss:$72 sps:$4 sm:$0xff]   ;;  %v23890_v18 = vld [vmem:[#allocation2 + $0x3bd8] ss:$72 sps:$4 sm:$0xff]  }
 0x85a   :  { %16877 = vmatprep.subr.bf16.mxu0 %v23847_v33  ;;  %v23893_v33 = vld [vmem:[#allocation2 + $0x29e0] ss:$72 sps:$4 sm:$0xff]  }
 0x85c   :  { %16620 = vmatpush1.bf16.msra.mxu1 %v23842_v37  ;;  %v23898_v37 = vld [vmem:[#allocation2 + $0x3c6c] ss:$72 sps:$4 sm:$0xff]  }
 0x85d   :  { %16878 = vmatpush1.bf16.msra.mxu0 %v23845_v38  ;;  %16621 = vmatprep.subr.bf16.mxu1 %v23850_v41  ;;  %v23901_v38 = vld [vmem:[#allocation2 + $0x2a74] ss:$72 sps:$4 sm:$0xff]   ;;  %v23896_v41 = vld [vmem:[#allocation2 + $0x3c68] ss:$72 sps:$4 sm:$0xff]  }
 0x85e   :  { %16879 = vmatprep.subr.bf16.mxu0 %v23853_v11  ;;  %v23899_v11 = vld [vmem:[#allocation2 + $0x2a70] ss:$72 sps:$4 sm:$0xff]  }
 0x860   :  { %16622 = vmatpush1.bf16.msra.mxu1 %v23848_v42  ;;  %v23904_v42 = vld [vmem:[#allocation2 + $0x3cfc] ss:$72 sps:$4 sm:$0xff]  }
 0x861   :  { %16880 = vmatpush1.bf16.msra.mxu0 %v23851_v8  ;;  %16623 = vmatprep.subr.bf16.mxu1 %v23856_v48  ;;  %v23907_v8 = vld [vmem:[#allocation2 + $0x2b04] ss:$72 sps:$4 sm:$0xff]   ;;  %v23902_v48 = vld [vmem:[#allocation2 + $0x3cf8] ss:$72 sps:$4 sm:$0xff]  }
 0x862   :  { %16881 = vmatprep.subr.bf16.mxu0 %v23859_v59  ;;  %v23905_v59 = vld [vmem:[#allocation2 + $0x2b00] ss:$72 sps:$4 sm:$0xff]  }
 0x864   :  { %16624 = vmatpush1.bf16.msra.mxu1 %v23854_v50  ;;  %v23910_v50 = vld [vmem:[#allocation2 + $0x3d8c] ss:$72 sps:$4 sm:$0xff]  }
 0x865   :  { %16882 = vmatpush1.bf16.msra.mxu0 %v23857_v43  ;;  %16625 = vmatprep.subr.bf16.mxu1 %v23862_v9  ;;  %v23913_v43 = vld [vmem:[#allocation2 + $0x2b94] ss:$72 sps:$4 sm:$0xff]   ;;  %v23908_v9 = vld [vmem:[#allocation2 + $0x3d88] ss:$72 sps:$4 sm:$0xff]  }
 0x866   :  { %16883 = vmatprep.subr.bf16.mxu0 %v23865_v30  ;;  %v23911_v30 = vld [vmem:[#allocation2 + $0x2b90] ss:$72 sps:$4 sm:$0xff]  }
 0x868   :  { %16626 = vmatpush1.bf16.msra.mxu1 %v23860_v10  ;;  %v23916_v10 = vld [vmem:[#allocation2 + $0x3e1c] ss:$72 sps:$4 sm:$0xff]  }
 0x869   :  { %16884 = vmatpush1.bf16.msra.mxu0 %v23863_v31  ;;  %16627 = vmatprep.subr.bf16.mxu1 %v23868_v52  ;;  %v23919_v31 = vld [vmem:[#allocation2 + $0x2c24] ss:$72 sps:$4 sm:$0xff]   ;;  %v23914_v52 = vld [vmem:[#allocation2 + $0x3e18] ss:$72 sps:$4 sm:$0xff]  }
 0x86a   :  { %16885 = vmatprep.subr.bf16.mxu0 %v23871_v60  ;;  %v23917_v60 = vld [vmem:[#allocation2 + $0x2c20] ss:$72 sps:$4 sm:$0xff]  }
 0x86c   :  { %16628 = vmatpush1.bf16.msra.mxu1 %v23866_v40  ;;  %v23922_v40 = vld [vmem:[#allocation2 + $0x3eac] ss:$72 sps:$4 sm:$0xff]  }
 0x86d   :  { %16886 = vmatpush1.bf16.msra.mxu0 %v23869_v47  ;;  %16629 = vmatprep.subr.bf16.mxu1 %v23874_v62  ;;  %v23925_v47 = vld [vmem:[#allocation2 + $0x2cb4] ss:$72 sps:$4 sm:$0xff]   ;;  %v23920_v62 = vld [vmem:[#allocation2 + $0x3ea8] ss:$72 sps:$4 sm:$0xff]  }
 0x86e   :  { %16887 = vmatprep.subr.bf16.mxu0 %v23877_v7  ;;  %v23923_v7 = vld [vmem:[#allocation2 + $0x2cb0] ss:$72 sps:$4 sm:$0xff]  }
 0x870   :  { %16630 = vmatpush1.bf16.msra.mxu1 %v23872_v17  ;;  %v23928_v17 = vld [vmem:[#allocation2 + $0x3f3c] ss:$72 sps:$4 sm:$0xff]  }
 0x871   :  { %16888 = vmatpush1.bf16.msra.mxu0 %v23875_v13  ;;  %16631 = vmatprep.subr.bf16.mxu1 %v23880_v3  ;;  %v23931_v13 = vld [vmem:[#allocation2 + $0x2d44] ss:$72 sps:$4 sm:$0xff]   ;;  %v23926_v3 = vld [vmem:[#allocation2 + $0x3f38] ss:$72 sps:$4 sm:$0xff]  }
 0x872   :  { %16889 = vmatprep.subr.bf16.mxu0 %v23883_v26  ;;  %v23929_v26 = vld [vmem:[#allocation2 + $0x2d40] ss:$72 sps:$4 sm:$0xff]  }
 0x874   :  { %16632 = vmatpush1.bf16.msra.mxu1 %v23878_v15  ;;  %v23934_v15 = vld [vmem:[#allocation2 + $0x3fcc] ss:$72 sps:$4 sm:$0xff]  }
 0x875   :  { %16890 = vmatpush1.bf16.msra.mxu0 %v23881_v6  ;;  %16633 = vmatprep.subr.bf16.mxu1 %v23886_v22  ;;  %v23937_v6 = vld [vmem:[#allocation2 + $0x2dd4] ss:$72 sps:$4 sm:$0xff]   ;;  %v23932_v22 = vld [vmem:[#allocation2 + $0x3fc8] ss:$72 sps:$4 sm:$0xff]  }
 0x876   :  { %16891 = vmatprep.subr.bf16.mxu0 %v23889_v2  ;;  %v23935_v2 = vld [vmem:[#allocation2 + $0x2dd0] ss:$72 sps:$4 sm:$0xff]  }
 0x878   :  { %16634 = vmatpush1.bf16.msra.mxu1 %v23884_v32  ;;  %v23940_v32 = vld [vmem:[#allocation2 + $0x405c] ss:$72 sps:$4 sm:$0xff]  }
 0x879   :  { %16892 = vmatpush1.bf16.msra.mxu0 %v23887_v16  ;;  %16635 = vmatprep.subr.bf16.mxu1 %v23892_v36  ;;  %v23943_v16 = vld [vmem:[#allocation2 + $0x2e64] ss:$72 sps:$4 sm:$0xff]   ;;  %v23938_v36 = vld [vmem:[#allocation2 + $0x4058] ss:$72 sps:$4 sm:$0xff]  }
 0x87a   :  { %16893 = vmatprep.subr.bf16.mxu0 %v23895_v55  ;;  %v23941_v55 = vld [vmem:[#allocation2 + $0x2e60] ss:$72 sps:$4 sm:$0xff]  }
 0x87c   :  { %16636 = vmatpush1.bf16.msra.mxu1 %v23890_v18  ;;  %v23946_v18 = vld [vmem:[#allocation2 + $0x40ec] ss:$72 sps:$4 sm:$0xff]  }
 0x87d   :  { %16894 = vmatpush1.bf16.msra.mxu0 %v23893_v33  ;;  %16637 = vmatprep.subr.bf16.mxu1 %v23898_v37  ;;  %v23944_v33 = vld [vmem:[#allocation2 + $0x40e8] ss:$72 sps:$4 sm:$0xff]  }
 0x87e   :  { %16895 = vmatprep.subr.bf16.mxu0 %v23901_v38  ;;  %v23947_v37 = vld [vmem:[#allocation2 + $0x2ef0] ss:$72 sps:$4 sm:$0xff]   ;;  %v23952_v38 = vld [vmem:[#allocation2 + $0x417c] ss:$72 sps:$4 sm:$0xff]  }
 0x880   :  { %16638 = vmatpush1.bf16.msra.mxu1 %v23896_v41  ;;  %v23955_v41 = vld [vmem:[#allocation2 + $0x2f84] ss:$72 sps:$4 sm:$0xff]  }
 0x881   :  { %16896 = vmatpush1.bf16.msra.mxu0 %v23899_v11  ;;  %16639 = vmatprep.subr.bf16.mxu1 %v23904_v42  ;;  %v23950_v11 = vld [vmem:[#allocation2 + $0x4178] ss:$72 sps:$4 sm:$0xff]   ;;  %v23958_v42 = vld [vmem:[#allocation2 + $0x420c] ss:$72 sps:$4 sm:$0xff]  }
 0x882   :  { %16897 = vmatprep.subr.bf16.mxu0 %v23907_v8  ;;  %v23961_v8 = vld [vmem:[#allocation2 + $0x3014] ss:$72 sps:$4 sm:$0xff]  }
 0x884   :  { %16640 = vmatpush1.bf16.msra.mxu1 %v23902_v48  ;;  %v23956_v48 = vld [vmem:[#allocation2 + $0x4208] ss:$72 sps:$4 sm:$0xff]  }
 0x885   :  { %16898 = vmatpush1.bf16.msra.mxu0 %v23905_v59  ;;  %16641 = vmatprep.subr.bf16.mxu1 %v23910_v50  ;;  %v23959_v59 = vld [vmem:[#allocation2 + $0x3010] ss:$72 sps:$4 sm:$0xff]   ;;  %v23964_v50 = vld [vmem:[#allocation2 + $0x429c] ss:$72 sps:$4 sm:$0xff]  }
 0x886   :  { %16899 = vmatprep.subr.bf16.mxu0 %v23913_v43  ;;  %v23967_v43 = vld [vmem:[#allocation2 + $0x30a4] ss:$72 sps:$4 sm:$0xff]  }
 0x888   :  { %16642 = vmatpush1.bf16.msra.mxu1 %v23908_v9  ;;  %v23962_v9 = vld [vmem:[#allocation2 + $0x4298] ss:$72 sps:$4 sm:$0xff]  }
 0x889   :  { %16900 = vmatpush1.bf16.msra.mxu0 %v23911_v30  ;;  %16643 = vmatprep.subr.bf16.mxu1 %v23916_v10  ;;  %v23965_v30 = vld [vmem:[#allocation2 + $0x30a0] ss:$72 sps:$4 sm:$0xff]   ;;  %v23970_v10 = vld [vmem:[#allocation2 + $0x432c] ss:$72 sps:$4 sm:$0xff]  }
 0x88a   :  { %16901 = vmatprep.subr.bf16.mxu0 %v23919_v31  ;;  %v23973_v31 = vld [vmem:[#allocation2 + $0x3134] ss:$72 sps:$4 sm:$0xff]  }
 0x88c   :  { %16644 = vmatpush1.bf16.msra.mxu1 %v23914_v52  ;;  %v23968_v52 = vld [vmem:[#allocation2 + $0x4328] ss:$72 sps:$4 sm:$0xff]  }
 0x88d   :  { %16902 = vmatpush1.bf16.msra.mxu0 %v23917_v60  ;;  %16645 = vmatprep.subr.bf16.mxu1 %v23922_v40  ;;  %v23971_v60 = vld [vmem:[#allocation2 + $0x3130] ss:$72 sps:$4 sm:$0xff]   ;;  %v23976_v40 = vld [vmem:[#allocation2 + $0x43bc] ss:$72 sps:$4 sm:$0xff]  }
 0x88e   :  { %16903 = vmatprep.subr.bf16.mxu0 %v23925_v47  ;;  %v23979_v47 = vld [vmem:[#allocation2 + $0x31c4] ss:$72 sps:$4 sm:$0xff]  }
 0x890   :  { %16646 = vmatpush1.bf16.msra.mxu1 %v23920_v62  ;;  %v23974_v62 = vld [vmem:[#allocation2 + $0x43b8] ss:$72 sps:$4 sm:$0xff]  }
 0x891   :  { %16904 = vmatpush1.bf16.msra.mxu0 %v23923_v7  ;;  %16658 = vmatprep.subr.bf16.mxu1 %v23928_v17  ;;  %v23977_v7 = vld [vmem:[#allocation2 + $0x31c0] ss:$72 sps:$4 sm:$0xff]   ;;  %v23982_v17 = vld [vmem:[#allocation2 + $0x444c] ss:$72 sps:$4 sm:$0xff]  }
 0x892   :  { %16916 = vmatprep.subr.bf16.mxu0 %v23931_v13  ;;  %v23985_v13 = vld [vmem:[#allocation2 + $0x3254] ss:$72 sps:$4 sm:$0xff]  }
 0x893   :  { %16648 = vmatmul.mubr.bf16.vlgmr.msra.gmra.mrb[16].mxu1 %v24373_v0 }
 0x894   :  { %16906 = vmatmul.mubr.bf16.vlgmr.msra.gmra.mrb[16].mxu0 %v24311_v23  ;;  %16659 = vmatpush1.bf16.msra.mxu1 %v23926_v3  ;;  %v23949_v23 = vld [vmem:[#allocation2 + $0x2ef4] ss:$72 sps:$4 sm:$0xff]   ;;  %v23980_v3 = vld [vmem:[#allocation2 + $0x4448] ss:$72 sps:$4 sm:$0xff]  }
 0x895   :  { %16917 = vmatpush1.bf16.msra.mxu0 %v23929_v26  ;;  %16660 = vmatprep.subr.bf16.mxu1 %v23934_v15  ;;  %v23983_v26 = vld [vmem:[#allocation2 + $0x3250] ss:$72 sps:$4 sm:$0xff]   ;;  %v23988_v15 = vld [vmem:[#allocation2 + $0x44dc] ss:$72 sps:$4 sm:$0xff]  }
 0x896   :  { %16918 = vmatprep.subr.bf16.mxu0 %v23937_v6  ;;  %16690 = vmatprep.mubr.bf16.mxu1 %v24387_v44  ;;  %v23991_v6 = vld [vmem:[#allocation2 + $0x32e4] ss:$72 sps:$4 sm:$0xff]  }
 0x897   :  { %16948 = vmatprep.mubr.bf16.mxu0 %v24341_v34  ;;  %v23953_v34 = vld [vmem:[#allocation2 + $0x2f80] ss:$72 sps:$4 sm:$0xff]  }
 0x898   :  { %16661 = vmatpush1.bf16.msra.mxu1 %v23932_v22  ;;  %v23986_v22 = vld [vmem:[#allocation2 + $0x44d8] ss:$72 sps:$4 sm:$0xff]  }
 0x899   :  { %16919 = vmatpush1.bf16.msra.mxu0 %v23935_v2  ;;  %16662 = vmatprep.subr.bf16.mxu1 %v23940_v32  ;;  %v23989_v2 = vld [vmem:[#allocation2 + $0x32e0] ss:$72 sps:$4 sm:$0xff]   ;;  %v23994_v32 = vld [vmem:[#allocation2 + $0x456c] ss:$72 sps:$4 sm:$0xff]  }
 0x89a   :  { %16920 = vmatprep.subr.bf16.mxu0 %v23943_v16  ;;  %v23997_v16 = vld [vmem:[#allocation2 + $0x3374] ss:$72 sps:$4 sm:$0xff]  }
 0x89c   :  { %16663 = vmatpush1.bf16.msra.mxu1 %v23938_v36  ;;  %v23992_v36 = vld [vmem:[#allocation2 + $0x4568] ss:$72 sps:$4 sm:$0xff]  }
 0x89d   :  { %16921 = vmatpush1.bf16.msra.mxu0 %v23941_v55  ;;  %16664 = vmatprep.subr.bf16.mxu1 %v23946_v18  ;;  %v23995_v55 = vld [vmem:[#allocation2 + $0x3370] ss:$72 sps:$4 sm:$0xff]   ;;  %v24000_v18 = vld [vmem:[#allocation2 + $0x45fc] ss:$72 sps:$4 sm:$0xff]  }
 0x89e   :  { %16922 = vmatprep.subr.bf16.mxu0 %v23949_v23  ;;  %v24003_v23 = vld [vmem:[#allocation2 + $0x3404] ss:$72 sps:$4 sm:$0xff]  }
 0x8a0   :  { %16665 = vmatpush1.bf16.msra.mxu1 %v23944_v33  ;;  %v23998_v33 = vld [vmem:[#allocation2 + $0x45f8] ss:$72 sps:$4 sm:$0xff]  }
 0x8a1   :  { %16923 = vmatpush1.bf16.msra.mxu0 %v23947_v37  ;;  %16666 = vmatprep.subr.bf16.mxu1 %v23952_v38  ;;  %v24001_v37 = vld [vmem:[#allocation2 + $0x3400] ss:$72 sps:$4 sm:$0xff]   ;;  %v24006_v38 = vld [vmem:[#allocation2 + $0x468c] ss:$72 sps:$4 sm:$0xff]  }
 0x8a2   :  { %16924 = vmatprep.subr.bf16.mxu0 %v23955_v41  ;;  %v24009_v41 = vld [vmem:[#allocation2 + $0x3494] ss:$72 sps:$4 sm:$0xff]  }
 0x8a4   :  { %16667 = vmatpush1.bf16.msra.mxu1 %v23950_v11  ;;  %v24004_v11 = vld [vmem:[#allocation2 + $0x4688] ss:$72 sps:$4 sm:$0xff]  }
 0x8a5   :  { %16925 = vmatpush1.bf16.msra.mxu0 %v23953_v34  ;;  %16668 = vmatprep.subr.bf16.mxu1 %v23958_v42  ;;  %v24007_v34 = vld [vmem:[#allocation2 + $0x3490] ss:$72 sps:$4 sm:$0xff]   ;;  %v24012_v42 = vld [vmem:[#allocation2 + $0x471c] ss:$72 sps:$4 sm:$0xff]  }
 0x8a6   :  { %16926 = vmatprep.subr.bf16.mxu0 %v23961_v8  ;;  %v24015_v8 = vld [vmem:[#allocation2 + $0x3524] ss:$72 sps:$4 sm:$0xff]  }
 0x8a8   :  { %16669 = vmatpush1.bf16.msra.mxu1 %v23956_v48  ;;  %v24010_v48 = vld [vmem:[#allocation2 + $0x4718] ss:$72 sps:$4 sm:$0xff]  }
 0x8a9   :  { %16927 = vmatpush1.bf16.msra.mxu0 %v23959_v59  ;;  %16670 = vmatprep.subr.bf16.mxu1 %v23964_v50  ;;  %v24013_v59 = vld [vmem:[#allocation2 + $0x3520] ss:$72 sps:$4 sm:$0xff]   ;;  %v24018_v50 = vld [vmem:[#allocation2 + $0x47ac] ss:$72 sps:$4 sm:$0xff]  }
 0x8aa   :  { %16928 = vmatprep.subr.bf16.mxu0 %v23967_v43  ;;  %v24021_v43 = vld [vmem:[#allocation2 + $0x35b4] ss:$72 sps:$4 sm:$0xff]  }
 0x8ac   :  { %16671 = vmatpush1.bf16.msra.mxu1 %v23962_v9  ;;  %v24016_v9 = vld [vmem:[#allocation2 + $0x47a8] ss:$72 sps:$4 sm:$0xff]  }
 0x8ad   :  { %16929 = vmatpush1.bf16.msra.mxu0 %v23965_v30  ;;  %16672 = vmatprep.subr.bf16.mxu1 %v23970_v10  ;;  %v24019_v30 = vld [vmem:[#allocation2 + $0x35b0] ss:$72 sps:$4 sm:$0xff]   ;;  %v24024_v10 = vld [vmem:[#allocation2 + $0x3644] ss:$72 sps:$4 sm:$0xff]  }
 0x8ae   :  { %16930 = vmatprep.subr.bf16.mxu0 %v23973_v31  ;;  %v24025_v31 = vld [vmem:[%s24885_s2 + $0x40] sm:$0xff]  }
 0x8b0   :  { %16673 = vmatpush1.bf16.msra.mxu1 %v23968_v52  ;;  %v24022_v52 = vld [vmem:[#allocation2 + $0x3640] ss:$72 sps:$4 sm:$0xff]  }
 0x8b1   :  { %16931 = vmatpush1.bf16.msra.mxu0 %v23971_v60  ;;  %16674 = vmatprep.subr.bf16.mxu1 %v23976_v40  ;;  %v24026_v60 = vld [vmem:[%s24885_s2] sm:$0xff]   ;;  %v24029_v40 = vld [vmem:[#allocation2 + $0x36d4] ss:$72 sps:$4 sm:$0xff]  }
 0x8b2   :  { %16932 = vmatprep.subr.bf16.mxu0 %v23979_v47  ;;  %v24030_v47 = vld [vmem:[%s24885_s2 + $0x48] sm:$0xff]  }
 0x8b4   :  { %16675 = vmatpush1.bf16.msra.mxu1 %v23974_v62  ;;  %v24027_v62 = vld [vmem:[#allocation2 + $0x36d0] ss:$72 sps:$4 sm:$0xff]  }
 0x8b5   :  { %16933 = vmatpush1.bf16.msra.mxu0 %v23977_v7  ;;  %16676 = vmatprep.subr.bf16.mxu1 %v23982_v17  ;;  %v24031_v7 = vld [vmem:[%s24885_s2 + $0x8] sm:$0xff]  }
 0x8b6   :  { %16934 = vmatprep.subr.bf16.mxu0 %v23985_v13  ;;  %v24034_v17 = vld [vmem:[#allocation2 + $0x3764] ss:$72 sps:$4 sm:$0xff]   ;;  %v24035_v13 = vld [vmem:[%s24885_s2 + $0x50] sm:$0xff]  }
 0x8b8   :  { %16677 = vmatpush1.bf16.msra.mxu1 %v23980_v3  ;;  %v24036_v3 = vld [vmem:[%s24885_s2 + $0x10] sm:$0xff]  }
 0x8b9   :  { %16935 = vmatpush1.bf16.msra.mxu0 %v23983_v26  ;;  %16678 = vmatprep.subr.bf16.mxu1 %v23988_v15  ;;  %v24044_v26 = vld [vmem:[#allocation2 + $0x3884] ss:$72 sps:$4 sm:$0xff]  }
 0x8ba   :  { %16936 = vmatprep.subr.bf16.mxu0 %v23991_v6  ;;  %v24045_v15 = vld [vmem:[%s24885_s2 + $0x60] sm:$0xff]  }
 0x8bb   :  { %v24042_v6 = vld [vmem:[#allocation2 + $0x3880] ss:$72 sps:$4 sm:$0xff]  }
 0x8bc   :  { %16679 = vmatpush1.bf16.msra.mxu1 %v23986_v22  ;;  %v24046_v22 = vld [vmem:[%s24885_s2 + $0x20] sm:$0xff]  }
 0x8bd   :  { %16937 = vmatpush1.bf16.msra.mxu0 %v23989_v2  ;;  %16680 = vmatprep.subr.bf16.mxu1 %v23994_v32  ;;  %v24049_v2 = vld [vmem:[#allocation2 + $0x3914] ss:$72 sps:$4 sm:$0xff]   ;;  %v24050_v32 = vld [vmem:[%s24885_s2 + $0x68] sm:$0xff]  }
 0x8be   :  { %16938 = vmatprep.subr.bf16.mxu0 %v23997_v16  ;;  %v24047_v16 = vld [vmem:[#allocation2 + $0x3910] ss:$72 sps:$4 sm:$0xff]  }
 0x8c0   :  { %16681 = vmatpush1.bf16.msra.mxu1 %v23992_v36  ;;  %v24051_v36 = vld [vmem:[%s24885_s2 + $0x28] sm:$0xff]  }
 0x8c1   :  { %16939 = vmatpush1.bf16.msra.mxu0 %v23995_v55  ;;  %16682 = vmatprep.subr.bf16.mxu1 %v24000_v18  ;;  %v24054_v55 = vld [vmem:[#allocation2 + $0x39a4] ss:$72 sps:$4 sm:$0xff]   ;;  %v24055_v18 = vld [vmem:[%s24885_s2 + $0x70] sm:$0xff]  }
 0x8c2   :  { %16940 = vmatprep.subr.bf16.mxu0 %v24003_v23  ;;  %v24052_v23 = vld [vmem:[#allocation2 + $0x39a0] ss:$72 sps:$4 sm:$0xff]  }
 0x8c4   :  { %16683 = vmatpush1.bf16.msra.mxu1 %v23998_v33  ;;  %v24056_v33 = vld [vmem:[%s24885_s2 + $0x30] sm:$0xff]  }
 0x8c5   :  { %16941 = vmatpush1.bf16.msra.mxu0 %v24001_v37  ;;  %16684 = vmatprep.subr.bf16.mxu1 %v24006_v38  ;;  %v24059_v37 = vld [vmem:[#allocation2 + $0x3a34] ss:$72 sps:$4 sm:$0xff]  }
 0x8c6   :  { %16942 = vmatprep.subr.bf16.mxu0 %v24009_v41  ;;  %v24060_v38 = vld [vmem:[%s24885_s2 + $0x78] sm:$0xff]  }
 0x8c7   :  { %v24057_v41 = vld [vmem:[#allocation2 + $0x3a30] ss:$72 sps:$4 sm:$0xff]  }
 0x8c8   :  { %16685 = vmatpush1.bf16.msra.mxu1 %v24004_v11  ;;  %v24061_v11 = vld [vmem:[%s24885_s2 + $0x38] sm:$0xff]  }
 0x8c9   :  { %16943 = vmatpush1.bf16.msra.mxu0 %v24007_v34  ;;  %16686 = vmatprep.subr.bf16.mxu1 %v24012_v42  ;;  %v24064_v34 = vld [vmem:[#allocation2 + $0x3ac4] ss:$72 sps:$4 sm:$0xff]  }
 0x8ca   :  { %16944 = vmatprep.subr.bf16.mxu0 %v24015_v8  ;;  %v24065_v42 = vld [vmem:[%s24885_s2 + $0xc0] sm:$0xff]  }
 0x8cb   :  { %v24062_v8 = vld [vmem:[#allocation2 + $0x3ac0] ss:$72 sps:$4 sm:$0xff]  }
 0x8cc   :  { %16687 = vmatpush1.bf16.msra.mxu1 %v24010_v48  ;;  %v24066_v48 = vld [vmem:[%s24885_s2 + $0x80] sm:$0xff]  }
 0x8cd   :  { %16945 = vmatpush1.bf16.msra.mxu0 %v24013_v59  ;;  %16688 = vmatprep.subr.bf16.mxu1 %v24018_v50  ;;  %v24069_v59 = vld [vmem:[#allocation2 + $0x3b54] ss:$72 sps:$4 sm:$0xff]   ;;  %v24070_v50 = vld [vmem:[%s24885_s2 + $0xc8] sm:$0xff]  }
 0x8ce   :  { %16946 = vmatprep.subr.bf16.mxu0 %v24021_v43  ;;  %v24067_v43 = vld [vmem:[#allocation2 + $0x3b50] ss:$72 sps:$4 sm:$0xff]  }
 0x8d0   :  { %16689 = vmatpush1.bf16.msra.mxu1 %v24016_v9  ;;  %v24071_v9 = vld [vmem:[%s24885_s2 + $0x88] sm:$0xff]  }
 0x8d1   :  { %16947 = vmatpush1.bf16.msra.mxu0 %v24019_v30  ;;  %20288 = vmatprep.subr.bf16.mxu1 %v24025_v31  ;;  %v24074_v30 = vld [vmem:[#allocation2 + $0x3be4] ss:$72 sps:$4 sm:$0xff]  }
 0x8d2   :  { %16959 = vmatprep.subr.bf16.mxu0 %v24024_v10  ;;  %v24075_v10 = vld [vmem:[%s24885_s2 + $0xd0] sm:$0xff]   ;;  %v24084_v31 = vld [vmem:[#allocation2 + $0x3d04] ss:$72 sps:$4 sm:$0xff]  }
 0x8d3   :  { %16691 = vmatmul.mubr.bf16.vlgmr.msra.gmra.mrb[16].mxu1 %v24395_v19 }
 0x8d4   :  { %16949 = vmatmul.mubr.bf16.vlgmr.msra.gmra.mrb[16].mxu0 %v24356_v46  ;;  %20289 = vmatpush3.bf16.msra.mxu1 %v24026_v60  ;;  %v24032_v46 = vld [vmem:[#allocation2 + $0x3760] ss:$72 sps:$4 sm:$0xff]  }
 0x8d5   :  { %16960 = vmatpush1.bf16.msra.mxu0 %v24022_v52  ;;  %17716 = vmatprep.mubr.bf16.mxu1 %v17100_v53  ;;  %v24037_v53 = vld [vmem:[#allocation2 + $0x37f0] ss:$72 sps:$4 sm:$0xff]   ;;  %v24085_v52 = vld [vmem:[%s24885_s2 + $0xe0] sm:$0xff]  }
 0x8d6   :  { %16961 = vmatprep.subr.bf16.mxu0 %v24029_v40  ;;  %20290 = vmatprep.subr.bf16.mxu1 %v24030_v47  ;;  %v24082_v60 = vld [vmem:[#allocation2 + $0x3d00] ss:$72 sps:$4 sm:$0xff]   ;;  %v24089_v47 = vld [vmem:[#allocation2 + $0x3d94] ss:$72 sps:$4 sm:$0xff]  }
 0x8d7   :  { %16991 = vmatprep.mubr.bf16.mxu0 %v24365_v28  ;;  %v24041_v28 = vld [vmem:[%s24885_s2 + $0x18] sm:$0xff]   ;;  %v24086_v40 = vld [vmem:[%s24885_s2 + $0xa0] sm:$0xff]  }
 0x8d8   :  { %20291 = vmatpush3.bf16.msra.mxu1 %v24031_v7  ;;  %v24087_v7 = vld [vmem:[#allocation2 + $0x3d90] ss:$72 sps:$4 sm:$0xff]  }
 0x8d9   :  { %16962 = vmatpush1.bf16.msra.mxu0 %v24027_v62  ;;  %20292 = vmatprep.subr.bf16.mxu1 %v24035_v13  ;;  %v24090_v62 = vld [vmem:[%s24885_s2 + $0xe8] sm:$0xff]  }
 0x8da   :  { %16963 = vmatprep.subr.bf16.mxu0 %v24034_v17  ;;  %v24091_v17 = vld [vmem:[%s24885_s2 + $0xa8] sm:$0xff]  }
 0x8db   :  { %v24094_v13 = vld [vmem:[#allocation2 + $0x3e24] ss:$72 sps:$4 sm:$0xff]  }
 0x8dc   :  { %20293 = vmatpush3.bf16.msra.mxu1 %v24036_v3  ;;  %v24092_v3 = vld [vmem:[#allocation2 + $0x3e20] ss:$72 sps:$4 sm:$0xff]  }
 0x8dd   :  { %16964 = vmatpush1.bf16.msra.mxu0 %v24032_v46  ;;  %20294 = vmatprep.subr.bf16.mxu1 %v24040_v51  ;;  %v24095_v46 = vld [vmem:[%s24885_s2 + $0xf0] sm:$0xff]  }
 0x8de   :  { %16965 = vmatprep.subr.bf16.mxu0 %v24039_v39  ;;  %v24096_v39 = vld [vmem:[%s24885_s2 + $0xb0] sm:$0xff]  }
 0x8df   :  { %v24099_v51 = vld [vmem:[#allocation2 + $0x3eb4] ss:$72 sps:$4 sm:$0xff]  }
 0x8e0   :  { %20295 = vmatpush3.bf16.msra.mxu1 %v24041_v28  ;;  %v24097_v28 = vld [vmem:[#allocation2 + $0x3eb0] ss:$72 sps:$4 sm:$0xff]  }
 0x8e1   :  { %16966 = vmatpush1.bf16.msra.mxu0 %v24037_v53  ;;  %20296 = vmatprep.subr.bf16.mxu1 %v24045_v15  ;;  %v24100_v53 = vld [vmem:[%s24885_s2 + $0xf8] sm:$0xff]   ;;  %v24104_v15 = vld [vmem:[#allocation2 + $0x3f44] ss:$72 sps:$4 sm:$0xff]  }
 0x8e2   :  { %16967 = vmatprep.subr.bf16.mxu0 %v24044_v26  ;;  %v24101_v26 = vld [vmem:[%s24885_s2 + $0xb8] sm:$0xff]  }
 0x8e4   :  { %20297 = vmatpush3.bf16.msra.mxu1 %v24046_v22  ;;  %v24102_v22 = vld [vmem:[#allocation2 + $0x3f40] ss:$72 sps:$4 sm:$0xff]  }
 0x8e5   :  { %16968 = vmatpush1.bf16.msra.mxu0 %v24042_v6  ;;  %20298 = vmatprep.subr.bf16.mxu1 %v24050_v32  ;;  %v24150_v6 = vld [vmem:[%s24885_s2 + $0x140] sm:$0xff]  }
 0x8e6   :  { %16969 = vmatprep.subr.bf16.mxu0 %v24049_v2  ;;  %v24107_v2 = vld [vmem:[#allocation2 + $0x3fd4] ss:$72 sps:$4 sm:$0xff]   ;;  %v24151_v32 = vld [vmem:[%s24885_s2 + $0x100] sm:$0xff]  }
 0x8e8   :  { %20299 = vmatpush3.bf16.msra.mxu1 %v24051_v36  ;;  %v24105_v36 = vld [vmem:[#allocation2 + $0x3fd0] ss:$72 sps:$4 sm:$0xff]  }
 0x8e9   :  { %16970 = vmatpush1.bf16.msra.mxu0 %v24047_v16  ;;  %20300 = vmatprep.subr.bf16.mxu1 %v24055_v18  ;;  %v24152_v16 = vld [vmem:[%s24885_s2 + $0x148] sm:$0xff]  }
 0x8ea   :  { %16971 = vmatprep.subr.bf16.mxu0 %v24054_v55  ;;  %v24110_v55 = vld [vmem:[#allocation2 + $0x4064] ss:$72 sps:$4 sm:$0xff]  }
 0x8eb   :  { %v24153_v18 = vld [vmem:[%s24885_s2 + $0x108] sm:$0xff]  }
 0x8ec   :  { %20301 = vmatpush3.bf16.msra.mxu1 %v24056_v33  ;;  %v24116_v33 = vld [vmem:[#allocation2 + $0x4184] ss:$72 sps:$4 sm:$0xff]  }
 0x8ed   :  { %16972 = vmatpush1.bf16.msra.mxu0 %v24052_v23  ;;  %20302 = vmatprep.subr.bf16.mxu1 %v24060_v38  ;;  %v24154_v23 = vld [vmem:[%s24885_s2 + $0x150] sm:$0xff]   ;;  %v24158_v38 = vld [vmem:[%s24885_s2 + $0x160] sm:$0xff]  }
 0x8ee   :  { %16973 = vmatprep.subr.bf16.mxu0 %v24059_v37  ;;  %v24157_v37 = vld [vmem:[%s24885_s2 + $0x118] sm:$0xff]  }
 0x8f0   :  { %20303 = vmatpush3.bf16.msra.mxu1 %v24061_v11  ;;  %v24119_v11 = vld [vmem:[#allocation2 + $0x4214] ss:$72 sps:$4 sm:$0xff]  }
 0x8f1   :  { %16974 = vmatpush1.bf16.msra.mxu0 %v24057_v41  ;;  %20310 = vmatprep.subr.bf16.mxu1 %v24065_v42  ;;  %v24114_v41 = vld [vmem:[#allocation2 + $0x4180] ss:$72 sps:$4 sm:$0xff]  }
 0x8f2   :  { %16975 = vmatprep.subr.bf16.mxu0 %v24064_v34  ;;  %v24159_v34 = vld [vmem:[%s24885_s2 + $0x120] sm:$0xff]   ;;  %v24160_v42 = vld [vmem:[%s24885_s2 + $0x168] sm:$0xff]  }
 0x8f3   :  { %17717 = vmatmul.mubr.bf16.vlgmr.msra.gmra.mrb[20].mxu1 %v17099_v35  ;;  %v24079_v35 = vld [vmem:[#allocation2 + $0x3c74] ss:$72 sps:$4 sm:$0xff]  }
 0x8f4   :  { %20311 = vmatpush3.bf16.msra.mxu1 %v24066_v48  ;;  %17757 = vmatprep.mubr.bf16.mxu1 %v17102_v45  ;;  %v24081_v45 = vld [vmem:[%s24885_s2 + $0x98] sm:$0xff]   ;;  %v24122_v48 = vld [vmem:[#allocation2 + $0x42a4] ss:$72 sps:$4 sm:$0xff]  }
 0x8f5   :  { %16976 = vmatpush1.bf16.msra.mxu0 %v24062_v8  ;;  %20312 = vmatprep.subr.bf16.mxu1 %v24070_v50  ;;  %v24117_v8 = vld [vmem:[#allocation2 + $0x4210] ss:$72 sps:$4 sm:$0xff]  }
 0x8f6   :  { %16977 = vmatprep.subr.bf16.mxu0 %v24069_v59  ;;  %v24161_v59 = vld [vmem:[%s24885_s2 + $0x128] sm:$0xff]   ;;  %v24162_v50 = vld [vmem:[%s24885_s2 + $0x170] sm:$0xff]  }
 0x8f8   :  { %20313 = vmatpush3.bf16.msra.mxu1 %v24071_v9  ;;  %v24125_v9 = vld [vmem:[#allocation2 + $0x4334] ss:$72 sps:$4 sm:$0xff]  }
 0x8f9   :  { %16978 = vmatpush1.bf16.msra.mxu0 %v24067_v43  ;;  %20314 = vmatprep.subr.bf16.mxu1 %v24075_v10  ;;  %v24120_v43 = vld [vmem:[#allocation2 + $0x42a0] ss:$72 sps:$4 sm:$0xff]   ;;  %v24164_v10 = vld [vmem:[%s24885_s2 + $0x178] sm:$0xff]  }
 0x8fa   :  { %16979 = vmatprep.subr.bf16.mxu0 %v24074_v30  ;;  %v24163_v30 = vld [vmem:[%s24885_s2 + $0x130] sm:$0xff]  }
 0x8fc   :  { %20315 = vmatpush3.bf16.msra.mxu1 %v24076_v1  ;;  %v24128_v1 = vld [vmem:[#allocation2 + $0x43c4] ss:$72 sps:$4 sm:$0xff]  }
 0x8fd   :  { %16980 = vmatpush1.bf16.msra.mxu0 %v24072_v27  ;;  %20316 = vmatprep.subr.bf16.mxu1 %v24080_v4  ;;  %v24123_v27 = vld [vmem:[#allocation2 + $0x4330] ss:$72 sps:$4 sm:$0xff]   ;;  %v24126_v4 = vld [vmem:[#allocation2 + $0x43c0] ss:$72 sps:$4 sm:$0xff]  }
 0x8fe   :  { %16981 = vmatprep.subr.bf16.mxu0 %v24079_v35  ;;  %v24165_v35 = vld [vmem:[%s24885_s2 + $0x138] sm:$0xff]  }
 0x900   :  { %20317 = vmatpush3.bf16.msra.mxu1 %v24081_v45  ;;  %v24129_v45 = vld [vmem:[#allocation2 + $0x4450] ss:$72 sps:$4 sm:$0xff]  }
 0x901   :  { %16982 = vmatpush1.bf16.msra.mxu0 %v24077_v24  ;;  %20318 = vmatprep.subr.bf16.mxu1 %v24085_v52  ;;  %v24131_v24 = vld [vmem:[#allocation2 + $0x4454] ss:$72 sps:$4 sm:$0xff]   ;;  %v24132_v52 = vld [vmem:[#allocation2 + $0x44e0] ss:$72 sps:$4 sm:$0xff]  }
 0x902   :  { %16983 = vmatprep.subr.bf16.mxu0 %v24084_v31  ;;  %v24134_v31 = vld [vmem:[#allocation2 + $0x44e4] ss:$72 sps:$4 sm:$0xff]  }
 0x904   :  { %20319 = vmatpush3.bf16.msra.mxu1 %v24086_v40  ;;  %v24135_v40 = vld [vmem:[#allocation2 + $0x4570] ss:$72 sps:$4 sm:$0xff]  }
 0x905   :  { %16984 = vmatpush1.bf16.msra.mxu0 %v24082_v60  ;;  %20320 = vmatprep.subr.bf16.mxu1 %v24090_v62  ;;  %v24137_v60 = vld [vmem:[#allocation2 + $0x4574] ss:$72 sps:$4 sm:$0xff]   ;;  %v24138_v62 = vld [vmem:[#allocation2 + $0x4600] ss:$72 sps:$4 sm:$0xff]  }
 0x906   :  { %16985 = vmatprep.subr.bf16.mxu0 %v24089_v47  ;;  %v24140_v47 = vld [vmem:[#allocation2 + $0x4604] ss:$72 sps:$4 sm:$0xff]  }
 0x908   :  { %20321 = vmatpush3.bf16.msra.mxu1 %v24091_v17  ;;  %v24141_v17 = vld [vmem:[#allocation2 + $0x4690] ss:$72 sps:$4 sm:$0xff]  }
 0x909   :  { %16986 = vmatpush1.bf16.msra.mxu0 %v24087_v7  ;;  %20322 = vmatprep.subr.bf16.mxu1 %v24095_v46  ;;  %v24143_v7 = vld [vmem:[#allocation2 + $0x4694] ss:$72 sps:$4 sm:$0xff]   ;;  %v24144_v46 = vld [vmem:[#allocation2 + $0x4720] ss:$72 sps:$4 sm:$0xff]  }
 0x90a   :  { %16987 = vmatprep.subr.bf16.mxu0 %v24094_v13  ;;  %v24146_v13 = vld [vmem:[#allocation2 + $0x4724] ss:$72 sps:$4 sm:$0xff]  }
 0x90c   :  { %20323 = vmatpush3.bf16.msra.mxu1 %v24096_v39  ;;  %v24147_v39 = vld [vmem:[#allocation2 + $0x47b0] ss:$72 sps:$4 sm:$0xff]  }
 0x90d   :  { %16988 = vmatpush1.bf16.msra.mxu0 %v24092_v3  ;;  %20324 = vmatprep.subr.bf16.mxu1 %v24100_v53  ;;  %v24149_v3 = vld [vmem:[#allocation2 + $0x47b4] ss:$72 sps:$4 sm:$0xff]  }
 0x90e   :  { %16989 = vmatprep.subr.bf16.mxu0 %v24099_v51  ;;  %v24166_v51 = vld [vmem:[%s24885_s2 + $0x1c0] sm:$0xff]  }
 0x910   :  { %20325 = vmatpush3.bf16.msra.mxu1 %v24101_v26 }
 0x911   :  { %16990 = vmatpush1.bf16.msra.mxu0 %v24097_v28  ;;  %20332 = vmatprep.subr.bf16.mxu1 %v24150_v6  ;;  %v17050_v28 = vmul.f32 %v24475_v20, %v24475_v20  ;;  %v17051_v6 = vmul.f32 %v24505_v54, %v24505_v54  ;;  %v24167_v54 = vld [vmem:[%s24885_s2 + $0x180] sm:$0xff]  }
 0x912   :  { %17002 = vmatprep.subr.bf16.mxu0 %v24104_v15 }
 0x913   :  { %17758 = vmatmul.mubr.bf16.vlgmr.msra.gmra.mrb[24].mxu1 %v17101_v63  ;;  %v24111_v63 = vld [vmem:[#allocation2 + $0x40f0] ss:$72 sps:$4 sm:$0xff]  }
 0x914   :  { %16992 = vmatmul.mubr.bf16.vlgmr.msra.gmra.mrb[16].mxu0 %v24373_v0  ;;  %20333 = vmatpush3.bf16.msra.mxu1 %v24151_v32  ;;  %v24113_v0 = vld [vmem:[#allocation2 + $0x40f4] ss:$72 sps:$4 sm:$0xff]   ;;  %v17059_v32 = vmul.f32 %v24479_v25, %v24479_v25 }
 0x915   :  { %17003 = vmatpush1.bf16.msra.mxu0 %v24102_v22  ;;  %17034 = vmatprep.mubr.bf16.mxu0 %v24387_v44  ;;  %v24155_v44 = vld [vmem:[%s24885_s2 + $0x110] sm:$0xff]  }
 0x916   :  { %17004 = vmatprep.subr.bf16.mxu0 %v24107_v2  ;;  %20334 = vmatprep.subr.bf16.mxu1 %v24152_v16 }
 0x918   :  { %20335 = vmatpush3.bf16.msra.mxu1 %v24153_v18 }
 0x919   :  { %17005 = vmatpush1.bf16.msra.mxu0 %v24105_v36  ;;  %20336 = vmatprep.subr.bf16.mxu1 %v24154_v23 }
 0x91a   :  { %17006 = vmatprep.subr.bf16.mxu0 %v24110_v55  ;;  %v17060_v55 = vmul.f32 %v24509_v57, %v24509_v57  ;;  %v24169_v57 = vld [vmem:[%s24885_s2 + $0x188] sm:$0xff]  }
 0x91c   :  { %20337 = vmatpush3.bf16.msra.mxu1 %v24155_v44  ;;  %v24168_v44 = vld [vmem:[%s24885_s2 + $0x1c8] sm:$0xff]  }
 0x91d   :  { %17007 = vmatpush1.bf16.msra.mxu0 %v24108_v49  ;;  %20338 = vmatprep.subr.bf16.mxu1 %v24156_v29  ;;  %v24170_v29 = vld [vmem:[%s24885_s2 + $0x1d0] sm:$0xff]  }
 0x91e   :  { %17008 = vmatprep.subr.bf16.mxu0 %v24113_v0 }
 0x920   :  { %20339 = vmatpush3.bf16.msra.mxu1 %v24157_v37  ;;  %v24176_v37 = vld [vmem:[%s24885_s2 + $0x1e8] sm:$0xff]  }
 0x921   :  { %17009 = vmatpush1.bf16.msra.mxu0 %v24111_v63  ;;  %20340 = vmatprep.subr.bf16.mxu1 %v24158_v38  ;;  %v24171_v63 = vld [vmem:[%s24885_s2 + $0x190] sm:$0xff]   ;;  %v24177_v38 = vld [vmem:[%s24885_s2 + $0x1a8] sm:$0xff]  }
 0x922   :  { %17010 = vmatprep.subr.bf16.mxu0 %v24116_v33  ;;  %v24175_v33 = vld [vmem:[%s24885_s2 + $0x1a0] sm:$0xff]  }
 0x924   :  { %20341 = vmatpush3.bf16.msra.mxu1 %v24159_v34 }
 0x925   :  { %17011 = vmatpush1.bf16.msra.mxu0 %v24114_v41  ;;  %20342 = vmatprep.subr.bf16.mxu1 %v24160_v42  ;;  %v24178_v41 = vld [vmem:[%s24885_s2 + $0x1f0] sm:$0xff]   ;;  %v24180_v42 = vld [vmem:[%s24885_s2 + $0x1f8] sm:$0xff]  }
 0x926   :  { %17012 = vmatprep.subr.bf16.mxu0 %v24119_v11  ;;  %v24179_v11 = vld [vmem:[%s24885_s2 + $0x1b0] sm:$0xff]  }
 0x928   :  { %20343 = vmatpush3.bf16.msra.mxu1 %v24161_v59 }
 0x929   :  { %17013 = vmatpush1.bf16.msra.mxu0 %v24117_v8  ;;  %20344 = vmatprep.subr.bf16.mxu1 %v24162_v50 }
 0x92a   :  { %17014 = vmatprep.subr.bf16.mxu0 %v24122_v48 }
 0x92c   :  { %20345 = vmatpush3.bf16.msra.mxu1 %v24163_v30  ;;  %v24217_v30 = vmov 0.0  }
 0x92d   :  { %17015 = vmatpush1.bf16.msra.mxu0 %v24120_v43  ;;  %20346 = vmatprep.subr.bf16.mxu1 %v24164_v10  ;;  %v24181_v43 = vld [vmem:[%s24885_s2 + $0x1b8] sm:$0xff]  }
 0x92e   :  { %17016 = vmatprep.subr.bf16.mxu0 %v24125_v9 }
 0x930   :  { %20347 = vmatpush3.bf16.msra.mxu1 %v24165_v35 }
 0x931   :  { %17017 = vmatpush1.bf16.msra.mxu0 %v24123_v27  ;;  %20354 = vmatprep.subr.bf16.mxu1 %v24166_v51  ;;  %v17062_v51 = vmul.f32 %v24525_v5, %v24525_v5  ;;  %v24184_v5 = vld [vmem:[%s24885_s2 + $0x210] sm:$0xff]  }
 0x932   :  { %17018 = vmatprep.subr.bf16.mxu0 %v24128_v1 }
 0x935   :  { %17019 = vmatpush1.bf16.msra.mxu0 %v24126_v4 }
 0x936   :  { %17020 = vmatprep.subr.bf16.mxu0 %v24131_v24 }
 0x939   :  { %17021 = vmatpush1.bf16.msra.mxu0 %v24129_v45 }
 0x93a   :  { %17022 = vmatprep.subr.bf16.mxu0 %v24134_v31 }
 0x93d   :  { %17023 = vmatpush1.bf16.msra.mxu0 %v24132_v52 }
 0x93e   :  { %17024 = vmatprep.subr.bf16.mxu0 %v24137_v60  ;;  %v17052_v60 = vmul.f32 %v24507_v56, %v24507_v56 }
 0x941   :  { %17025 = vmatpush1.bf16.msra.mxu0 %v24135_v40 }
 0x942   :  { %17026 = vmatprep.subr.bf16.mxu0 %v24140_v47 }
 0x945   :  { %17027 = vmatpush1.bf16.msra.mxu0 %v24138_v62  ;;  %v17053_v62 = vmul.f32 %v24521_v58, %v24521_v58  ;;  %v24182_v58 = vld [vmem:[%s24885_s2 + $0x200] sm:$0xff]  }
 0x946   :  { %17028 = vmatprep.subr.bf16.mxu0 %v24143_v7 }
 0x949   :  { %17029 = vmatpush1.bf16.msra.mxu0 %v24141_v17 }
 0x94a   :  { %17030 = vmatprep.subr.bf16.mxu0 %v24146_v13  ;;  %v17061_v13 = vmul.f32 %v24511_v61, %v24511_v61  ;;  %v24183_v61 = vld [vmem:[%s24885_s2 + $0x208] sm:$0xff]  }
 0x94d   :  { %17031 = vmatpush1.bf16.msra.mxu0 %v24144_v46 }
 0x94e   :  { %17032 = vmatprep.subr.bf16.mxu0 %v24149_v3 }
 0x951   :  { %17033 = vmatpush1.bf16.msra.mxu0 %v24147_v39 }
 0x954   :  { %17035 = vmatmul.mubr.bf16.vlgmr.msra.gmra.mrb[16].mxu0 %v24395_v19 }
 0x9a6   :  { %v16692_v53 = vpop.f32.mrb[16].mxu1 }
 0x9a7   :  { %v17068_v26 = vmul.f32 %v16692_v53, %v16692_v53  ;;  %v16694_v15 = vpop.f32.mrb[17].mxu1 }
 0x9a8   :  { %v17069_v22 = vmul.f32 %v16694_v15, %v16694_v15  ;;  %v16696_v2 = vpop.f32.mrb[18].mxu1 }
 0x9a9   :  { %v17086_v19 = vadd.f32 %v17068_v26, %v17050_v28  ;;  %v17077_v16 = vmul.f32 %v16696_v2, %v16696_v2  ;;  %v16698_v36 = vpop.f32.mrb[19].mxu1  ;;  %v24186_v2 = vld [vmem:[%s24885_s2 + $0x220] sm:$0xff]  }
 0x9aa   :  { %v24788_v18 = vadd.f32 %v17069_v22, %v17051_v6  ;;  %v17078_v23 = vmul.f32 %v16698_v36, %v16698_v36  ;;  %v24185_v22 = vld [vmem:[%s24885_s2 + $0x218] sm:$0xff]  }
 0x9ab   :  { %v17095_v20 = vadd.f32 %v17077_v16, %v17059_v32  ;;  %v24187_v32 = vld [vmem:[%s24885_s2 + $0x228] sm:$0xff]   ;;  %v24189_v16 = vld [vmem:[%s24885_s2 + $0x238] sm:$0xff]  }
 0x9ac   :  { %v24790_v49 = vadd.f32 %v17078_v23, %v17060_v55 }
 0x9ad   :  { %v17104_v0 = vpack.c.bf16 %v17095_v20, %v17086_v19  ;;  %v24188_v19 = vld [vmem:[%s24885_s2 + $0x230] sm:$0xff]  }
 0x9ae   :  { %v17105_v25 = vpack.c.bf16 %v24790_v49, %v24788_v18 }
 0x9af   :  { %17798 = vmatprep.mubr.bf16.mxu1 %v17104_v0 }
 0x9b0   :  { %17799 = vmatmul.mubr.bf16.vlgmr.msra.gmra.mrb[28].mxu1 %v17103_v21  ;;  %v24174_v21 = vld [vmem:[%s24885_s2 + $0x1e0] sm:$0xff]  }
 0x9b1   :  { %20355 = vmatpush3.bf16.msra.mxu1 %v24167_v54 }
 0x9b2   :  { %20356 = vmatprep.subr.bf16.mxu1 %v24168_v44 }
 0x9b5   :  { %20357 = vmatpush3.bf16.msra.mxu1 %v24169_v57 }
 0x9b6   :  { %20358 = vmatprep.subr.bf16.mxu1 %v24170_v29 }
 0x9b9   :  { %20359 = vmatpush3.bf16.msra.mxu1 %v24171_v63 }
 0x9ba   :  { %20360 = vmatprep.subr.bf16.mxu1 %v24172_v12 }
 0x9bd   :  { %20361 = vmatpush3.bf16.msra.mxu1 %v24173_v14 }
 0x9be   :  { %20362 = vmatprep.subr.bf16.mxu1 %v24174_v21 }
 0x9c1   :  { %20363 = vmatpush3.bf16.msra.mxu1 %v24175_v33 }
 0x9c2   :  { %20364 = vmatprep.subr.bf16.mxu1 %v24176_v37 }
 0x9c5   :  { %20365 = vmatpush3.bf16.msra.mxu1 %v24177_v38 }
 0x9c6   :  { %v20304_v34 = vpop.f32.mrb[20].mxu1  ;;  %20366 = vmatprep.subr.bf16.mxu1 %v24178_v41 }
 0x9c7   :  { %v20305_v8 = vpop.f32.mrb[21].mxu1 }
 0x9c8   :  { %v20306_v48 = vadd.f32 %v20305_v8, %v20304_v34  ;;  %v20307_v59 = vpop.f32.mrb[22].mxu1 }
 0x9c9   :  { %v20308_v50 = vpop.f32.mrb[23].mxu1  ;;  %20367 = vmatpush3.bf16.msra.mxu1 %v24179_v11 }
 0x9ca   :  { %v20309_v9 = vadd.f32 %v20308_v50, %v20307_v59  ;;  %20368 = vmatprep.subr.bf16.mxu1 %v24180_v42 }
 0x9cd   :  { %20369 = vmatpush3.bf16.msra.mxu1 %v24181_v43 }
 0x9ce   :  { %20385 = vmatprep.subr.bf16.mxu1 %v24217_v30 }
 0x9e6   :  { %v20326_v10 = vpop.f32.mrb[24].mxu1 }
 0x9e7   :  { %v20327_v27 = vpop.f32.mrb[25].mxu1 }
 0x9e8   :  { %v20328_v1 = vadd.f32 %v20327_v27, %v20326_v10  ;;  %v20329_v35 = vpop.f32.mrb[26].mxu1 }
 0x9e9   :  { %v20330_v4 = vpop.f32.mrb[27].mxu1 }
 0x9ea   :  { %v17760_v24 = vadd.f32 %v20328_v1, %v20306_v48  ;;  %v20331_v45 = vadd.f32 %v20330_v4, %v20329_v35 }
 0x9ec   :  { %v17763_v31 = vadd.f32 %v20331_v45, %v20309_v9 }
 0xa27   :  { %v17036_v52 = vpop.f32.mrb[16].mxu0 }
 0xa28   :  { %v17070_v40 = vmul.f32 %v17036_v52, %v17036_v52  ;;  %v17038_v47 = vpop.f32.mrb[17].mxu0 }
 0xa29   :  { %v17071_v7 = vmul.f32 %v17038_v47, %v17038_v47  ;;  %v17040_v17 = vpop.f32.mrb[18].mxu0 }
 0xa2a   :  { %v17088_v46 = vadd.f32 %v17070_v40, %v17052_v60  ;;  %v17079_v3 = vmul.f32 %v17040_v17, %v17040_v17  ;;  %v17042_v39 = vpop.f32.mrb[19].mxu0 }
 0xa2b   :  { %v17089_v53 = vadd.f32 %v17071_v7, %v17053_v62  ;;  %v17080_v28 = vmul.f32 %v17042_v39, %v17042_v39 }
 0xa2c   :  { %v17097_v26 = vadd.f32 %v17079_v3, %v17061_v13 }
 0xa2d   :  { %v17098_v56 = vadd.f32 %v17080_v28, %v17062_v51 }
 0xa2e   :  { %v17106_v15 = vpack.c.bf16 %v17097_v26, %v17088_v46 }
 0xa2f   :  { %v17107_v6 = vpack.c.bf16 %v17098_v56, %v17089_v53 }
 0xa30   :  { %17839 = vmatprep.mubr.bf16.mxu1 %v17106_v15 }
 0xa31   :  { %17840 = vmatmul.mubr.bf16.vlgmr.msra.gmra.mrb[32].mxu1 %v17105_v25 }
 0xa32   :  { %20386 = vmatpush3.bf16.msra.mxu1 %v24182_v58  ;;  %20401 = vmatprep.mubr.msk.bf16.mxu1 %vm24218_vm0, %v24217_v30 }
 0xa33   :  { %20387 = vmatprep.subr.bf16.mxu1 %v24217_v30 }
 0xa36   :  { %20388 = vmatpush3.bf16.msra.mxu1 %v24183_v61 }
 0xa37   :  { %20389 = vmatprep.subr.bf16.mxu1 %v24217_v30 }
 0xa3a   :  { %20390 = vmatpush3.bf16.msra.mxu1 %v24184_v5 }
 0xa3b   :  { %20391 = vmatprep.subr.bf16.mxu1 %v24217_v30 }
 0xa3e   :  { %20392 = vmatpush3.bf16.msra.mxu1 %v24185_v22 }
 0xa3f   :  { %20393 = vmatprep.subr.bf16.mxu1 %v24217_v30 }
 0xa42   :  { %20394 = vmatpush3.bf16.msra.mxu1 %v24186_v2 }
 0xa43   :  { %20395 = vmatprep.subr.bf16.mxu1 %v24217_v30 }
 0xa46   :  { %20396 = vmatpush3.bf16.msra.mxu1 %v24187_v32 }
 0xa47   :  { %20397 = vmatprep.subr.bf16.mxu1 %v24217_v30 }
 0xa4a   :  { %20398 = vmatpush3.bf16.msra.mxu1 %v24188_v19 }
 0xa4b   :  { %20399 = vmatprep.subr.bf16.mxu1 %v24217_v30 }
 0xa4e   :  { %20400 = vmatpush3.bf16.msra.mxu1 %v24189_v16 }
 0xa51   :  { %20402 = vmatmul.mubr.bf16.vlgmr.msra.gmra.mrb[36].mxu1 %v17107_v6 }
 0xa83   :  { %v20348_v36 = vpop.f32.mrb[28].mxu1 }
 0xa84   :  { %v20349_v55 = vpop.f32.mrb[29].mxu1 }
 0xa85   :  { %v20350_v18 = vadd.f32 %v20349_v55, %v20348_v36  ;;  %v20351_v23 = vpop.f32.mrb[30].mxu1 }
 0xa86   :  { %v20352_v20 = vpop.f32.mrb[31].mxu1 }
 0xa87   :  { %v17801_v49 = vadd.f32 %v20350_v18, %v17760_v24  ;;  %v20353_v0 = vadd.f32 %v20352_v20, %v20351_v23 }
 0xa89   :  { %v17804_v54 = vadd.f32 %v20353_v0, %v17763_v31 }
 0xb04   :  { %v20370_v25 = vpop.f32.mrb[32].mxu1 }
 0xb05   :  { %v20371_v44 = vpop.f32.mrb[33].mxu1 }
 0xb06   :  { %v20372_v57 = vadd.f32 %v20371_v44, %v20370_v25  ;;  %v20373_v29 = vpop.f32.mrb[34].mxu1 }
 0xb07   :  { %v20374_v63 = vpop.f32.mrb[35].mxu1 }
 0xb08   :  { %v20375_v12 = vadd.f32 %v20374_v63, %v20373_v29  ;;  %v17842_v14 = vadd.f32 %v20372_v57, %v17801_v49 }
 0xb0a   :  { %v17845_v21 = vadd.f32 %v20375_v12, %v17804_v54 }
 0xb24   :  { %v17882_v33 = vpop.f32.mrb[36].mxu1 }
 0xb25   :  { %v17883_v37 = vadd.f32 %v17882_v33, %v17842_v14  ;;  %v20403_v38 = vpop.f32.mrb[37].mxu1 }
 0xb26   :  { %v17885_v41 = vpop.f32.mrb[38].mxu1 }
 0xb27   :  { %17889 = vst [vmem:[%s24886_s3] sm:$0xff] %v17883_v37  ;;  %v17886_v11 = vadd.f32 %v17885_v41, %v17845_v21  ;;  %v20404_v34 = vpop.f32.mrb[39].mxu1 }
 0xb29   :  { %17890 = vst [vmem:[%s24886_s3 + $0x8] sm:$0xff] %v17886_v11 }
 0xb2a   :  { %17895 = vsyncpa [#allocation3], 1 }

</bundles_post_ra>
